<compile_context>
chip_gen: v7x
topology: tpu7x:2x2x1
jax: 0.10.0
libtpu: 0.0.40
codegen_flags: <defaults>
</compile_context>

<pallas_src>
import math
from functools import partial

import numpy as np
import jax
import jax.numpy as jnp
from jax import lax
from jax.experimental import pallas as pl
from jax.experimental.pallas import tpu as pltpu

# ----------------------------- config --------------------------------------
DIM = 128                 # model dim (small stand-in for 1024)
DEPTH = 2                 # attn_depth (small stand-in for 24)
HEADS = 4
HEAD_DIM = DIM // HEADS
FF_INNER = DIM * 4
QUANT_BIT = 7
NQ = 2 ** QUANT_BIT       # 128
PE_FREQS = 8
PE_FEAT = 3 * PE_FREQS * 2 + 3   # 51
PE_FEAT_PAD = 64                 # lane-padded Fourier feature width
POINT_EMB_DIM = 512
PC_LATENTS = 16
PC_FEAT = 64
HEAD_PAD = 256            # all coordinate-head logits padded to 256 lanes

_VMEM_LIMIT = 48 * 1024 * 1024   # explicit scoped-VMEM cap (safe on v5e/v6e/v7x)


def _cparams(n_parallel):
    return pltpu.CompilerParams(
        dimension_semantics=("parallel",) * n_parallel,
        vmem_limit_bytes=_VMEM_LIMIT)


def _round_up(x, m):
    return (x + m - 1) // m * m


def _row_plan(M, max_tile=256):
    """Row-tiling plan: pad M to an (8,128)-friendly size, pick a tile."""
    if M <= max_tile:
        Mp = _round_up(M, 8)
        return Mp, Mp
    Mp = _round_up(M, max_tile)
    return Mp, max_tile


def _pad_rows(x, Mp):
    M = x.shape[0]
    if Mp == M:
        return x
    return jnp.pad(x, ((0, Mp - M),) + ((0, 0),) * (x.ndim - 1))


def _ln(x, g, b, eps=1e-5):
    mu = jnp.mean(x, axis=-1, keepdims=True)
    var = jnp.mean((x - mu) ** 2, axis=-1, keepdims=True)
    return (x - mu) * lax.rsqrt(var + eps) * g + b


# --------------------------- small GEMM kernel -------------------------------
def _linear_kernel(x_ref, w_ref, b_ref, o_ref, *, activation):
    y = jnp.dot(x_ref[...].astype(jnp.bfloat16), w_ref[...],
                preferred_element_type=jnp.float32) + b_ref[...]
    if activation == "relu":
        y = jnp.maximum(y, 0.0)
    o_ref[...] = y


def linear_pallas(x, w, b, activation=None):
    """y = act(x @ w + b).  x:(M,K) f32, w:(K,N) bf16, b:(N,) f32 -> (M,N) f32."""
    M, K = x.shape
    N = w.shape[1]
    Mp, tm = _row_plan(M)
    xp = _pad_rows(x, Mp)
    out = pl.pallas_call(
        partial(_linear_kernel, activation=activation),
        out_shape=jax.ShapeDtypeStruct((Mp, N), jnp.float32),
        grid=(Mp // tm,),
        in_specs=[
            pl.BlockSpec((tm, K), lambda i: (i, 0)),
            pl.BlockSpec((K, N), lambda i: (0, 0)),
            pl.BlockSpec((1, N), lambda i: (0, 0)),
        ],
        out_specs=pl.BlockSpec((tm, N), lambda i: (i, 0)),
        compiler_params=_cparams(1),
    )(xp, w, b.reshape(1, N))
    return out[:M] if Mp != M else out


# --------------------- fused decoder layer (attn + FF) -----------------------
def _decoder_layer_kernel(x_ref, g1_ref, b1_ref, wqkv_ref, bqkv_ref, wo_ref,
                          bo_ref, g2_ref, b2_ref, wffa_ref, bffa_ref,
                          wffg_ref, bffg_ref, wff2_ref, bff2_ref, o_ref,
                          *, heads, head_dim, scale):
    x = x_ref[0].astype(jnp.float32)               # (S, D) residual in f32
    S, D = x.shape

    # --- attention half ---
    hn = _ln(x, g1_ref[...], b1_ref[...])
    qkv = jnp.dot(hn.astype(jnp.bfloat16), wqkv_ref[...],
                  preferred_element_type=jnp.float32) + bqkv_ref[...]
    q = qkv[:, :D] * scale                         # scale folded in once
    k_b = qkv[:, D:2 * D].astype(jnp.bfloat16)     # bf16 immediately
    v_b = qkv[:, 2 * D:].astype(jnp.bfloat16)

    row = lax.broadcasted_iota(jnp.int32, (S, S), 0)
    col = lax.broadcasted_iota(jnp.int32, (S, S), 1)
    causal = col <= row
    lane = lax.broadcasted_iota(jnp.int32, (S, D), 1)

    o_merged = jnp.zeros((S, D), jnp.float32)
    # TODO(synk): at production S/HEADS, switch to q-tiled flash streaming and
    # a fori_loop over heads; full (S,S) scores are fine at these toy sizes.
    for h in range(heads):
        # masked-lane head extraction keeps all operands 128-lane dense
        head_mask = (lane >= h * head_dim) & (lane < (h + 1) * head_dim)
        q_h = jnp.where(head_mask, q, 0.0).astype(jnp.bfloat16)
        v_h = jnp.where(head_mask, v_b, 0.0)
        # A @ B^T: both operands contract on dim 1 -> native MXU transposed-RHS
        s = lax.dot_general(q_h, k_b, (((1,), (1,)), ((), ())),
                            preferred_element_type=jnp.float32)
        s = jnp.where(causal, s, -1e30)
        m = jnp.max(s, axis=-1, keepdims=True)
        p = jnp.exp(s - m)
        p = p * pl.reciprocal(jnp.sum(p, axis=-1, keepdims=True))  # exact
        o_merged = o_merged + jnp.dot(p.astype(jnp.bfloat16), v_h,
                                      preferred_element_type=jnp.float32)

    x = x + (jnp.dot(o_merged.astype(jnp.bfloat16), wo_ref[...],
                     preferred_element_type=jnp.float32) + bo_ref[...])

    # --- feed-forward half (GEGLU, split weights) ---
    hn2 = _ln(x, g2_ref[...], b2_ref[...]).astype(jnp.bfloat16)
    a = jnp.dot(hn2, wffa_ref[...], preferred_element_type=jnp.float32) + bffa_ref[...]
    g = jnp.dot(hn2, wffg_ref[...], preferred_element_type=jnp.float32) + bffg_ref[...]
    f = (a * jax.nn.gelu(g)).astype(jnp.bfloat16)
    y = jnp.dot(f, wff2_ref[...], preferred_element_type=jnp.float32) + bff2_ref[...]
    o_ref[0] = (x + y).astype(o_ref.dtype)


def decoder_layer_pallas(x, lp):
    """x: (B, S, D) bf16 residual stream -> (B, S, D) bf16."""
    B, S, D = x.shape
    return pl.pallas_call(
        partial(_decoder_layer_kernel, heads=HEADS, head_dim=HEAD_DIM,
                scale=1.0 / math.sqrt(HEAD_DIM)),
        out_shape=jax.ShapeDtypeStruct((B, S, D), jnp.bfloat16),
        grid=(B,),
        in_specs=[
            pl.BlockSpec((1, S, D), lambda b: (b, 0, 0)),
            pl.BlockSpec((1, D), lambda b: (0, 0)),
            pl.BlockSpec((1, D), lambda b: (0, 0)),
            pl.BlockSpec((D, 3 * D), lambda b: (0, 0)),
            pl.BlockSpec((1, 3 * D), lambda b: (0, 0)),
            pl.BlockSpec((D, D), lambda b: (0, 0)),
            pl.BlockSpec((1, D), lambda b: (0, 0)),
            pl.BlockSpec((1, D), lambda b: (0, 0)),
            pl.BlockSpec((1, D), lambda b: (0, 0)),
            pl.BlockSpec((D, FF_INNER), lambda b: (0, 0)),
            pl.BlockSpec((1, FF_INNER), lambda b: (0, 0)),
            pl.BlockSpec((D, FF_INNER), lambda b: (0, 0)),
            pl.BlockSpec((1, FF_INNER), lambda b: (0, 0)),
            pl.BlockSpec((FF_INNER, D), lambda b: (0, 0)),
            pl.BlockSpec((1, D), lambda b: (0, 0)),
        ],
        out_specs=pl.BlockSpec((1, S, D), lambda b: (b, 0, 0)),
        compiler_params=_cparams(1),
    )(x, lp["ln1_g"].reshape(1, D), lp["ln1_b"].reshape(1, D),
      lp["wqkv"], lp["bqkv"].reshape(1, 3 * D), lp["wo"], lp["bo"].reshape(1, D),
      lp["ln2_g"].reshape(1, D), lp["ln2_b"].reshape(1, D),
      lp["w_ff1a"], lp["b_ff1a"].reshape(1, FF_INNER),
      lp["w_ff1g"], lp["b_ff1g"].reshape(1, FF_INNER),
      lp["w_ff2"], lp["b_ff2"].reshape(1, D))


# ------------------- edge-embedding projection (full + half) -----------------
def _edges_proj_kernel(g1_ref, g2_ref, wfa_ref, wfb_ref, bf_ref, wh_ref, bh_ref,
                       full_ref, half_ref):
    g1 = g1_ref[...].astype(jnp.bfloat16)
    g2 = g2_ref[...].astype(jnp.bfloat16)
    full_ref[...] = (jnp.dot(g1, wfa_ref[...], preferred_element_type=jnp.float32)
                     + jnp.dot(g2, wfb_ref[...], preferred_element_type=jnp.float32)
                     + bf_ref[...])
    # half edge: fc_edges_2(cat([g1e, sos_emb_2])) ; the sos_emb_2 @ W[512:] + b
    # part is row-constant and precomputed on the host (bh_const).
    half_ref[...] = (jnp.dot(g1, wh_ref[...], preferred_element_type=jnp.float32)
                     + bh_ref[...])


def edges_proj_pallas(g1e, g2e, wfa, wfb, bf, wh, bh_const):
    M, D1 = g1e.shape
    Mp, tm = _row_plan(M)
    g1p, g2p = _pad_rows(g1e, Mp), _pad_rows(g2e, Mp)
    full, half = pl.pallas_call(
        _edges_proj_kernel,
        out_shape=(jax.ShapeDtypeStruct((Mp, DIM), jnp.float32),
                   jax.ShapeDtypeStruct((Mp, DIM), jnp.float32)),
        grid=(Mp // tm,),
        in_specs=[
            pl.BlockSpec((tm, D1), lambda i: (i, 0)),
            pl.BlockSpec((tm, D1), lambda i: (i, 0)),
            pl.BlockSpec((D1, DIM), lambda i: (0, 0)),
            pl.BlockSpec((D1, DIM), lambda i: (0, 0)),
            pl.BlockSpec((1, DIM), lambda i: (0, 0)),
            pl.BlockSpec((D1, DIM), lambda i: (0, 0)),
            pl.BlockSpec((1, DIM), lambda i: (0, 0)),
        ],
        out_specs=(pl.BlockSpec((tm, DIM), lambda i: (i, 0)),
                   pl.BlockSpec((tm, DIM), lambda i: (i, 0))),
        compiler_params=_cparams(1),
    )(g1p, g2p, wfa, wfb, bf.reshape(1, DIM), wh, bh_const.reshape(1, DIM))
    return full[:M], half[:M]


# -------------------- fused coordinate heads (+ final LN) --------------------
def _coord_heads_kernel(res_ref, zf_ref, yf_ref, lnfg_ref, lnfb_ref,
                        h1w1_ref, h1b1_ref, h1w2_ref, h1b2_ref, h1w3_ref, h1b3_ref,
                        h2w1a_ref, h2w1b_ref, h2b1_ref, h2w2_ref, h2b2_ref,
                        h2w3_ref, h2b3_ref,
                        h3w1a_ref, h3w1b_ref, h3w1c_ref, h3b1_ref, h3w2_ref,
                        h3b2_ref, h3w3_ref, h3b3_ref,
                        oz_ref, oy_ref, ox_ref):
    # decoder final LayerNorm fused here (per-row, so the prefix slice commutes)
    res = _ln(res_ref[...].astype(jnp.float32), lnfg_ref[...], lnfb_ref[...])
    r = res.astype(jnp.bfloat16)
    zf = zf_ref[...].astype(jnp.bfloat16)
    yf = yf_ref[...].astype(jnp.bfloat16)

    def tail(h, w2, b2, w3, b3):
        h = jnp.maximum(h, 0.0).astype(jnp.bfloat16)
        h = jnp.dot(h, w2, preferred_element_type=jnp.float32) + b2
        h = jnp.maximum(h, 0.0).astype(jnp.bfloat16)
        return jnp.dot(h, w3, preferred_element_type=jnp.float32) + b3

    h1 = jnp.dot(r, h1w1_ref[...], preferred_element_type=jnp.float32) + h1b1_ref[...]
    oz_ref[...] = tail(h1, h1w2_ref[...], h1b2_ref[...], h1w3_ref[...], h1b3_ref[...])

    h2 = (jnp.dot(r, h2w1a_ref[...], preferred_element_type=jnp.float32)
          + jnp.dot(zf, h2w1b_ref[...], preferred_element_type=jnp.float32)
          + h2b1_ref[...])
    oy_ref[...] = tail(h2, h2w2_ref[...], h2b2_ref[...], h2w3_ref[...], h2b3_ref[...])

    h3 = (jnp.dot(r, h3w1a_ref[...], preferred_element_type=jnp.float32)
          + jnp.dot(zf, h3w1b_ref[...], preferred_element_type=jnp.float32)
          + jnp.dot(yf, h3w1c_ref[...], preferred_element_type=jnp.float32)
          + h3b1_ref[...])
    ox_ref[...] = tail(h3, h3w2_ref[...], h3b2_ref[...], h3w3_ref[...], h3b3_ref[...])


def coord_heads_pallas(res, z_force, y_force, params):
    M, D = res.shape
    Mp, tm = _row_plan(M)
    resp, zfp, yfp = _pad_rows(res, Mp), _pad_rows(z_force, Mp), _pad_rows(y_force, Mp)
    h1, h2, h3 = params["head1"], params["head2"], params["head3"]
    dec = params["decoder"]

    def row_spec(n):
        return pl.BlockSpec((tm, n), lambda i: (i, 0))

    def w_spec(k, n):
        return pl.BlockSpec((k, n), lambda i: (0, 0))

    def b_spec(n):
        return pl.BlockSpec((1, n), lambda i: (0, 0))

    out_z, out_y, out_x = pl.pallas_call(
        _coord_heads_kernel,
        out_shape=(jax.ShapeDtypeStruct((Mp, HEAD_PAD), jnp.float32),) * 3,
        grid=(Mp // tm,),
        in_specs=[
            row_spec(D), row_spec(D), row_spec(D), b_spec(D), b_spec(D),
            w_spec(D, D), b_spec(D), w_spec(D, D), b_spec(D),
            w_spec(D, HEAD_PAD), b_spec(HEAD_PAD),
            w_spec(D, D), w_spec(D, D), b_spec(D), w_spec(D, D), b_spec(D),
            w_spec(D, HEAD_PAD), b_spec(HEAD_PAD),
            w_spec(D, D), w_spec(D, D), w_spec(D, D), b_spec(D), w_spec(D, D),
            b_spec(D), w_spec(D, HEAD_PAD), b_spec(HEAD_PAD),
        ],
        out_specs=(pl.BlockSpec((tm, HEAD_PAD), lambda i: (i, 0)),) * 3,
        compiler_params=_cparams(1),
    )(resp, zfp, yfp,
      dec["lnf_g"].reshape(1, D), dec["lnf_b"].reshape(1, D),
      h1["w1"], h1["b1"].reshape(1, D), h1["w2"], h1["b2"].reshape(1, D),
      h1["w3"], h1["b3"].reshape(1, HEAD_PAD),
      h2["w1a"], h2["w1b"], h2["b1"].reshape(1, D), h2["w2"], h2["b2"].reshape(1, D),
      h2["w3"], h2["b3"].reshape(1, HEAD_PAD),
      h3["w1a"], h3["w1b"], h3["w1c"], h3["b1"].reshape(1, D), h3["w2"],
      h3["b2"].reshape(1, D), h3["w3"], h3["b3"].reshape(1, HEAD_PAD))
    return out_z[:M], out_y[:M], out_x[:M]


# --------------------------- model components -------------------------------
def get_positional_encoding(L, D):
    position = jnp.arange(L, dtype=jnp.float32)[:, None]
    div_term = jnp.exp(jnp.arange(0, D, 2, dtype=jnp.float32) * (-math.log(10000.0) / D))
    pe = jnp.zeros((L, D), jnp.float32)
    pe = pe.at[:, 0::2].set(jnp.sin(position * div_term))
    pe = pe.at[:, 1::2].set(jnp.cos(position * div_term))
    return pe


def point_embed(pts, params):
    """pts: (M, 3) continuous coords -> (M, 512) Fourier-feature embedding."""
    Mp_ = pts.shape[0]
    freqs = params["pe_freqs"]                               # (PE_FREQS,)
    proj = (pts[:, :, None] * freqs[None, None, :]).reshape(Mp_, 3 * PE_FREQS)
    feat = jnp.concatenate([jnp.sin(proj), jnp.cos(proj), pts], axis=-1)   # (M, 51)
    feat = jnp.pad(feat, ((0, 0), (0, PE_FEAT_PAD - PE_FEAT)))             # lane pad
    return linear_pallas(feat, params["pe_w"], params["pe_b"])


# ------------------------------- forward ------------------------------------
@jax.jit
def treemeshgpt_forward(params, vertices, edges, gt_ind, pc):
    B, N = gt_ind.shape
    _, Mv, C = vertices.shape
    P = PC_LATENTS
    P_pts = pc.shape[1]

    # dequantize_verts_tensor  (TODO(synk): assumed quant->[-0.5,0.5] convention)
    vertices_cont = vertices.astype(jnp.float32) / (NQ - 1) - 0.5

    mask = (jnp.arange(N)[None, :] <= N)                     # all True (as in torch)
    gt_ind_copy = jnp.where(gt_ind < 0, 0, gt_ind)
    idx = jnp.broadcast_to(gt_ind_copy[:, :, None], (B, N, C))
    gt = jnp.take_along_axis(vertices, idx, axis=1)
    gt = jnp.where((gt_ind == -1)[:, :, None], NQ, gt)
    gt = jnp.where((gt_ind == -2)[:, :, None], NQ + 1, gt)
    gt_x = jnp.minimum(gt[:, :, 0], NQ - 1)
    gt_y = jnp.minimum(gt[:, :, 1], NQ - 1)
    gt_z = gt[:, :, 2]

    # edge endpoints -> continuous coords
    edge_type = jnp.sum((edges == -1).astype(jnp.int32), axis=-1)     # (B, N)
    edges_ind = jnp.maximum(edges, 0)
    idx1 = jnp.broadcast_to(edges_ind[:, :, 0:1], (B, N, C))
    idx2 = jnp.broadcast_to(edges_ind[:, :, 1:2], (B, N, C))
    g1 = jnp.take_along_axis(vertices_cont, idx1, axis=1).reshape(B * N, C)
    g2 = jnp.take_along_axis(vertices_cont, idx2, axis=1).reshape(B * N, C)

    # single stacked point_embed for both edge endpoints and the point cloud
    pts_all = jnp.concatenate([g1, g2, pc.reshape(B * P_pts, 3)], axis=0)
    pe_all = point_embed(pts_all, params)                             # (2BN + BP, 512)
    g1e = pe_all[:B * N]
    g2e = pe_all[B * N:2 * B * N]
    pc_pe = pe_all[2 * B * N:]

    # constant half-edge contribution: sos_emb_2 @ W2[512:] + b2
    # (matches torch cat([g1e, sos_emb_2]) ordering: wa acts on g1e)
    bh_const = (jnp.dot(params["sos_emb_2"],
                        params["fc_edges_2_wb"].astype(jnp.float32))
                + params["fc_edges_2_b"])
    emb_full, emb_half = edges_proj_pallas(
        g1e, g2e, params["fc_edges_wa"], params["fc_edges_wb"],
        params["fc_edges_b"], params["fc_edges_2_wa"], bh_const)

    et = edge_type.reshape(B * N, 1)
    edges_emb = jnp.where(et == 2, params["sos_emb"][None, :],
                          jnp.where(et == 0, emb_full, emb_half)).reshape(B, N, DIM)

    # point-cloud prefix
    # TODO(synk): real CloudEncoder uses FPS + cross-attention to learned
    # latents; approximated with point_embed + linear + strided subsampling.
    pc_feat = linear_pallas(pc_pe, params["pc_w"], params["pc_b"]).reshape(B, P_pts, PC_FEAT)
    stride = P_pts // PC_LATENTS
    pc_embed = pc_feat[:, ::stride, :][:, :PC_LATENTS, :]             # (B, 16, 64)
    l2_norm_loss = jnp.mean(jnp.sum(pc_embed ** 2, axis=-1))
    pc_tok = linear_pallas(pc_embed.reshape(B * P, PC_FEAT),
                           params["pc_adapter_w"],
                           params["pc_adapter_b"]).reshape(B, P, DIM)

    edges_emb = edges_emb + get_positional_encoding(N, DIM)[None, :, :]
    start_emb = jnp.concatenate([pc_tok, edges_emb], axis=1)          # (B, P+N, DIM)

    # decoder: residual stream kept bf16 in HBM between fused per-layer calls
    x = start_emb.astype(jnp.bfloat16)
    for lp in params["decoder"]["layers"]:
        x = decoder_layer_pallas(x, lp)
    res2 = x[:, P:, :].reshape(B * N, DIM)        # final LN fused into heads kernel

    # coordinate heads with teacher forcing: one fused pallas_call
    z_force = params["coord1_emb"][jnp.minimum(gt_z, NQ - 1).reshape(B * N)]
    y_force = params["coord2_emb"][jnp.minimum(gt_y, NQ - 1).reshape(B * N)]
    out_z, out_y, out_x = coord_heads_pallas(res2, z_force, y_force, params)

    coord_mask = (gt_z < NQ).reshape(B * N).astype(jnp.float32)
    maskf = mask.reshape(B * N).astype(jnp.float32)

    def ce(logits, targets):
        # padded classes carry bias -1e9 and zero weights -> zero lse contribution
        lse = jax.nn.logsumexp(logits, axis=-1)
        tl = jnp.take_along_axis(logits, targets[:, None], axis=-1)[:, 0]
        return lse - tl

    loss_z = jnp.sum(ce(out_z, gt_z.reshape(B * N)) * maskf) / jnp.sum(maskf)
    loss_y = (jnp.sum(ce(out_y, gt_y.reshape(B * N)) * maskf * coord_mask)
              / jnp.sum(maskf * coord_mask))
    loss_x = (jnp.sum(ce(out_x, gt_x.reshape(B * N)) * maskf * coord_mask)
              / jnp.sum(maskf * coord_mask))
    return loss_x + loss_y + loss_z, l2_norm_loss


# ------------------------------ params --------------------------------------
def _linear_params(key, fan_in, fan_out):
    w = (jax.random.normal(key, (fan_in, fan_out), jnp.float32)
         / math.sqrt(fan_in)).astype(jnp.bfloat16)
    b = jnp.zeros((fan_out,), jnp.float32)
    return w, b


def _head_params(key, in_parts, out_dim, pad_to):
    k1, k2, k3 = jax.random.split(key, 3)
    w1, b1 = _linear_params(k1, in_parts * DIM, DIM)
    w2, b2 = _linear_params(k2, DIM, DIM)
    w3, b3 = _linear_params(k3, DIM, out_dim)
    pad = pad_to - out_dim
    w3 = jnp.concatenate([w3, jnp.zeros((DIM, pad), jnp.bfloat16)], axis=1)
    b3 = jnp.concatenate([b3, jnp.full((pad,), -1e9, jnp.float32)])
    parts = [w1[i * DIM:(i + 1) * DIM] for i in range(in_parts)]
    return parts, b1, w2, b2, w3, b3


def init_params(key):
    keys = jax.random.split(key, 64)
    ki = iter(keys)
    p = {}
    p["sos_emb"] = jax.random.normal(next(ki), (DIM,), jnp.float32)
    p["sos_emb_2"] = jax.random.normal(next(ki), (POINT_EMB_DIM,), jnp.float32)
    fc_w, p["fc_edges_b"] = _linear_params(next(ki), 2 * POINT_EMB_DIM, DIM)
    p["fc_edges_wa"], p["fc_edges_wb"] = fc_w[:POINT_EMB_DIM], fc_w[POINT_EMB_DIM:]
    fc2_w, p["fc_edges_2_b"] = _linear_params(next(ki), 2 * POINT_EMB_DIM, DIM)
    p["fc_edges_2_wa"], p["fc_edges_2_wb"] = fc2_w[:POINT_EMB_DIM], fc2_w[POINT_EMB_DIM:]
    p["pe_freqs"] = (2.0 ** jnp.arange(PE_FREQS, dtype=jnp.float32)) * math.pi
    pe_w_core, p["pe_b"] = _linear_params(next(ki), PE_FEAT, POINT_EMB_DIM)
    p["pe_w"] = jnp.concatenate(
        [pe_w_core, jnp.zeros((PE_FEAT_PAD - PE_FEAT, POINT_EMB_DIM), jnp.bfloat16)],
        axis=0)                                   # zero rows for padded lanes
    p["pc_w"], p["pc_b"] = _linear_params(next(ki), POINT_EMB_DIM, PC_FEAT)
    p["pc_adapter_w"], p["pc_adapter_b"] = _linear_params(next(ki), PC_FEAT, DIM)

    layers = []
    for _ in range(DEPTH):
        lp = {"ln1_g": jnp.ones((DIM,), jnp.float32), "ln1_b": jnp.zeros((DIM,), jnp.float32),
              "ln2_g": jnp.ones((DIM,), jnp.float32), "ln2_b": jnp.zeros((DIM,), jnp.float32)}
        lp["wqkv"], lp["bqkv"] = _linear_params(next(ki), DIM, 3 * DIM)     # packed Q|K|V
        lp["wo"], lp["bo"] = _linear_params(next(ki), DIM, DIM)
        w_ff1, b_ff1 = _linear_params(next(ki), DIM, 2 * FF_INNER)          # GEGLU packed
        lp["w_ff1a"], lp["b_ff1a"] = w_ff1[:, :FF_INNER], b_ff1[:FF_INNER]  # value half
        lp["w_ff1g"], lp["b_ff1g"] = w_ff1[:, FF_INNER:], b_ff1[FF_INNER:]  # gate half
        lp["w_ff2"], lp["b_ff2"] = _linear_params(next(ki), FF_INNER, DIM)
        layers.append(lp)
    p["decoder"] = {"layers": layers,
                    "lnf_g": jnp.ones((DIM,), jnp.float32),
                    "lnf_b": jnp.zeros((DIM,), jnp.float32)}

    parts, b1, w2, b2, w3, b3 = _head_params(next(ki), 1, NQ + 2, HEAD_PAD)
    p["head1"] = {"w1": parts[0], "b1": b1, "w2": w2, "b2": b2, "w3": w3, "b3": b3}
    parts, b1, w2, b2, w3, b3 = _head_params(next(ki), 2, NQ, HEAD_PAD)
    p["head2"] = {"w1a": parts[0], "w1b": parts[1], "b1": b1, "w2": w2, "b2": b2,
                  "w3": w3, "b3": b3}
    parts, b1, w2, b2, w3, b3 = _head_params(next(ki), 3, NQ, HEAD_PAD)
    p["head3"] = {"w1a": parts[0], "w1b": parts[1], "w1c": parts[2], "b1": b1,
                  "w2": w2, "b2": b2, "w3": w3, "b3": b3}
    p["coord1_emb"] = jax.random.normal(next(ki), (NQ, DIM), jnp.float32) * 0.02
    p["coord2_emb"] = jax.random.normal(next(ki), (NQ, DIM), jnp.float32) * 0.02
    return p


# ----------------------- host-side dynamic preprocessing --------------------
def host_preprocess(gt_ind_np, edges_np):
    """Data-dependent truncation (eos_ind) done eagerly in numpy, B must be 1."""
    gt_ind = gt_ind_np.copy()
    gt_ind[gt_ind == -2] = -1
    valid = gt_ind != -1
    last_idx = int(np.max(np.where(valid[0])[0]))
    eos_ind = last_idx + 1
    gt_ind = gt_ind[:, :eos_ind + 1]
    gt_ind[:, -1] = -2
    N = gt_ind.shape[1]
    edges = edges_np[:, :N]
    return gt_ind, edges


# --------------------------------- main --------------------------------------
if __name__ == "__main__":
    key = jax.random.PRNGKey(0)
    k_v, k_e, k_g, k_pc = jax.random.split(key, 4)

    B = 1            # forward's int(last_indices + 1) implies batch size 1
    M_VERTS = 32
    N_RAW = 64
    P_PTS = 64

    vertices = jax.random.randint(k_v, (B, M_VERTS, 3), 0, NQ, dtype=jnp.int32)
    pc = jax.random.uniform(k_pc, (B, P_PTS, 3), jnp.float32, -0.5, 0.5)

    # gt_ind: 47 valid entries, then -1 padding -> truncated length N = 48
    gt_ind_np = np.full((B, N_RAW), -1, dtype=np.int32)
    gt_ind_np[:, :47] = np.array(jax.random.randint(k_g, (B, 47), 0, M_VERTS, dtype=jnp.int32))
    gt_ind_np[0, 10] = -1    # a skipped token inside the valid region

    # edges: SOS edge [-1,-1], two half edges, rest full edges
    edges_np = np.array(jax.random.randint(k_e, (B, N_RAW, 2), 0, M_VERTS, dtype=jnp.int32))
    edges_np[0, 0] = [-1, -1]
    edges_np[0, 1, 1] = -1
    edges_np[0, 2, 1] = -1

    gt_ind_p, edges_p = host_preprocess(gt_ind_np, edges_np)

    params = init_params(jax.random.PRNGKey(1))

    loss_ce, l2_loss = treemeshgpt_forward(
        params, vertices, jnp.asarray(edges_p), jnp.asarray(gt_ind_p), pc)
    jax.block_until_ready((loss_ce, l2_loss))
    assert np.isfinite(float(loss_ce)) and np.isfinite(float(l2_loss))
    print("KERNEL_OK")
</pallas_src>

<mosaic_0001>
module attributes {stable_mosaic.version = 11 : i64} {
  func.func @_linear_kernel(%arg0: i32, %arg1: memref<160x64xf32, #tpu.memory_space<vmem>>, %arg2: memref<64x512xbf16, #tpu.memory_space<vmem>>, %arg3: memref<1x512xf32, #tpu.memory_space<vmem>>, %arg4: memref<160x512xf32, #tpu.memory_space<vmem>>) attributes {dimension_semantics = [#tpu.dimension_semantics<parallel>], iteration_bounds = array<i64: 1>, scalar_prefetch = 0 : i64, scratch_operands = 0 : i64, tpu.core_type = #tpu.core_type<tc>, window_params = [{transform_indices = @transform_0, window_bounds = array<i64: 160, 64>}, {pipeline_mode = #tpu.pipeline_mode<synchronous>, transform_indices = @transform_1, window_bounds = array<i64: 64, 512>}, {pipeline_mode = #tpu.pipeline_mode<synchronous>, transform_indices = @transform_2, window_bounds = array<i64: 1, 512>}, {transform_indices = @transform_3, window_bounds = array<i64: 160, 512>}]} {
    %c0 = arith.constant 0 : index
    %c0_0 = arith.constant 0 : index
    %0 = vector.load %arg1[%c0, %c0_0] : memref<160x64xf32, #tpu.memory_space<vmem>>, vector<160x64xf32>
    %1 = arith.truncf %0 : vector<160x64xf32> to vector<160x64xbf16>
    %c0_1 = arith.constant 0 : index
    %c0_2 = arith.constant 0 : index
    %2 = vector.load %arg2[%c0_1, %c0_2] : memref<64x512xbf16, #tpu.memory_space<vmem>>, vector<64x512xbf16>
    %cst = arith.constant dense<0.000000e+00> : vector<160x512xf32>
    %3 = tpu.matmul %1, %2, %cst {dimension_numbers = #tpu.dot_dimension_numbers<[1], [0], [0], [1], [0, 0, 1, 1], [], []>} : vector<160x64xbf16>, vector<64x512xbf16>, vector<160x512xf32> -> vector<160x512xf32>
    %c0_3 = arith.constant 0 : index
    %c0_4 = arith.constant 0 : index
    %4 = vector.load %arg3[%c0_3, %c0_4] : memref<1x512xf32, #tpu.memory_space<vmem>>, vector<1x512xf32>
    %5 = vector.broadcast %4 : vector<1x512xf32> to vector<160x512xf32>
    %6 = arith.addf %3, %5 : vector<160x512xf32>
    %c0_5 = arith.constant 0 : index
    %c0_6 = arith.constant 0 : index
    %7 = vector.load %arg4[%c0_5, %c0_6] : memref<160x512xf32, #tpu.memory_space<vmem>>, vector<160x512xf32>
    tpu.vector_store %arg4[%c0_5, %c0_6], %6 {strides = array<i32>} : memref<160x512xf32, #tpu.memory_space<vmem>>, vector<160x512xf32>,
    return
  }
  func.func @transform_0(%arg0: i32) -> (i32, i32) {
    %c0_i32 = arith.constant 0 : i32
    %c0_i32_0 = arith.constant 0 : i32
    return %arg0, %c0_i32 : i32, i32
  }
  func.func @transform_1(%arg0: i32) -> (i32, i32) {
    %c0_i32 = arith.constant 0 : i32
    %c0_i32_0 = arith.constant 0 : i32
    %c0_i32_1 = arith.constant 0 : i32
    return %c0_i32, %c0_i32_0 : i32, i32
  }
  func.func @transform_2(%arg0: i32) -> (i32, i32) {
    %c0_i32 = arith.constant 0 : i32
    %c0_i32_0 = arith.constant 0 : i32
    %c0_i32_1 = arith.constant 0 : i32
    return %c0_i32, %c0_i32_0 : i32, i32
  }
  func.func @transform_3(%arg0: i32) -> (i32, i32) {
    %c0_i32 = arith.constant 0 : i32
    %c0_i32_0 = arith.constant 0 : i32
    return %arg0, %c0_i32 : i32, i32
  }
}

module attributes {stable_mosaic.version = 11 : i64} {
  func.func @_edges_proj_kernel(%arg0: i32, %arg1: memref<48x512xf32, #tpu.memory_space<vmem>>, %arg2: memref<48x512xf32, #tpu.memory_space<vmem>>, %arg3: memref<512x128xbf16, #tpu.memory_space<vmem>>, %arg4: memref<512x128xbf16, #tpu.memory_space<vmem>>, %arg5: memref<1x128xf32, #tpu.memory_space<vmem>>, %arg6: memref<512x128xbf16, #tpu.memory_space<vmem>>, %arg7: memref<1x128xf32, #tpu.memory_space<vmem>>, %arg8: memref<48x128xf32, #tpu.memory_space<vmem>>, %arg9: memref<48x128xf32, #tpu.memory_space<vmem>>) attributes {dimension_semantics = [#tpu.dimension_semantics<parallel>], iteration_bounds = array<i64: 1>, scalar_prefetch = 0 : i64, scratch_operands = 0 : i64, tpu.core_type = #tpu.core_type<tc>, window_params = [{transform_indices = @transform_0, window_bounds = array<i64: 48, 512>}, {transform_indices = @transform_1, window_bounds = array<i64: 48, 512>}, {pipeline_mode = #tpu.pipeline_mode<synchronous>, transform_indices = @transform_2, window_bounds = array<i64: 512, 128>}, {pipeline_mode = #tpu.pipeline_mode<synchronous>, transform_indices = @transform_3, window_bounds = array<i64: 512, 128>}, {pipeline_mode = #tpu.pipeline_mode<synchronous>, transform_indices = @transform_4, window_bounds = array<i64: 1, 128>}, {pipeline_mode = #tpu.pipeline_mode<synchronous>, transform_indices = @transform_5, window_bounds = array<i64: 512, 128>}, {pipeline_mode = #tpu.pipeline_mode<synchronous>, transform_indices = @transform_6, window_bounds = array<i64: 1, 128>}, {transform_indices = @transform_7, window_bounds = array<i64: 48, 128>}, {transform_indices = @transform_8, window_bounds = array<i64: 48, 128>}]} {
    %c0 = arith.constant 0 : index
    %c0_0 = arith.constant 0 : index
    %0 = vector.load %arg1[%c0, %c0_0] : memref<48x512xf32, #tpu.memory_space<vmem>>, vector<48x512xf32>
    %1 = arith.truncf %0 : vector<48x512xf32> to vector<48x512xbf16>
    %c0_1 = arith.constant 0 : index
    %c0_2 = arith.constant 0 : index
    %2 = vector.load %arg2[%c0_1, %c0_2] : memref<48x512xf32, #tpu.memory_space<vmem>>, vector<48x512xf32>
    %3 = arith.truncf %2 : vector<48x512xf32> to vector<48x512xbf16>
    %c0_3 = arith.constant 0 : index
    %c0_4 = arith.constant 0 : index
    %4 = vector.load %arg3[%c0_3, %c0_4] : memref<512x128xbf16, #tpu.memory_space<vmem>>, vector<512x128xbf16>
    %cst = arith.constant dense<0.000000e+00> : vector<48x128xf32>
    %5 = tpu.matmul %1, %4, %cst {dimension_numbers = #tpu.dot_dimension_numbers<[1], [0], [0], [1], [0, 0, 1, 1], [], []>} : vector<48x512xbf16>, vector<512x128xbf16>, vector<48x128xf32> -> vector<48x128xf32>
    %c0_5 = arith.constant 0 : index
    %c0_6 = arith.constant 0 : index
    %6 = vector.load %arg4[%c0_5, %c0_6] : memref<512x128xbf16, #tpu.memory_space<vmem>>, vector<512x128xbf16>
    %cst_7 = arith.constant dense<0.000000e+00> : vector<48x128xf32>
    %7 = tpu.matmul %3, %6, %cst_7 {dimension_numbers = #tpu.dot_dimension_numbers<[1], [0], [0], [1], [0, 0, 1, 1], [], []>} : vector<48x512xbf16>, vector<512x128xbf16>, vector<48x128xf32> -> vector<48x128xf32>
    %8 = arith.addf %5, %7 : vector<48x128xf32>
    %c0_8 = arith.constant 0 : index
    %c0_9 = arith.constant 0 : index
    %9 = vector.load %arg5[%c0_8, %c0_9] : memref<1x128xf32, #tpu.memory_space<vmem>>, vector<1x128xf32>
    %10 = vector.broadcast %9 : vector<1x128xf32> to vector<48x128xf32>
    %11 = arith.addf %8, %10 : vector<48x128xf32>
    %c0_10 = arith.constant 0 : index
    %c0_11 = arith.constant 0 : index
    %12 = vector.load %arg8[%c0_10, %c0_11] : memref<48x128xf32, #tpu.memory_space<vmem>>, vector<48x128xf32>
    tpu.vector_store %arg8[%c0_10, %c0_11], %11 {strides = array<i32>} : memref<48x128xf32, #tpu.memory_space<vmem>>, vector<48x128xf32>,
    %c0_12 = arith.constant 0 : index
    %c0_13 = arith.constant 0 : index
    %13 = vector.load %arg6[%c0_12, %c0_13] : memref<512x128xbf16, #tpu.memory_space<vmem>>, vector<512x128xbf16>
    %cst_14 = arith.constant dense<0.000000e+00> : vector<48x128xf32>
    %14 = tpu.matmul %1, %13, %cst_14 {dimension_numbers = #tpu.dot_dimension_numbers<[1], [0], [0], [1], [0, 0, 1, 1], [], []>} : vector<48x512xbf16>, vector<512x128xbf16>, vector<48x128xf32> -> vector<48x128xf32>
    %c0_15 = arith.constant 0 : index
    %c0_16 = arith.constant 0 : index
    %15 = vector.load %arg7[%c0_15, %c0_16] : memref<1x128xf32, #tpu.memory_space<vmem>>, vector<1x128xf32>
    %16 = vector.broadcast %15 : vector<1x128xf32> to vector<48x128xf32>
    %17 = arith.addf %14, %16 : vector<48x128xf32>
    %c0_17 = arith.constant 0 : index
    %c0_18 = arith.constant 0 : index
    %18 = vector.load %arg9[%c0_17, %c0_18] : memref<48x128xf32, #tpu.memory_space<vmem>>, vector<48x128xf32>
    tpu.vector_store %arg9[%c0_17, %c0_18], %17 {strides = array<i32>} : memref<48x128xf32, #tpu.memory_space<vmem>>, vector<48x128xf32>,
    return
  }
  func.func @transform_0(%arg0: i32) -> (i32, i32) {
    %c0_i32 = arith.constant 0 : i32
    %c0_i32_0 = arith.constant 0 : i32
    return %arg0, %c0_i32 : i32, i32
  }
  func.func @transform_1(%arg0: i32) -> (i32, i32) {
    %c0_i32 = arith.constant 0 : i32
    %c0_i32_0 = arith.constant 0 : i32
    return %arg0, %c0_i32 : i32, i32
  }
  func.func @transform_2(%arg0: i32) -> (i32, i32) {
    %c0_i32 = arith.constant 0 : i32
    %c0_i32_0 = arith.constant 0 : i32
    %c0_i32_1 = arith.constant 0 : i32
    return %c0_i32, %c0_i32_0 : i32, i32
  }
  func.func @transform_3(%arg0: i32) -> (i32, i32) {
    %c0_i32 = arith.constant 0 : i32
    %c0_i32_0 = arith.constant 0 : i32
    %c0_i32_1 = arith.constant 0 : i32
    return %c0_i32, %c0_i32_0 : i32, i32
  }
  func.func @transform_4(%arg0: i32) -> (i32, i32) {
    %c0_i32 = arith.constant 0 : i32
    %c0_i32_0 = arith.constant 0 : i32
    %c0_i32_1 = arith.constant 0 : i32
    return %c0_i32, %c0_i32_0 : i32, i32
  }
  func.func @transform_5(%arg0: i32) -> (i32, i32) {
    %c0_i32 = arith.constant 0 : i32
    %c0_i32_0 = arith.constant 0 : i32
    %c0_i32_1 = arith.constant 0 : i32
    return %c0_i32, %c0_i32_0 : i32, i32
  }
  func.func @transform_6(%arg0: i32) -> (i32, i32) {
    %c0_i32 = arith.constant 0 : i32
    %c0_i32_0 = arith.constant 0 : i32
    %c0_i32_1 = arith.constant 0 : i32
    return %c0_i32, %c0_i32_0 : i32, i32
  }
  func.func @transform_7(%arg0: i32) -> (i32, i32) {
    %c0_i32 = arith.constant 0 : i32
    %c0_i32_0 = arith.constant 0 : i32
    return %arg0, %c0_i32 : i32, i32
  }
  func.func @transform_8(%arg0: i32) -> (i32, i32) {
    %c0_i32 = arith.constant 0 : i32
    %c0_i32_0 = arith.constant 0 : i32
    return %arg0, %c0_i32 : i32, i32
  }
}

module attributes {stable_mosaic.version = 11 : i64} {
  func.func @_linear_kernel(%arg0: i32, %arg1: memref<64x512xf32, #tpu.memory_space<vmem>>, %arg2: memref<512x64xbf16, #tpu.memory_space<vmem>>, %arg3: memref<1x64xf32, #tpu.memory_space<vmem>>, %arg4: memref<64x64xf32, #tpu.memory_space<vmem>>) attributes {dimension_semantics = [#tpu.dimension_semantics<parallel>], iteration_bounds = array<i64: 1>, scalar_prefetch = 0 : i64, scratch_operands = 0 : i64, tpu.core_type = #tpu.core_type<tc>, window_params = [{transform_indices = @transform_0, window_bounds = array<i64: 64, 512>}, {pipeline_mode = #tpu.pipeline_mode<synchronous>, transform_indices = @transform_1, window_bounds = array<i64: 512, 64>}, {pipeline_mode = #tpu.pipeline_mode<synchronous>, transform_indices = @transform_2, window_bounds = array<i64: 1, 64>}, {transform_indices = @transform_3, window_bounds = array<i64: 64, 64>}]} {
    %c0 = arith.constant 0 : index
    %c0_0 = arith.constant 0 : index
    %0 = vector.load %arg1[%c0, %c0_0] : memref<64x512xf32, #tpu.memory_space<vmem>>, vector<64x512xf32>
    %1 = arith.truncf %0 : vector<64x512xf32> to vector<64x512xbf16>
    %c0_1 = arith.constant 0 : index
    %c0_2 = arith.constant 0 : index
    %2 = vector.load %arg2[%c0_1, %c0_2] : memref<512x64xbf16, #tpu.memory_space<vmem>>, vector<512x64xbf16>
    %cst = arith.constant dense<0.000000e+00> : vector<64x64xf32>
    %3 = tpu.matmul %1, %2, %cst {dimension_numbers = #tpu.dot_dimension_numbers<[1], [0], [0], [1], [0, 0, 1, 1], [], []>} : vector<64x512xbf16>, vector<512x64xbf16>, vector<64x64xf32> -> vector<64x64xf32>
    %c0_3 = arith.constant 0 : index
    %c0_4 = arith.constant 0 : index
    %4 = vector.load %arg3[%c0_3, %c0_4] : memref<1x64xf32, #tpu.memory_space<vmem>>, vector<1x64xf32>
    %5 = vector.broadcast %4 : vector<1x64xf32> to vector<64x64xf32>
    %6 = arith.addf %3, %5 : vector<64x64xf32>
    %c0_5 = arith.constant 0 : index
    %c0_6 = arith.constant 0 : index
    %7 = vector.load %arg4[%c0_5, %c0_6] : memref<64x64xf32, #tpu.memory_space<vmem>>, vector<64x64xf32>
    tpu.vector_store %arg4[%c0_5, %c0_6], %6 {strides = array<i32>} : memref<64x64xf32, #tpu.memory_space<vmem>>, vector<64x64xf32>,
    return
  }
  func.func @transform_0(%arg0: i32) -> (i32, i32) {
    %c0_i32 = arith.constant 0 : i32
    %c0_i32_0 = arith.constant 0 : i32
    return %arg0, %c0_i32 : i32, i32
  }
  func.func @transform_1(%arg0: i32) -> (i32, i32) {
    %c0_i32 = arith.constant 0 : i32
    %c0_i32_0 = arith.constant 0 : i32
    %c0_i32_1 = arith.constant 0 : i32
    return %c0_i32, %c0_i32_0 : i32, i32
  }
  func.func @transform_2(%arg0: i32) -> (i32, i32) {
    %c0_i32 = arith.constant 0 : i32
    %c0_i32_0 = arith.constant 0 : i32
    %c0_i32_1 = arith.constant 0 : i32
    return %c0_i32, %c0_i32_0 : i32, i32
  }
  func.func @transform_3(%arg0: i32) -> (i32, i32) {
    %c0_i32 = arith.constant 0 : i32
    %c0_i32_0 = arith.constant 0 : i32
    return %arg0, %c0_i32 : i32, i32
  }
}

module attributes {stable_mosaic.version = 11 : i64} {
  func.func @_linear_kernel(%arg0: i32, %arg1: memref<16x64xf32, #tpu.memory_space<vmem>>, %arg2: memref<64x128xbf16, #tpu.memory_space<vmem>>, %arg3: memref<1x128xf32, #tpu.memory_space<vmem>>, %arg4: memref<16x128xf32, #tpu.memory_space<vmem>>) attributes {dimension_semantics = [#tpu.dimension_semantics<parallel>], iteration_bounds = array<i64: 1>, scalar_prefetch = 0 : i64, scratch_operands = 0 : i64, tpu.core_type = #tpu.core_type<tc>, window_params = [{transform_indices = @transform_0, window_bounds = array<i64: 16, 64>}, {pipeline_mode = #tpu.pipeline_mode<synchronous>, transform_indices = @transform_1, window_bounds = array<i64: 64, 128>}, {pipeline_mode = #tpu.pipeline_mode<synchronous>, transform_indices = @transform_2, window_bounds = array<i64: 1, 128>}, {transform_indices = @transform_3, window_bounds = array<i64: 16, 128>}]} {
    %c0 = arith.constant 0 : index
    %c0_0 = arith.constant 0 : index
    %0 = vector.load %arg1[%c0, %c0_0] : memref<16x64xf32, #tpu.memory_space<vmem>>, vector<16x64xf32>
    %1 = arith.truncf %0 : vector<16x64xf32> to vector<16x64xbf16>
    %c0_1 = arith.constant 0 : index
    %c0_2 = arith.constant 0 : index
    %2 = vector.load %arg2[%c0_1, %c0_2] : memref<64x128xbf16, #tpu.memory_space<vmem>>, vector<64x128xbf16>
    %cst = arith.constant dense<0.000000e+00> : vector<16x128xf32>
    %3 = tpu.matmul %1, %2, %cst {dimension_numbers = #tpu.dot_dimension_numbers<[1], [0], [0], [1], [0, 0, 1, 1], [], []>} : vector<16x64xbf16>, vector<64x128xbf16>, vector<16x128xf32> -> vector<16x128xf32>
    %c0_3 = arith.constant 0 : index
    %c0_4 = arith.constant 0 : index
    %4 = vector.load %arg3[%c0_3, %c0_4] : memref<1x128xf32, #tpu.memory_space<vmem>>, vector<1x128xf32>
    %5 = vector.broadcast %4 : vector<1x128xf32> to vector<16x128xf32>
    %6 = arith.addf %3, %5 : vector<16x128xf32>
    %c0_5 = arith.constant 0 : index
    %c0_6 = arith.constant 0 : index
    %7 = vector.load %arg4[%c0_5, %c0_6] : memref<16x128xf32, #tpu.memory_space<vmem>>, vector<16x128xf32>
    tpu.vector_store %arg4[%c0_5, %c0_6], %6 {strides = array<i32>} : memref<16x128xf32, #tpu.memory_space<vmem>>, vector<16x128xf32>,
    return
  }
  func.func @transform_0(%arg0: i32) -> (i32, i32) {
    %c0_i32 = arith.constant 0 : i32
    %c0_i32_0 = arith.constant 0 : i32
    return %arg0, %c0_i32 : i32, i32
  }
  func.func @transform_1(%arg0: i32) -> (i32, i32) {
    %c0_i32 = arith.constant 0 : i32
    %c0_i32_0 = arith.constant 0 : i32
    %c0_i32_1 = arith.constant 0 : i32
    return %c0_i32, %c0_i32_0 : i32, i32
  }
  func.func @transform_2(%arg0: i32) -> (i32, i32) {
    %c0_i32 = arith.constant 0 : i32
    %c0_i32_0 = arith.constant 0 : i32
    %c0_i32_1 = arith.constant 0 : i32
    return %c0_i32, %c0_i32_0 : i32, i32
  }
  func.func @transform_3(%arg0: i32) -> (i32, i32) {
    %c0_i32 = arith.constant 0 : i32
    %c0_i32_0 = arith.constant 0 : i32
    return %arg0, %c0_i32 : i32, i32
  }
}

module attributes {stable_mosaic.version = 11 : i64} {
  func.func @_decoder_layer_kernel(%arg0: i32, %arg1: memref<1x64x128xbf16, #tpu.memory_space<vmem>>, %arg2: memref<1x128xf32, #tpu.memory_space<vmem>>, %arg3: memref<1x128xf32, #tpu.memory_space<vmem>>, %arg4: memref<128x384xbf16, #tpu.memory_space<vmem>>, %arg5: memref<1x384xf32, #tpu.memory_space<vmem>>, %arg6: memref<128x128xbf16, #tpu.memory_space<vmem>>, %arg7: memref<1x128xf32, #tpu.memory_space<vmem>>, %arg8: memref<1x128xf32, #tpu.memory_space<vmem>>, %arg9: memref<1x128xf32, #tpu.memory_space<vmem>>, %arg10: memref<128x512xbf16, #tpu.memory_space<vmem>>, %arg11: memref<1x512xf32, #tpu.memory_space<vmem>>, %arg12: memref<128x512xbf16, #tpu.memory_space<vmem>>, %arg13: memref<1x512xf32, #tpu.memory_space<vmem>>, %arg14: memref<512x128xbf16, #tpu.memory_space<vmem>>, %arg15: memref<1x128xf32, #tpu.memory_space<vmem>>, %arg16: memref<1x64x128xbf16, #tpu.memory_space<vmem>>) attributes {dimension_semantics = [#tpu.dimension_semantics<parallel>], iteration_bounds = array<i64: 1>, scalar_prefetch = 0 : i64, scratch_operands = 0 : i64, tpu.core_type = #tpu.core_type<tc>, window_params = [{transform_indices = @transform_0, window_bounds = array<i64: 1, 64, 128>}, {pipeline_mode = #tpu.pipeline_mode<synchronous>, transform_indices = @transform_1, window_bounds = array<i64: 1, 128>}, {pipeline_mode = #tpu.pipeline_mode<synchronous>, transform_indices = @transform_2, window_bounds = array<i64: 1, 128>}, {pipeline_mode = #tpu.pipeline_mode<synchronous>, transform_indices = @transform_3, window_bounds = array<i64: 128, 384>}, {pipeline_mode = #tpu.pipeline_mode<synchronous>, transform_indices = @transform_4, window_bounds = array<i64: 1, 384>}, {pipeline_mode = #tpu.pipeline_mode<synchronous>, transform_indices = @transform_5, window_bounds = array<i64: 128, 128>}, {pipeline_mode = #tpu.pipeline_mode<synchronous>, transform_indices = @transform_6, window_bounds = array<i64: 1, 128>}, {pipeline_mode = #tpu.pipeline_mode<synchronous>, transform_indices = @transform_7, window_bounds = array<i64: 1, 128>}, {pipeline_mode = #tpu.pipeline_mode<synchronous>, transform_indices = @transform_8, window_bounds = array<i64: 1, 128>}, {pipeline_mode = #tpu.pipeline_mode<synchronous>, transform_indices = @transform_9, window_bounds = array<i64: 128, 512>}, {pipeline_mode = #tpu.pipeline_mode<synchronous>, transform_indices = @transform_10, window_bounds = array<i64: 1, 512>}, {pipeline_mode = #tpu.pipeline_mode<synchronous>, transform_indices = @transform_11, window_bounds = array<i64: 128, 512>}, {pipeline_mode = #tpu.pipeline_mode<synchronous>, transform_indices = @transform_12, window_bounds = array<i64: 1, 512>}, {pipeline_mode = #tpu.pipeline_mode<synchronous>, transform_indices = @transform_13, window_bounds = array<i64: 512, 128>}, {pipeline_mode = #tpu.pipeline_mode<synchronous>, transform_indices = @transform_14, window_bounds = array<i64: 1, 128>}, {transform_indices = @transform_15, window_bounds = array<i64: 1, 64, 128>}]} {
    %c0 = arith.constant 0 : index
    %c0_0 = arith.constant 0 : index
    %c0_1 = arith.constant 0 : index
    %0 = vector.load %arg1[%c0, %c0_0, %c0_1] : memref<1x64x128xbf16, #tpu.memory_space<vmem>>, vector<1x64x128xbf16>
    %1 = vector.shape_cast %0 : vector<1x64x128xbf16> to vector<64x128xbf16>
    %2 = arith.extf %1 : vector<64x128xbf16> to vector<64x128xf32>
    %c0_2 = arith.constant 0 : index
    %c0_3 = arith.constant 0 : index
    %3 = vector.load %arg2[%c0_2, %c0_3] : memref<1x128xf32, #tpu.memory_space<vmem>>, vector<1x128xf32>
    %c0_4 = arith.constant 0 : index
    %c0_5 = arith.constant 0 : index
    %4 = vector.load %arg3[%c0_4, %c0_5] : memref<1x128xf32, #tpu.memory_space<vmem>>, vector<1x128xf32>
    %cst = arith.constant dense<0.000000e+00> : vector<64xf32>
    %5 = vector.multi_reduction <add>, %2, %cst [1] : vector<64x128xf32> to vector<64xf32>
    %6 = vector.shape_cast %5 : vector<64xf32> to vector<64x1xf32>
    %cst_6 = arith.constant 1.280000e+02 : f32
    %7 = vector.broadcast %cst_6 : f32 to vector<64x1xf32>
    %8 = arith.divf %6, %7 : vector<64x1xf32>
    %9 = vector.broadcast %8 : vector<64x1xf32> to vector<64x128xf32>
    %10 = arith.subf %2, %9 : vector<64x128xf32>
    %11 = arith.mulf %10, %10 : vector<64x128xf32>
    %cst_7 = arith.constant dense<0.000000e+00> : vector<64xf32>
    %12 = vector.multi_reduction <add>, %11, %cst_7 [1] : vector<64x128xf32> to vector<64xf32>
    %13 = vector.shape_cast %12 : vector<64xf32> to vector<64x1xf32>
    %cst_8 = arith.constant 1.280000e+02 : f32
    %14 = vector.broadcast %cst_8 : f32 to vector<64x1xf32>
    %15 = arith.divf %13, %14 : vector<64x1xf32>
    %16 = vector.broadcast %8 : vector<64x1xf32> to vector<64x128xf32>
    %17 = arith.subf %2, %16 : vector<64x128xf32>
    %cst_9 = arith.constant 9.99999974E-6 : f32
    %18 = vector.broadcast %cst_9 : f32 to vector<64x1xf32>
    %19 = arith.addf %15, %18 : vector<64x1xf32>
    %20 = math.rsqrt %19 : vector<64x1xf32>
    %21 = vector.broadcast %20 : vector<64x1xf32> to vector<64x128xf32>
    %22 = arith.mulf %17, %21 : vector<64x128xf32>
    %23 = vector.broadcast %3 : vector<1x128xf32> to vector<64x128xf32>
    %24 = arith.mulf %22, %23 : vector<64x128xf32>
    %25 = vector.broadcast %4 : vector<1x128xf32> to vector<64x128xf32>
    %26 = arith.addf %24, %25 : vector<64x128xf32>
    %27 = arith.truncf %26 : vector<64x128xf32> to vector<64x128xbf16>
    %c0_10 = arith.constant 0 : index
    %c0_11 = arith.constant 0 : index
    %28 = vector.load %arg4[%c0_10, %c0_11] : memref<128x384xbf16, #tpu.memory_space<vmem>>, vector<128x384xbf16>
    %cst_12 = arith.constant dense<0.000000e+00> : vector<64x384xf32>
    %29 = tpu.matmul %27, %28, %cst_12 {dimension_numbers = #tpu.dot_dimension_numbers<[1], [0], [0], [1], [0, 0, 1, 1], [], []>} : vector<64x128xbf16>, vector<128x384xbf16>, vector<64x384xf32> -> vector<64x384xf32>
    %c0_13 = arith.constant 0 : index
    %c0_14 = arith.constant 0 : index
    %30 = vector.load %arg5[%c0_13, %c0_14] : memref<1x384xf32, #tpu.memory_space<vmem>>, vector<1x384xf32>
    %31 = vector.broadcast %30 : vector<1x384xf32> to vector<64x384xf32>
    %32 = arith.addf %29, %31 : vector<64x384xf32>
    %33 = vector.extract_strided_slice %32 {offsets = [0, 0], sizes = [64, 128], strides = [1, 1]} : vector<64x384xf32> to vector<64x128xf32>
    %cst_15 = arith.constant 0.176776692 : f32
    %34 = vector.broadcast %cst_15 : f32 to vector<64x128xf32>
    %35 = arith.mulf %33, %34 : vector<64x128xf32>
    %36 = vector.extract_strided_slice %32 {offsets = [0, 128], sizes = [64, 128], strides = [1, 1]} : vector<64x384xf32> to vector<64x128xf32>
    %37 = arith.truncf %36 : vector<64x128xf32> to vector<64x128xbf16>
    %38 = vector.extract_strided_slice %32 {offsets = [0, 256], sizes = [64, 128], strides = [1, 1]} : vector<64x384xf32> to vector<64x128xf32>
    %39 = arith.truncf %38 : vector<64x128xf32> to vector<64x128xbf16>
    %40 = tpu.iota {dimensions = array<i32: 0>} : vector<64x64xi32>
    %41 = tpu.iota {dimensions = array<i32: 1>} : vector<64x64xi32>
    %42 = arith.cmpi sle, %41, %40 : vector<64x64xi32>
    %43 = tpu.iota {dimensions = array<i32: 1>} : vector<64x128xi32>
    %cst_16 = arith.constant 0.000000e+00 : f32
    %44 = vector.broadcast %cst_16 : f32 to vector<64x128xf32>
    %c0_i32 = arith.constant 0 : i32
    %45 = vector.broadcast %c0_i32 : i32 to vector<64x128xi32>
    %46 = arith.cmpi sge, %43, %45 : vector<64x128xi32>
    %c32_i32 = arith.constant 32 : i32
    %47 = vector.broadcast %c32_i32 : i32 to vector<64x128xi32>
    %48 = arith.cmpi slt, %43, %47 : vector<64x128xi32>
    %49 = arith.andi %46, %48 : vector<64x128xi1>
    %cst_17 = arith.constant 0.000000e+00 : f32
    %50 = vector.broadcast %cst_17 : f32 to vector<64x128xf32>
    %51 = arith.select %49, %35, %50 : vector<64x128xi1>, vector<64x128xf32>
    %52 = arith.truncf %51 : vector<64x128xf32> to vector<64x128xbf16>
    %cst_18 = arith.constant 0.000000e+00 : f32
    %53 = arith.truncf %cst_18 : f32 to bf16
    %54 = vector.broadcast %53 : bf16 to vector<64x128xbf16>
    %55 = arith.select %49, %39, %54 : vector<64x128xi1>, vector<64x128xbf16>
    %cst_19 = arith.constant dense<0.000000e+00> : vector<64x64xf32>
    %56 = tpu.matmul %52, %37, %cst_19 {dimension_numbers = #tpu.dot_dimension_numbers<[1], [1], [0], [0], [0, 0, 1, 0], [], []>} : vector<64x128xbf16>, vector<64x128xbf16>, vector<64x64xf32> -> vector<64x64xf32>
    %cst_20 = arith.constant -1.000000e+30 : f32
    %57 = vector.broadcast %cst_20 : f32 to vector<64x64xf32>
    %58 = arith.select %42, %56, %57 : vector<64x64xi1>, vector<64x64xf32>
    %cst_21 = arith.constant dense<0xFF800000> : vector<64xf32>
    %59 = vector.multi_reduction <maximumf>, %58, %cst_21 [1] : vector<64x64xf32> to vector<64xf32>
    %60 = vector.shape_cast %59 : vector<64xf32> to vector<64x1xf32>
    %61 = vector.broadcast %60 : vector<64x1xf32> to vector<64x64xf32>
    %62 = arith.subf %58, %61 : vector<64x64xf32>
    %63 = math.exp %62 : vector<64x64xf32>
    %cst_22 = arith.constant dense<0.000000e+00> : vector<64xf32>
    %64 = vector.multi_reduction <add>, %63, %cst_22 [1] : vector<64x64xf32> to vector<64xf32>
    %65 = vector.shape_cast %64 : vector<64xf32> to vector<64x1xf32>
    %66 = tpu.reciprocal %65 : vector<64x1xf32> -> vector<64x1xf32>
    %67 = vector.broadcast %66 : vector<64x1xf32> to vector<64x64xf32>
    %68 = arith.mulf %63, %67 : vector<64x64xf32>
    %69 = arith.truncf %68 : vector<64x64xf32> to vector<64x64xbf16>
    %cst_23 = arith.constant dense<0.000000e+00> : vector<64x128xf32>
    %70 = tpu.matmul %69, %55, %cst_23 {dimension_numbers = #tpu.dot_dimension_numbers<[1], [0], [0], [1], [0, 0, 1, 1], [], []>} : vector<64x64xbf16>, vector<64x128xbf16>, vector<64x128xf32> -> vector<64x128xf32>
    %71 = arith.addf %44, %70 : vector<64x128xf32>
    %c32_i32_24 = arith.constant 32 : i32
    %72 = vector.broadcast %c32_i32_24 : i32 to vector<64x128xi32>
    %73 = arith.cmpi sge, %43, %72 : vector<64x128xi32>
    %c64_i32 = arith.constant 64 : i32
    %74 = vector.broadcast %c64_i32 : i32 to vector<64x128xi32>
    %75 = arith.cmpi slt, %43, %74 : vector<64x128xi32>
    %76 = arith.andi %73, %75 : vector<64x128xi1>
    %cst_25 = arith.constant 0.000000e+00 : f32
    %77 = vector.broadcast %cst_25 : f32 to vector<64x128xf32>
    %78 = arith.select %76, %35, %77 : vector<64x128xi1>, vector<64x128xf32>
    %79 = arith.truncf %78 : vector<64x128xf32> to vector<64x128xbf16>
    %cst_26 = arith.constant 0.000000e+00 : f32
    %80 = arith.truncf %cst_26 : f32 to bf16
    %81 = vector.broadcast %80 : bf16 to vector<64x128xbf16>
    %82 = arith.select %76, %39, %81 : vector<64x128xi1>, vector<64x128xbf16>
    %cst_27 = arith.constant dense<0.000000e+00> : vector<64x64xf32>
    %83 = tpu.matmul %79, %37, %cst_27 {dimension_numbers = #tpu.dot_dimension_numbers<[1], [1], [0], [0], [0, 0, 1, 0], [], []>} : vector<64x128xbf16>, vector<64x128xbf16>, vector<64x64xf32> -> vector<64x64xf32>
    %cst_28 = arith.constant -1.000000e+30 : f32
    %84 = vector.broadcast %cst_28 : f32 to vector<64x64xf32>
    %85 = arith.select %42, %83, %84 : vector<64x64xi1>, vector<64x64xf32>
    %cst_29 = arith.constant dense<0xFF800000> : vector<64xf32>
    %86 = vector.multi_reduction <maximumf>, %85, %cst_29 [1] : vector<64x64xf32> to vector<64xf32>
    %87 = vector.shape_cast %86 : vector<64xf32> to vector<64x1xf32>
    %88 = vector.broadcast %87 : vector<64x1xf32> to vector<64x64xf32>
    %89 = arith.subf %85, %88 : vector<64x64xf32>
    %90 = math.exp %89 : vector<64x64xf32>
    %cst_30 = arith.constant dense<0.000000e+00> : vector<64xf32>
    %91 = vector.multi_reduction <add>, %90, %cst_30 [1] : vector<64x64xf32> to vector<64xf32>
    %92 = vector.shape_cast %91 : vector<64xf32> to vector<64x1xf32>
    %93 = tpu.reciprocal %92 : vector<64x1xf32> -> vector<64x1xf32>
    %94 = vector.broadcast %93 : vector<64x1xf32> to vector<64x64xf32>
    %95 = arith.mulf %90, %94 : vector<64x64xf32>
    %96 = arith.truncf %95 : vector<64x64xf32> to vector<64x64xbf16>
    %cst_31 = arith.constant dense<0.000000e+00> : vector<64x128xf32>
    %97 = tpu.matmul %96, %82, %cst_31 {dimension_numbers = #tpu.dot_dimension_numbers<[1], [0], [0], [1], [0, 0, 1, 1], [], []>} : vector<64x64xbf16>, vector<64x128xbf16>, vector<64x128xf32> -> vector<64x128xf32>
    %98 = arith.addf %71, %97 : vector<64x128xf32>
    %c64_i32_32 = arith.constant 64 : i32
    %99 = vector.broadcast %c64_i32_32 : i32 to vector<64x128xi32>
    %100 = arith.cmpi sge, %43, %99 : vector<64x128xi32>
    %c96_i32 = arith.constant 96 : i32
    %101 = vector.broadcast %c96_i32 : i32 to vector<64x128xi32>
    %102 = arith.cmpi slt, %43, %101 : vector<64x128xi32>
    %103 = arith.andi %100, %102 : vector<64x128xi1>
    %cst_33 = arith.constant 0.000000e+00 : f32
    %104 = vector.broadcast %cst_33 : f32 to vector<64x128xf32>
    %105 = arith.select %103, %35, %104 : vector<64x128xi1>, vector<64x128xf32>
    %106 = arith.truncf %105 : vector<64x128xf32> to vector<64x128xbf16>
    %cst_34 = arith.constant 0.000000e+00 : f32
    %107 = arith.truncf %cst_34 : f32 to bf16
    %108 = vector.broadcast %107 : bf16 to vector<64x128xbf16>
    %109 = arith.select %103, %39, %108 : vector<64x128xi1>, vector<64x128xbf16>
    %cst_35 = arith.constant dense<0.000000e+00> : vector<64x64xf32>
    %110 = tpu.matmul %106, %37, %cst_35 {dimension_numbers = #tpu.dot_dimension_numbers<[1], [1], [0], [0], [0, 0, 1, 0], [], []>} : vector<64x128xbf16>, vector<64x128xbf16>, vector<64x64xf32> -> vector<64x64xf32>
    %cst_36 = arith.constant -1.000000e+30 : f32
    %111 = vector.broadcast %cst_36 : f32 to vector<64x64xf32>
    %112 = arith.select %42, %110, %111 : vector<64x64xi1>, vector<64x64xf32>
    %cst_37 = arith.constant dense<0xFF800000> : vector<64xf32>
    %113 = vector.multi_reduction <maximumf>, %112, %cst_37 [1] : vector<64x64xf32> to vector<64xf32>
    %114 = vector.shape_cast %113 : vector<64xf32> to vector<64x1xf32>
    %115 = vector.broadcast %114 : vector<64x1xf32> to vector<64x64xf32>
    %116 = arith.subf %112, %115 : vector<64x64xf32>
    %117 = math.exp %116 : vector<64x64xf32>
    %cst_38 = arith.constant dense<0.000000e+00> : vector<64xf32>
    %118 = vector.multi_reduction <add>, %117, %cst_38 [1] : vector<64x64xf32> to vector<64xf32>
    %119 = vector.shape_cast %118 : vector<64xf32> to vector<64x1xf32>
    %120 = tpu.reciprocal %119 : vector<64x1xf32> -> vector<64x1xf32>
    %121 = vector.broadcast %120 : vector<64x1xf32> to vector<64x64xf32>
    %122 = arith.mulf %117, %121 : vector<64x64xf32>
    %123 = arith.truncf %122 : vector<64x64xf32> to vector<64x64xbf16>
    %cst_39 = arith.constant dense<0.000000e+00> : vector<64x128xf32>
    %124 = tpu.matmul %123, %109, %cst_39 {dimension_numbers = #tpu.dot_dimension_numbers<[1], [0], [0], [1], [0, 0, 1, 1], [], []>} : vector<64x64xbf16>, vector<64x128xbf16>, vector<64x128xf32> -> vector<64x128xf32>
    %125 = arith.addf %98, %124 : vector<64x128xf32>
    %c96_i32_40 = arith.constant 96 : i32
    %126 = vector.broadcast %c96_i32_40 : i32 to vector<64x128xi32>
    %127 = arith.cmpi sge, %43, %126 : vector<64x128xi32>
    %c128_i32 = arith.constant 128 : i32
    %128 = vector.broadcast %c128_i32 : i32 to vector<64x128xi32>
    %129 = arith.cmpi slt, %43, %128 : vector<64x128xi32>
    %130 = arith.andi %127, %129 : vector<64x128xi1>
    %cst_41 = arith.constant 0.000000e+00 : f32
    %131 = vector.broadcast %cst_41 : f32 to vector<64x128xf32>
    %132 = arith.select %130, %35, %131 : vector<64x128xi1>, vector<64x128xf32>
    %133 = arith.truncf %132 : vector<64x128xf32> to vector<64x128xbf16>
    %cst_42 = arith.constant 0.000000e+00 : f32
    %134 = arith.truncf %cst_42 : f32 to bf16
    %135 = vector.broadcast %134 : bf16 to vector<64x128xbf16>
    %136 = arith.select %130, %39, %135 : vector<64x128xi1>, vector<64x128xbf16>
    %cst_43 = arith.constant dense<0.000000e+00> : vector<64x64xf32>
    %137 = tpu.matmul %133, %37, %cst_43 {dimension_numbers = #tpu.dot_dimension_numbers<[1], [1], [0], [0], [0, 0, 1, 0], [], []>} : vector<64x128xbf16>, vector<64x128xbf16>, vector<64x64xf32> -> vector<64x64xf32>
    %cst_44 = arith.constant -1.000000e+30 : f32
    %138 = vector.broadcast %cst_44 : f32 to vector<64x64xf32>
    %139 = arith.select %42, %137, %138 : vector<64x64xi1>, vector<64x64xf32>
    %cst_45 = arith.constant dense<0xFF800000> : vector<64xf32>
    %140 = vector.multi_reduction <maximumf>, %139, %cst_45 [1] : vector<64x64xf32> to vector<64xf32>
    %141 = vector.shape_cast %140 : vector<64xf32> to vector<64x1xf32>
    %142 = vector.broadcast %141 : vector<64x1xf32> to vector<64x64xf32>
    %143 = arith.subf %139, %142 : vector<64x64xf32>
    %144 = math.exp %143 : vector<64x64xf32>
    %cst_46 = arith.constant dense<0.000000e+00> : vector<64xf32>
    %145 = vector.multi_reduction <add>, %144, %cst_46 [1] : vector<64x64xf32> to vector<64xf32>
    %146 = vector.shape_cast %145 : vector<64xf32> to vector<64x1xf32>
    %147 = tpu.reciprocal %146 : vector<64x1xf32> -> vector<64x1xf32>
    %148 = vector.broadcast %147 : vector<64x1xf32> to vector<64x64xf32>
    %149 = arith.mulf %144, %148 : vector<64x64xf32>
    %150 = arith.truncf %149 : vector<64x64xf32> to vector<64x64xbf16>
    %cst_47 = arith.constant dense<0.000000e+00> : vector<64x128xf32>
    %151 = tpu.matmul %150, %136, %cst_47 {dimension_numbers = #tpu.dot_dimension_numbers<[1], [0], [0], [1], [0, 0, 1, 1], [], []>} : vector<64x64xbf16>, vector<64x128xbf16>, vector<64x128xf32> -> vector<64x128xf32>
    %152 = arith.addf %125, %151 : vector<64x128xf32>
    %153 = arith.truncf %152 : vector<64x128xf32> to vector<64x128xbf16>
    %c0_48 = arith.constant 0 : index
    %c0_49 = arith.constant 0 : index
    %154 = vector.load %arg6[%c0_48, %c0_49] : memref<128x128xbf16, #tpu.memory_space<vmem>>, vector<128x128xbf16>
    %cst_50 = arith.constant dense<0.000000e+00> : vector<64x128xf32>
    %155 = tpu.matmul %153, %154, %cst_50 {dimension_numbers = #tpu.dot_dimension_numbers<[1], [0], [0], [1], [0, 0, 1, 1], [], []>} : vector<64x128xbf16>, vector<128x128xbf16>, vector<64x128xf32> -> vector<64x128xf32>
    %c0_51 = arith.constant 0 : index
    %c0_52 = arith.constant 0 : index
    %156 = vector.load %arg7[%c0_51, %c0_52] : memref<1x128xf32, #tpu.memory_space<vmem>>, vector<1x128xf32>
    %157 = vector.broadcast %156 : vector<1x128xf32> to vector<64x128xf32>
    %158 = arith.addf %155, %157 : vector<64x128xf32>
    %159 = arith.addf %2, %158 : vector<64x128xf32>
    %c0_53 = arith.constant 0 : index
    %c0_54 = arith.constant 0 : index
    %160 = vector.load %arg8[%c0_53, %c0_54] : memref<1x128xf32, #tpu.memory_space<vmem>>, vector<1x128xf32>
    %c0_55 = arith.constant 0 : index
    %c0_56 = arith.constant 0 : index
    %161 = vector.load %arg9[%c0_55, %c0_56] : memref<1x128xf32, #tpu.memory_space<vmem>>, vector<1x128xf32>
    %cst_57 = arith.constant dense<0.000000e+00> : vector<64xf32>
    %162 = vector.multi_reduction <add>, %159, %cst_57 [1] : vector<64x128xf32> to vector<64xf32>
    %163 = vector.shape_cast %162 : vector<64xf32> to vector<64x1xf32>
    %cst_58 = arith.constant 1.280000e+02 : f32
    %164 = vector.broadcast %cst_58 : f32 to vector<64x1xf32>
    %165 = arith.divf %163, %164 : vector<64x1xf32>
    %166 = vector.broadcast %165 : vector<64x1xf32> to vector<64x128xf32>
    %167 = arith.subf %159, %166 : vector<64x128xf32>
    %168 = arith.mulf %167, %167 : vector<64x128xf32>
    %cst_59 = arith.constant dense<0.000000e+00> : vector<64xf32>
    %169 = vector.multi_reduction <add>, %168, %cst_59 [1] : vector<64x128xf32> to vector<64xf32>
    %170 = vector.shape_cast %169 : vector<64xf32> to vector<64x1xf32>
    %cst_60 = arith.constant 1.280000e+02 : f32
    %171 = vector.broadcast %cst_60 : f32 to vector<64x1xf32>
    %172 = arith.divf %170, %171 : vector<64x1xf32>
    %173 = vector.broadcast %165 : vector<64x1xf32> to vector<64x128xf32>
    %174 = arith.subf %159, %173 : vector<64x128xf32>
    %cst_61 = arith.constant 9.99999974E-6 : f32
    %175 = vector.broadcast %cst_61 : f32 to vector<64x1xf32>
    %176 = arith.addf %172, %175 : vector<64x1xf32>
    %177 = math.rsqrt %176 : vector<64x1xf32>
    %178 = vector.broadcast %177 : vector<64x1xf32> to vector<64x128xf32>
    %179 = arith.mulf %174, %178 : vector<64x128xf32>
    %180 = vector.broadcast %160 : vector<1x128xf32> to vector<64x128xf32>
    %181 = arith.mulf %179, %180 : vector<64x128xf32>
    %182 = vector.broadcast %161 : vector<1x128xf32> to vector<64x128xf32>
    %183 = arith.addf %181, %182 : vector<64x128xf32>
    %184 = arith.truncf %183 : vector<64x128xf32> to vector<64x128xbf16>
    %c0_62 = arith.constant 0 : index
    %c0_63 = arith.constant 0 : index
    %185 = vector.load %arg10[%c0_62, %c0_63] : memref<128x512xbf16, #tpu.memory_space<vmem>>, vector<128x512xbf16>
    %cst_64 = arith.constant dense<0.000000e+00> : vector<64x512xf32>
    %186 = tpu.matmul %184, %185, %cst_64 {dimension_numbers = #tpu.dot_dimension_numbers<[1], [0], [0], [1], [0, 0, 1, 1], [], []>} : vector<64x128xbf16>, vector<128x512xbf16>, vector<64x512xf32> -> vector<64x512xf32>
    %c0_65 = arith.constant 0 : index
    %c0_66 = arith.constant 0 : index
    %187 = vector.load %arg11[%c0_65, %c0_66] : memref<1x512xf32, #tpu.memory_space<vmem>>, vector<1x512xf32>
    %188 = vector.broadcast %187 : vector<1x512xf32> to vector<64x512xf32>
    %189 = arith.addf %186, %188 : vector<64x512xf32>
    %c0_67 = arith.constant 0 : index
    %c0_68 = arith.constant 0 : index
    %190 = vector.load %arg12[%c0_67, %c0_68] : memref<128x512xbf16, #tpu.memory_space<vmem>>, vector<128x512xbf16>
    %cst_69 = arith.constant dense<0.000000e+00> : vector<64x512xf32>
    %191 = tpu.matmul %184, %190, %cst_69 {dimension_numbers = #tpu.dot_dimension_numbers<[1], [0], [0], [1], [0, 0, 1, 1], [], []>} : vector<64x128xbf16>, vector<128x512xbf16>, vector<64x512xf32> -> vector<64x512xf32>
    %c0_70 = arith.constant 0 : index
    %c0_71 = arith.constant 0 : index
    %192 = vector.load %arg13[%c0_70, %c0_71] : memref<1x512xf32, #tpu.memory_space<vmem>>, vector<1x512xf32>
    %193 = vector.broadcast %192 : vector<1x512xf32> to vector<64x512xf32>
    %194 = arith.addf %191, %193 : vector<64x512xf32>
    %195 = arith.mulf %194, %194 : vector<64x512xf32>
    %196 = arith.mulf %194, %195 : vector<64x512xf32>
    %cst_72 = arith.constant 4.471500e-02 : f32
    %197 = vector.broadcast %cst_72 : f32 to vector<64x512xf32>
    %198 = arith.mulf %197, %196 : vector<64x512xf32>
    %199 = arith.addf %194, %198 : vector<64x512xf32>
    %cst_73 = arith.constant 0.797884583 : f32
    %200 = vector.broadcast %cst_73 : f32 to vector<64x512xf32>
    %201 = arith.mulf %200, %199 : vector<64x512xf32>
    %202 = math.tanh %201 : vector<64x512xf32>
    %cst_74 = arith.constant 1.000000e+00 : f32
    %203 = vector.broadcast %cst_74 : f32 to vector<64x512xf32>
    %204 = arith.addf %203, %202 : vector<64x512xf32>
    %cst_75 = arith.constant 5.000000e-01 : f32
    %205 = vector.broadcast %cst_75 : f32 to vector<64x512xf32>
    %206 = arith.mulf %205, %204 : vector<64x512xf32>
    %207 = arith.mulf %194, %206 : vector<64x512xf32>
    %208 = arith.mulf %189, %207 : vector<64x512xf32>
    %209 = arith.truncf %208 : vector<64x512xf32> to vector<64x512xbf16>
    %c0_76 = arith.constant 0 : index
    %c0_77 = arith.constant 0 : index
    %210 = vector.load %arg14[%c0_76, %c0_77] : memref<512x128xbf16, #tpu.memory_space<vmem>>, vector<512x128xbf16>
    %cst_78 = arith.constant dense<0.000000e+00> : vector<64x128xf32>
    %211 = tpu.matmul %209, %210, %cst_78 {dimension_numbers = #tpu.dot_dimension_numbers<[1], [0], [0], [1], [0, 0, 1, 1], [], []>} : vector<64x512xbf16>, vector<512x128xbf16>, vector<64x128xf32> -> vector<64x128xf32>
    %c0_79 = arith.constant 0 : index
    %c0_80 = arith.constant 0 : index
    %212 = vector.load %arg15[%c0_79, %c0_80] : memref<1x128xf32, #tpu.memory_space<vmem>>, vector<1x128xf32>
    %213 = vector.broadcast %212 : vector<1x128xf32> to vector<64x128xf32>
    %214 = arith.addf %211, %213 : vector<64x128xf32>
    %215 = arith.addf %159, %214 : vector<64x128xf32>
    %216 = arith.truncf %215 : vector<64x128xf32> to vector<64x128xbf16>
    %c0_81 = arith.constant 0 : index
    %c0_82 = arith.constant 0 : index
    %c0_83 = arith.constant 0 : index
    %217 = vector.load %arg16[%c0_81, %c0_82, %c0_83] : memref<1x64x128xbf16, #tpu.memory_space<vmem>>, vector<1x64x128xbf16>
    %218 = vector.shape_cast %217 : vector<1x64x128xbf16> to vector<64x128xbf16>
    %219 = vector.shape_cast %216 : vector<64x128xbf16> to vector<1x64x128xbf16>
    tpu.vector_store %arg16[%c0_81, %c0_82, %c0_83], %219 {strides = array<i32>} : memref<1x64x128xbf16, #tpu.memory_space<vmem>>, vector<1x64x128xbf16>,
    return
  }
  func.func @transform_0(%arg0: i32) -> (i32, i32, i32) {
    %c0_i32 = arith.constant 0 : i32
    %c0_i32_0 = arith.constant 0 : i32
    %c0_i32_1 = arith.constant 0 : i32
    return %arg0, %c0_i32, %c0_i32_0 : i32, i32, i32
  }
  func.func @transform_1(%arg0: i32) -> (i32, i32) {
    %c0_i32 = arith.constant 0 : i32
    %c0_i32_0 = arith.constant 0 : i32
    %c0_i32_1 = arith.constant 0 : i32
    return %c0_i32, %c0_i32_0 : i32, i32
  }
  func.func @transform_2(%arg0: i32) -> (i32, i32) {
    %c0_i32 = arith.constant 0 : i32
    %c0_i32_0 = arith.constant 0 : i32
    %c0_i32_1 = arith.constant 0 : i32
    return %c0_i32, %c0_i32_0 : i32, i32
  }
  func.func @transform_3(%arg0: i32) -> (i32, i32) {
    %c0_i32 = arith.constant 0 : i32
    %c0_i32_0 = arith.constant 0 : i32
    %c0_i32_1 = arith.constant 0 : i32
    return %c0_i32, %c0_i32_0 : i32, i32
  }
  func.func @transform_4(%arg0: i32) -> (i32, i32) {
    %c0_i32 = arith.constant 0 : i32
    %c0_i32_0 = arith.constant 0 : i32
    %c0_i32_1 = arith.constant 0 : i32
    return %c0_i32, %c0_i32_0 : i32, i32
  }
  func.func @transform_5(%arg0: i32) -> (i32, i32) {
    %c0_i32 = arith.constant 0 : i32
    %c0_i32_0 = arith.constant 0 : i32
    %c0_i32_1 = arith.constant 0 : i32
    return %c0_i32, %c0_i32_0 : i32, i32
  }
  func.func @transform_6(%arg0: i32) -> (i32, i32) {
    %c0_i32 = arith.constant 0 : i32
    %c0_i32_0 = arith.constant 0 : i32
    %c0_i32_1 = arith.constant 0 : i32
    return %c0_i32, %c0_i32_0 : i32, i32
  }
  func.func @transform_7(%arg0: i32) -> (i32, i32) {
    %c0_i32 = arith.constant 0 : i32
    %c0_i32_0 = arith.constant 0 : i32
    %c0_i32_1 = arith.constant 0 : i32
    return %c0_i32, %c0_i32_0 : i32, i32
  }
  func.func @transform_8(%arg0: i32) -> (i32, i32) {
    %c0_i32 = arith.constant 0 : i32
    %c0_i32_0 = arith.constant 0 : i32
    %c0_i32_1 = arith.constant 0 : i32
    return %c0_i32, %c0_i32_0 : i32, i32
  }
  func.func @transform_9(%arg0: i32) -> (i32, i32) {
    %c0_i32 = arith.constant 0 : i32
    %c0_i32_0 = arith.constant 0 : i32
    %c0_i32_1 = arith.constant 0 : i32
    return %c0_i32, %c0_i32_0 : i32, i32
  }
  func.func @transform_10(%arg0: i32) -> (i32, i32) {
    %c0_i32 = arith.constant 0 : i32
    %c0_i32_0 = arith.constant 0 : i32
    %c0_i32_1 = arith.constant 0 : i32
    return %c0_i32, %c0_i32_0 : i32, i32
  }
  func.func @transform_11(%arg0: i32) -> (i32, i32) {
    %c0_i32 = arith.constant 0 : i32
    %c0_i32_0 = arith.constant 0 : i32
    %c0_i32_1 = arith.constant 0 : i32
    return %c0_i32, %c0_i32_0 : i32, i32
  }
  func.func @transform_12(%arg0: i32) -> (i32, i32) {
    %c0_i32 = arith.constant 0 : i32
    %c0_i32_0 = arith.constant 0 : i32
    %c0_i32_1 = arith.constant 0 : i32
    return %c0_i32, %c0_i32_0 : i32, i32
  }
  func.func @transform_13(%arg0: i32) -> (i32, i32) {
    %c0_i32 = arith.constant 0 : i32
    %c0_i32_0 = arith.constant 0 : i32
    %c0_i32_1 = arith.constant 0 : i32
    return %c0_i32, %c0_i32_0 : i32, i32
  }
  func.func @transform_14(%arg0: i32) -> (i32, i32) {
    %c0_i32 = arith.constant 0 : i32
    %c0_i32_0 = arith.constant 0 : i32
    %c0_i32_1 = arith.constant 0 : i32
    return %c0_i32, %c0_i32_0 : i32, i32
  }
  func.func @transform_15(%arg0: i32) -> (i32, i32, i32) {
    %c0_i32 = arith.constant 0 : i32
    %c0_i32_0 = arith.constant 0 : i32
    %c0_i32_1 = arith.constant 0 : i32
    return %arg0, %c0_i32, %c0_i32_0 : i32, i32, i32
  }
}

module attributes {stable_mosaic.version = 11 : i64} {
  func.func @_coord_heads_kernel(%arg0: i32, %arg1: memref<48x128xbf16, #tpu.memory_space<vmem>>, %arg2: memref<48x128xf32, #tpu.memory_space<vmem>>, %arg3: memref<48x128xf32, #tpu.memory_space<vmem>>, %arg4: memref<1x128xf32, #tpu.memory_space<vmem>>, %arg5: memref<1x128xf32, #tpu.memory_space<vmem>>, %arg6: memref<128x128xbf16, #tpu.memory_space<vmem>>, %arg7: memref<1x128xf32, #tpu.memory_space<vmem>>, %arg8: memref<128x128xbf16, #tpu.memory_space<vmem>>, %arg9: memref<1x128xf32, #tpu.memory_space<vmem>>, %arg10: memref<128x256xbf16, #tpu.memory_space<vmem>>, %arg11: memref<1x256xf32, #tpu.memory_space<vmem>>, %arg12: memref<128x128xbf16, #tpu.memory_space<vmem>>, %arg13: memref<128x128xbf16, #tpu.memory_space<vmem>>, %arg14: memref<1x128xf32, #tpu.memory_space<vmem>>, %arg15: memref<128x128xbf16, #tpu.memory_space<vmem>>, %arg16: memref<1x128xf32, #tpu.memory_space<vmem>>, %arg17: memref<128x256xbf16, #tpu.memory_space<vmem>>, %arg18: memref<1x256xf32, #tpu.memory_space<vmem>>, %arg19: memref<128x128xbf16, #tpu.memory_space<vmem>>, %arg20: memref<128x128xbf16, #tpu.memory_space<vmem>>, %arg21: memref<128x128xbf16, #tpu.memory_space<vmem>>, %arg22: memref<1x128xf32, #tpu.memory_space<vmem>>, %arg23: memref<128x128xbf16, #tpu.memory_space<vmem>>, %arg24: memref<1x128xf32, #tpu.memory_space<vmem>>, %arg25: memref<128x256xbf16, #tpu.memory_space<vmem>>, %arg26: memref<1x256xf32, #tpu.memory_space<vmem>>, %arg27: memref<48x256xf32, #tpu.memory_space<vmem>>, %arg28: memref<48x256xf32, #tpu.memory_space<vmem>>, %arg29: memref<48x256xf32, #tpu.memory_space<vmem>>) attributes {dimension_semantics = [#tpu.dimension_semantics<parallel>], iteration_bounds = array<i64: 1>, scalar_prefetch = 0 : i64, scratch_operands = 0 : i64, tpu.core_type = #tpu.core_type<tc>, window_params = [{transform_indices = @transform_0, window_bounds = array<i64: 48, 128>}, {transform_indices = @transform_1, window_bounds = array<i64: 48, 128>}, {transform_indices = @transform_2, window_bounds = array<i64: 48, 128>}, {pipeline_mode = #tpu.pipeline_mode<synchronous>, transform_indices = @transform_3, window_bounds = array<i64: 1, 128>}, {pipeline_mode = #tpu.pipeline_mode<synchronous>, transform_indices = @transform_4, window_bounds = array<i64: 1, 128>}, {pipeline_mode = #tpu.pipeline_mode<synchronous>, transform_indices = @transform_5, window_bounds = array<i64: 128, 128>}, {pipeline_mode = #tpu.pipeline_mode<synchronous>, transform_indices = @transform_6, window_bounds = array<i64: 1, 128>}, {pipeline_mode = #tpu.pipeline_mode<synchronous>, transform_indices = @transform_7, window_bounds = array<i64: 128, 128>}, {pipeline_mode = #tpu.pipeline_mode<synchronous>, transform_indices = @transform_8, window_bounds = array<i64: 1, 128>}, {pipeline_mode = #tpu.pipeline_mode<synchronous>, transform_indices = @transform_9, window_bounds = array<i64: 128, 256>}, {pipeline_mode = #tpu.pipeline_mode<synchronous>, transform_indices = @transform_10, window_bounds = array<i64: 1, 256>}, {pipeline_mode = #tpu.pipeline_mode<synchronous>, transform_indices = @transform_11, window_bounds = array<i64: 128, 128>}, {pipeline_mode = #tpu.pipeline_mode<synchronous>, transform_indices = @transform_12, window_bounds = array<i64: 128, 128>}, {pipeline_mode = #tpu.pipeline_mode<synchronous>, transform_indices = @transform_13, window_bounds = array<i64: 1, 128>}, {pipeline_mode = #tpu.pipeline_mode<synchronous>, transform_indices = @transform_14, window_bounds = array<i64: 128, 128>}, {pipeline_mode = #tpu.pipeline_mode<synchronous>, transform_indices = @transform_15, window_bounds = array<i64: 1, 128>}, {pipeline_mode = #tpu.pipeline_mode<synchronous>, transform_indices = @transform_16, window_bounds = array<i64: 128, 256>}, {pipeline_mode = #tpu.pipeline_mode<synchronous>, transform_indices = @transform_17, window_bounds = array<i64: 1, 256>}, {pipeline_mode = #tpu.pipeline_mode<synchronous>, transform_indices = @transform_18, window_bounds = array<i64: 128, 128>}, {pipeline_mode = #tpu.pipeline_mode<synchronous>, transform_indices = @transform_19, window_bounds = array<i64: 128, 128>}, {pipeline_mode = #tpu.pipeline_mode<synchronous>, transform_indices = @transform_20, window_bounds = array<i64: 128, 128>}, {pipeline_mode = #tpu.pipeline_mode<synchronous>, transform_indices = @transform_21, window_bounds = array<i64: 1, 128>}, {pipeline_mode = #tpu.pipeline_mode<synchronous>, transform_indices = @transform_22, window_bounds = array<i64: 128, 128>}, {pipeline_mode = #tpu.pipeline_mode<synchronous>, transform_indices = @transform_23, window_bounds = array<i64: 1, 128>}, {pipeline_mode = #tpu.pipeline_mode<synchronous>, transform_indices = @transform_24, window_bounds = array<i64: 128, 256>}, {pipeline_mode = #tpu.pipeline_mode<synchronous>, transform_indices = @transform_25, window_bounds = array<i64: 1, 256>}, {transform_indices = @transform_26, window_bounds = array<i64: 48, 256>}, {transform_indices = @transform_27, window_bounds = array<i64: 48, 256>}, {transform_indices = @transform_28, window_bounds = array<i64: 48, 256>}]} {
    %c0 = arith.constant 0 : index
    %c0_0 = arith.constant 0 : index
    %0 = vector.load %arg1[%c0, %c0_0] : memref<48x128xbf16, #tpu.memory_space<vmem>>, vector<48x128xbf16>
    %1 = arith.extf %0 : vector<48x128xbf16> to vector<48x128xf32>
    %c0_1 = arith.constant 0 : index
    %c0_2 = arith.constant 0 : index
    %2 = vector.load %arg4[%c0_1, %c0_2] : memref<1x128xf32, #tpu.memory_space<vmem>>, vector<1x128xf32>
    %c0_3 = arith.constant 0 : index
    %c0_4 = arith.constant 0 : index
    %3 = vector.load %arg5[%c0_3, %c0_4] : memref<1x128xf32, #tpu.memory_space<vmem>>, vector<1x128xf32>
    %cst = arith.constant dense<0.000000e+00> : vector<48xf32>
    %4 = vector.multi_reduction <add>, %1, %cst [1] : vector<48x128xf32> to vector<48xf32>
    %5 = vector.shape_cast %4 : vector<48xf32> to vector<48x1xf32>
    %cst_5 = arith.constant 1.280000e+02 : f32
    %6 = vector.broadcast %cst_5 : f32 to vector<48x1xf32>
    %7 = arith.divf %5, %6 : vector<48x1xf32>
    %8 = vector.broadcast %7 : vector<48x1xf32> to vector<48x128xf32>
    %9 = arith.subf %1, %8 : vector<48x128xf32>
    %10 = arith.mulf %9, %9 : vector<48x128xf32>
    %cst_6 = arith.constant dense<0.000000e+00> : vector<48xf32>
    %11 = vector.multi_reduction <add>, %10, %cst_6 [1] : vector<48x128xf32> to vector<48xf32>
    %12 = vector.shape_cast %11 : vector<48xf32> to vector<48x1xf32>
    %cst_7 = arith.constant 1.280000e+02 : f32
    %13 = vector.broadcast %cst_7 : f32 to vector<48x1xf32>
    %14 = arith.divf %12, %13 : vector<48x1xf32>
    %15 = vector.broadcast %7 : vector<48x1xf32> to vector<48x128xf32>
    %16 = arith.subf %1, %15 : vector<48x128xf32>
    %cst_8 = arith.constant 9.99999974E-6 : f32
    %17 = vector.broadcast %cst_8 : f32 to vector<48x1xf32>
    %18 = arith.addf %14, %17 : vector<48x1xf32>
    %19 = math.rsqrt %18 : vector<48x1xf32>
    %20 = vector.broadcast %19 : vector<48x1xf32> to vector<48x128xf32>
    %21 = arith.mulf %16, %20 : vector<48x128xf32>
    %22 = vector.broadcast %2 : vector<1x128xf32> to vector<48x128xf32>
    %23 = arith.mulf %21, %22 : vector<48x128xf32>
    %24 = vector.broadcast %3 : vector<1x128xf32> to vector<48x128xf32>
    %25 = arith.addf %23, %24 : vector<48x128xf32>
    %26 = arith.truncf %25 : vector<48x128xf32> to vector<48x128xbf16>
    %c0_9 = arith.constant 0 : index
    %c0_10 = arith.constant 0 : index
    %27 = vector.load %arg2[%c0_9, %c0_10] : memref<48x128xf32, #tpu.memory_space<vmem>>, vector<48x128xf32>
    %28 = arith.truncf %27 : vector<48x128xf32> to vector<48x128xbf16>
    %c0_11 = arith.constant 0 : index
    %c0_12 = arith.constant 0 : index
    %29 = vector.load %arg3[%c0_11, %c0_12] : memref<48x128xf32, #tpu.memory_space<vmem>>, vector<48x128xf32>
    %30 = arith.truncf %29 : vector<48x128xf32> to vector<48x128xbf16>
    %c0_13 = arith.constant 0 : index
    %c0_14 = arith.constant 0 : index
    %31 = vector.load %arg6[%c0_13, %c0_14] : memref<128x128xbf16, #tpu.memory_space<vmem>>, vector<128x128xbf16>
    %cst_15 = arith.constant dense<0.000000e+00> : vector<48x128xf32>
    %32 = tpu.matmul %26, %31, %cst_15 {dimension_numbers = #tpu.dot_dimension_numbers<[1], [0], [0], [1], [0, 0, 1, 1], [], []>} : vector<48x128xbf16>, vector<128x128xbf16>, vector<48x128xf32> -> vector<48x128xf32>
    %c0_16 = arith.constant 0 : index
    %c0_17 = arith.constant 0 : index
    %33 = vector.load %arg7[%c0_16, %c0_17] : memref<1x128xf32, #tpu.memory_space<vmem>>, vector<1x128xf32>
    %34 = vector.broadcast %33 : vector<1x128xf32> to vector<48x128xf32>
    %35 = arith.addf %32, %34 : vector<48x128xf32>
    %c0_18 = arith.constant 0 : index
    %c0_19 = arith.constant 0 : index
    %36 = vector.load %arg8[%c0_18, %c0_19] : memref<128x128xbf16, #tpu.memory_space<vmem>>, vector<128x128xbf16>
    %c0_20 = arith.constant 0 : index
    %c0_21 = arith.constant 0 : index
    %37 = vector.load %arg9[%c0_20, %c0_21] : memref<1x128xf32, #tpu.memory_space<vmem>>, vector<1x128xf32>
    %c0_22 = arith.constant 0 : index
    %c0_23 = arith.constant 0 : index
    %38 = vector.load %arg10[%c0_22, %c0_23] : memref<128x256xbf16, #tpu.memory_space<vmem>>, vector<128x256xbf16>
    %c0_24 = arith.constant 0 : index
    %c0_25 = arith.constant 0 : index
    %39 = vector.load %arg11[%c0_24, %c0_25] : memref<1x256xf32, #tpu.memory_space<vmem>>, vector<1x256xf32>
    %cst_26 = arith.constant 0.000000e+00 : f32
    %40 = vector.broadcast %cst_26 : f32 to vector<48x128xf32>
    %41 = arith.maximumf %35, %40 : vector<48x128xf32>
    %42 = arith.truncf %41 : vector<48x128xf32> to vector<48x128xbf16>
    %cst_27 = arith.constant dense<0.000000e+00> : vector<48x128xf32>
    %43 = tpu.matmul %42, %36, %cst_27 {dimension_numbers = #tpu.dot_dimension_numbers<[1], [0], [0], [1], [0, 0, 1, 1], [], []>} : vector<48x128xbf16>, vector<128x128xbf16>, vector<48x128xf32> -> vector<48x128xf32>
    %44 = vector.broadcast %37 : vector<1x128xf32> to vector<48x128xf32>
    %45 = arith.addf %43, %44 : vector<48x128xf32>
    %cst_28 = arith.constant 0.000000e+00 : f32
    %46 = vector.broadcast %cst_28 : f32 to vector<48x128xf32>
    %47 = arith.maximumf %45, %46 : vector<48x128xf32>
    %48 = arith.truncf %47 : vector<48x128xf32> to vector<48x128xbf16>
    %cst_29 = arith.constant dense<0.000000e+00> : vector<48x256xf32>
    %49 = tpu.matmul %48, %38, %cst_29 {dimension_numbers = #tpu.dot_dimension_numbers<[1], [0], [0], [1], [0, 0, 1, 1], [], []>} : vector<48x128xbf16>, vector<128x256xbf16>, vector<48x256xf32> -> vector<48x256xf32>
    %50 = vector.broadcast %39 : vector<1x256xf32> to vector<48x256xf32>
    %51 = arith.addf %49, %50 : vector<48x256xf32>
    %c0_30 = arith.constant 0 : index
    %c0_31 = arith.constant 0 : index
    %52 = vector.load %arg27[%c0_30, %c0_31] : memref<48x256xf32, #tpu.memory_space<vmem>>, vector<48x256xf32>
    tpu.vector_store %arg27[%c0_30, %c0_31], %51 {strides = array<i32>} : memref<48x256xf32, #tpu.memory_space<vmem>>, vector<48x256xf32>,
    %c0_32 = arith.constant 0 : index
    %c0_33 = arith.constant 0 : index
    %53 = vector.load %arg12[%c0_32, %c0_33] : memref<128x128xbf16, #tpu.memory_space<vmem>>, vector<128x128xbf16>
    %cst_34 = arith.constant dense<0.000000e+00> : vector<48x128xf32>
    %54 = tpu.matmul %26, %53, %cst_34 {dimension_numbers = #tpu.dot_dimension_numbers<[1], [0], [0], [1], [0, 0, 1, 1], [], []>} : vector<48x128xbf16>, vector<128x128xbf16>, vector<48x128xf32> -> vector<48x128xf32>
    %c0_35 = arith.constant 0 : index
    %c0_36 = arith.constant 0 : index
    %55 = vector.load %arg13[%c0_35, %c0_36] : memref<128x128xbf16, #tpu.memory_space<vmem>>, vector<128x128xbf16>
    %cst_37 = arith.constant dense<0.000000e+00> : vector<48x128xf32>
    %56 = tpu.matmul %28, %55, %cst_37 {dimension_numbers = #tpu.dot_dimension_numbers<[1], [0], [0], [1], [0, 0, 1, 1], [], []>} : vector<48x128xbf16>, vector<128x128xbf16>, vector<48x128xf32> -> vector<48x128xf32>
    %57 = arith.addf %54, %56 : vector<48x128xf32>
    %c0_38 = arith.constant 0 : index
    %c0_39 = arith.constant 0 : index
    %58 = vector.load %arg14[%c0_38, %c0_39] : memref<1x128xf32, #tpu.memory_space<vmem>>, vector<1x128xf32>
    %59 = vector.broadcast %58 : vector<1x128xf32> to vector<48x128xf32>
    %60 = arith.addf %57, %59 : vector<48x128xf32>
    %c0_40 = arith.constant 0 : index
    %c0_41 = arith.constant 0 : index
    %61 = vector.load %arg15[%c0_40, %c0_41] : memref<128x128xbf16, #tpu.memory_space<vmem>>, vector<128x128xbf16>
    %c0_42 = arith.constant 0 : index
    %c0_43 = arith.constant 0 : index
    %62 = vector.load %arg16[%c0_42, %c0_43] : memref<1x128xf32, #tpu.memory_space<vmem>>, vector<1x128xf32>
    %c0_44 = arith.constant 0 : index
    %c0_45 = arith.constant 0 : index
    %63 = vector.load %arg17[%c0_44, %c0_45] : memref<128x256xbf16, #tpu.memory_space<vmem>>, vector<128x256xbf16>
    %c0_46 = arith.constant 0 : index
    %c0_47 = arith.constant 0 : index
    %64 = vector.load %arg18[%c0_46, %c0_47] : memref<1x256xf32, #tpu.memory_space<vmem>>, vector<1x256xf32>
    %cst_48 = arith.constant 0.000000e+00 : f32
    %65 = vector.broadcast %cst_48 : f32 to vector<48x128xf32>
    %66 = arith.maximumf %60, %65 : vector<48x128xf32>
    %67 = arith.truncf %66 : vector<48x128xf32> to vector<48x128xbf16>
    %cst_49 = arith.constant dense<0.000000e+00> : vector<48x128xf32>
    %68 = tpu.matmul %67, %61, %cst_49 {dimension_numbers = #tpu.dot_dimension_numbers<[1], [0], [0], [1], [0, 0, 1, 1], [], []>} : vector<48x128xbf16>, vector<128x128xbf16>, vector<48x128xf32> -> vector<48x128xf32>
    %69 = vector.broadcast %62 : vector<1x128xf32> to vector<48x128xf32>
    %70 = arith.addf %68, %69 : vector<48x128xf32>
    %cst_50 = arith.constant 0.000000e+00 : f32
    %71 = vector.broadcast %cst_50 : f32 to vector<48x128xf32>
    %72 = arith.maximumf %70, %71 : vector<48x128xf32>
    %73 = arith.truncf %72 : vector<48x128xf32> to vector<48x128xbf16>
    %cst_51 = arith.constant dense<0.000000e+00> : vector<48x256xf32>
    %74 = tpu.matmul %73, %63, %cst_51 {dimension_numbers = #tpu.dot_dimension_numbers<[1], [0], [0], [1], [0, 0, 1, 1], [], []>} : vector<48x128xbf16>, vector<128x256xbf16>, vector<48x256xf32> -> vector<48x256xf32>
    %75 = vector.broadcast %64 : vector<1x256xf32> to vector<48x256xf32>
    %76 = arith.addf %74, %75 : vector<48x256xf32>
    %c0_52 = arith.constant 0 : index
    %c0_53 = arith.constant 0 : index
    %77 = vector.load %arg28[%c0_52, %c0_53] : memref<48x256xf32, #tpu.memory_space<vmem>>, vector<48x256xf32>
    tpu.vector_store %arg28[%c0_52, %c0_53], %76 {strides = array<i32>} : memref<48x256xf32, #tpu.memory_space<vmem>>, vector<48x256xf32>,
    %c0_54 = arith.constant 0 : index
    %c0_55 = arith.constant 0 : index
    %78 = vector.load %arg19[%c0_54, %c0_55] : memref<128x128xbf16, #tpu.memory_space<vmem>>, vector<128x128xbf16>
    %cst_56 = arith.constant dense<0.000000e+00> : vector<48x128xf32>
    %79 = tpu.matmul %26, %78, %cst_56 {dimension_numbers = #tpu.dot_dimension_numbers<[1], [0], [0], [1], [0, 0, 1, 1], [], []>} : vector<48x128xbf16>, vector<128x128xbf16>, vector<48x128xf32> -> vector<48x128xf32>
    %c0_57 = arith.constant 0 : index
    %c0_58 = arith.constant 0 : index
    %80 = vector.load %arg20[%c0_57, %c0_58] : memref<128x128xbf16, #tpu.memory_space<vmem>>, vector<128x128xbf16>
    %cst_59 = arith.constant dense<0.000000e+00> : vector<48x128xf32>
    %81 = tpu.matmul %28, %80, %cst_59 {dimension_numbers = #tpu.dot_dimension_numbers<[1], [0], [0], [1], [0, 0, 1, 1], [], []>} : vector<48x128xbf16>, vector<128x128xbf16>, vector<48x128xf32> -> vector<48x128xf32>
    %82 = arith.addf %79, %81 : vector<48x128xf32>
    %c0_60 = arith.constant 0 : index
    %c0_61 = arith.constant 0 : index
    %83 = vector.load %arg21[%c0_60, %c0_61] : memref<128x128xbf16, #tpu.memory_space<vmem>>, vector<128x128xbf16>
    %cst_62 = arith.constant dense<0.000000e+00> : vector<48x128xf32>
    %84 = tpu.matmul %30, %83, %cst_62 {dimension_numbers = #tpu.dot_dimension_numbers<[1], [0], [0], [1], [0, 0, 1, 1], [], []>} : vector<48x128xbf16>, vector<128x128xbf16>, vector<48x128xf32> -> vector<48x128xf32>
    %85 = arith.addf %82, %84 : vector<48x128xf32>
    %c0_63 = arith.constant 0 : index
    %c0_64 = arith.constant 0 : index
    %86 = vector.load %arg22[%c0_63, %c0_64] : memref<1x128xf32, #tpu.memory_space<vmem>>, vector<1x128xf32>
    %87 = vector.broadcast %86 : vector<1x128xf32> to vector<48x128xf32>
    %88 = arith.addf %85, %87 : vector<48x128xf32>
    %c0_65 = arith.constant 0 : index
    %c0_66 = arith.constant 0 : index
    %89 = vector.load %arg23[%c0_65, %c0_66] : memref<128x128xbf16, #tpu.memory_space<vmem>>, vector<128x128xbf16>
    %c0_67 = arith.constant 0 : index
    %c0_68 = arith.constant 0 : index
    %90 = vector.load %arg24[%c0_67, %c0_68] : memref<1x128xf32, #tpu.memory_space<vmem>>, vector<1x128xf32>
    %c0_69 = arith.constant 0 : index
    %c0_70 = arith.constant 0 : index
    %91 = vector.load %arg25[%c0_69, %c0_70] : memref<128x256xbf16, #tpu.memory_space<vmem>>, vector<128x256xbf16>
    %c0_71 = arith.constant 0 : index
    %c0_72 = arith.constant 0 : index
    %92 = vector.load %arg26[%c0_71, %c0_72] : memref<1x256xf32, #tpu.memory_space<vmem>>, vector<1x256xf32>
    %cst_73 = arith.constant 0.000000e+00 : f32
    %93 = vector.broadcast %cst_73 : f32 to vector<48x128xf32>
    %94 = arith.maximumf %88, %93 : vector<48x128xf32>
    %95 = arith.truncf %94 : vector<48x128xf32> to vector<48x128xbf16>
    %cst_74 = arith.constant dense<0.000000e+00> : vector<48x128xf32>
    %96 = tpu.matmul %95, %89, %cst_74 {dimension_numbers = #tpu.dot_dimension_numbers<[1], [0], [0], [1], [0, 0, 1, 1], [], []>} : vector<48x128xbf16>, vector<128x128xbf16>, vector<48x128xf32> -> vector<48x128xf32>
    %97 = vector.broadcast %90 : vector<1x128xf32> to vector<48x128xf32>
    %98 = arith.addf %96, %97 : vector<48x128xf32>
    %cst_75 = arith.constant 0.000000e+00 : f32
    %99 = vector.broadcast %cst_75 : f32 to vector<48x128xf32>
    %100 = arith.maximumf %98, %99 : vector<48x128xf32>
    %101 = arith.truncf %100 : vector<48x128xf32> to vector<48x128xbf16>
    %cst_76 = arith.constant dense<0.000000e+00> : vector<48x256xf32>
    %102 = tpu.matmul %101, %91, %cst_76 {dimension_numbers = #tpu.dot_dimension_numbers<[1], [0], [0], [1], [0, 0, 1, 1], [], []>} : vector<48x128xbf16>, vector<128x256xbf16>, vector<48x256xf32> -> vector<48x256xf32>
    %103 = vector.broadcast %92 : vector<1x256xf32> to vector<48x256xf32>
    %104 = arith.addf %102, %103 : vector<48x256xf32>
    %c0_77 = arith.constant 0 : index
    %c0_78 = arith.constant 0 : index
    %105 = vector.load %arg29[%c0_77, %c0_78] : memref<48x256xf32, #tpu.memory_space<vmem>>, vector<48x256xf32>
    tpu.vector_store %arg29[%c0_77, %c0_78], %104 {strides = array<i32>} : memref<48x256xf32, #tpu.memory_space<vmem>>, vector<48x256xf32>,
    return
  }
  func.func @transform_0(%arg0: i32) -> (i32, i32) {
    %c0_i32 = arith.constant 0 : i32
    %c0_i32_0 = arith.constant 0 : i32
    return %arg0, %c0_i32 : i32, i32
  }
  func.func @transform_1(%arg0: i32) -> (i32, i32) {
    %c0_i32 = arith.constant 0 : i32
    %c0_i32_0 = arith.constant 0 : i32
    return %arg0, %c0_i32 : i32, i32
  }
  func.func @transform_2(%arg0: i32) -> (i32, i32) {
    %c0_i32 = arith.constant 0 : i32
    %c0_i32_0 = arith.constant 0 : i32
    return %arg0, %c0_i32 : i32, i32
  }
  func.func @transform_3(%arg0: i32) -> (i32, i32) {
    %c0_i32 = arith.constant 0 : i32
    %c0_i32_0 = arith.constant 0 : i32
    %c0_i32_1 = arith.constant 0 : i32
    return %c0_i32, %c0_i32_0 : i32, i32
  }
  func.func @transform_4(%arg0: i32) -> (i32, i32) {
    %c0_i32 = arith.constant 0 : i32
    %c0_i32_0 = arith.constant 0 : i32
    %c0_i32_1 = arith.constant 0 : i32
    return %c0_i32, %c0_i32_0 : i32, i32
  }
  func.func @transform_5(%arg0: i32) -> (i32, i32) {
    %c0_i32 = arith.constant 0 : i32
    %c0_i32_0 = arith.constant 0 : i32
    %c0_i32_1 = arith.constant 0 : i32
    return %c0_i32, %c0_i32_0 : i32, i32
  }
  func.func @transform_6(%arg0: i32) -> (i32, i32) {
    %c0_i32 = arith.constant 0 : i32
    %c0_i32_0 = arith.constant 0 : i32
    %c0_i32_1 = arith.constant 0 : i32
    return %c0_i32, %c0_i32_0 : i32, i32
  }
  func.func @transform_7(%arg0: i32) -> (i32, i32) {
    %c0_i32 = arith.constant 0 : i32
    %c0_i32_0 = arith.constant 0 : i32
    %c0_i32_1 = arith.constant 0 : i32
    return %c0_i32, %c0_i32_0 : i32, i32
  }
  func.func @transform_8(%arg0: i32) -> (i32, i32) {
    %c0_i32 = arith.constant 0 : i32
    %c0_i32_0 = arith.constant 0 : i32
    %c0_i32_1 = arith.constant 0 : i32
    return %c0_i32, %c0_i32_0 : i32, i32
  }
  func.func @transform_9(%arg0: i32) -> (i32, i32) {
    %c0_i32 = arith.constant 0 : i32
    %c0_i32_0 = arith.constant 0 : i32
    %c0_i32_1 = arith.constant 0 : i32
    return %c0_i32, %c0_i32_0 : i32, i32
  }
  func.func @transform_10(%arg0: i32) -> (i32, i32) {
    %c0_i32 = arith.constant 0 : i32
    %c0_i32_0 = arith.constant 0 : i32
    %c0_i32_1 = arith.constant 0 : i32
    return %c0_i32, %c0_i32_0 : i32, i32
  }
  func.func @transform_11(%arg0: i32) -> (i32, i32) {
    %c0_i32 = arith.constant 0 : i32
    %c0_i32_0 = arith.constant 0 : i32
    %c0_i32_1 = arith.constant 0 : i32
    return %c0_i32, %c0_i32_0 : i32, i32
  }
  func.func @transform_12(%arg0: i32) -> (i32, i32) {
    %c0_i32 = arith.constant 0 : i32
    %c0_i32_0 = arith.constant 0 : i32
    %c0_i32_1 = arith.constant 0 : i32
    return %c0_i32, %c0_i32_0 : i32, i32
  }
  func.func @transform_13(%arg0: i32) -> (i32, i32) {
    %c0_i32 = arith.constant 0 : i32
    %c0_i32_0 = arith.constant 0 : i32
    %c0_i32_1 = arith.constant 0 : i32
    return %c0_i32, %c0_i32_0 : i32, i32
  }
  func.func @transform_14(%arg0: i32) -> (i32, i32) {
    %c0_i32 = arith.constant 0 : i32
    %c0_i32_0 = arith.constant 0 : i32
    %c0_i32_1 = arith.constant 0 : i32
    return %c0_i32, %c0_i32_0 : i32, i32
  }
  func.func @transform_15(%arg0: i32) -> (i32, i32) {
    %c0_i32 = arith.constant 0 : i32
    %c0_i32_0 = arith.constant 0 : i32
    %c0_i32_1 = arith.constant 0 : i32
    return %c0_i32, %c0_i32_0 : i32, i32
  }
  func.func @transform_16(%arg0: i32) -> (i32, i32) {
    %c0_i32 = arith.constant 0 : i32
    %c0_i32_0 = arith.constant 0 : i32
    %c0_i32_1 = arith.constant 0 : i32
    return %c0_i32, %c0_i32_0 : i32, i32
  }
  func.func @transform_17(%arg0: i32) -> (i32, i32) {
    %c0_i32 = arith.constant 0 : i32
    %c0_i32_0 = arith.constant 0 : i32
    %c0_i32_1 = arith.constant 0 : i32
    return %c0_i32, %c0_i32_0 : i32, i32
  }
  func.func @transform_18(%arg0: i32) -> (i32, i32) {
    %c0_i32 = arith.constant 0 : i32
    %c0_i32_0 = arith.constant 0 : i32
    %c0_i32_1 = arith.constant 0 : i32
    return %c0_i32, %c0_i32_0 : i32, i32
  }
  func.func @transform_19(%arg0: i32) -> (i32, i32) {
    %c0_i32 = arith.constant 0 : i32
    %c0_i32_0 = arith.constant 0 : i32
    %c0_i32_1 = arith.constant 0 : i32
    return %c0_i32, %c0_i32_0 : i32, i32
  }
  func.func @transform_20(%arg0: i32) -> (i32, i32) {
    %c0_i32 = arith.constant 0 : i32
    %c0_i32_0 = arith.constant 0 : i32
    %c0_i32_1 = arith.constant 0 : i32
    return %c0_i32, %c0_i32_0 : i32, i32
  }
  func.func @transform_21(%arg0: i32) -> (i32, i32) {
    %c0_i32 = arith.constant 0 : i32
    %c0_i32_0 = arith.constant 0 : i32
    %c0_i32_1 = arith.constant 0 : i32
    return %c0_i32, %c0_i32_0 : i32, i32
  }
  func.func @transform_22(%arg0: i32) -> (i32, i32) {
    %c0_i32 = arith.constant 0 : i32
    %c0_i32_0 = arith.constant 0 : i32
    %c0_i32_1 = arith.constant 0 : i32
    return %c0_i32, %c0_i32_0 : i32, i32
  }
  func.func @transform_23(%arg0: i32) -> (i32, i32) {
    %c0_i32 = arith.constant 0 : i32
    %c0_i32_0 = arith.constant 0 : i32
    %c0_i32_1 = arith.constant 0 : i32
    return %c0_i32, %c0_i32_0 : i32, i32
  }
  func.func @transform_24(%arg0: i32) -> (i32, i32) {
    %c0_i32 = arith.constant 0 : i32
    %c0_i32_0 = arith.constant 0 : i32
    %c0_i32_1 = arith.constant 0 : i32
    return %c0_i32, %c0_i32_0 : i32, i32
  }
  func.func @transform_25(%arg0: i32) -> (i32, i32) {
    %c0_i32 = arith.constant 0 : i32
    %c0_i32_0 = arith.constant 0 : i32
    %c0_i32_1 = arith.constant 0 : i32
    return %c0_i32, %c0_i32_0 : i32, i32
  }
  func.func @transform_26(%arg0: i32) -> (i32, i32) {
    %c0_i32 = arith.constant 0 : i32
    %c0_i32_0 = arith.constant 0 : i32
    return %arg0, %c0_i32 : i32, i32
  }
  func.func @transform_27(%arg0: i32) -> (i32, i32) {
    %c0_i32 = arith.constant 0 : i32
    %c0_i32_0 = arith.constant 0 : i32
    return %arg0, %c0_i32 : i32, i32
  }
  func.func @transform_28(%arg0: i32) -> (i32, i32) {
    %c0_i32 = arith.constant 0 : i32
    %c0_i32_0 = arith.constant 0 : i32
    return %arg0, %c0_i32 : i32, i32
  }
}

</mosaic_0001>

<bundles_post_ra>
// kernel: treemeshgpt_forward.7
= control target key start
LH: loop header
LB: loop body
LE: loop exit
PB: predicated region body
PF: predicated region fallthrough
CT: control target
= control target key end

     0   :  { %v605_v1 = vmov 0   ;;  %vm163_vm0 = vcmask 523264   ;;  %v63_v47 = vlaneseq  ;;  %s1105_s1 = inlined_call_operand.vmem [shape: bf16[64,512], index: 1, kind: input, shape index: {}]   ;;  %s1106_s0 = inlined_call_operand.vmem [shape: f32[160,64], index: 0, kind: input, shape index: {}]   ;;  %s1107_s2 = inlined_call_operand.vmem [shape: f32[1,512], index: 2, kind: input, shape index: {}]   ;;  %s1108_s3 = inlined_call_operand.vmem [shape: f32[160,512], index: 3, kind: output, shape index: {}]  }
   0x1   :  { %v581_v0 = vld [vmem:[%s1105_s1 + $0x4] ss:$16 sps:$4 sm:$0xff]   ;;  %226 = vmatprep.mubr.bf16.mxu0 %v605_v1  ;;  %359 = vmatprep.mubr.bf16.mxu1 %v605_v1  ;;  %v583_v2 = vld [vmem:[%s1105_s1 + $0xc] ss:$16 sps:$4 sm:$0xff]   ;;  %v585_v3 = vld [vmem:[%s1105_s1] ss:$16 sps:$4 sm:$0xff]  }
   0x2   :  { %194 = vmatprep.subr.bf16.mxu0 %v581_v0  ;;  %v586_v4 = vld [vmem:[%s1105_s1 + $0x8] ss:$16 sps:$4 sm:$0xff]   ;;  %327 = vmatprep.subr.bf16.mxu1 %v583_v2  ;;  %v587_v5 = vld [vmem:[%s1105_s1 + $0x24] ss:$16 sps:$4 sm:$0xff]   ;;  %v589_v6 = vld [vmem:[%s1105_s1 + $0x2c] ss:$16 sps:$4 sm:$0xff]  }
   0x3   :  { %195 = vmatpush1.bf16.msra.mxu0 %v585_v3  ;;  %328 = vmatpush1.bf16.msra.mxu1 %v586_v4  ;;  %v591_v7 = vld [vmem:[%s1105_s1 + $0x20] ss:$16 sps:$4 sm:$0xff]   ;;  %v592_v8 = vld [vmem:[%s1105_s1 + $0x28] ss:$16 sps:$4 sm:$0xff]   ;;  %v593_v9 = vld [vmem:[%s1105_s1 + $0x44] ss:$16 sps:$4 sm:$0xff]  }
   0x4   :  { %196 = vmatprep.subr.bf16.mxu0 %v587_v5  ;;  %329 = vmatprep.subr.bf16.mxu1 %v589_v6  ;;  %v595_v10 = vld [vmem:[%s1105_s1 + $0x4c] ss:$16 sps:$4 sm:$0xff]   ;;  %v597_v11 = vld [vmem:[%s1105_s1 + $0x40] ss:$16 sps:$4 sm:$0xff]   ;;  %v598_v12 = vld [vmem:[%s1105_s1 + $0x48] ss:$16 sps:$4 sm:$0xff]  }
   0x5   :  { %v599_v13 = vld [vmem:[%s1105_s1 + $0x64] ss:$16 sps:$4 sm:$0xff]   ;;  %v601_v14 = vld [vmem:[%s1105_s1 + $0x6c] ss:$16 sps:$4 sm:$0xff]   ;;  %v603_v15 = vld [vmem:[%s1105_s1 + $0x60] ss:$16 sps:$4 sm:$0xff]  }
   0x6   :  { %v604_v16 = vld [vmem:[%s1105_s1 + $0x68] ss:$16 sps:$4 sm:$0xff]   ;;  %v15_v17 = vld [vmem:[%s1106_s0] sm:$0xff]  ;;  %v17_v20 = vld [vmem:[%s1106_s0 + $0x10] sm:$0xff]  ;;  %v64_v48 = vshrl.u32 %v63_v47, 7 }
   0x7   :  { %197 = vmatpush1.bf16.msra.mxu0 %v591_v7  ;;  %330 = vmatpush1.bf16.msra.mxu1 %v592_v8  ;;  %v16_v18 = vld [vmem:[%s1106_s0 + $0x8] sm:$0xff]  ;;  %v18_v21 = vld [vmem:[%s1106_s0 + $0x18] sm:$0xff]  ;;  %v19_v23 = vld [vmem:[%s1106_s0 + $0x20] sm:$0xff] }
   0x8   :  { %198 = vmatprep.subr.bf16.mxu0 %v593_v9  ;;  %331 = vmatprep.subr.bf16.mxu1 %v595_v10  ;;  %v35_v19 = vpack.c.bf16 %v16_v18, %v15_v17  ;;  %v36_v22 = vpack.c.bf16 %v18_v21, %v17_v20  ;;  %v20_v24 = vld [vmem:[%s1106_s0 + $0x28] sm:$0xff]  ;;  %v21_v26 = vld [vmem:[%s1106_s0 + $0x30] sm:$0xff]  ;;  %v22_v27 = vld [vmem:[%s1106_s0 + $0x38] sm:$0xff]  ;;  %v65_v49 = vsub.s32 0, %v64_v48  ;;  %v73_v50 = vsub.s32 2, %v64_v48 }
   0x9   :  { %v37_v25 = vpack.c.bf16 %v20_v24, %v19_v23  ;;  %v38_v28 = vpack.c.bf16 %v22_v27, %v21_v26  ;;  %v23_v29 = vld [vmem:[%s1106_s0 + $0x40] sm:$0xff]  ;;  %v24_v30 = vld [vmem:[%s1106_s0 + $0x48] sm:$0xff]  ;;  %v25_v32 = vld [vmem:[%s1106_s0 + $0x50] sm:$0xff]  ;;  %v69_v52 = vsub.s32 1, %v64_v48  ;;  %v77_v53 = vsub.s32 3, %v64_v48 }
   0xa   :  { %v39_v31 = vpack.c.bf16 %v24_v30, %v23_v29  ;;  %v26_v33 = vld [vmem:[%s1106_s0 + $0x58] sm:$0xff]  ;;  %v27_v35 = vld [vmem:[%s1106_s0 + $0x60] sm:$0xff]  ;;  %v28_v36 = vld [vmem:[%s1106_s0 + $0x68] sm:$0xff] }
   0xb   :  { %199 = vmatpush1.bf16.msra.mxu0 %v597_v11  ;;  %332 = vmatpush1.bf16.msra.mxu1 %v598_v12  ;;  %v40_v34 = vpack.c.bf16 %v26_v33, %v25_v32  ;;  %v41_v37 = vpack.c.bf16 %v28_v36, %v27_v35  ;;  %v29_v38 = vld [vmem:[%s1106_s0 + $0x70] sm:$0xff]  ;;  %v30_v39 = vld [vmem:[%s1106_s0 + $0x78] sm:$0xff]  ;;  %v31_v41 = vld [vmem:[%s1106_s0 + $0x80] sm:$0xff] }
   0xc   :  { %200 = vmatprep.subr.bf16.mxu0 %v599_v13  ;;  %333 = vmatprep.subr.bf16.mxu1 %v601_v14  ;;  %v42_v40 = vpack.c.bf16 %v30_v39, %v29_v38  ;;  %v32_v42 = vld [vmem:[%s1106_s0 + $0x88] sm:$0xff]  ;;  %v33_v44 = vld [vmem:[%s1106_s0 + $0x90] sm:$0xff]  ;;  %v34_v45 = vld [vmem:[%s1106_s0 + $0x98] sm:$0xff] }
   0xd   :  { %v43_v43 = vpack.c.bf16 %v32_v42, %v31_v41  ;;  %v44_v46 = vpack.c.bf16 %v34_v45, %v33_v44  ;;  %v61_v51 = vld [vmem:[%s1107_s2] sm:$0xf] }
   0xe   :  { %v777_v54 = vrot.slane %v61_v51, %v65_v49  ;;  %v779_v55 = vrot.slane %v61_v51, %v73_v50  ;;  %v781_v56 = vrot.slane %v61_v51, %v69_v52  ;;  %v783_v57 = vrot.slane %v61_v51, %v77_v53 }
   0xf   :  { %201 = vmatpush1.bf16.msra.mxu0 %v603_v15  ;;  %334 = vmatpush1.bf16.msra.mxu1 %v604_v16 }
  0x12   :  { %560 = vmatmul.mubr.msk.bf16.vlgmr.msra.gmra.mrb[0].mxu0 %vm163_vm0, %v35_v19  ;;  %570 = vmatmul.mubr.msk.bf16.vlgmr.msra.gmra.mrb[0].mxu1 %vm163_vm0, %v35_v19 }
  0x13   :  { %236 = vmatprep.mubr.bf16.mxu0 %v605_v1  ;;  %369 = vmatprep.mubr.bf16.mxu1 %v605_v1 }
  0x1a   :  { %561 = vmatmul.mubr.msk.bf16.gmra.mrb[4].mxu0 %vm163_vm0, %v36_v22  ;;  %571 = vmatmul.mubr.msk.bf16.gmra.mrb[4].mxu1 %vm163_vm0, %v36_v22 }
  0x1b   :  { %246 = vmatprep.mubr.bf16.mxu0 %v605_v1  ;;  %379 = vmatprep.mubr.bf16.mxu1 %v605_v1 }
  0x22   :  { %562 = vmatmul.mubr.msk.bf16.gmra.mrb[8].mxu0 %vm163_vm0, %v37_v25  ;;  %572 = vmatmul.mubr.msk.bf16.gmra.mrb[8].mxu1 %vm163_vm0, %v37_v25 }
  0x23   :  { %256 = vmatprep.mubr.bf16.mxu0 %v605_v1  ;;  %389 = vmatprep.mubr.bf16.mxu1 %v605_v1 }
  0x2a   :  { %563 = vmatmul.mubr.msk.bf16.gmra.mrb[12].mxu0 %vm163_vm0, %v38_v28  ;;  %573 = vmatmul.mubr.msk.bf16.gmra.mrb[12].mxu1 %vm163_vm0, %v38_v28 }
  0x2b   :  { %266 = vmatprep.mubr.bf16.mxu0 %v605_v1  ;;  %399 = vmatprep.mubr.bf16.mxu1 %v605_v1 }
  0x32   :  { %564 = vmatmul.mubr.msk.bf16.gmra.mrb[16].mxu0 %vm163_vm0, %v39_v31  ;;  %574 = vmatmul.mubr.msk.bf16.gmra.mrb[16].mxu1 %vm163_vm0, %v39_v31 }
  0x33   :  { %276 = vmatprep.mubr.bf16.mxu0 %v605_v1  ;;  %409 = vmatprep.mubr.bf16.mxu1 %v605_v1 }
  0x3a   :  { %565 = vmatmul.mubr.msk.bf16.gmra.mrb[20].mxu0 %vm163_vm0, %v40_v34  ;;  %575 = vmatmul.mubr.msk.bf16.gmra.mrb[20].mxu1 %vm163_vm0, %v40_v34 }
  0x3b   :  { %286 = vmatprep.mubr.bf16.mxu0 %v605_v1  ;;  %419 = vmatprep.mubr.bf16.mxu1 %v605_v1 }
  0x42   :  { %566 = vmatmul.mubr.msk.bf16.gmra.mrb[24].mxu0 %vm163_vm0, %v41_v37  ;;  %576 = vmatmul.mubr.msk.bf16.gmra.mrb[24].mxu1 %vm163_vm0, %v41_v37 }
  0x43   :  { %296 = vmatprep.mubr.bf16.mxu0 %v605_v1  ;;  %429 = vmatprep.mubr.bf16.mxu1 %v605_v1 }
  0x4a   :  { %567 = vmatmul.mubr.msk.bf16.gmra.mrb[28].mxu0 %vm163_vm0, %v42_v40  ;;  %577 = vmatmul.mubr.msk.bf16.gmra.mrb[28].mxu1 %vm163_vm0, %v42_v40 }
  0x4b   :  { %306 = vmatprep.mubr.bf16.mxu0 %v605_v1  ;;  %439 = vmatprep.mubr.bf16.mxu1 %v605_v1 }
  0x52   :  { %568 = vmatmul.mubr.msk.bf16.gmra.mrb[32].mxu0 %vm163_vm0, %v43_v43  ;;  %578 = vmatmul.mubr.msk.bf16.gmra.mrb[32].mxu1 %vm163_vm0, %v43_v43 }
  0x53   :  { %316 = vmatprep.mubr.bf16.mxu0 %v605_v1  ;;  %449 = vmatprep.mubr.bf16.mxu1 %v605_v1 }
  0x5a   :  { %569 = vmatmul.mubr.msk.bf16.gmra.mrb[36].mxu0 %vm163_vm0, %v44_v46  ;;  %579 = vmatmul.mubr.msk.bf16.gmra.mrb[36].mxu1 %vm163_vm0, %v44_v46 }
  0xe5   :  { %v228_v58 = vpop.f32.mrb[0].mxu0  ;;  %v361_v59 = vpop.f32.mrb[0].mxu1 }
  0xe6   :  { %v229_v60 = vadd.f32 %v228_v58, %v777_v54  ;;  %v362_v61 = vadd.f32 %v361_v59, %v779_v55  ;;  %v230_v62 = vpop.f32.mrb[1].mxu0  ;;  %v363_v63 = vpop.f32.mrb[1].mxu1 }
  0xe7   :  { %v231_v0 = vadd.f32 %v230_v62, %v781_v56  ;;  %v364_v1 = vadd.f32 %v363_v63, %v783_v57  ;;  %v232_v2 = vpop.f32.mrb[2].mxu0  ;;  %v365_v3 = vpop.f32.mrb[2].mxu1 }
  0xe8   :  { %460 = vst [vmem:[%s1108_s3] sm:$0xff] %v229_v60  ;;  %462 = vst [vmem:[%s1108_s3 + $0x10] sm:$0xff] %v362_v61  ;;  %v233_v4 = vadd.f32 %v232_v2, %v777_v54  ;;  %v366_v5 = vadd.f32 %v365_v3, %v779_v55  ;;  %v234_v6 = vpop.f32.mrb[3].mxu0  ;;  %v367_v7 = vpop.f32.mrb[3].mxu1 }
  0xe9   :  { %461 = vst [vmem:[%s1108_s3 + $0x8] sm:$0xff] %v231_v0  ;;  %463 = vst [vmem:[%s1108_s3 + $0x18] sm:$0xff] %v364_v1  ;;  %v235_v8 = vadd.f32 %v234_v6, %v781_v56  ;;  %v368_v9 = vadd.f32 %v367_v7, %v783_v57 }
  0xea   :  { %464 = vst [vmem:[%s1108_s3 + $0x20] sm:$0xff] %v233_v4  ;;  %466 = vst [vmem:[%s1108_s3 + $0x30] sm:$0xff] %v366_v5 }
  0xeb   :  { %465 = vst [vmem:[%s1108_s3 + $0x28] sm:$0xff] %v235_v8  ;;  %467 = vst [vmem:[%s1108_s3 + $0x38] sm:$0xff] %v368_v9 }
  0xed   :  { %v238_v10 = vpop.f32.mrb[4].mxu0  ;;  %v371_v11 = vpop.f32.mrb[4].mxu1 }
  0xee   :  { %v239_v12 = vadd.f32 %v238_v10, %v777_v54  ;;  %v372_v13 = vadd.f32 %v371_v11, %v779_v55  ;;  %v240_v14 = vpop.f32.mrb[5].mxu0  ;;  %v373_v15 = vpop.f32.mrb[5].mxu1 }
  0xef   :  { %v241_v16 = vadd.f32 %v240_v14, %v781_v56  ;;  %v374_v17 = vadd.f32 %v373_v15, %v783_v57  ;;  %v242_v18 = vpop.f32.mrb[6].mxu0  ;;  %v375_v19 = vpop.f32.mrb[6].mxu1 }
  0xf0   :  { %468 = vst [vmem:[%s1108_s3 + $0x40] sm:$0xff] %v239_v12  ;;  %470 = vst [vmem:[%s1108_s3 + $0x50] sm:$0xff] %v372_v13  ;;  %v243_v20 = vadd.f32 %v242_v18, %v777_v54  ;;  %v376_v21 = vadd.f32 %v375_v19, %v779_v55  ;;  %v244_v22 = vpop.f32.mrb[7].mxu0  ;;  %v377_v23 = vpop.f32.mrb[7].mxu1 }
  0xf1   :  { %469 = vst [vmem:[%s1108_s3 + $0x48] sm:$0xff] %v241_v16  ;;  %471 = vst [vmem:[%s1108_s3 + $0x58] sm:$0xff] %v374_v17  ;;  %v245_v24 = vadd.f32 %v244_v22, %v781_v56  ;;  %v378_v25 = vadd.f32 %v377_v23, %v783_v57 }
  0xf2   :  { %472 = vst [vmem:[%s1108_s3 + $0x60] sm:$0xff] %v243_v20  ;;  %474 = vst [vmem:[%s1108_s3 + $0x70] sm:$0xff] %v376_v21 }
  0xf3   :  { %473 = vst [vmem:[%s1108_s3 + $0x68] sm:$0xff] %v245_v24  ;;  %475 = vst [vmem:[%s1108_s3 + $0x78] sm:$0xff] %v378_v25 }
  0xf5   :  { %v248_v26 = vpop.f32.mrb[8].mxu0  ;;  %v381_v27 = vpop.f32.mrb[8].mxu1 }
  0xf6   :  { %v249_v28 = vadd.f32 %v248_v26, %v777_v54  ;;  %v382_v29 = vadd.f32 %v381_v27, %v779_v55  ;;  %v250_v30 = vpop.f32.mrb[9].mxu0  ;;  %v383_v31 = vpop.f32.mrb[9].mxu1 }
  0xf7   :  { %v251_v32 = vadd.f32 %v250_v30, %v781_v56  ;;  %v384_v33 = vadd.f32 %v383_v31, %v783_v57  ;;  %v252_v34 = vpop.f32.mrb[10].mxu0  ;;  %v385_v35 = vpop.f32.mrb[10].mxu1 }
  0xf8   :  { %476 = vst [vmem:[%s1108_s3 + $0x80] sm:$0xff] %v249_v28  ;;  %478 = vst [vmem:[%s1108_s3 + $0x90] sm:$0xff] %v382_v29  ;;  %v253_v36 = vadd.f32 %v252_v34, %v777_v54  ;;  %v386_v37 = vadd.f32 %v385_v35, %v779_v55  ;;  %v254_v38 = vpop.f32.mrb[11].mxu0  ;;  %v387_v39 = vpop.f32.mrb[11].mxu1 }
  0xf9   :  { %477 = vst [vmem:[%s1108_s3 + $0x88] sm:$0xff] %v251_v32  ;;  %479 = vst [vmem:[%s1108_s3 + $0x98] sm:$0xff] %v384_v33  ;;  %v255_v40 = vadd.f32 %v254_v38, %v781_v56  ;;  %v388_v41 = vadd.f32 %v387_v39, %v783_v57 }
  0xfa   :  { %480 = vst [vmem:[%s1108_s3 + $0xa0] sm:$0xff] %v253_v36  ;;  %482 = vst [vmem:[%s1108_s3 + $0xb0] sm:$0xff] %v386_v37 }
  0xfb   :  { %481 = vst [vmem:[%s1108_s3 + $0xa8] sm:$0xff] %v255_v40  ;;  %483 = vst [vmem:[%s1108_s3 + $0xb8] sm:$0xff] %v388_v41 }
  0xfd   :  { %v258_v42 = vpop.f32.mrb[12].mxu0  ;;  %v391_v43 = vpop.f32.mrb[12].mxu1 }
  0xfe   :  { %v259_v44 = vadd.f32 %v258_v42, %v777_v54  ;;  %v392_v45 = vadd.f32 %v391_v43, %v779_v55  ;;  %v260_v46 = vpop.f32.mrb[13].mxu0  ;;  %v393_v47 = vpop.f32.mrb[13].mxu1 }
  0xff   :  { %v261_v48 = vadd.f32 %v260_v46, %v781_v56  ;;  %v394_v49 = vadd.f32 %v393_v47, %v783_v57  ;;  %v262_v50 = vpop.f32.mrb[14].mxu0  ;;  %v395_v51 = vpop.f32.mrb[14].mxu1 }
 0x100   :  { %484 = vst [vmem:[%s1108_s3 + $0xc0] sm:$0xff] %v259_v44  ;;  %486 = vst [vmem:[%s1108_s3 + $0xd0] sm:$0xff] %v392_v45  ;;  %v263_v52 = vadd.f32 %v262_v50, %v777_v54  ;;  %v396_v53 = vadd.f32 %v395_v51, %v779_v55  ;;  %v264_v58 = vpop.f32.mrb[15].mxu0  ;;  %v397_v59 = vpop.f32.mrb[15].mxu1 }
 0x101   :  { %485 = vst [vmem:[%s1108_s3 + $0xc8] sm:$0xff] %v261_v48  ;;  %487 = vst [vmem:[%s1108_s3 + $0xd8] sm:$0xff] %v394_v49  ;;  %v265_v60 = vadd.f32 %v264_v58, %v781_v56  ;;  %v398_v61 = vadd.f32 %v397_v59, %v783_v57 }
 0x102   :  { %488 = vst [vmem:[%s1108_s3 + $0xe0] sm:$0xff] %v263_v52  ;;  %490 = vst [vmem:[%s1108_s3 + $0xf0] sm:$0xff] %v396_v53 }
 0x103   :  { %489 = vst [vmem:[%s1108_s3 + $0xe8] sm:$0xff] %v265_v60  ;;  %491 = vst [vmem:[%s1108_s3 + $0xf8] sm:$0xff] %v398_v61 }
 0x105   :  { %v268_v62 = vpop.f32.mrb[16].mxu0  ;;  %v401_v63 = vpop.f32.mrb[16].mxu1 }
 0x106   :  { %v269_v0 = vadd.f32 %v268_v62, %v777_v54  ;;  %v402_v1 = vadd.f32 %v401_v63, %v779_v55  ;;  %v270_v2 = vpop.f32.mrb[17].mxu0  ;;  %v403_v3 = vpop.f32.mrb[17].mxu1 }
 0x107   :  { %v271_v4 = vadd.f32 %v270_v2, %v781_v56  ;;  %v404_v5 = vadd.f32 %v403_v3, %v783_v57  ;;  %v272_v6 = vpop.f32.mrb[18].mxu0  ;;  %v405_v7 = vpop.f32.mrb[18].mxu1 }
 0x108   :  { %492 = vst [vmem:[%s1108_s3 + $0x100] sm:$0xff] %v269_v0  ;;  %494 = vst [vmem:[%s1108_s3 + $0x110] sm:$0xff] %v402_v1  ;;  %v273_v8 = vadd.f32 %v272_v6, %v777_v54  ;;  %v406_v9 = vadd.f32 %v405_v7, %v779_v55  ;;  %v274_v10 = vpop.f32.mrb[19].mxu0  ;;  %v407_v11 = vpop.f32.mrb[19].mxu1 }
 0x109   :  { %493 = vst [vmem:[%s1108_s3 + $0x108] sm:$0xff] %v271_v4  ;;  %495 = vst [vmem:[%s1108_s3 + $0x118] sm:$0xff] %v404_v5  ;;  %v275_v12 = vadd.f32 %v274_v10, %v781_v56  ;;  %v408_v13 = vadd.f32 %v407_v11, %v783_v57 }
 0x10a   :  { %496 = vst [vmem:[%s1108_s3 + $0x120] sm:$0xff] %v273_v8  ;;  %498 = vst [vmem:[%s1108_s3 + $0x130] sm:$0xff] %v406_v9 }
 0x10b   :  { %497 = vst [vmem:[%s1108_s3 + $0x128] sm:$0xff] %v275_v12  ;;  %499 = vst [vmem:[%s1108_s3 + $0x138] sm:$0xff] %v408_v13 }
 0x10d   :  { %v278_v14 = vpop.f32.mrb[20].mxu0  ;;  %v411_v15 = vpop.f32.mrb[20].mxu1 }
 0x10e   :  { %v279_v16 = vadd.f32 %v278_v14, %v777_v54  ;;  %v412_v17 = vadd.f32 %v411_v15, %v779_v55  ;;  %v280_v18 = vpop.f32.mrb[21].mxu0  ;;  %v413_v19 = vpop.f32.mrb[21].mxu1 }
 0x10f   :  { %v281_v20 = vadd.f32 %v280_v18, %v781_v56  ;;  %v414_v21 = vadd.f32 %v413_v19, %v783_v57  ;;  %v282_v22 = vpop.f32.mrb[22].mxu0  ;;  %v415_v23 = vpop.f32.mrb[22].mxu1 }
 0x110   :  { %500 = vst [vmem:[%s1108_s3 + $0x140] sm:$0xff] %v279_v16  ;;  %502 = vst [vmem:[%s1108_s3 + $0x150] sm:$0xff] %v412_v17  ;;  %v283_v24 = vadd.f32 %v282_v22, %v777_v54  ;;  %v416_v25 = vadd.f32 %v415_v23, %v779_v55  ;;  %v284_v26 = vpop.f32.mrb[23].mxu0  ;;  %v417_v27 = vpop.f32.mrb[23].mxu1 }
 0x111   :  { %501 = vst [vmem:[%s1108_s3 + $0x148] sm:$0xff] %v281_v20  ;;  %503 = vst [vmem:[%s1108_s3 + $0x158] sm:$0xff] %v414_v21  ;;  %v285_v28 = vadd.f32 %v284_v26, %v781_v56  ;;  %v418_v29 = vadd.f32 %v417_v27, %v783_v57 }
 0x112   :  { %504 = vst [vmem:[%s1108_s3 + $0x160] sm:$0xff] %v283_v24  ;;  %506 = vst [vmem:[%s1108_s3 + $0x170] sm:$0xff] %v416_v25 }
 0x113   :  { %505 = vst [vmem:[%s1108_s3 + $0x168] sm:$0xff] %v285_v28  ;;  %507 = vst [vmem:[%s1108_s3 + $0x178] sm:$0xff] %v418_v29 }
 0x115   :  { %v288_v30 = vpop.f32.mrb[24].mxu0  ;;  %v421_v31 = vpop.f32.mrb[24].mxu1 }
 0x116   :  { %v289_v32 = vadd.f32 %v288_v30, %v777_v54  ;;  %v422_v33 = vadd.f32 %v421_v31, %v779_v55  ;;  %v290_v34 = vpop.f32.mrb[25].mxu0  ;;  %v423_v35 = vpop.f32.mrb[25].mxu1 }
 0x117   :  { %v291_v36 = vadd.f32 %v290_v34, %v781_v56  ;;  %v424_v37 = vadd.f32 %v423_v35, %v783_v57  ;;  %v292_v38 = vpop.f32.mrb[26].mxu0  ;;  %v425_v39 = vpop.f32.mrb[26].mxu1 }
 0x118   :  { %508 = vst [vmem:[%s1108_s3 + $0x180] sm:$0xff] %v289_v32  ;;  %510 = vst [vmem:[%s1108_s3 + $0x190] sm:$0xff] %v422_v33  ;;  %v293_v40 = vadd.f32 %v292_v38, %v777_v54  ;;  %v426_v41 = vadd.f32 %v425_v39, %v779_v55  ;;  %v294_v42 = vpop.f32.mrb[27].mxu0  ;;  %v427_v43 = vpop.f32.mrb[27].mxu1 }
 0x119   :  { %509 = vst [vmem:[%s1108_s3 + $0x188] sm:$0xff] %v291_v36  ;;  %511 = vst [vmem:[%s1108_s3 + $0x198] sm:$0xff] %v424_v37  ;;  %v295_v44 = vadd.f32 %v294_v42, %v781_v56  ;;  %v428_v45 = vadd.f32 %v427_v43, %v783_v57 }
 0x11a   :  { %512 = vst [vmem:[%s1108_s3 + $0x1a0] sm:$0xff] %v293_v40  ;;  %514 = vst [vmem:[%s1108_s3 + $0x1b0] sm:$0xff] %v426_v41 }
 0x11b   :  { %513 = vst [vmem:[%s1108_s3 + $0x1a8] sm:$0xff] %v295_v44  ;;  %515 = vst [vmem:[%s1108_s3 + $0x1b8] sm:$0xff] %v428_v45 }
 0x11d   :  { %v298_v46 = vpop.f32.mrb[28].mxu0  ;;  %v431_v47 = vpop.f32.mrb[28].mxu1 }
 0x11e   :  { %v299_v48 = vadd.f32 %v298_v46, %v777_v54  ;;  %v432_v49 = vadd.f32 %v431_v47, %v779_v55  ;;  %v300_v50 = vpop.f32.mrb[29].mxu0  ;;  %v433_v51 = vpop.f32.mrb[29].mxu1 }
 0x11f   :  { %v301_v52 = vadd.f32 %v300_v50, %v781_v56  ;;  %v434_v53 = vadd.f32 %v433_v51, %v783_v57  ;;  %v302_v58 = vpop.f32.mrb[30].mxu0  ;;  %v435_v59 = vpop.f32.mrb[30].mxu1 }
 0x120   :  { %516 = vst [vmem:[%s1108_s3 + $0x1c0] sm:$0xff] %v299_v48  ;;  %518 = vst [vmem:[%s1108_s3 + $0x1d0] sm:$0xff] %v432_v49  ;;  %v303_v60 = vadd.f32 %v302_v58, %v777_v54  ;;  %v436_v61 = vadd.f32 %v435_v59, %v779_v55  ;;  %v304_v62 = vpop.f32.mrb[31].mxu0  ;;  %v437_v63 = vpop.f32.mrb[31].mxu1 }
 0x121   :  { %517 = vst [vmem:[%s1108_s3 + $0x1c8] sm:$0xff] %v301_v52  ;;  %519 = vst [vmem:[%s1108_s3 + $0x1d8] sm:$0xff] %v434_v53  ;;  %v305_v0 = vadd.f32 %v304_v62, %v781_v56  ;;  %v438_v1 = vadd.f32 %v437_v63, %v783_v57 }
 0x122   :  { %520 = vst [vmem:[%s1108_s3 + $0x1e0] sm:$0xff] %v303_v60  ;;  %522 = vst [vmem:[%s1108_s3 + $0x1f0] sm:$0xff] %v436_v61 }
 0x123   :  { %521 = vst [vmem:[%s1108_s3 + $0x1e8] sm:$0xff] %v305_v0  ;;  %523 = vst [vmem:[%s1108_s3 + $0x1f8] sm:$0xff] %v438_v1 }
 0x125   :  { %v308_v2 = vpop.f32.mrb[32].mxu0  ;;  %v441_v3 = vpop.f32.mrb[32].mxu1 }
 0x126   :  { %v309_v4 = vadd.f32 %v308_v2, %v777_v54  ;;  %v442_v5 = vadd.f32 %v441_v3, %v779_v55  ;;  %v310_v6 = vpop.f32.mrb[33].mxu0  ;;  %v443_v7 = vpop.f32.mrb[33].mxu1 }
 0x127   :  { %v311_v8 = vadd.f32 %v310_v6, %v781_v56  ;;  %v444_v9 = vadd.f32 %v443_v7, %v783_v57  ;;  %v312_v10 = vpop.f32.mrb[34].mxu0  ;;  %v445_v11 = vpop.f32.mrb[34].mxu1 }
 0x128   :  { %524 = vst [vmem:[%s1108_s3 + $0x200] sm:$0xff] %v309_v4  ;;  %526 = vst [vmem:[%s1108_s3 + $0x210] sm:$0xff] %v442_v5  ;;  %v313_v12 = vadd.f32 %v312_v10, %v777_v54  ;;  %v446_v13 = vadd.f32 %v445_v11, %v779_v55  ;;  %v314_v14 = vpop.f32.mrb[35].mxu0  ;;  %v447_v15 = vpop.f32.mrb[35].mxu1 }
 0x129   :  { %525 = vst [vmem:[%s1108_s3 + $0x208] sm:$0xff] %v311_v8  ;;  %527 = vst [vmem:[%s1108_s3 + $0x218] sm:$0xff] %v444_v9  ;;  %v315_v16 = vadd.f32 %v314_v14, %v781_v56  ;;  %v448_v17 = vadd.f32 %v447_v15, %v783_v57 }
 0x12a   :  { %528 = vst [vmem:[%s1108_s3 + $0x220] sm:$0xff] %v313_v12  ;;  %530 = vst [vmem:[%s1108_s3 + $0x230] sm:$0xff] %v446_v13 }
 0x12b   :  { %529 = vst [vmem:[%s1108_s3 + $0x228] sm:$0xff] %v315_v16  ;;  %531 = vst [vmem:[%s1108_s3 + $0x238] sm:$0xff] %v448_v17 }
 0x12d   :  { %v318_v18 = vpop.f32.mrb[36].mxu0  ;;  %v451_v19 = vpop.f32.mrb[36].mxu1 }
 0x12e   :  { %v319_v20 = vadd.f32 %v318_v18, %v777_v54  ;;  %v452_v21 = vadd.f32 %v451_v19, %v779_v55  ;;  %v320_v22 = vpop.f32.mrb[37].mxu0  ;;  %v453_v23 = vpop.f32.mrb[37].mxu1 }
 0x12f   :  { %v321_v24 = vadd.f32 %v320_v22, %v781_v56  ;;  %v454_v25 = vadd.f32 %v453_v23, %v783_v57  ;;  %v322_v26 = vpop.f32.mrb[38].mxu0  ;;  %v455_v27 = vpop.f32.mrb[38].mxu1 }
 0x130   :  { %532 = vst [vmem:[%s1108_s3 + $0x240] sm:$0xff] %v319_v20  ;;  %534 = vst [vmem:[%s1108_s3 + $0x250] sm:$0xff] %v452_v21  ;;  %v323_v28 = vadd.f32 %v322_v26, %v777_v54  ;;  %v456_v29 = vadd.f32 %v455_v27, %v779_v55  ;;  %v324_v30 = vpop.f32.mrb[39].mxu0  ;;  %v457_v31 = vpop.f32.mrb[39].mxu1 }
 0x131   :  { %533 = vst [vmem:[%s1108_s3 + $0x248] sm:$0xff] %v321_v24  ;;  %535 = vst [vmem:[%s1108_s3 + $0x258] sm:$0xff] %v454_v25  ;;  %v325_v32 = vadd.f32 %v324_v30, %v781_v56  ;;  %v458_v33 = vadd.f32 %v457_v31, %v783_v57 }
 0x132   :  { %536 = vst [vmem:[%s1108_s3 + $0x260] sm:$0xff] %v323_v28  ;;  %538 = vst [vmem:[%s1108_s3 + $0x270] sm:$0xff] %v456_v29 }
 0x133   :  { %537 = vst [vmem:[%s1108_s3 + $0x268] sm:$0xff] %v325_v32  ;;  %539 = vst [vmem:[%s1108_s3 + $0x278] sm:$0xff] %v458_v33 }

// kernel: treemeshgpt_forward.8
= control target key start
LH: loop header
LB: loop body
LE: loop exit
PB: predicated region body
PF: predicated region fallthrough
CT: control target
= control target key end

     0   :  { %s2200_s3 = inlined_call_operand.vmem [shape: bf16[512,128], index: 3, kind: input, shape index: {}]   ;;  %s2201_s1 = inlined_call_operand.vmem [shape: f32[48,512], index: 1, kind: input, shape index: {}]   ;;  %s2202_s2 = inlined_call_operand.vmem [shape: bf16[512,128], index: 2, kind: input, shape index: {}]   ;;  %s2203_s0 = inlined_call_operand.vmem [shape: f32[48,512], index: 0, kind: input, shape index: {}]   ;;  %s2204_s5 = inlined_call_operand.vmem [shape: bf16[512,128], index: 5, kind: input, shape index: {}]   ;;  %s2205_s4 = inlined_call_operand.vmem [shape: f32[1,128], index: 4, kind: input, shape index: {}]   ;;  %s2206_s7 = inlined_call_operand.vmem [shape: f32[48,128], index: 7, kind: output, shape index: {0}]   ;;  %s2207_s6 = inlined_call_operand.vmem [shape: f32[1,128], index: 6, kind: input, shape index: {}]   ;;  %s2208_s8 = inlined_call_operand.vmem [shape: f32[48,128], index: 8, kind: output, shape index: {1}]  }
   0x1   :  { %v1553_v0 = vld [vmem:[%s2200_s3 + $0x40] sm:$0xff]   ;;  %v1557_v4 = vld [vmem:[%s2200_s3 + $0x48] sm:$0xff]   ;;  %v1561_v8 = vld [vmem:[%s2200_s3 + $0x50] sm:$0xff]  }
   0x2   :  { %v1554_v1 = vld [vmem:[%s2200_s3 + $0xc0] sm:$0xff]   ;;  %1349 = vmatprep.subr.bf16.mxu0 %v1553_v0  ;;  %v1558_v5 = vld [vmem:[%s2200_s3 + $0xc8] sm:$0xff]   ;;  %v1562_v9 = vld [vmem:[%s2200_s3 + $0xd0] sm:$0xff]  }
   0x3   :  { %v1555_v2 = vld [vmem:[%s2200_s3] sm:$0xff]   ;;  %1383 = vmatprep.subr.bf16.mxu1 %v1554_v1  ;;  %v1559_v6 = vld [vmem:[%s2200_s3 + $0x8] sm:$0xff]   ;;  %v1563_v10 = vld [vmem:[%s2200_s3 + $0x10] sm:$0xff]  }
   0x4   :  { %v1556_v3 = vld [vmem:[%s2200_s3 + $0x80] sm:$0xff]   ;;  %1350 = vmatpush3.bf16.msra.mxu0 %v1555_v2  ;;  %v1560_v7 = vld [vmem:[%s2200_s3 + $0x88] sm:$0xff]   ;;  %v1564_v11 = vld [vmem:[%s2200_s3 + $0x90] sm:$0xff]  }
   0x5   :  { %1384 = vmatpush3.bf16.msra.mxu1 %v1556_v3  ;;  %1351 = vmatprep.subr.bf16.mxu0 %v1557_v4  ;;  %v1565_v12 = vld [vmem:[%s2200_s3 + $0x58] sm:$0xff]   ;;  %v1569_v16 = vld [vmem:[%s2200_s3 + $0x60] sm:$0xff]   ;;  %v1573_v20 = vld [vmem:[%s2200_s3 + $0x68] sm:$0xff]  }
   0x6   :  { %1385 = vmatprep.subr.bf16.mxu1 %v1558_v5  ;;  %v1566_v13 = vld [vmem:[%s2200_s3 + $0xd8] sm:$0xff]   ;;  %v1570_v17 = vld [vmem:[%s2200_s3 + $0xe0] sm:$0xff]   ;;  %v1574_v21 = vld [vmem:[%s2200_s3 + $0xe8] sm:$0xff]  }
   0x7   :  { %v1567_v14 = vld [vmem:[%s2200_s3 + $0x18] sm:$0xff]   ;;  %v1571_v18 = vld [vmem:[%s2200_s3 + $0x20] sm:$0xff]   ;;  %v1575_v22 = vld [vmem:[%s2200_s3 + $0x28] sm:$0xff]  }
   0x8   :  { %1352 = vmatpush3.bf16.msra.mxu0 %v1559_v6  ;;  %v1568_v15 = vld [vmem:[%s2200_s3 + $0x98] sm:$0xff]   ;;  %v1572_v19 = vld [vmem:[%s2200_s3 + $0xa0] sm:$0xff]   ;;  %v1576_v23 = vld [vmem:[%s2200_s3 + $0xa8] sm:$0xff]  }
   0x9   :  { %1386 = vmatpush3.bf16.msra.mxu1 %v1560_v7  ;;  %1353 = vmatprep.subr.bf16.mxu0 %v1561_v8  ;;  %v1577_v24 = vld [vmem:[%s2200_s3 + $0x70] sm:$0xff]   ;;  %v1581_v28 = vld [vmem:[%s2200_s3 + $0x78] sm:$0xff]   ;;  %v66_v32 = vld [vmem:[%s2201_s1 + $0x8] sm:$0xff] }
   0xa   :  { %1387 = vmatprep.subr.bf16.mxu1 %v1562_v9  ;;  %v1578_v25 = vld [vmem:[%s2200_s3 + $0xf0] sm:$0xff]   ;;  %v1582_v29 = vld [vmem:[%s2200_s3 + $0xf8] sm:$0xff]   ;;  %v70_v33 = vld [vmem:[%s2201_s1 + $0x28] sm:$0xff] }
   0xb   :  { %v1579_v26 = vld [vmem:[%s2200_s3 + $0x30] sm:$0xff]   ;;  %v1583_v30 = vld [vmem:[%s2200_s3 + $0x38] sm:$0xff]   ;;  %v90_v35 = vpack.c.bf16 %v70_v33, %v66_v32  ;;  %v65_v37 = vld [vmem:[%s2201_s1] sm:$0xff] }
   0xc   :  { %1354 = vmatpush3.bf16.msra.mxu0 %v1563_v10  ;;  %v1580_v27 = vld [vmem:[%s2200_s3 + $0xb0] sm:$0xff]   ;;  %v1584_v31 = vld [vmem:[%s2200_s3 + $0xb8] sm:$0xff]   ;;  %v69_v38 = vld [vmem:[%s2201_s1 + $0x20] sm:$0xff] }
   0xd   :  { %1388 = vmatpush3.bf16.msra.mxu1 %v1564_v11  ;;  %1355 = vmatprep.subr.bf16.mxu0 %v1565_v12  ;;  %v68_v34 = vld [vmem:[%s2201_s1 + $0x18] sm:$0xff]  ;;  %v89_v40 = vpack.c.bf16 %v69_v38, %v65_v37  ;;  %v67_v41 = vld [vmem:[%s2201_s1 + $0x10] sm:$0xff]  ;;  %v1585_v44 = vld [vmem:[%s2202_s2 + $0x40] sm:$0xff]  }
   0xe   :  { %1389 = vmatprep.subr.bf16.mxu1 %v1566_v13  ;;  %v72_v36 = vld [vmem:[%s2201_s1 + $0x38] sm:$0xff]  ;;  %v71_v42 = vld [vmem:[%s2201_s1 + $0x30] sm:$0xff]  ;;  %453 = vmatprep.mubr.bf16.mxu0 %v90_v35  ;;  %v1586_v45 = vld [vmem:[%s2202_s2 + $0xc0] sm:$0xff]  }
   0xf   :  { %v92_v39 = vpack.c.bf16 %v72_v36, %v68_v34  ;;  %v91_v43 = vpack.c.bf16 %v71_v42, %v67_v41  ;;  %v1587_v46 = vld [vmem:[%s2202_s2] sm:$0xff]   ;;  %v1589_v48 = vld [vmem:[%s2202_s2 + $0x48] sm:$0xff]   ;;  %v1593_v52 = vld [vmem:[%s2202_s2 + $0x50] sm:$0xff]  }
  0x10   :  { %1356 = vmatpush3.bf16.msra.mxu0 %v1567_v14  ;;  %v1588_v47 = vld [vmem:[%s2202_s2 + $0x80] sm:$0xff]   ;;  %v1590_v49 = vld [vmem:[%s2202_s2 + $0xc8] sm:$0xff]   ;;  %v1594_v53 = vld [vmem:[%s2202_s2 + $0xd0] sm:$0xff]  }
  0x11   :  { %1390 = vmatpush3.bf16.msra.mxu1 %v1568_v15  ;;  %1357 = vmatprep.subr.bf16.mxu0 %v1569_v16  ;;  %v1591_v50 = vld [vmem:[%s2202_s2 + $0x8] sm:$0xff]   ;;  %v1595_v54 = vld [vmem:[%s2202_s2 + $0x10] sm:$0xff]   ;;  %v1597_v56 = vld [vmem:[%s2202_s2 + $0x58] sm:$0xff]  }
  0x12   :  { %1391 = vmatprep.subr.bf16.mxu1 %v1570_v17  ;;  %510 = vmatprep.mubr.bf16.mxu1 %v92_v39  ;;  %v1592_v51 = vld [vmem:[%s2202_s2 + $0x88] sm:$0xff]   ;;  %v1596_v55 = vld [vmem:[%s2202_s2 + $0x90] sm:$0xff]   ;;  %v1598_v57 = vld [vmem:[%s2202_s2 + $0xd8] sm:$0xff]  }
  0x13   :  { %v74_v58 = vld [vmem:[%s2201_s1 + $0x48] sm:$0xff]  ;;  %v76_v60 = vld [vmem:[%s2201_s1 + $0x58] sm:$0xff]  ;;  %v73_v2 = vld [vmem:[%s2201_s1 + $0x40] sm:$0xff] }
  0x14   :  { %1358 = vmatpush3.bf16.msra.mxu0 %v1571_v18  ;;  %v78_v59 = vld [vmem:[%s2201_s1 + $0x68] sm:$0xff]  ;;  %v80_v61 = vld [vmem:[%s2201_s1 + $0x78] sm:$0xff]  ;;  %v77_v3 = vld [vmem:[%s2201_s1 + $0x60] sm:$0xff] }
  0x15   :  { %1392 = vmatpush3.bf16.msra.mxu1 %v1572_v19  ;;  %1359 = vmatprep.subr.bf16.mxu0 %v1573_v20  ;;  %v94_v62 = vpack.c.bf16 %v78_v59, %v74_v58  ;;  %v96_v63 = vpack.c.bf16 %v80_v61, %v76_v60  ;;  %v1599_v0 = vld [vmem:[%s2202_s2 + $0x18] sm:$0xff]   ;;  %v75_v4 = vld [vmem:[%s2201_s1 + $0x50] sm:$0xff]  ;;  %v93_v5 = vpack.c.bf16 %v77_v3, %v73_v2  ;;  %v1601_v8 = vld [vmem:[%s2202_s2 + $0x60] sm:$0xff]  }
  0x16   :  { %1393 = vmatprep.subr.bf16.mxu1 %v1574_v21  ;;  %v1600_v1 = vld [vmem:[%s2202_s2 + $0x98] sm:$0xff]   ;;  %v79_v6 = vld [vmem:[%s2201_s1 + $0x70] sm:$0xff]  ;;  %v1602_v9 = vld [vmem:[%s2202_s2 + $0xe0] sm:$0xff]  }
  0x17   :  { %v95_v7 = vpack.c.bf16 %v79_v6, %v75_v4  ;;  %v1603_v10 = vld [vmem:[%s2202_s2 + $0x20] sm:$0xff]   ;;  %v1605_v12 = vld [vmem:[%s2202_s2 + $0x68] sm:$0xff]   ;;  %v84_v17 = vld [vmem:[%s2201_s1 + $0x98] sm:$0xff] }
  0x18   :  { %1360 = vmatpush3.bf16.msra.mxu0 %v1575_v22  ;;  %v1604_v11 = vld [vmem:[%s2202_s2 + $0xa0] sm:$0xff]   ;;  %v1606_v13 = vld [vmem:[%s2202_s2 + $0xe8] sm:$0xff]   ;;  %v88_v18 = vld [vmem:[%s2201_s1 + $0xb8] sm:$0xff] }
  0x19   :  { %1394 = vmatpush3.bf16.msra.mxu1 %v1576_v23  ;;  %1361 = vmatprep.subr.bf16.mxu0 %v1577_v24  ;;  %v82_v14 = vld [vmem:[%s2201_s1 + $0x88] sm:$0xff]  ;;  %v100_v19 = vpack.c.bf16 %v88_v18, %v84_v17  ;;  %v81_v22 = vld [vmem:[%s2201_s1 + $0x80] sm:$0xff]  ;;  %v83_v24 = vld [vmem:[%s2201_s1 + $0x90] sm:$0xff] }
  0x1a   :  { %1395 = vmatprep.subr.bf16.mxu1 %v1578_v25  ;;  %v86_v15 = vld [vmem:[%s2201_s1 + $0xa8] sm:$0xff]  ;;  %v85_v23 = vld [vmem:[%s2201_s1 + $0xa0] sm:$0xff]  ;;  %v87_v25 = vld [vmem:[%s2201_s1 + $0xb0] sm:$0xff] }
  0x1b   :  { %v98_v16 = vpack.c.bf16 %v86_v15, %v82_v14  ;;  %v1607_v20 = vld [vmem:[%s2202_s2 + $0x28] sm:$0xff]   ;;  %v1613_v32 = vld [vmem:[%s2202_s2 + $0x78] sm:$0xff]   ;;  %v29_v41 = vld [vmem:[%s2203_s0] sm:$0xff] }
  0x1c   :  { %1362 = vmatpush3.bf16.msra.mxu0 %v1579_v26  ;;  %v1608_v21 = vld [vmem:[%s2202_s2 + $0xa8] sm:$0xff]   ;;  %v97_v26 = vpack.c.bf16 %v85_v23, %v81_v22  ;;  %v1614_v33 = vld [vmem:[%s2202_s2 + $0xf8] sm:$0xff]   ;;  %v33_v42 = vld [vmem:[%s2203_s0 + $0x20] sm:$0xff] }
  0x1d   :  { %1396 = vmatpush3.bf16.msra.mxu1 %v1580_v27  ;;  %1363 = vmatprep.subr.bf16.mxu0 %v1581_v28  ;;  %v99_v27 = vpack.c.bf16 %v87_v25, %v83_v24  ;;  %v1609_v28 = vld [vmem:[%s2202_s2 + $0x70] sm:$0xff]   ;;  %v1615_v34 = vld [vmem:[%s2202_s2 + $0x38] sm:$0xff]   ;;  %v30_v36 = vld [vmem:[%s2203_s0 + $0x8] sm:$0xff] }
  0x1e   :  { %1397 = vmatprep.subr.bf16.mxu1 %v1582_v29  ;;  %v1610_v29 = vld [vmem:[%s2202_s2 + $0xf0] sm:$0xff]   ;;  %v1616_v35 = vld [vmem:[%s2202_s2 + $0xb8] sm:$0xff]   ;;  %v34_v37 = vld [vmem:[%s2203_s0 + $0x28] sm:$0xff] }
  0x1f   :  { %v32_v38 = vld [vmem:[%s2203_s0 + $0x18] sm:$0xff]  ;;  %v1967_v39 = vpack.c.bf16 %v34_v37, %v30_v36  ;;  %v37_v58 = vld [vmem:[%s2203_s0 + $0x40] sm:$0xff]  ;;  %v1627_v3 = vld [vmem:[%s2204_s5 + $0x10] sm:$0xff]  }
  0x20   :  { %1364 = vmatpush3.bf16.msra.mxu0 %v1583_v30  ;;  %v1611_v30 = vld [vmem:[%s2202_s2 + $0x30] sm:$0xff]   ;;  %v41_v59 = vld [vmem:[%s2203_s0 + $0x60] sm:$0xff]  ;;  %v1645_v36 = vld [vmem:[%s2204_s5 + $0x78] sm:$0xff]  }
  0x21   :  { %1398 = vmatpush3.bf16.msra.mxu1 %v1584_v31  ;;  %1417 = vmatprep.subr.bf16.mxu0 %v1585_v44  ;;  %v1612_v31 = vld [vmem:[%s2202_s2 + $0xb0] sm:$0xff]   ;;  %v1980_v44 = vpack.c.bf16 %v33_v42, %v29_v41  ;;  %v2032_v61 = vpack.c.bf16 %v41_v59, %v37_v58  ;;  %v45_v15 = vld [vmem:[%s2203_s0 + $0x80] sm:$0xff]  ;;  %v1646_v37 = vld [vmem:[%s2204_s5 + $0xf8] sm:$0xff]  }
  0x22   :  { %1451 = vmatprep.subr.bf16.mxu1 %v1586_v45  ;;  %v31_v45 = vld [vmem:[%s2203_s0 + $0x10] sm:$0xff]  ;;  %v1633_v18 = vld [vmem:[%s2204_s5 + $0x60] sm:$0xff]  }
  0x23   :  { %454 = vmatmul.mubr.bf16.vlgmr.msra.gmra.mrb[0].mxu0 %v89_v40  ;;  %v36_v40 = vld [vmem:[%s2203_s0 + $0x38] sm:$0xff]  ;;  %v1628_v4 = vld [vmem:[%s2204_s5 + $0x90] sm:$0xff]   ;;  %v1635_v23 = vld [vmem:[%s2204_s5 + $0x20] sm:$0xff]  }
  0x24   :  { %511 = vmatmul.mubr.bf16.vlgmr.msra.gmra.mrb[0].mxu1 %v91_v43  ;;  %1418 = vmatpush3.bf16.msra.mxu0 %v1587_v46  ;;  %v1978_v43 = vpack.c.bf16 %v36_v40, %v32_v38  ;;  %v35_v46 = vld [vmem:[%s2203_s0 + $0x30] sm:$0xff]  ;;  %v1636_v24 = vld [vmem:[%s2204_s5 + $0xa0] sm:$0xff]   ;;  %v1647_v38 = vld [vmem:[%s2204_s5 + $0x38] sm:$0xff]  }
  0x25   :  { %1452 = vmatpush3.bf16.msra.mxu1 %v1588_v47  ;;  %1419 = vmatprep.subr.bf16.mxu0 %v1589_v48  ;;  %v1989_v47 = vpack.c.bf16 %v35_v46, %v31_v45  ;;  %v1617_v48 = vld [vmem:[%s2204_s5 + $0x40] sm:$0xff]   ;;  %v43_v6 = vld [vmem:[%s2203_s0 + $0x70] sm:$0xff] }
  0x26   :  { %1453 = vmatprep.subr.bf16.mxu1 %v1590_v49  ;;  %461 = vmatprep.mubr.bf16.mxu0 %v94_v62  ;;  %v1618_v49 = vld [vmem:[%s2204_s5 + $0xc0] sm:$0xff]   ;;  %v1625_v62 = vld [vmem:[%s2204_s5 + $0x50] sm:$0xff]  }
  0x27   :  { %518 = vmatprep.mubr.bf16.mxu1 %v96_v63  ;;  %v1626_v63 = vld [vmem:[%s2204_s5 + $0xd0] sm:$0xff]  }
  0x28   :  { %1420 = vmatpush3.bf16.msra.mxu0 %v1591_v50  ;;  %v1619_v50 = vld [vmem:[%s2204_s5] sm:$0xff]   ;;  %v47_v25 = vld [vmem:[%s2203_s0 + $0x90] sm:$0xff] }
  0x29   :  { %1454 = vmatpush3.bf16.msra.mxu1 %v1592_v51  ;;  %1421 = vmatprep.subr.bf16.mxu0 %v1593_v52  ;;  %v1620_v51 = vld [vmem:[%s2204_s5 + $0x80] sm:$0xff]   ;;  %v1621_v52 = vld [vmem:[%s2204_s5 + $0x48] sm:$0xff]  }
  0x2a   :  { %1455 = vmatprep.subr.bf16.mxu1 %v1594_v53  ;;  %v1622_v53 = vld [vmem:[%s2204_s5 + $0xc8] sm:$0xff]  }
  0x2b   :  { %462 = vmatmul.mubr.bf16.gmra.mrb[4].mxu0 %v93_v5  ;;  %v39_v5 = vld [vmem:[%s2203_s0 + $0x50] sm:$0xff] }
  0x2c   :  { %1422 = vmatpush3.bf16.msra.mxu0 %v1595_v54  ;;  %519 = vmatmul.mubr.bf16.gmra.mrb[4].mxu1 %v95_v7  ;;  %v1623_v54 = vld [vmem:[%s2204_s5 + $0x8] sm:$0xff]   ;;  %v2063_v7 = vpack.c.bf16 %v43_v6, %v39_v5 }
  0x2d   :  { %1456 = vmatpush3.bf16.msra.mxu1 %v1596_v55  ;;  %1423 = vmatprep.subr.bf16.mxu0 %v1597_v56  ;;  %v1624_v55 = vld [vmem:[%s2204_s5 + $0x88] sm:$0xff]  }
  0x2e   :  { %1457 = vmatprep.subr.bf16.mxu1 %v1598_v57  ;;  %469 = vmatprep.mubr.bf16.mxu0 %v98_v16  ;;  %v38_v56 = vld [vmem:[%s2203_s0 + $0x48] sm:$0xff]  ;;  %v49_v16 = vld [vmem:[%s2203_s0 + $0xa0] sm:$0xff] }
  0x2f   :  { %526 = vmatprep.mubr.bf16.mxu1 %v100_v19  ;;  %v42_v57 = vld [vmem:[%s2203_s0 + $0x68] sm:$0xff]  ;;  %v61_v17 = vpack.c.bf16 %v49_v16, %v45_v15  ;;  %v1634_v19 = vld [vmem:[%s2204_s5 + $0xe0] sm:$0xff]  }
  0x30   :  { %1424 = vmatpush3.bf16.msra.mxu0 %v1599_v0  ;;  %v2030_v60 = vpack.c.bf16 %v42_v57, %v38_v56  ;;  %v40_v0 = vld [vmem:[%s2203_s0 + $0x58] sm:$0xff] }
  0x31   :  { %1458 = vmatpush3.bf16.msra.mxu1 %v1600_v1  ;;  %1425 = vmatprep.subr.bf16.mxu0 %v1601_v8  ;;  %v44_v1 = vld [vmem:[%s2203_s0 + $0x78] sm:$0xff] }
  0x32   :  { %1459 = vmatprep.subr.bf16.mxu1 %v1602_v9  ;;  %v2048_v2 = vpack.c.bf16 %v44_v1, %v40_v0  ;;  %v1629_v8 = vld [vmem:[%s2204_s5 + $0x58] sm:$0xff]  }
  0x33   :  { %470 = vmatmul.mubr.bf16.gmra.mrb[8].mxu0 %v97_v26  ;;  %v1630_v9 = vld [vmem:[%s2204_s5 + $0xd8] sm:$0xff]   ;;  %v51_v26 = vld [vmem:[%s2203_s0 + $0xb0] sm:$0xff] }
  0x34   :  { %1426 = vmatpush3.bf16.msra.mxu0 %v1603_v10  ;;  %527 = vmatmul.mubr.bf16.gmra.mrb[8].mxu1 %v99_v27  ;;  %v1631_v10 = vld [vmem:[%s2204_s5 + $0x18] sm:$0xff]   ;;  %v63_v27 = vpack.c.bf16 %v51_v26, %v47_v25 }
  0x35   :  { %1460 = vmatpush3.bf16.msra.mxu1 %v1604_v11  ;;  %1427 = vmatprep.subr.bf16.mxu0 %v1605_v12  ;;  %v1632_v11 = vld [vmem:[%s2204_s5 + $0x98] sm:$0xff]   ;;  %v46_v12 = vld [vmem:[%s2203_s0 + $0x88] sm:$0xff] }
  0x36   :  { %1461 = vmatprep.subr.bf16.mxu1 %v1606_v13  ;;  %759 = vmatprep.mubr.bf16.mxu0 %v1967_v39  ;;  %v50_v13 = vld [vmem:[%s2203_s0 + $0xa8] sm:$0xff] }
  0x37   :  { %816 = vmatprep.mubr.bf16.mxu1 %v1978_v43  ;;  %v62_v14 = vpack.c.bf16 %v50_v13, %v46_v12 }
  0x38   :  { %1428 = vmatpush3.bf16.msra.mxu0 %v1607_v20  ;;  %v48_v20 = vld [vmem:[%s2203_s0 + $0x98] sm:$0xff] }
  0x39   :  { %1462 = vmatpush3.bf16.msra.mxu1 %v1608_v21  ;;  %1429 = vmatprep.subr.bf16.mxu0 %v1609_v28  ;;  %v52_v21 = vld [vmem:[%s2203_s0 + $0xb8] sm:$0xff]  ;;  %v1637_v28 = vld [vmem:[%s2204_s5 + $0x68] sm:$0xff]  }
  0x3a   :  { %1463 = vmatprep.subr.bf16.mxu1 %v1610_v29  ;;  %v64_v22 = vpack.c.bf16 %v52_v21, %v48_v20  ;;  %v1638_v29 = vld [vmem:[%s2204_s5 + $0xe8] sm:$0xff]  }
  0x3c   :  { %1430 = vmatpush3.bf16.msra.mxu0 %v1611_v30  ;;  %v1639_v30 = vld [vmem:[%s2204_s5 + $0x28] sm:$0xff]  }
  0x3d   :  { %1464 = vmatpush3.bf16.msra.mxu1 %v1612_v31  ;;  %1431 = vmatprep.subr.bf16.mxu0 %v1613_v32  ;;  %v1640_v31 = vld [vmem:[%s2204_s5 + $0xa8] sm:$0xff]   ;;  %v1641_v32 = vld [vmem:[%s2204_s5 + $0x70] sm:$0xff]  }
  0x3e   :  { %1465 = vmatprep.subr.bf16.mxu1 %v1614_v33  ;;  %v1642_v33 = vld [vmem:[%s2204_s5 + $0xf0] sm:$0xff]  }
  0x40   :  { %1432 = vmatpush3.bf16.msra.mxu0 %v1615_v34  ;;  %v1643_v34 = vld [vmem:[%s2204_s5 + $0x30] sm:$0xff]  }
  0x41   :  { %1466 = vmatpush3.bf16.msra.mxu1 %v1616_v35  ;;  %1485 = vmatprep.subr.bf16.mxu0 %v1617_v48  ;;  %v1644_v35 = vld [vmem:[%s2204_s5 + $0xb0] sm:$0xff]  }
  0x42   :  { %1519 = vmatprep.subr.bf16.mxu1 %v1618_v49 }
  0x43   :  { %760 = vmatmul.mubr.bf16.vlgmr.msra.gmra.mrb[12].mxu0 %v1980_v44 }
  0x44   :  { %817 = vmatmul.mubr.bf16.vlgmr.msra.gmra.mrb[12].mxu1 %v1989_v47  ;;  %1486 = vmatpush3.bf16.msra.mxu0 %v1619_v50 }
  0x45   :  { %1520 = vmatpush3.bf16.msra.mxu1 %v1620_v51  ;;  %1487 = vmatprep.subr.bf16.mxu0 %v1621_v52 }
  0x46   :  { %1521 = vmatprep.subr.bf16.mxu1 %v1622_v53  ;;  %767 = vmatprep.mubr.bf16.mxu0 %v2030_v60 }
  0x47   :  { %824 = vmatprep.mubr.bf16.mxu1 %v2048_v2 }
  0x48   :  { %1488 = vmatpush3.bf16.msra.mxu0 %v1623_v54 }
  0x49   :  { %1522 = vmatpush3.bf16.msra.mxu1 %v1624_v55  ;;  %1489 = vmatprep.subr.bf16.mxu0 %v1625_v62 }
  0x4a   :  { %1523 = vmatprep.subr.bf16.mxu1 %v1626_v63 }
  0x4b   :  { %768 = vmatmul.mubr.bf16.gmra.mrb[16].mxu0 %v2032_v61 }
  0x4c   :  { %1490 = vmatpush3.bf16.msra.mxu0 %v1627_v3  ;;  %825 = vmatmul.mubr.bf16.gmra.mrb[16].mxu1 %v2063_v7 }
  0x4d   :  { %1524 = vmatpush3.bf16.msra.mxu1 %v1628_v4  ;;  %1491 = vmatprep.subr.bf16.mxu0 %v1629_v8 }
  0x4e   :  { %1525 = vmatprep.subr.bf16.mxu1 %v1630_v9  ;;  %775 = vmatprep.mubr.bf16.mxu0 %v62_v14 }
  0x4f   :  { %832 = vmatprep.mubr.bf16.mxu1 %v64_v22 }
  0x50   :  { %1492 = vmatpush3.bf16.msra.mxu0 %v1631_v10 }
  0x51   :  { %1526 = vmatpush3.bf16.msra.mxu1 %v1632_v11  ;;  %1493 = vmatprep.subr.bf16.mxu0 %v1633_v18 }
  0x52   :  { %1527 = vmatprep.subr.bf16.mxu1 %v1634_v19 }
  0x53   :  { %776 = vmatmul.mubr.bf16.gmra.mrb[20].mxu0 %v61_v17 }
  0x54   :  { %1155 = vmatprep.mubr.bf16.mxu0 %v1967_v39  ;;  %1494 = vmatpush3.bf16.msra.mxu0 %v1635_v23  ;;  %v1648_v39 = vld [vmem:[%s2204_s5 + $0xb8] sm:$0xff]  }
  0x55   :  { %1528 = vmatpush3.bf16.msra.mxu1 %v1636_v24  ;;  %1495 = vmatprep.subr.bf16.mxu0 %v1637_v28 }
  0x56   :  { %833 = vmatmul.mubr.bf16.gmra.mrb[20].mxu1 %v63_v27  ;;  %1529 = vmatprep.subr.bf16.mxu1 %v1638_v29 }
  0x57   :  { %1212 = vmatprep.mubr.bf16.mxu1 %v1978_v43 }
  0x58   :  { %1496 = vmatpush3.bf16.msra.mxu0 %v1639_v30  ;;  %v1315_v30 = vld [vmem:[%s2205_s4] ss:$0 sm:$0xff] }
  0x59   :  { %1530 = vmatpush3.bf16.msra.mxu1 %v1640_v31  ;;  %1497 = vmatprep.subr.bf16.mxu0 %v1641_v32 }
  0x5a   :  { %1531 = vmatprep.subr.bf16.mxu1 %v1642_v33 }
  0x5c   :  { %1498 = vmatpush3.bf16.msra.mxu0 %v1643_v34 }
  0x5d   :  { %1532 = vmatpush3.bf16.msra.mxu1 %v1644_v35  ;;  %1499 = vmatprep.subr.bf16.mxu0 %v1645_v36 }
  0x5e   :  { %1533 = vmatprep.subr.bf16.mxu1 %v1646_v37 }
  0x60   :  { %1500 = vmatpush3.bf16.msra.mxu0 %v1647_v38 }
  0x61   :  { %1534 = vmatpush3.bf16.msra.mxu1 %v1648_v39 }
  0x63   :  { %1156 = vmatmul.mubr.bf16.vlgmr.msra.gmra.mrb[24].mxu0 %v1980_v44 }
  0x64   :  { %1213 = vmatmul.mubr.bf16.vlgmr.msra.gmra.mrb[24].mxu1 %v1989_v47  ;;  %1163 = vmatprep.mubr.bf16.mxu0 %v2030_v60 }
  0x65   :  { %1220 = vmatprep.mubr.bf16.mxu1 %v2048_v2 }
  0x6b   :  { %1164 = vmatmul.mubr.bf16.gmra.mrb[28].mxu0 %v2032_v61 }
  0x6c   :  { %1221 = vmatmul.mubr.bf16.gmra.mrb[28].mxu1 %v2063_v7  ;;  %1171 = vmatprep.mubr.bf16.mxu0 %v62_v14 }
  0x6d   :  { %1228 = vmatprep.mubr.bf16.mxu1 %v64_v22 }
  0x73   :  { %1172 = vmatmul.mubr.bf16.gmra.mrb[32].mxu0 %v61_v17 }
  0x74   :  { %1229 = vmatmul.mubr.bf16.gmra.mrb[32].mxu1 %v63_v27 }
  0xf6   :  { %v1365_v40 = vpop.f32.mrb[0].mxu0 }
  0xf7   :  { %v1399_v41 = vpop.f32.mrb[0].mxu1  ;;  %v1366_v42 = vpop.f32.mrb[1].mxu0 }
  0xf8   :  { %v1367_v43 = vadd.f32 %v1366_v42, %v1365_v40  ;;  %v1400_v45 = vpop.f32.mrb[1].mxu1  ;;  %v1368_v44 = vpop.f32.mrb[2].mxu0 }
  0xf9   :  { %v1401_v46 = vadd.f32 %v1400_v45, %v1399_v41  ;;  %v1402_v47 = vpop.f32.mrb[2].mxu1  ;;  %v1369_v48 = vpop.f32.mrb[3].mxu0 }
  0xfa   :  { %v1370_v49 = vadd.f32 %v1369_v48, %v1368_v44  ;;  %v1403_v50 = vpop.f32.mrb[3].mxu1 }
  0xfb   :  { %v513_v51 = vadd.f32 %v1401_v46, %v1367_v43  ;;  %v1404_v52 = vadd.f32 %v1403_v50, %v1402_v47 }
  0xfd   :  { %v516_v53 = vadd.f32 %v1404_v52, %v1370_v49 }
  0xfe   :  { %v1371_v54 = vpop.f32.mrb[4].mxu0 }
  0xff   :  { %v1405_v55 = vpop.f32.mrb[4].mxu1  ;;  %v1372_v56 = vpop.f32.mrb[5].mxu0 }
 0x100   :  { %v1373_v57 = vadd.f32 %v1372_v56, %v1371_v54  ;;  %v1406_v58 = vpop.f32.mrb[5].mxu1  ;;  %v1374_v59 = vpop.f32.mrb[6].mxu0 }
 0x101   :  { %v1407_v60 = vadd.f32 %v1406_v58, %v1405_v55  ;;  %v1408_v61 = vpop.f32.mrb[6].mxu1  ;;  %v1375_v62 = vpop.f32.mrb[7].mxu0 }
 0x102   :  { %v1376_v63 = vadd.f32 %v1375_v62, %v1374_v59  ;;  %v1409_v0 = vpop.f32.mrb[7].mxu1 }
 0x103   :  { %v521_v1 = vadd.f32 %v1407_v60, %v1373_v57  ;;  %v1410_v2 = vadd.f32 %v1409_v0, %v1408_v61 }
 0x105   :  { %v524_v3 = vadd.f32 %v1410_v2, %v1376_v63 }
 0x106   :  { %v1377_v4 = vpop.f32.mrb[8].mxu0 }
 0x107   :  { %v1411_v5 = vpop.f32.mrb[8].mxu1  ;;  %v1378_v6 = vpop.f32.mrb[9].mxu0 }
 0x108   :  { %v1412_v7 = vpop.f32.mrb[9].mxu1  ;;  %v1379_v8 = vadd.f32 %v1378_v6, %v1377_v4  ;;  %v1380_v10 = vpop.f32.mrb[10].mxu0 }
 0x109   :  { %v1413_v9 = vadd.f32 %v1412_v7, %v1411_v5  ;;  %v1414_v11 = vpop.f32.mrb[10].mxu1  ;;  %v1381_v12 = vpop.f32.mrb[11].mxu0 }
 0x10a   :  { %v1415_v13 = vpop.f32.mrb[11].mxu1  ;;  %v1382_v15 = vadd.f32 %v1381_v12, %v1380_v10 }
 0x10b   :  { %v529_v14 = vadd.f32 %v1413_v9, %v1379_v8  ;;  %v1416_v16 = vadd.f32 %v1415_v13, %v1414_v11  ;;  %v1316_v11 = vld [vmem:[%s2207_s6] ss:$0 sm:$0xff] }
 0x10d   :  { %v532_v17 = vadd.f32 %v1416_v16, %v1382_v15 }
 0x116   :  { %v1433_v18 = vpop.f32.mrb[12].mxu0 }
 0x117   :  { %v1467_v19 = vpop.f32.mrb[12].mxu1  ;;  %v1434_v20 = vpop.f32.mrb[13].mxu0 }
 0x118   :  { %v1435_v21 = vadd.f32 %v1434_v20, %v1433_v18  ;;  %v1468_v22 = vpop.f32.mrb[13].mxu1  ;;  %v1436_v23 = vpop.f32.mrb[14].mxu0 }
 0x119   :  { %v1469_v24 = vadd.f32 %v1468_v22, %v1467_v19  ;;  %v1470_v25 = vpop.f32.mrb[14].mxu1  ;;  %v1437_v26 = vpop.f32.mrb[15].mxu0 }
 0x11a   :  { %v762_v27 = vadd.f32 %v1435_v21, %v513_v51  ;;  %v1438_v28 = vadd.f32 %v1437_v26, %v1436_v23  ;;  %v1471_v29 = vpop.f32.mrb[15].mxu1 }
 0x11b   :  { %v1472_v31 = vadd.f32 %v1471_v29, %v1470_v25 }
 0x11c   :  { %v819_v32 = vadd.f32 %v1469_v24, %v762_v27  ;;  %v765_v33 = vadd.f32 %v1438_v28, %v516_v53 }
 0x11e   :  { %v848_v34 = vadd.f32 %v1315_v30, %v819_v32  ;;  %v822_v35 = vadd.f32 %v1472_v31, %v765_v33  ;;  %v1439_v37 = vpop.f32.mrb[16].mxu0 }
 0x11f   :  { %v1440_v38 = vpop.f32.mrb[17].mxu0  ;;  %v1473_v45 = vpop.f32.mrb[16].mxu1 }
 0x120   :  { %854 = vst [vmem:[%s2206_s7] sm:$0xff] %v848_v34  ;;  %v849_v36 = vadd.f32 %v1315_v30, %v822_v35  ;;  %v1441_v39 = vadd.f32 %v1440_v38, %v1439_v37  ;;  %v1442_v40 = vpop.f32.mrb[18].mxu0  ;;  %v1474_v46 = vpop.f32.mrb[17].mxu1 }
 0x121   :  { %v1443_v41 = vpop.f32.mrb[19].mxu0  ;;  %v1475_v47 = vadd.f32 %v1474_v46, %v1473_v45  ;;  %v1476_v48 = vpop.f32.mrb[18].mxu1 }
 0x122   :  { %855 = vst [vmem:[%s2206_s7 + $0x8] sm:$0xff] %v849_v36  ;;  %v770_v42 = vadd.f32 %v1441_v39, %v521_v1  ;;  %v1444_v43 = vadd.f32 %v1443_v41, %v1442_v40  ;;  %v1477_v49 = vpop.f32.mrb[19].mxu1 }
 0x123   :  { %v1478_v51 = vadd.f32 %v1477_v49, %v1476_v48 }
 0x124   :  { %v773_v44 = vadd.f32 %v1444_v43, %v524_v3  ;;  %v827_v50 = vadd.f32 %v1475_v47, %v770_v42 }
 0x126   :  { %v1445_v52 = vpop.f32.mrb[20].mxu0  ;;  %v850_v53 = vadd.f32 %v1315_v30, %v827_v50  ;;  %v830_v54 = vadd.f32 %v1478_v51, %v773_v44 }
 0x127   :  { %v1446_v55 = vpop.f32.mrb[21].mxu0 }
 0x128   :  { %v1447_v56 = vadd.f32 %v1446_v55, %v1445_v52  ;;  %v1448_v57 = vpop.f32.mrb[22].mxu0  ;;  %856 = vst [vmem:[%s2206_s7 + $0x10] sm:$0xff] %v850_v53  ;;  %v851_v58 = vadd.f32 %v1315_v30, %v830_v54 }
 0x129   :  { %v1449_v59 = vpop.f32.mrb[23].mxu0  ;;  %v1479_v62 = vpop.f32.mrb[20].mxu1 }
 0x12a   :  { %v778_v60 = vadd.f32 %v1447_v56, %v529_v14  ;;  %v1450_v61 = vadd.f32 %v1449_v59, %v1448_v57  ;;  %857 = vst [vmem:[%s2206_s7 + $0x18] sm:$0xff] %v851_v58  ;;  %v1480_v0 = vpop.f32.mrb[21].mxu1 }
 0x12b   :  { %v1481_v1 = vadd.f32 %v1480_v0, %v1479_v62  ;;  %v1482_v2 = vpop.f32.mrb[22].mxu1 }
 0x12c   :  { %v781_v63 = vadd.f32 %v1450_v61, %v532_v17  ;;  %v1483_v3 = vpop.f32.mrb[23].mxu1 }
 0x12d   :  { %v835_v4 = vadd.f32 %v1481_v1, %v778_v60  ;;  %v1484_v5 = vadd.f32 %v1483_v3, %v1482_v2 }
 0x12f   :  { %v852_v6 = vadd.f32 %v1315_v30, %v835_v4  ;;  %v838_v7 = vadd.f32 %v1484_v5, %v781_v63 }
 0x131   :  { %858 = vst [vmem:[%s2206_s7 + $0x20] sm:$0xff] %v852_v6  ;;  %v853_v8 = vadd.f32 %v1315_v30, %v838_v7 }
 0x133   :  { %859 = vst [vmem:[%s2206_s7 + $0x28] sm:$0xff] %v853_v8 }
 0x136   :  { %v1501_v9 = vpop.f32.mrb[24].mxu0 }
 0x137   :  { %v1535_v10 = vpop.f32.mrb[24].mxu1  ;;  %v1502_v12 = vpop.f32.mrb[25].mxu0 }
 0x138   :  { %v1503_v13 = vadd.f32 %v1502_v12, %v1501_v9  ;;  %v1536_v14 = vpop.f32.mrb[25].mxu1  ;;  %v1504_v15 = vpop.f32.mrb[26].mxu0 }
 0x139   :  { %v1537_v16 = vadd.f32 %v1536_v14, %v1535_v10  ;;  %v1538_v17 = vpop.f32.mrb[26].mxu1  ;;  %v1505_v18 = vpop.f32.mrb[27].mxu0 }
 0x13a   :  { %v1158_v19 = vadd.f32 %v1503_v13, %v1316_v11  ;;  %v1506_v20 = vadd.f32 %v1505_v18, %v1504_v15  ;;  %v1539_v21 = vpop.f32.mrb[27].mxu1 }
 0x13b   :  { %v1540_v22 = vadd.f32 %v1539_v21, %v1538_v17 }
 0x13c   :  { %v1215_v23 = vadd.f32 %v1537_v16, %v1158_v19  ;;  %v1161_v24 = vadd.f32 %v1506_v20, %v1316_v11 }
 0x13e   :  { %1237 = vst [vmem:[%s2208_s8] sm:$0xff] %v1215_v23  ;;  %v1218_v25 = vadd.f32 %v1540_v22, %v1161_v24  ;;  %v1507_v26 = vpop.f32.mrb[28].mxu0 }
 0x13f   :  { %v1541_v27 = vpop.f32.mrb[28].mxu1  ;;  %v1508_v28 = vpop.f32.mrb[29].mxu0 }
 0x140   :  { %1238 = vst [vmem:[%s2208_s8 + $0x8] sm:$0xff] %v1218_v25  ;;  %v1509_v29 = vadd.f32 %v1508_v28, %v1507_v26  ;;  %v1542_v30 = vpop.f32.mrb[29].mxu1  ;;  %v1510_v31 = vpop.f32.mrb[30].mxu0 }
 0x141   :  { %v1543_v32 = vadd.f32 %v1542_v30, %v1541_v27  ;;  %v1544_v33 = vpop.f32.mrb[30].mxu1  ;;  %v1511_v34 = vpop.f32.mrb[31].mxu0 }
 0x142   :  { %v1166_v35 = vadd.f32 %v1509_v29, %v1316_v11  ;;  %v1512_v36 = vadd.f32 %v1511_v34, %v1510_v31  ;;  %v1545_v37 = vpop.f32.mrb[31].mxu1 }
 0x143   :  { %v1546_v38 = vadd.f32 %v1545_v37, %v1544_v33 }
 0x144   :  { %v1223_v39 = vadd.f32 %v1543_v32, %v1166_v35  ;;  %v1169_v40 = vadd.f32 %v1512_v36, %v1316_v11 }
 0x146   :  { %1239 = vst [vmem:[%s2208_s8 + $0x10] sm:$0xff] %v1223_v39  ;;  %v1226_v41 = vadd.f32 %v1546_v38, %v1169_v40  ;;  %v1513_v42 = vpop.f32.mrb[32].mxu0 }
 0x147   :  { %v1547_v43 = vpop.f32.mrb[32].mxu1  ;;  %v1514_v45 = vpop.f32.mrb[33].mxu0 }
 0x148   :  { %1240 = vst [vmem:[%s2208_s8 + $0x18] sm:$0xff] %v1226_v41  ;;  %v1515_v44 = vadd.f32 %v1514_v45, %v1513_v42  ;;  %v1548_v46 = vpop.f32.mrb[33].mxu1  ;;  %v1516_v47 = vpop.f32.mrb[34].mxu0 }
 0x149   :  { %v1549_v48 = vadd.f32 %v1548_v46, %v1547_v43  ;;  %v1550_v49 = vpop.f32.mrb[34].mxu1  ;;  %v1517_v50 = vpop.f32.mrb[35].mxu0 }
 0x14a   :  { %v1174_v51 = vadd.f32 %v1515_v44, %v1316_v11  ;;  %v1518_v52 = vadd.f32 %v1517_v50, %v1516_v47  ;;  %v1551_v53 = vpop.f32.mrb[35].mxu1 }
 0x14b   :  { %v1552_v54 = vadd.f32 %v1551_v53, %v1550_v49 }
 0x14c   :  { %v1231_v55 = vadd.f32 %v1549_v48, %v1174_v51  ;;  %v1177_v56 = vadd.f32 %v1518_v52, %v1316_v11 }
 0x14e   :  { %1241 = vst [vmem:[%s2208_s8 + $0x20] sm:$0xff] %v1231_v55  ;;  %v1234_v57 = vadd.f32 %v1552_v54, %v1177_v56 }
 0x150   :  { %1242 = vst [vmem:[%s2208_s8 + $0x28] sm:$0xff] %v1234_v57 }

// kernel: treemeshgpt_forward.10
= control target key start
LH: loop header
LB: loop body
LE: loop exit
PB: predicated region body
PF: predicated region fallthrough
CT: control target
= control target key end

     0   :  { %v137_v0 = vmov 0.0   ;;  %vm138_vm0 = vmmov 0   ;;  %vm57_vm1 = vcmask 523264   ;;  %s186_s1 = inlined_call_operand.vmem [shape: bf16[64,128], index: 1, kind: input, shape index: {}]   ;;  %s187_s0 = inlined_call_operand.vmem [shape: f32[16,64], index: 0, kind: input, shape index: {}]   ;;  %s188_s2 = inlined_call_operand.vmem [shape: f32[1,128], index: 2, kind: input, shape index: {}]   ;;  %s189_s3 = inlined_call_operand.vmem [shape: f32[16,128], index: 3, kind: output, shape index: {}]  }
   0x1   :  { %119 = vmatprep.subr.bf16.mxu0 %v137_v0  ;;  %v133_v1 = vld [vmem:[%s186_s1] sm:$0xff]   ;;  %127 = vmatprep.mubr.msk.bf16.mxu0 %vm138_vm0, %v137_v0  ;;  %v134_v2 = vld [vmem:[%s186_s1 + $0x8] sm:$0xff]   ;;  %v135_v3 = vld [vmem:[%s186_s1 + $0x10] sm:$0xff]  }
   0x2   :  { %120 = vmatpush3.bf16.msra.mxu0 %v133_v1  ;;  %v136_v4 = vld [vmem:[%s186_s1 + $0x18] sm:$0xff]   ;;  %v15_v5 = vld [vmem:[%s187_s0] sm:$0xff]  ;;  %v16_v6 = vld [vmem:[%s187_s0 + $0x8] sm:$0xff] }
   0x3   :  { %121 = vmatprep.subr.bf16.mxu0 %v137_v0  ;;  %v17_v7 = vpack.c.bf16 %v16_v6, %v15_v5  ;;  %v108_v8 = vld [vmem:[%s188_s2] ss:$0 sm:$0xff] }
   0x6   :  { %122 = vmatpush3.bf16.msra.mxu0 %v134_v2 }
   0x7   :  { %123 = vmatprep.subr.bf16.mxu0 %v137_v0 }
   0xa   :  { %124 = vmatpush3.bf16.msra.mxu0 %v135_v3 }
   0xb   :  { %125 = vmatprep.subr.bf16.mxu0 %v137_v0 }
   0xe   :  { %126 = vmatpush3.bf16.msra.mxu0 %v136_v4 }
  0x11   :  { %128 = vmatmul.mubr.msk.bf16.vlgmr.msra.gmra.mrb[0].mxu0 %vm57_vm1, %v17_v7 }
  0xe4   :  { %v95_v9 = vpop.f32.mrb[0].mxu0 }
  0xe5   :  { %v96_v10 = vadd.f32 %v108_v8, %v95_v9  ;;  %v129_v11 = vpop.f32.mrb[1].mxu0 }
  0xe6   :  { %v98_v12 = vpop.f32.mrb[2].mxu0 }
  0xe7   :  { %102 = vst [vmem:[%s189_s3] sm:$0xff] %v96_v10  ;;  %v99_v13 = vadd.f32 %v108_v8, %v98_v12  ;;  %v130_v14 = vpop.f32.mrb[3].mxu0 }
  0xe9   :  { %103 = vst [vmem:[%s189_s3 + $0x8] sm:$0xff] %v99_v13 }

// kernel: treemeshgpt_forward.9
= control target key start
LH: loop header
LB: loop body
LE: loop exit
PB: predicated region body
PF: predicated region fallthrough
CT: control target
= control target key end

     0   :  { %vm456_vm0 = vcmask 523264   ;;  %s871_s1 = inlined_call_operand.vmem [shape: bf16[512,64], index: 1, kind: input, shape index: {}]   ;;  %s872_s0 = inlined_call_operand.vmem [shape: f32[64,512], index: 0, kind: input, shape index: {}]   ;;  %s873_s2 = inlined_call_operand.vmem [shape: f32[1,64], index: 2, kind: input, shape index: {}]   ;;  %s874_s3 = inlined_call_operand.vmem [shape: f32[64,64], index: 3, kind: output, shape index: {}]  }
   0x1   :  { %v582_v0 = vld [vmem:[%s871_s1 + $0x40] sm:$0xff]   ;;  %v586_v4 = vld [vmem:[%s871_s1 + $0x48] sm:$0xff]   ;;  %v590_v8 = vld [vmem:[%s871_s1 + $0x50] sm:$0xff]  }
   0x2   :  { %v583_v1 = vld [vmem:[%s871_s1 + $0xc0] sm:$0xff]   ;;  %502 = vmatprep.subr.bf16.mxu0 %v582_v0  ;;  %v587_v5 = vld [vmem:[%s871_s1 + $0xc8] sm:$0xff]   ;;  %v591_v9 = vld [vmem:[%s871_s1 + $0xd0] sm:$0xff]  }
   0x3   :  { %v584_v2 = vld [vmem:[%s871_s1] sm:$0xff]   ;;  %542 = vmatprep.subr.bf16.mxu1 %v583_v1  ;;  %v588_v6 = vld [vmem:[%s871_s1 + $0x8] sm:$0xff]   ;;  %v592_v10 = vld [vmem:[%s871_s1 + $0x10] sm:$0xff]  }
   0x4   :  { %v585_v3 = vld [vmem:[%s871_s1 + $0x80] sm:$0xff]   ;;  %503 = vmatpush3.bf16.msra.mxu0 %v584_v2  ;;  %v589_v7 = vld [vmem:[%s871_s1 + $0x88] sm:$0xff]   ;;  %v593_v11 = vld [vmem:[%s871_s1 + $0x90] sm:$0xff]  }
   0x5   :  { %543 = vmatpush3.bf16.msra.mxu1 %v585_v3  ;;  %504 = vmatprep.subr.bf16.mxu0 %v586_v4  ;;  %v594_v12 = vld [vmem:[%s871_s1 + $0x58] sm:$0xff]   ;;  %v598_v16 = vld [vmem:[%s871_s1 + $0x60] sm:$0xff]   ;;  %v602_v20 = vld [vmem:[%s871_s1 + $0x68] sm:$0xff]  }
   0x6   :  { %544 = vmatprep.subr.bf16.mxu1 %v587_v5  ;;  %v595_v13 = vld [vmem:[%s871_s1 + $0xd8] sm:$0xff]   ;;  %v599_v17 = vld [vmem:[%s871_s1 + $0xe0] sm:$0xff]   ;;  %v603_v21 = vld [vmem:[%s871_s1 + $0xe8] sm:$0xff]  }
   0x7   :  { %v596_v14 = vld [vmem:[%s871_s1 + $0x18] sm:$0xff]   ;;  %v600_v18 = vld [vmem:[%s871_s1 + $0x20] sm:$0xff]   ;;  %v604_v22 = vld [vmem:[%s871_s1 + $0x28] sm:$0xff]  }
   0x8   :  { %505 = vmatpush3.bf16.msra.mxu0 %v588_v6  ;;  %v597_v15 = vld [vmem:[%s871_s1 + $0x98] sm:$0xff]   ;;  %v601_v19 = vld [vmem:[%s871_s1 + $0xa0] sm:$0xff]   ;;  %v605_v23 = vld [vmem:[%s871_s1 + $0xa8] sm:$0xff]  }
   0x9   :  { %545 = vmatpush3.bf16.msra.mxu1 %v589_v7  ;;  %506 = vmatprep.subr.bf16.mxu0 %v590_v8  ;;  %v606_v24 = vld [vmem:[%s871_s1 + $0x70] sm:$0xff]   ;;  %v610_v28 = vld [vmem:[%s871_s1 + $0x78] sm:$0xff]   ;;  %v16_v32 = vld [vmem:[%s872_s0 + $0x8] sm:$0xff] }
   0xa   :  { %546 = vmatprep.subr.bf16.mxu1 %v591_v9  ;;  %v607_v25 = vld [vmem:[%s871_s1 + $0xf0] sm:$0xff]   ;;  %v611_v29 = vld [vmem:[%s871_s1 + $0xf8] sm:$0xff]   ;;  %v20_v33 = vld [vmem:[%s872_s0 + $0x28] sm:$0xff] }
   0xb   :  { %v608_v26 = vld [vmem:[%s871_s1 + $0x30] sm:$0xff]   ;;  %v612_v30 = vld [vmem:[%s871_s1 + $0x38] sm:$0xff]   ;;  %v48_v35 = vpack.c.bf16 %v20_v33, %v16_v32  ;;  %v15_v37 = vld [vmem:[%s872_s0] sm:$0xff] }
   0xc   :  { %507 = vmatpush3.bf16.msra.mxu0 %v592_v10  ;;  %v609_v27 = vld [vmem:[%s871_s1 + $0xb0] sm:$0xff]   ;;  %v613_v31 = vld [vmem:[%s871_s1 + $0xb8] sm:$0xff]   ;;  %v19_v38 = vld [vmem:[%s872_s0 + $0x20] sm:$0xff] }
   0xd   :  { %547 = vmatpush3.bf16.msra.mxu1 %v593_v11  ;;  %508 = vmatprep.subr.bf16.mxu0 %v594_v12  ;;  %v18_v34 = vld [vmem:[%s872_s0 + $0x18] sm:$0xff]  ;;  %v47_v40 = vpack.c.bf16 %v19_v38, %v15_v37  ;;  %v17_v41 = vld [vmem:[%s872_s0 + $0x10] sm:$0xff]  ;;  %v24_v43 = vld [vmem:[%s872_s0 + $0x48] sm:$0xff] }
   0xe   :  { %548 = vmatprep.subr.bf16.mxu1 %v595_v13  ;;  %v22_v36 = vld [vmem:[%s872_s0 + $0x38] sm:$0xff]  ;;  %v21_v42 = vld [vmem:[%s872_s0 + $0x30] sm:$0xff]  ;;  %358 = vmatprep.mubr.bf16.mxu0 %v48_v35  ;;  %v28_v45 = vld [vmem:[%s872_s0 + $0x68] sm:$0xff] }
   0xf   :  { %v50_v39 = vpack.c.bf16 %v22_v36, %v18_v34  ;;  %v49_v44 = vpack.c.bf16 %v21_v42, %v17_v41  ;;  %v26_v46 = vld [vmem:[%s872_s0 + $0x58] sm:$0xff]  ;;  %v52_v48 = vpack.c.bf16 %v28_v45, %v24_v43  ;;  %v23_v50 = vld [vmem:[%s872_s0 + $0x40] sm:$0xff]  ;;  %v25_v52 = vld [vmem:[%s872_s0 + $0x50] sm:$0xff] }
  0x10   :  { %509 = vmatpush3.bf16.msra.mxu0 %v596_v14  ;;  %v30_v47 = vld [vmem:[%s872_s0 + $0x78] sm:$0xff]  ;;  %v27_v51 = vld [vmem:[%s872_s0 + $0x60] sm:$0xff]  ;;  %v29_v53 = vld [vmem:[%s872_s0 + $0x70] sm:$0xff] }
  0x11   :  { %549 = vmatpush3.bf16.msra.mxu1 %v597_v15  ;;  %510 = vmatprep.subr.bf16.mxu0 %v598_v16  ;;  %v54_v49 = vpack.c.bf16 %v30_v47, %v26_v46  ;;  %v32_v54 = vld [vmem:[%s872_s0 + $0x88] sm:$0xff]  ;;  %v34_v56 = vld [vmem:[%s872_s0 + $0x98] sm:$0xff]  ;;  %v51_v58 = vpack.c.bf16 %v27_v51, %v23_v50  ;;  %v53_v59 = vpack.c.bf16 %v29_v53, %v25_v52  ;;  %v31_v62 = vld [vmem:[%s872_s0 + $0x80] sm:$0xff] }
  0x12   :  { %550 = vmatprep.subr.bf16.mxu1 %v599_v17  ;;  %423 = vmatprep.mubr.bf16.mxu1 %v50_v39  ;;  %v36_v55 = vld [vmem:[%s872_s0 + $0xa8] sm:$0xff]  ;;  %v38_v57 = vld [vmem:[%s872_s0 + $0xb8] sm:$0xff]  ;;  %v35_v63 = vld [vmem:[%s872_s0 + $0xa0] sm:$0xff] }
  0x13   :  { %v56_v60 = vpack.c.bf16 %v36_v55, %v32_v54  ;;  %v58_v61 = vpack.c.bf16 %v38_v57, %v34_v56  ;;  %v33_v0 = vld [vmem:[%s872_s0 + $0x90] sm:$0xff]  ;;  %v40_v2 = vld [vmem:[%s872_s0 + $0xc8] sm:$0xff]  ;;  %v42_v4 = vld [vmem:[%s872_s0 + $0xd8] sm:$0xff]  ;;  %v55_v6 = vpack.c.bf16 %v35_v63, %v31_v62 }
  0x14   :  { %511 = vmatpush3.bf16.msra.mxu0 %v600_v18  ;;  %v37_v1 = vld [vmem:[%s872_s0 + $0xb0] sm:$0xff]  ;;  %v44_v3 = vld [vmem:[%s872_s0 + $0xe8] sm:$0xff]  ;;  %v46_v5 = vld [vmem:[%s872_s0 + $0xf8] sm:$0xff] }
  0x15   :  { %551 = vmatpush3.bf16.msra.mxu1 %v601_v19  ;;  %512 = vmatprep.subr.bf16.mxu0 %v602_v20  ;;  %v57_v7 = vpack.c.bf16 %v37_v1, %v33_v0  ;;  %v60_v8 = vpack.c.bf16 %v44_v3, %v40_v2  ;;  %v62_v9 = vpack.c.bf16 %v46_v5, %v42_v4  ;;  %v39_v10 = vld [vmem:[%s872_s0 + $0xc0] sm:$0xff]  ;;  %v41_v12 = vld [vmem:[%s872_s0 + $0xd0] sm:$0xff] }
  0x16   :  { %552 = vmatprep.subr.bf16.mxu1 %v603_v21  ;;  %v43_v11 = vld [vmem:[%s872_s0 + $0xe0] sm:$0xff]  ;;  %v45_v13 = vld [vmem:[%s872_s0 + $0xf0] sm:$0xff] }
  0x17   :  { %v59_v14 = vpack.c.bf16 %v43_v11, %v39_v10  ;;  %v61_v15 = vpack.c.bf16 %v45_v13, %v41_v12  ;;  %v829_v18 = vld [vmem:[%s873_s2] ss:$0 sm:$0xff] }
  0x18   :  { %513 = vmatpush3.bf16.msra.mxu0 %v604_v22 }
  0x19   :  { %553 = vmatpush3.bf16.msra.mxu1 %v605_v23  ;;  %514 = vmatprep.subr.bf16.mxu0 %v606_v24 }
  0x1a   :  { %554 = vmatprep.subr.bf16.mxu1 %v607_v25 }
  0x1c   :  { %515 = vmatpush3.bf16.msra.mxu0 %v608_v26 }
  0x1d   :  { %555 = vmatpush3.bf16.msra.mxu1 %v609_v27  ;;  %516 = vmatprep.subr.bf16.mxu0 %v610_v28 }
  0x1e   :  { %556 = vmatprep.subr.bf16.mxu1 %v611_v29 }
  0x20   :  { %517 = vmatpush3.bf16.msra.mxu0 %v612_v30 }
  0x21   :  { %557 = vmatpush3.bf16.msra.mxu1 %v613_v31 }
  0x23   :  { %359 = vmatmul.mubr.bf16.vlgmr.msra.gmra.mrb[0].mxu0 %v47_v40 }
  0x24   :  { %424 = vmatmul.mubr.bf16.vlgmr.msra.gmra.mrb[0].mxu1 %v49_v44  ;;  %366 = vmatprep.mubr.bf16.mxu0 %v52_v48 }
  0x25   :  { %431 = vmatprep.mubr.bf16.mxu1 %v54_v49 }
  0x2b   :  { %367 = vmatmul.mubr.bf16.gmra.mrb[4].mxu0 %v51_v58 }
  0x2c   :  { %432 = vmatmul.mubr.bf16.gmra.mrb[4].mxu1 %v53_v59  ;;  %374 = vmatprep.mubr.bf16.mxu0 %v56_v60 }
  0x2d   :  { %439 = vmatprep.mubr.bf16.mxu1 %v58_v61 }
  0x33   :  { %375 = vmatmul.mubr.bf16.gmra.mrb[8].mxu0 %v55_v6 }
  0x34   :  { %440 = vmatmul.mubr.bf16.gmra.mrb[8].mxu1 %v57_v7  ;;  %382 = vmatprep.mubr.bf16.mxu0 %v60_v8 }
  0x35   :  { %447 = vmatprep.mubr.bf16.mxu1 %v62_v9 }
  0x3b   :  { %383 = vmatmul.mubr.bf16.gmra.mrb[12].mxu0 %v59_v14 }
  0x3c   :  { %448 = vmatmul.mubr.bf16.gmra.mrb[12].mxu1 %v61_v15 }
  0xf6   :  { %v518_v16 = vpop.f32.mrb[0].mxu0 }
  0xf7   :  { %v558_v17 = vpop.f32.mrb[0].mxu1  ;;  %v519_v19 = vpop.f32.mrb[1].mxu0 }
  0xf8   :  { %v520_v20 = vadd.f32 %v519_v19, %v518_v16  ;;  %v559_v21 = vpop.f32.mrb[1].mxu1  ;;  %v521_v22 = vpop.f32.mrb[2].mxu0 }
  0xf9   :  { %v560_v23 = vadd.f32 %v559_v21, %v558_v17  ;;  %v561_v24 = vpop.f32.mrb[2].mxu1  ;;  %v522_v25 = vpop.f32.mrb[3].mxu0 }
  0xfa   :  { %v361_v26 = vadd.f32 %v520_v20, %v829_v18  ;;  %v523_v27 = vadd.f32 %v522_v25, %v521_v22  ;;  %v562_v28 = vpop.f32.mrb[3].mxu1 }
  0xfb   :  { %v563_v29 = vadd.f32 %v562_v28, %v561_v24 }
  0xfc   :  { %v426_v30 = vadd.f32 %v560_v23, %v361_v26  ;;  %v364_v31 = vadd.f32 %v523_v27, %v829_v18 }
  0xfe   :  { %457 = vst.msk [vmem:[%s874_s3] sm:$0xff] %vm456_vm0, %v426_v30  ;;  %v429_v32 = vadd.f32 %v563_v29, %v364_v31  ;;  %v524_v33 = vpop.f32.mrb[4].mxu0 }
  0xff   :  { %v564_v34 = vpop.f32.mrb[4].mxu1  ;;  %v525_v35 = vpop.f32.mrb[5].mxu0 }
 0x100   :  { %458 = vst.msk [vmem:[%s874_s3 + $0x8] sm:$0xff] %vm456_vm0, %v429_v32  ;;  %v526_v36 = vadd.f32 %v525_v35, %v524_v33  ;;  %v565_v37 = vpop.f32.mrb[5].mxu1  ;;  %v527_v38 = vpop.f32.mrb[6].mxu0 }
 0x101   :  { %v566_v39 = vadd.f32 %v565_v37, %v564_v34  ;;  %v567_v40 = vpop.f32.mrb[6].mxu1  ;;  %v528_v41 = vpop.f32.mrb[7].mxu0 }
 0x102   :  { %v369_v42 = vadd.f32 %v526_v36, %v829_v18  ;;  %v529_v43 = vadd.f32 %v528_v41, %v527_v38  ;;  %v568_v44 = vpop.f32.mrb[7].mxu1 }
 0x103   :  { %v569_v45 = vadd.f32 %v568_v44, %v567_v40 }
 0x104   :  { %v434_v46 = vadd.f32 %v566_v39, %v369_v42  ;;  %v372_v47 = vadd.f32 %v529_v43, %v829_v18 }
 0x106   :  { %459 = vst.msk [vmem:[%s874_s3 + $0x10] sm:$0xff] %vm456_vm0, %v434_v46  ;;  %v437_v48 = vadd.f32 %v569_v45, %v372_v47  ;;  %v530_v49 = vpop.f32.mrb[8].mxu0 }
 0x107   :  { %v570_v50 = vpop.f32.mrb[8].mxu1  ;;  %v531_v51 = vpop.f32.mrb[9].mxu0 }
 0x108   :  { %460 = vst.msk [vmem:[%s874_s3 + $0x18] sm:$0xff] %vm456_vm0, %v437_v48  ;;  %v532_v52 = vadd.f32 %v531_v51, %v530_v49  ;;  %v571_v53 = vpop.f32.mrb[9].mxu1  ;;  %v533_v54 = vpop.f32.mrb[10].mxu0 }
 0x109   :  { %v572_v55 = vadd.f32 %v571_v53, %v570_v50  ;;  %v573_v56 = vpop.f32.mrb[10].mxu1  ;;  %v534_v57 = vpop.f32.mrb[11].mxu0 }
 0x10a   :  { %v377_v58 = vadd.f32 %v532_v52, %v829_v18  ;;  %v535_v59 = vadd.f32 %v534_v57, %v533_v54  ;;  %v574_v60 = vpop.f32.mrb[11].mxu1 }
 0x10b   :  { %v575_v61 = vadd.f32 %v574_v60, %v573_v56 }
 0x10c   :  { %v442_v62 = vadd.f32 %v572_v55, %v377_v58  ;;  %v380_v63 = vadd.f32 %v535_v59, %v829_v18 }
 0x10e   :  { %461 = vst.msk [vmem:[%s874_s3 + $0x20] sm:$0xff] %vm456_vm0, %v442_v62  ;;  %v445_v0 = vadd.f32 %v575_v61, %v380_v63  ;;  %v536_v1 = vpop.f32.mrb[12].mxu0 }
 0x10f   :  { %v576_v2 = vpop.f32.mrb[12].mxu1  ;;  %v537_v3 = vpop.f32.mrb[13].mxu0 }
 0x110   :  { %462 = vst.msk [vmem:[%s874_s3 + $0x28] sm:$0xff] %vm456_vm0, %v445_v0  ;;  %v538_v4 = vadd.f32 %v537_v3, %v536_v1  ;;  %v577_v5 = vpop.f32.mrb[13].mxu1  ;;  %v539_v6 = vpop.f32.mrb[14].mxu0 }
 0x111   :  { %v578_v7 = vadd.f32 %v577_v5, %v576_v2  ;;  %v579_v8 = vpop.f32.mrb[14].mxu1  ;;  %v540_v9 = vpop.f32.mrb[15].mxu0 }
 0x112   :  { %v385_v10 = vadd.f32 %v538_v4, %v829_v18  ;;  %v541_v11 = vadd.f32 %v540_v9, %v539_v6  ;;  %v580_v12 = vpop.f32.mrb[15].mxu1 }
 0x113   :  { %v581_v13 = vadd.f32 %v580_v12, %v579_v8 }
 0x114   :  { %v450_v14 = vadd.f32 %v578_v7, %v385_v10  ;;  %v388_v15 = vadd.f32 %v541_v11, %v829_v18 }
 0x116   :  { %463 = vst.msk [vmem:[%s874_s3 + $0x30] sm:$0xff] %vm456_vm0, %v450_v14  ;;  %v453_v16 = vadd.f32 %v581_v13, %v388_v15 }
 0x118   :  { %464 = vst.msk [vmem:[%s874_s3 + $0x38] sm:$0xff] %vm456_vm0, %v453_v16 }

// kernel: treemeshgpt_forward.11
= control target key start
LH: loop header
LB: loop body
LE: loop exit
PB: predicated region body
PF: predicated region fallthrough
CT: control target
= control target key end

     0   :  { %vm641_vm14 = vcmask 523264   ;;  %s6480_s0 = inlined_call_operand.vmem [shape: bf16[1,64,128], index: 0, kind: input, shape index: {}]   ;;  %s6481_s3 = inlined_call_operand.vmem [shape: bf16[128,384], index: 3, kind: input, shape index: {}]   ;;  %s6482_s1 = inlined_call_operand.vmem [shape: f32[1,128], index: 1, kind: input, shape index: {}]   ;;  %s6483_s2 = inlined_call_operand.vmem [shape: f32[1,128], index: 2, kind: input, shape index: {}]   ;;  %s6484_s4 = inlined_call_operand.vmem [shape: f32[1,384], index: 4, kind: input, shape index: {}]   ;;  %s6485_s5 = inlined_call_operand.vmem [shape: bf16[128,128], index: 5, kind: input, shape index: {}]   ;;  %s6486_s6 = inlined_call_operand.vmem [shape: f32[1,128], index: 6, kind: input, shape index: {}]   ;;  %s6487_s9 = inlined_call_operand.vmem [shape: bf16[128,512], index: 9, kind: input, shape index: {}]   ;;  %s6488_s11 = inlined_call_operand.vmem [shape: bf16[128,512], index: 11, kind: input, shape index: {}]   ;;  %s6489_s7 = inlined_call_operand.vmem [shape: f32[1,128], index: 7, kind: input, shape index: {}]   ;;  %s6490_s8 = inlined_call_operand.vmem [shape: f32[1,128], index: 8, kind: input, shape index: {}]   ;;  %s6491_s13 = inlined_call_operand.vmem [shape: bf16[512,128], index: 13, kind: input, shape index: {}]   ;;  %s6492_s10 = inlined_call_operand.vmem [shape: f32[1,512], index: 10, kind: input, shape index: {}]   ;;  %s6493_s12 = inlined_call_operand.vmem [shape: f32[1,512], index: 12, kind: input, shape index: {}]   ;;  %s6494_s14 = inlined_call_operand.vmem [shape: f32[1,128], index: 14, kind: input, shape index: {}]   ;;  %s6495_s15 = inlined_call_operand.vmem [shape: bf16[1,64,128], index: 15, kind: output, shape index: {}]  }
   0x1   :  { %v3617_v0 = vld [vmem:[%s6480_s0] sm:$0xff]   ;;  %v3652_v1 = vld [vmem:[%s6480_s0 + $0x8] sm:$0xff]   ;;  %v3653_v6 = vld [vmem:[%s6480_s0 + $0x10] sm:$0xff]  }
   0x2   :  { %v4522_v2 = vunpack.c.l.bf16 %v3617_v0  ;;  %v4524_v3 = vunpack.c.l.bf16 %v3652_v1  ;;  %v4528_v4 = vunpack.c.h.bf16 %v3617_v0  ;;  %v4530_v5 = vunpack.c.h.bf16 %v3652_v1  ;;  %v3654_v9 = vld [vmem:[%s6480_s0 + $0x18] sm:$0xff]   ;;  %v4043_v12 = vld [vmem:[%s6481_s3 + $0x4] ss:$12 sps:$4 sm:$0xff]   ;;  %v4045_v13 = vld [vmem:[%s6481_s3] ss:$12 sps:$4 sm:$0xff]  }
   0x3   :  { %v4537_v7 = vunpack.c.l.bf16 %v3653_v6  ;;  %v4539_v8 = vunpack.c.h.bf16 %v3653_v6  ;;  %v4546_v10 = vunpack.c.l.bf16 %v3654_v9  ;;  %v4548_v11 = vunpack.c.h.bf16 %v3654_v9  ;;  %369 = vmatprep.subr.bf16.mxu0 %v4043_v12  ;;  %v4046_v14 = vld [vmem:[%s6481_s3 + $0x1c] ss:$12 sps:$4 sm:$0xff]   ;;  %v4049_v48 = vld [vmem:[%s6481_s3 + $0x18] ss:$12 sps:$4 sm:$0xff]   ;;  %v4050_v49 = vld [vmem:[%s6481_s3 + $0x34] ss:$12 sps:$4 sm:$0xff]  }
   0x4   :  { %71 = vadd.xlane.f32.xlu0 %v4522_v2  ;;  %75 = vadd.xlane.f32.xlu1 %v4524_v3  ;;  %v4048_v15 = vld [vmem:[%s6481_s3 + $0x8] ss:$12 sps:$4 sm:$0xff]   ;;  %v4052_v50 = vld [vmem:[%s6481_s3 + $0x20] ss:$12 sps:$4 sm:$0xff]   ;;  %v4053_v51 = vld [vmem:[%s6481_s3 + $0x30] ss:$12 sps:$4 sm:$0xff]  }
   0x5   :  { %6523 = vst [vmem:[#allocation2_spill] sm:$0xff] %v4548_v11  ;;  %370 = vmatpush1.bf16.msra.mxu0 %v4045_v13  ;;  %3826 = vmatprep.subr.bf16.mxu1 %v4048_v15  ;;  %v4054_v52 = vld [vmem:[%s6481_s3 + $0x4c] ss:$12 sps:$4 sm:$0xff]   ;;  %v4057_v54 = vld [vmem:[%s6481_s3 + $0x48] ss:$12 sps:$4 sm:$0xff]   ;;  %v6496_v9 = vmov 0  }
   0x6   :  { %371 = vmatprep.subr.bf16.mxu0 %v4046_v14  ;;  %3827 = vmatpush3.bf16.msra.mxu1 %v4048_v15  ;;  %v4056_v53 = vld [vmem:[%s6481_s3 + $0x38] ss:$12 sps:$4 sm:$0xff]   ;;  %v4060_v56 = vld [vmem:[%s6481_s3 + $0x50] ss:$12 sps:$4 sm:$0xff]   ;;  %v4061_v57 = vld [vmem:[%s6481_s3 + $0x60] ss:$12 sps:$4 sm:$0xff]  }
   0x7   :  { %3828 = vmatprep.subr.bf16.mxu1 %v4052_v50  ;;  %v4058_v55 = vld [vmem:[%s6481_s3 + $0x64] ss:$12 sps:$4 sm:$0xff]   ;;  %v4062_v58 = vld [vmem:[%s6481_s3 + $0x7c] ss:$12 sps:$4 sm:$0xff]   ;;  %v4066_v61 = vld [vmem:[%s6481_s3 + $0x94] ss:$12 sps:$4 sm:$0xff]   ;;  %401 = vmatprep.mubr.bf16.mxu0 %v6496_v9 }
   0x8   :  { %73 = vadd.xlane.f32.xlu0 %v4528_v4  ;;  %77 = vadd.xlane.f32.xlu1 %v4530_v5  ;;  %v4064_v59 = vld [vmem:[%s6481_s3 + $0x68] ss:$12 sps:$4 sm:$0xff]   ;;  %v4065_v60 = vld [vmem:[%s6481_s3 + $0x78] ss:$12 sps:$4 sm:$0xff]   ;;  %v4068_v62 = vld [vmem:[%s6481_s3 + $0x80] ss:$12 sps:$4 sm:$0xff]  }
   0x9   :  { %372 = vmatpush1.bf16.msra.mxu0 %v4049_v48  ;;  %v4069_v63 = vld [vmem:[%s6481_s3 + $0x90] ss:$12 sps:$4 sm:$0xff]   ;;  %v4070_v0 = vld [vmem:[%s6481_s3 + $0xac] ss:$12 sps:$4 sm:$0xff]   ;;  %v4073_v6 = vld [vmem:[%s6481_s3 + $0xa8] ss:$12 sps:$4 sm:$0xff]  }
   0xa   :  { %373 = vmatprep.subr.bf16.mxu0 %v4050_v49  ;;  %3829 = vmatpush3.bf16.msra.mxu1 %v4052_v50  ;;  %v4072_v1 = vld [vmem:[%s6481_s3 + $0x98] ss:$12 sps:$4 sm:$0xff]   ;;  %v4074_v12 = vld [vmem:[%s6481_s3 + $0xb0] ss:$12 sps:$4 sm:$0xff]  }
   0xb   :  { %3830 = vmatprep.subr.bf16.mxu1 %v4056_v53 }
   0xc   :  { %79 = vadd.xlane.f32.xlu0 %v4537_v7  ;;  %81 = vadd.xlane.f32.xlu1 %v4539_v8 }
   0xd   :  { %374 = vmatpush1.bf16.msra.mxu0 %v4053_v51 }
   0xe   :  { %375 = vmatprep.subr.bf16.mxu0 %v4054_v52  ;;  %3831 = vmatpush3.bf16.msra.mxu1 %v4056_v53  ;;  %v3403_v52 = vld [vmem:[%s6483_s2] ss:$0 sm:$0xff] }
   0xf   :  { %3832 = vmatprep.subr.bf16.mxu1 %v4060_v56 }
  0x10   :  { %83 = vadd.xlane.f32.xlu0 %v4546_v10  ;;  %85 = vadd.xlane.f32.xlu1 %v4548_v11 }
  0x11   :  { %376 = vmatpush1.bf16.msra.mxu0 %v4057_v54 }
  0x12   :  { %377 = vmatprep.subr.bf16.mxu0 %v4058_v55  ;;  %3833 = vmatpush3.bf16.msra.mxu1 %v4060_v56 }
  0x13   :  { %3834 = vmatprep.subr.bf16.mxu1 %v4064_v59 }
  0x15   :  { %378 = vmatpush1.bf16.msra.mxu0 %v4061_v57 }
  0x16   :  { %379 = vmatprep.subr.bf16.mxu0 %v4062_v58  ;;  %3835 = vmatpush3.bf16.msra.mxu1 %v4064_v59 }
  0x17   :  { %3836 = vmatprep.subr.bf16.mxu1 %v4068_v62 }
  0x19   :  { %380 = vmatpush1.bf16.msra.mxu0 %v4065_v60 }
  0x1a   :  { %381 = vmatprep.subr.bf16.mxu0 %v4066_v61  ;;  %3837 = vmatpush3.bf16.msra.mxu1 %v4068_v62 }
  0x1b   :  { %3838 = vmatprep.subr.bf16.mxu1 %v4072_v1 }
  0x1d   :  { %382 = vmatpush1.bf16.msra.mxu0 %v4069_v63 }
  0x1e   :  { %383 = vmatprep.subr.bf16.mxu0 %v4070_v0  ;;  %3839 = vmatpush3.bf16.msra.mxu1 %v4072_v1 }
  0x1f   :  { %3840 = vmatprep.subr.bf16.mxu1 %v4074_v12 }
  0x21   :  { %384 = vmatpush1.bf16.msra.mxu0 %v4073_v6 }
  0x22   :  { %3841 = vmatpush3.bf16.msra.mxu1 %v4074_v12 }
  0x91   :  { %v72_v16 = vpop.xlane.xlu0 %71  ;;  %v76_v17 = vpop.xlane.xlu1 %75 }
  0x92   :  { %v88_v18 = vmul.f32 0.0078125, %v72_v16  ;;  %v90_v19 = vmul.f32 0.0078125, %v76_v17 }
  0x94   :  { %v4565_v20 = vsub.f32 %v4522_v2, %v88_v18  ;;  %v4568_v21 = vsub.f32 %v4524_v3, %v90_v19 }
  0x95   :  { %v74_v22 = vpop.xlane.xlu0 %73  ;;  %v78_v23 = vpop.xlane.xlu1 %77 }
  0x96   :  { %v89_v24 = vmul.f32 0.0078125, %v74_v22  ;;  %v104_v25 = vmul.f32 %v4565_v20, %v4565_v20  ;;  %v91_v26 = vmul.f32 0.0078125, %v78_v23  ;;  %v106_v29 = vmul.f32 %v4568_v21, %v4568_v21 }
  0x98   :  { %v4573_v27 = vsub.f32 %v4528_v4, %v89_v24  ;;  %112 = vadd.xlane.f32.xlu0 %v104_v25  ;;  %v4576_v28 = vsub.f32 %v4530_v5, %v91_v26 }
  0x99   :  { %v80_v30 = vpop.xlane.xlu0 %79  ;;  %v82_v31 = vpop.xlane.xlu1 %81 }
  0x9a   :  { %v92_v32 = vmul.f32 0.0078125, %v80_v30  ;;  %v105_v33 = vmul.f32 %v4573_v27, %v4573_v27  ;;  %v93_v34 = vmul.f32 0.0078125, %v82_v31  ;;  %v107_v37 = vmul.f32 %v4576_v28, %v4576_v28 }
  0x9c   :  { %v4583_v35 = vsub.f32 %v4537_v7, %v92_v32  ;;  %116 = vadd.xlane.f32.xlu0 %v106_v29  ;;  %114 = vadd.xlane.f32.xlu1 %v105_v33  ;;  %v4586_v36 = vsub.f32 %v4539_v8, %v93_v34 }
  0x9d   :  { %v84_v38 = vpop.xlane.xlu0 %83  ;;  %v86_v39 = vpop.xlane.xlu1 %85 }
  0x9e   :  { %v94_v40 = vmul.f32 0.0078125, %v84_v38  ;;  %v108_v41 = vmul.f32 %v4583_v35, %v4583_v35  ;;  %v95_v42 = vmul.f32 0.0078125, %v86_v39  ;;  %v109_v45 = vmul.f32 %v4586_v36, %v4586_v36 }
  0xa0   :  { %v4593_v43 = vsub.f32 %v4546_v10, %v94_v40  ;;  %118 = vadd.xlane.f32.xlu1 %v107_v37  ;;  %120 = vadd.xlane.f32.xlu0 %v108_v41  ;;  %v4596_v44 = vsub.f32 %v4548_v11, %v95_v42 }
  0xa2   :  { %v110_v46 = vmul.f32 %v4593_v43, %v4593_v43  ;;  %v111_v47 = vmul.f32 %v4596_v44, %v4596_v44 }
  0xa4   :  { %122 = vadd.xlane.f32.xlu1 %v109_v45  ;;  %124 = vadd.xlane.f32.xlu0 %v110_v46  ;;  %v3402_v46 = vld [vmem:[%s6482_s1] ss:$0 sm:$0xff] }
  0xa8   :  { %126 = vadd.xlane.f32.xlu1 %v111_v47 }
 0x125   :  { %v113_v13 = vpop.xlane.xlu0 %112 }
 0x126   :  { %v128_v14 = vmul.f32 0.0078125, %v113_v13 }
 0x128   :  { %v136_v15 = vadd.f32 1e-05, %v128_v14 }
 0x129   :  { %v115_v16 = vpop.xlane.xlu1 %114  ;;  %v117_v17 = vpop.xlane.xlu0 %116 }
 0x12a   :  { %4211 = vrsqrt.f32 %v136_v15  ;;  %v129_v18 = vmul.f32 0.0078125, %v115_v16  ;;  %v130_v19 = vmul.f32 0.0078125, %v117_v17 }
 0x12c   :  { %v137_v22 = vadd.f32 1e-05, %v129_v18  ;;  %v138_v23 = vadd.f32 1e-05, %v130_v19 }
 0x12d   :  { %v119_v24 = vpop.xlane.xlu1 %118  ;;  %v121_v25 = vpop.xlane.xlu0 %120 }
 0x12e   :  { %4213 = vrsqrt.f32 %v137_v22  ;;  %v131_v26 = vmul.f32 0.0078125, %v119_v24  ;;  %v132_v29 = vmul.f32 0.0078125, %v121_v25  ;;  %v224_v25 = vld [vmem:[%s6484_s4] sm:$0x7] }
 0x12f   :  { %4215 = vrsqrt.f32 %v138_v23 }
 0x130   :  { %v139_v30 = vadd.f32 1e-05, %v131_v26  ;;  %v140_v31 = vadd.f32 1e-05, %v132_v29 }
 0x131   :  { %v123_v32 = vpop.xlane.xlu1 %122  ;;  %v125_v33 = vpop.xlane.xlu0 %124 }
 0x132   :  { %4217 = vrsqrt.f32 %v139_v30  ;;  %v133_v34 = vmul.f32 0.0078125, %v123_v32  ;;  %v134_v37 = vmul.f32 0.0078125, %v125_v33 }
 0x133   :  { %4219 = vrsqrt.f32 %v140_v31 }
 0x134   :  { %v4212_v38 = vpop.eup %4211  ;;  %v141_v39 = vadd.f32 1e-05, %v133_v34  ;;  %v142_v40 = vadd.f32 1e-05, %v134_v37 }
 0x135   :  { %v127_v41 = vpop.xlane.xlu1 %126  ;;  %v152_v42 = vmul.f32 %v4212_v38, %v4565_v20 }
 0x136   :  { %4221 = vrsqrt.f32 %v141_v39  ;;  %v135_v45 = vmul.f32 0.0078125, %v127_v41 }
 0x137   :  { %4223 = vrsqrt.f32 %v142_v40  ;;  %v166_v51 = vmul.f32 %v3402_v46, %v152_v42 }
 0x138   :  { %v4214_v47 = vpop.eup %4213  ;;  %v143_v48 = vadd.f32 1e-05, %v135_v45 }
 0x139   :  { %v4216_v49 = vpop.eup %4215  ;;  %v153_v50 = vmul.f32 %v4214_v47, %v4573_v27  ;;  %v180_v57 = vadd.f32 %v3403_v52, %v166_v51 }
 0x13a   :  { %4225 = vrsqrt.f32 %v143_v48  ;;  %v154_v20 = vmul.f32 %v4216_v49, %v4568_v21 }
 0x13b   :  { %v167_v53 = vmul.f32 %v3402_v46, %v153_v50 }
 0x13c   :  { %v4218_v54 = vpop.eup %4217  ;;  %v168_v55 = vmul.f32 %v3402_v46, %v154_v20 }
 0x13d   :  { %v4220_v56 = vpop.eup %4219  ;;  %v181_v58 = vadd.f32 %v3403_v52, %v167_v53  ;;  %v155_v59 = vmul.f32 %v4218_v54, %v4576_v28 }
 0x13e   :  { %v156_v60 = vmul.f32 %v4220_v56, %v4583_v35  ;;  %v182_v63 = vadd.f32 %v3403_v52, %v168_v55 }
 0x13f   :  { %v188_v61 = vpack.c.bf16 %v181_v58, %v180_v57  ;;  %v169_v27 = vmul.f32 %v3402_v46, %v155_v59 }
 0x140   :  { %v4222_v62 = vpop.eup %4221  ;;  %v170_v6 = vmul.f32 %v3402_v46, %v156_v60 }
 0x141   :  { %v4224_v0 = vpop.eup %4223  ;;  %402 = vmatmul.mubr.bf16.vlgmr.msra.gmra.mrb[0].mxu0 %v188_v61  ;;  %3842 = vmatprep.mubr.bf16.mxu1 %v188_v61  ;;  %v183_v1 = vadd.f32 %v3403_v52, %v169_v27  ;;  %v157_v21 = vmul.f32 %v4222_v62, %v4586_v36 }
 0x142   :  { %411 = vmatprep.mubr.bf16.mxu0 %v6496_v9  ;;  %v158_v12 = vmul.f32 %v4224_v0, %v4593_v43  ;;  %v184_v35 = vadd.f32 %v3403_v52, %v170_v6  ;;  %v226_v43 = vlaneseq }
 0x143   :  { %v189_v13 = vpack.c.bf16 %v183_v1, %v182_v63  ;;  %v171_v14 = vmul.f32 %v3402_v46, %v157_v21 }
 0x144   :  { %v4226_v28 = vpop.eup %4225  ;;  %v172_v17 = vmul.f32 %v3402_v46, %v158_v12  ;;  %v4682_v24 = vshrl.u32 %v226_v43, 7  ;;  %v4699_v31 = vand.u32 127, %v226_v43 }
 0x145   :  { %3843 = vmatmul.mubr.bf16.vlgmr.msra.gmra.mrb[0].mxu1 %v189_v13  ;;  %v185_v15 = vadd.f32 %v3403_v52, %v171_v14  ;;  %v159_v16 = vmul.f32 %v4226_v28, %v4596_v44 }
 0x146   :  { %v186_v22 = vadd.f32 %v3403_v52, %v172_v17  ;;  %v4685_v44 = vsub.s32 0, %v4682_v24  ;;  %v4691_v26 = vsub.s32 1, %v4682_v24  ;;  %v4697_v30 = vsub.s32 2, %v4682_v24 }
 0x147   :  { %v190_v18 = vpack.c.bf16 %v185_v15, %v184_v35  ;;  %v173_v19 = vmul.f32 %v3402_v46, %v159_v16  ;;  %vm734_vm0 = vcmp.ge.s32.totalorder %v4699_v31, 32  ;;  %vm735_vm1 = vcmp.lt.s32.totalorder %v4699_v31, 64 }
 0x148   :  { %6524 = vst [vmem:[#allocation3_spill] sm:$0xff] %v4691_v26  ;;  %v4694_v29 = vrot.slane %v224_v25, %v4685_v44  ;;  %6525 = vst [vmem:[#allocation4_spill] sm:$0xff] %v4697_v30  ;;  %v4702_v33 = vrot.slane %v224_v25, %v4691_v26  ;;  %v237_v41 = vrot.slane %v224_v25, %v4697_v30  ;;  %vm543_vm2 = vcmp.lt.s32.totalorder %v4699_v31, 32 }
 0x149   :  { %412 = vmatmul.mubr.bf16.gmra.mrb[4].mxu0 %v189_v13  ;;  %3846 = vmatprep.mubr.bf16.mxu1 %v190_v18  ;;  %v187_v36 = vadd.f32 %v3403_v52, %v173_v19  ;;  %vm4714_vm3 = vmand %vm734_vm0, %vm735_vm1  ;;  %vm1079_vm8 = vcmp.ge.s32.totalorder %v4699_v31, 64  ;;  %vm1080_vm9 = vcmp.lt.s32.totalorder %v4699_v31, 96  ;;  %vm534_vm13 = vcmp.le.s32.totalorder %v4699_v31, %v4682_v24 }
 0x14a   :  { %421 = vmatprep.mubr.bf16.mxu0 %v6496_v9  ;;  %vm4722_vm4 = vmpackc.low %vm543_vm2, %vm543_vm2 }
 0x14b   :  { %v191_v23 = vpack.c.bf16 %v187_v36, %v186_v22  ;;  %vm4736_vm5 = vmpackc.low %vm4714_vm3, %vm4714_vm3 }
 0x14c   :  { %vm1081_vm10 = vmand %vm1079_vm8, %vm1080_vm9 }
 0x14d   :  { %3847 = vmatmul.mubr.bf16.gmra.mrb[4].mxu1 %v191_v23  ;;  %vm4836_vm11 = vmpackc.low %vm1081_vm10, %vm1081_vm10 }
 0x151   :  { %422 = vmatmul.mubr.bf16.gmra.mrb[8].mxu0 %v190_v18 }
 0x152   :  { %431 = vmatprep.mubr.bf16.mxu0 %v6496_v9 }
 0x159   :  { %432 = vmatmul.mubr.bf16.gmra.mrb[12].mxu0 %v191_v23 }
 0x214   :  { %v403_v32 = vpop.f32.mrb[0].mxu0 }
 0x215   :  { %v404_v34 = vadd.f32 %v403_v32, %v4694_v29  ;;  %v405_v37 = vpop.f32.mrb[1].mxu0 }
 0x216   :  { %v407_v38 = vpop.f32.mrb[2].mxu0  ;;  %v406_v42 = vadd.f32 %v405_v37, %v4702_v33 }
 0x217   :  { %v408_v39 = vadd.f32 %v407_v38, %v4694_v29  ;;  %v409_v40 = vpop.f32.mrb[3].mxu0  ;;  %v507_v47 = vmul.f32 0.17677669, %v404_v34 }
 0x218   :  { %v410_v45 = vadd.f32 %v409_v40, %v4702_v33  ;;  %v3844_v46 = vpop.f32.mrb[0].mxu1 }
 0x219   :  { %v508_v48 = vmul.f32 0.17677669, %v408_v39  ;;  %v476_v49 = vpop.f32.mrb[1].mxu1  ;;  %v485_v53 = vadd.f32 %v3844_v46, %v237_v41 }
 0x21a   :  { %v4712_v50 = vpack.c.bf16 %v410_v45, %v406_v42  ;;  %v3845_v51 = vpop.f32.mrb[2].mxu1  ;;  %v477_v56 = vadd.f32 %v476_v49, %v237_v41 }
 0x21b   :  { %v4718_v20 = vpack.c.bf16 %v508_v48, %v507_v47  ;;  %v488_v54 = vadd.f32 %v3845_v51, %v237_v41  ;;  %v479_v55 = vpop.f32.mrb[3].mxu1 }
 0x21c   :  { %v480_v57 = vadd.f32 %v479_v55, %v237_v41  ;;  %v413_v58 = vpop.f32.mrb[4].mxu0  ;;  %3850 = vmatprep.subr.bf16.mxu0 %v4712_v50  ;;  %3866 = vmatprep.subr.bf16.mxu1 %v4712_v50  ;;  %v750_v55 = vsel %vm4736_vm5, 65537, %v6496_v9 }
 0x21d   :  { %v4726_v60 = vpack.c.bf16 %v488_v54, %v485_v53  ;;  %v414_v61 = vadd.f32 %v413_v58, %v4694_v29  ;;  %v415_v27 = vpop.f32.mrb[5].mxu0  ;;  %3851 = vmatpush3.bf16.xpose.msra.mxu0 %v4712_v50  ;;  %3858 = vmatprep.mubr.msk.bf16.mxu0 %vm4722_vm4, %v4718_v20  ;;  %v558_v53 = vsel %vm4722_vm4, 65537, %v6496_v9 }
 0x21e   :  { %v4740_v63 = vpack.c.bf16 %v480_v57, %v477_v56  ;;  %3867 = vmatpush3.bf16.xpose.msra.mxu1 %v4712_v50  ;;  %3874 = vmatprep.mubr.msk.bf16.mxu1 %vm4736_vm5, %v4718_v20  ;;  %v417_v0 = vpop.f32.mrb[6].mxu0  ;;  %v416_v6 = vadd.f32 %v415_v27, %v4702_v33  ;;  %v562_v27 = vrot.slane %v558_v53, %v4685_v44  ;;  %v4915_v53 = vadd.s32 32, %v4682_v24 }
 0x21f   :  { %v418_v1 = vadd.f32 %v417_v0, %v4694_v29  ;;  %v419_v21 = vpop.f32.mrb[7].mxu0  ;;  %v509_v14 = vmul.f32 0.17677669, %v414_v61 }
 0x220   :  { %v420_v12 = vadd.f32 %v419_v21, %v4702_v33  ;;  %v3848_v13 = vpop.f32.mrb[4].mxu1  ;;  %v754_v21 = vrot.slane %v750_v55, %v4685_v44  ;;  %vm4791_vm6 = vcmp.ne.s16.totalorder %v562_v27, 0  ;;  %vm538_vm2 = vcmp.le.s32.totalorder %v4699_v31, %v4915_v53 }
 0x221   :  { %v510_v28 = vmul.f32 0.17677669, %v418_v1  ;;  %v492_v35 = vpop.f32.mrb[5].mxu1  ;;  %v501_v18 = vadd.f32 %v3848_v13, %v237_v41 }
 0x222   :  { %v4749_v15 = vpack.c.bf16 %v420_v12, %v416_v6  ;;  %v3849_v16 = vpop.f32.mrb[6].mxu1  ;;  %v493_v36 = vadd.f32 %v492_v35, %v237_v41  ;;  %vm4796_vm7 = vcmp.ne.s16.totalorder %v754_v21, 0 }
 0x223   :  { %v4751_v17 = vpack.c.bf16 %v510_v28, %v509_v14  ;;  %v504_v19 = vadd.f32 %v3849_v16, %v237_v41  ;;  %v495_v22 = vpop.f32.mrb[7].mxu1  ;;  %v756_v13 = vsel %vm4796_vm7, %v4740_v63, 0  ;;  %v564_v14 = vsel %vm4791_vm6, %v4740_v63, 0 }
 0x224   :  { %v496_v23 = vadd.f32 %v495_v22, %v237_v41  ;;  %v423_v43 = vpop.f32.mrb[8].mxu0  ;;  %3852 = vmatprep.subr.bf16.mxu0 %v4749_v15  ;;  %3868 = vmatprep.subr.bf16.mxu1 %v4749_v15  ;;  %v757_v28 = vsel %vm4796_vm7, %v4726_v60, 0  ;;  %v565_v16 = vsel %vm4791_vm6, %v4726_v60, 0 }
 0x225   :  { %v4755_v25 = vpack.c.bf16 %v504_v19, %v501_v18  ;;  %v424_v32 = vadd.f32 %v423_v43, %v4694_v29  ;;  %v425_v34 = vpop.f32.mrb[9].mxu0  ;;  %3853 = vmatpush3.bf16.xpose.msra.mxu0 %v4749_v15  ;;  %v1095_v18 = vsel %vm4836_vm11, 65537, %v6496_v9  ;;  %v4886_v43 = vadd.s32 16, %v4682_v24 }
 0x226   :  { %v4759_v37 = vpack.c.bf16 %v496_v23, %v493_v36  ;;  %3869 = vmatpush3.bf16.xpose.msra.mxu1 %v4749_v15  ;;  %v427_v38 = vpop.f32.mrb[10].mxu0  ;;  %v426_v41 = vadd.f32 %v425_v34, %v4702_v33  ;;  %v1099_v59 = vrot.slane %v1095_v18, %v4685_v44 }
 0x227   :  { %v428_v39 = vadd.f32 %v427_v38, %v4694_v29  ;;  %v429_v40 = vpop.f32.mrb[11].mxu0  ;;  %v511_v45 = vmul.f32 0.17677669, %v424_v32  ;;  %v759_v62 = vsel %vm4796_vm7, %v4755_v25, 0  ;;  %v567_v36 = vsel %vm4791_vm6, %v4755_v25, 0 }
 0x228   :  { %v430_v42 = vadd.f32 %v429_v40, %v4702_v33  ;;  %v758_v19 = vsel %vm4796_vm7, %v4759_v37, 0  ;;  %v566_v22 = vsel %vm4791_vm6, %v4759_v37, 0  ;;  %vm4878_vm12 = vcmp.ne.s16.totalorder %v1099_v59, 0 }
 0x229   :  { %v512_v46 = vmul.f32 0.17677669, %v428_v39  ;;  %v4889_v32 = vadd.s32 8, %v4682_v24  ;;  %v4896_v38 = vadd.s32 24, %v4682_v24  ;;  %vm536_vm15 = vcmp.le.s32.totalorder %v4699_v31, %v4886_v43 }
 0x22a   :  { %v4765_v47 = vpack.c.bf16 %v430_v42, %v426_v41 }
 0x22b   :  { %v4767_v48 = vpack.c.bf16 %v512_v46, %v511_v45  ;;  %vm535_vm0 = vcmp.le.s32.totalorder %v4699_v31, %v4889_v32  ;;  %vm537_vm1 = vcmp.le.s32.totalorder %v4699_v31, %v4896_v38 }
 0x22c   :  { %v433_v49 = vpop.f32.mrb[12].mxu0  ;;  %3854 = vmatprep.subr.bf16.mxu0 %v4765_v47  ;;  %3870 = vmatprep.subr.bf16.mxu1 %v4765_v47 }
 0x22d   :  { %v434_v51 = vadd.f32 %v433_v49, %v4694_v29  ;;  %v435_v52 = vpop.f32.mrb[13].mxu0  ;;  %3855 = vmatpush3.bf16.xpose.msra.mxu0 %v4765_v47 }
 0x22e   :  { %3871 = vmatpush3.bf16.xpose.msra.mxu1 %v4765_v47  ;;  %v437_v54 = vpop.f32.mrb[14].mxu0  ;;  %v436_v58 = vadd.f32 %v435_v52, %v4702_v33 }
 0x22f   :  { %v438_v56 = vadd.f32 %v437_v54, %v4694_v29  ;;  %v439_v57 = vpop.f32.mrb[15].mxu0  ;;  %v513_v0 = vmul.f32 0.17677669, %v434_v51 }
 0x230   :  { %v440_v61 = vadd.f32 %v439_v57, %v4702_v33  ;;  %v4925_v57 = vadd.s32 48, %v4682_v24 }
 0x231   :  { %v514_v1 = vmul.f32 0.17677669, %v438_v56 }
 0x232   :  { %v4785_v6 = vpack.c.bf16 %v440_v61, %v436_v58  ;;  %v4928_v58 = vadd.s32 40, %v4682_v24  ;;  %vm540_vm3 = vcmp.le.s32.totalorder %v4699_v31, %v4925_v57 }
 0x233   :  { %v4787_v12 = vpack.c.bf16 %v514_v1, %v513_v0  ;;  %v4939_v1 = vadd.s32 56, %v4682_v24 }
 0x234   :  { %3856 = vmatprep.subr.bf16.mxu0 %v4785_v6  ;;  %3872 = vmatprep.subr.bf16.mxu1 %v4785_v6 }
 0x235   :  { %3857 = vmatpush3.bf16.xpose.msra.mxu0 %v4785_v6 }
 0x236   :  { %3873 = vmatpush3.bf16.xpose.msra.mxu1 %v4785_v6  ;;  %4030 = vmatprep.subr.msk.bf16.mxu0 %vm4791_vm6, %v4740_v63 }
 0x237   :  { %4026 = vmatprep.subr.msk.bf16.mxu1 %vm4796_vm7, %v4740_v63 }
 0x23c   :  { %3859 = vmatmul.mubr.msk.bf16.vlgmr.msra.gmra.mrb[16].mxu0 %vm4722_vm4, %v4751_v17 }
 0x23d   :  { %3875 = vmatmul.mubr.msk.bf16.vlgmr.msra.gmra.mrb[8].mxu1 %vm4736_vm5, %v4751_v17  ;;  %3862 = vmatprep.mubr.msk.bf16.mxu0 %vm4722_vm4, %v4767_v48 }
 0x23e   :  { %3878 = vmatprep.mubr.msk.bf16.mxu1 %vm4736_vm5, %v4767_v48  ;;  %3883 = vmatpush3.bf16.msra.mxu1 %v756_v13 }
 0x23f   :  { %3899 = vmatpush3.bf16.msra.mxu0 %v564_v14  ;;  %4027 = vmatprep.subr.msk.bf16.mxu1 %vm4796_vm7, %v4726_v60 }
 0x240   :  { %4031 = vmatprep.subr.msk.bf16.mxu0 %vm4791_vm6, %v4726_v60 }
 0x242   :  { %3885 = vmatpush3.bf16.msra.mxu1 %v757_v28 }
 0x243   :  { %3901 = vmatpush3.bf16.msra.mxu0 %v565_v16  ;;  %4028 = vmatprep.subr.msk.bf16.mxu1 %vm4796_vm7, %v4759_v37 }
 0x244   :  { %4032 = vmatprep.subr.msk.bf16.mxu0 %vm4791_vm6, %v4759_v37  ;;  %3863 = vmatmul.mubr.msk.bf16.gmra.mrb[20].mxu0 %vm4722_vm4, %v4787_v12  ;;  %vm539_vm4 = vcmp.le.s32.totalorder %v4699_v31, %v4928_v58 }
 0x245   :  { %3879 = vmatmul.mubr.msk.bf16.gmra.mrb[12].mxu1 %vm4736_vm5, %v4787_v12  ;;  %vm541_vm5 = vcmp.le.s32.totalorder %v4699_v31, %v4939_v1 }
 0x246   :  { %3887 = vmatpush3.bf16.msra.mxu1 %v758_v19 }
 0x247   :  { %3903 = vmatpush3.bf16.msra.mxu0 %v566_v22  ;;  %4029 = vmatprep.subr.msk.bf16.mxu1 %vm4796_vm7, %v4755_v25 }
 0x248   :  { %4033 = vmatprep.subr.msk.bf16.mxu0 %vm4791_vm6, %v4755_v25  ;;  %vm1355_vm6 = vcmp.ge.s32.totalorder %v4699_v31, 96 }
 0x249   :  { %vm5101_vm7 = vmpackc.low %vm1355_vm6, %vm1355_vm6 }
 0x24a   :  { %3889 = vmatpush3.bf16.msra.mxu1 %v759_v62 }
 0x24b   :  { %3905 = vmatpush3.bf16.msra.mxu0 %v567_v36  ;;  %3914 = vmatprep.subr.bf16.mxu1 %v4712_v50 }
 0x24c   :  { %4034 = vmatprep.subr.msk.bf16.mxu0 %vm4878_vm12, %v4740_v63 }
 0x30f   :  { %v4891_v34 = vpop.f32.mrb[16].mxu0 }
 0x310   :  { %v3876_v39 = vpop.f32.mrb[8].mxu1  ;;  %v4898_v40 = vpop.f32.mrb[17].mxu0 }
 0x311   :  { %v794_v41 = vpop.f32.mrb[9].mxu1  ;;  %v4902_v42 = vpop.f32.mrb[18].mxu0  ;;  %v827_v54 = vsel %vm536_vm15, %v3876_v39, -1e+30 }
 0x312   :  { %v825_v45 = vsel %vm534_vm13, %v794_v41, -1e+30  ;;  %v3877_v46 = vpop.f32.mrb[10].mxu1  ;;  %v4909_v49 = vpop.f32.mrb[19].mxu0  ;;  %v839_v27 = vsel %vm641_vm14, %v827_v54, -inf }
 0x313   :  { %v797_v51 = vpop.f32.mrb[11].mxu1  ;;  %v833_v52 = vsel %vm641_vm14, %v825_v45, -inf  ;;  %v828_v61 = vsel %vm537_vm1, %v3877_v46, -1e+30 }
 0x314   :  { %v826_v55 = vsel %vm535_vm0, %v797_v51, -1e+30  ;;  %834 = vmax.xlane.f32.xlu0 %v833_v52  ;;  %v842_v13 = vsel %vm641_vm14, %v828_v61, -inf }
 0x315   :  { %v836_v56 = vsel %vm641_vm14, %v826_v55, -inf }
 0x316   :  { %837 = vmax.xlane.f32.xlu1 %v836_v56 }
 0x317   :  { %v4934_v0 = vpop.f32.mrb[20].mxu0 }
 0x318   :  { %840 = vmax.xlane.f32.xlu0 %v839_v27  ;;  %v3880_v21 = vpop.f32.mrb[12].mxu1  ;;  %v4941_v29 = vpop.f32.mrb[21].mxu0 }
 0x319   :  { %v810_v33 = vpop.f32.mrb[13].mxu1  ;;  %v4946_v14 = vpop.f32.mrb[22].mxu0  ;;  %v831_v59 = vsel %vm540_vm3, %v3880_v21, -1e+30 }
 0x31a   :  { %v829_v28 = vsel %vm538_vm2, %v810_v33, -1e+30  ;;  %843 = vmax.xlane.f32.xlu1 %v842_v13  ;;  %v3881_v16 = vpop.f32.mrb[14].mxu1  ;;  %v4953_v18 = vpop.f32.mrb[23].mxu0  ;;  %v851_v41 = vsel %vm641_vm14, %v831_v59, -inf }
 0x31b   :  { %v813_v19 = vpop.f32.mrb[15].mxu1  ;;  %v845_v22 = vsel %vm641_vm14, %v829_v28, -inf  ;;  %v832_v39 = vsel %vm541_vm5, %v3881_v16, -1e+30 }
 0x31c   :  { %v830_v62 = vsel %vm539_vm4, %v813_v19, -1e+30  ;;  %846 = vmax.xlane.f32.xlu0 %v845_v22  ;;  %v854_v46 = vsel %vm641_vm14, %v832_v39, -inf }
 0x31d   :  { %v848_v36 = vsel %vm641_vm14, %v830_v62, -inf }
 0x31e   :  { %849 = vmax.xlane.f32.xlu1 %v848_v36 }
 0x320   :  { %852 = vmax.xlane.f32.xlu0 %v851_v41 }
 0x322   :  { %855 = vmax.xlane.f32.xlu1 %v854_v46 }
 0x3a1   :  { %v835_v51 = vpop.xlane.xlu0 %834 }
 0x3a2   :  { %v857_v52 = vsub.f32 %v825_v45, %v835_v51 }
 0x3a3   :  { %v838_v56 = vpop.xlane.xlu1 %837 }
 0x3a4   :  { %v865_v27 = vmul.f32 1.442695, %v857_v52  ;;  %v858_v21 = vsub.f32 %v826_v55, %v838_v56 }
 0x3a5   :  { %v841_v33 = vpop.xlane.xlu0 %840 }
 0x3a6   :  { %4227 = vpow2.f32 %v865_v27  ;;  %v867_v13 = vmul.f32 1.442695, %v858_v21  ;;  %v859_v19 = vsub.f32 %v827_v54, %v841_v33 }
 0x3a7   :  { %v844_v22 = vpop.xlane.xlu1 %843 }
 0x3a8   :  { %4229 = vpow2.f32 %v867_v13  ;;  %v869_v9 = vmul.f32 1.442695, %v859_v19  ;;  %v860_v16 = vsub.f32 %v828_v61, %v844_v22 }
 0x3a9   :  { %v847_v36 = vpop.xlane.xlu0 %846 }
 0x3aa   :  { %4231 = vpow2.f32 %v869_v9  ;;  %v871_v26 = vmul.f32 1.442695, %v860_v16  ;;  %v861_v41 = vsub.f32 %v829_v28, %v847_v36  ;;  %v5004_v36 = vsel %vm534_vm13, %v4898_v40, -1e+30 }
 0x3ab   :  { %v850_v30 = vpop.xlane.xlu1 %849  ;;  %v5020_v40 = vsel %vm536_vm15, %v4891_v34, -1e+30  ;;  %v5036_v34 = vsel %vm538_vm2, %v4941_v29, -1e+30  ;;  %v5052_v29 = vsel %vm540_vm3, %v4934_v0, -1e+30 }
 0x3ac   :  { %4233 = vpow2.f32 %v871_v26  ;;  %v873_v46 = vmul.f32 1.442695, %v861_v41  ;;  %v862_v11 = vsub.f32 %v830_v62, %v850_v30 }
 0x3ad   :  { %v853_v45 = vpop.xlane.xlu0 %852 }
 0x3ae   :  { %4235 = vpow2.f32 %v873_v46  ;;  %v875_v51 = vmul.f32 1.442695, %v862_v11  ;;  %v863_v55 = vsub.f32 %v831_v59, %v853_v45  ;;  %v5012_v46 = vsel %vm535_vm0, %v4909_v49, -1e+30 }
 0x3af   :  { %v856_v52 = vpop.xlane.xlu1 %855  ;;  %v642_v45 = vsel %vm641_vm14, %v5004_v36, -inf  ;;  %v5028_v49 = vsel %vm537_vm1, %v4902_v42, -1e+30  ;;  %v5044_v42 = vsel %vm539_vm4, %v4953_v18, -1e+30 }
 0x3b0   :  { %v4970_v56 = vpop.eup %4227  ;;  %4237 = vpow2.f32 %v875_v51  ;;  %v877_v54 = vmul.f32 1.442695, %v863_v55  ;;  %v864_v27 = vsub.f32 %v832_v39, %v856_v52  ;;  %v645_v51 = vsel %vm641_vm14, %v5012_v46, -inf }
 0x3b1   :  { %v881_v61 = vsel %vm641_vm14, %v4970_v56, 0.0  ;;  %v648_v55 = vsel %vm641_vm14, %v5020_v40, -inf  ;;  %v651_v52 = vsel %vm641_vm14, %v5028_v49, -inf  ;;  %v5060_v18 = vsel %vm541_vm5, %v4946_v14, -1e+30 }
 0x3b2   :  { %v4974_v9 = vpop.eup %4229  ;;  %4239 = vpow2.f32 %v877_v54  ;;  %v879_v28 = vmul.f32 1.442695, %v864_v27  ;;  %882 = vadd.xlane.f32.xlu0 %v881_v61  ;;  %v654_v54 = vsel %vm641_vm14, %v5036_v34, -inf  ;;  %v657_v27 = vsel %vm641_vm14, %v5044_v42, -inf }
 0x3b3   :  { %v884_v26 = vsel %vm641_vm14, %v4974_v9, 0.0  ;;  %v660_v61 = vsel %vm641_vm14, %v5052_v29, -inf }
 0x3b4   :  { %v4978_v30 = vpop.eup %4231  ;;  %4241 = vpow2.f32 %v879_v28  ;;  %885 = vadd.xlane.f32.xlu1 %v884_v26  ;;  %v663_v28 = vsel %vm641_vm14, %v5060_v18, -inf }
 0x3b5   :  { %v887_v11 = vsel %vm641_vm14, %v4978_v30, 0.0 }
 0x3b6   :  { %v4982_v59 = vpop.eup %4233  ;;  %888 = vadd.xlane.f32.xlu0 %v887_v11 }
 0x3b7   :  { %v890_v62 = vsel %vm641_vm14, %v4982_v59, 0.0 }
 0x3b8   :  { %v4986_v39 = vpop.eup %4235  ;;  %891 = vadd.xlane.f32.xlu1 %v890_v62 }
 0x3b9   :  { %v893_v21 = vsel %vm641_vm14, %v4986_v39, 0.0 }
 0x3ba   :  { %v4990_v33 = vpop.eup %4237  ;;  %894 = vadd.xlane.f32.xlu0 %v893_v21 }
 0x3bb   :  { %v896_v13 = vsel %vm641_vm14, %v4990_v33, 0.0 }
 0x3bc   :  { %v4994_v19 = vpop.eup %4239  ;;  %897 = vadd.xlane.f32.xlu1 %v896_v13 }
 0x3bd   :  { %v899_v22 = vsel %vm641_vm14, %v4994_v19, 0.0 }
 0x3be   :  { %v4998_v16 = vpop.eup %4241  ;;  %900 = vadd.xlane.f32.xlu0 %v899_v22 }
 0x3bf   :  { %v902_v41 = vsel %vm641_vm14, %v4998_v16, 0.0 }
 0x3c0   :  { %903 = vadd.xlane.f32.xlu1 %v902_v41 }
 0x3c2   :  { %643 = vmax.xlane.f32.xlu0 %v642_v45 }
 0x3c4   :  { %646 = vmax.xlane.f32.xlu1 %v645_v51 }
 0x3c6   :  { %649 = vmax.xlane.f32.xlu0 %v648_v55 }
 0x3c8   :  { %652 = vmax.xlane.f32.xlu1 %v651_v52 }
 0x3ca   :  { %655 = vmax.xlane.f32.xlu0 %v654_v54 }
 0x3cc   :  { %658 = vmax.xlane.f32.xlu1 %v657_v27 }
 0x3ce   :  { %661 = vmax.xlane.f32.xlu0 %v660_v61 }
 0x3d0   :  { %664 = vmax.xlane.f32.xlu1 %v663_v28 }
 0x43f   :  { %v883_v0 = vpop.xlane.xlu0 %882 }
 0x440   :  { %4243 = vrcp.f32 %v883_v0 }
 0x441   :  { %v886_v26 = vpop.xlane.xlu1 %885 }
 0x442   :  { %4245 = vrcp.f32 %v886_v26 }
 0x443   :  { %v889_v11 = vpop.xlane.xlu0 %888 }
 0x444   :  { %4247 = vrcp.f32 %v889_v11 }
 0x445   :  { %v892_v62 = vpop.xlane.xlu1 %891 }
 0x446   :  { %4249 = vrcp.f32 %v892_v62 }
 0x447   :  { %v895_v21 = vpop.xlane.xlu0 %894 }
 0x448   :  { %4251 = vrcp.f32 %v895_v21 }
 0x449   :  { %v898_v14 = vpop.xlane.xlu1 %897 }
 0x44a   :  { %v4244_v13 = vpop.eup %4243  ;;  %4253 = vrcp.f32 %v898_v14 }
 0x44b   :  { %v901_v22 = vpop.xlane.xlu0 %900  ;;  %v913_v51 = vmul.f32 %v4244_v13, %v4970_v56 }
 0x44c   :  { %v4246_v41 = vpop.eup %4245  ;;  %4255 = vrcp.f32 %v901_v22 }
 0x44d   :  { %v904_v45 = vpop.xlane.xlu1 %903  ;;  %v914_v55 = vmul.f32 %v4246_v41, %v4974_v9 }
 0x44e   :  { %v4248_v52 = vpop.eup %4247  ;;  %4257 = vrcp.f32 %v904_v45 }
 0x44f   :  { %v921_v54 = vpack.c.bf16 %v914_v55, %v913_v51  ;;  %v915_v61 = vmul.f32 %v4248_v52, %v4978_v30 }
 0x450   :  { %v4250_v27 = vpop.eup %4249 }
 0x451   :  { %v916_v28 = vmul.f32 %v4250_v27, %v4982_v59  ;;  %3890 = vmatprep.mubr.msk.bf16.mxu1 %vm641_vm14, %v921_v54 }
 0x452   :  { %v4252_v0 = vpop.eup %4251 }
 0x453   :  { %v922_v26 = vpack.c.bf16 %v916_v28, %v915_v61  ;;  %v917_v62 = vmul.f32 %v4252_v0, %v4986_v39  ;;  %v1104_v39 = vsel %vm4878_vm12, %v4755_v25, 0 }
 0x454   :  { %v4254_v11 = vpop.eup %4253 }
 0x455   :  { %3891 = vmatmul.mubr.msk.bf16.vlgmr.msra.gmra.mrb[16].mxu1 %vm641_vm14, %v922_v26  ;;  %v918_v56 = vmul.f32 %v4254_v11, %v4990_v33 }
 0x456   :  { %v4256_v9 = vpop.eup %4255  ;;  %3915 = vmatpush3.bf16.xpose.msra.mxu1 %v4712_v50 }
 0x457   :  { %3916 = vmatprep.subr.bf16.mxu1 %v4749_v15  ;;  %v923_v21 = vpack.c.bf16 %v918_v56, %v917_v62  ;;  %v919_v59 = vmul.f32 %v4256_v9, %v4994_v19 }
 0x458   :  { %v4258_v30 = vpop.eup %4257 }
 0x459   :  { %3894 = vmatprep.mubr.msk.bf16.mxu1 %vm641_vm14, %v923_v21  ;;  %v920_v14 = vmul.f32 %v4258_v30, %v4998_v16 }
 0x45b   :  { %v924_v13 = vpack.c.bf16 %v920_v14, %v919_v59 }
 0x45d   :  { %3895 = vmatmul.mubr.msk.bf16.gmra.mrb[20].mxu1 %vm641_vm14, %v924_v13 }
 0x45e   :  { %3917 = vmatpush3.bf16.xpose.msra.mxu1 %v4749_v15  ;;  %3922 = vmatprep.mubr.msk.bf16.mxu1 %vm4836_vm11, %v4718_v20 }
 0x45f   :  { %3918 = vmatprep.subr.bf16.mxu1 %v4765_v47 }
 0x466   :  { %3919 = vmatpush3.bf16.xpose.msra.mxu1 %v4765_v47 }
 0x467   :  { %3920 = vmatprep.subr.bf16.mxu1 %v4785_v6 }
 0x46e   :  { %3921 = vmatpush3.bf16.xpose.msra.mxu1 %v4785_v6 }
 0x46f   :  { %3946 = vmatprep.subr.bf16.mxu1 %v4712_v50 }
 0x475   :  { %3923 = vmatmul.mubr.msk.bf16.vlgmr.msra.gmra.mrb[24].mxu1 %vm4836_vm11, %v4751_v17 }
 0x476   :  { %3926 = vmatprep.mubr.msk.bf16.mxu1 %vm4836_vm11, %v4767_v48  ;;  %3947 = vmatpush3.bf16.xpose.msra.mxu1 %v4712_v50  ;;  %v6542_v50 = vmov 0  }
 0x477   :  { %3948 = vmatprep.subr.bf16.mxu1 %v4749_v15 }
 0x47d   :  { %3927 = vmatmul.mubr.msk.bf16.gmra.mrb[28].mxu1 %vm4836_vm11, %v4787_v12 }
 0x47e   :  { %3949 = vmatpush3.bf16.xpose.msra.mxu1 %v4749_v15  ;;  %3954 = vmatprep.mubr.msk.bf16.mxu1 %vm5101_vm7, %v4718_v20 }
 0x47f   :  { %3950 = vmatprep.subr.bf16.mxu1 %v4765_v47 }
 0x486   :  { %3951 = vmatpush3.bf16.xpose.msra.mxu1 %v4765_v47 }
 0x487   :  { %3952 = vmatprep.subr.bf16.mxu1 %v4785_v6 }
 0x48e   :  { %3953 = vmatpush3.bf16.xpose.msra.mxu1 %v4785_v6 }
 0x495   :  { %3955 = vmatmul.mubr.msk.bf16.vlgmr.msra.gmra.mrb[32].mxu1 %vm5101_vm7, %v4751_v17 }
 0x496   :  { %3958 = vmatprep.mubr.msk.bf16.mxu1 %vm5101_vm7, %v4767_v48 }
 0x49d   :  { %3959 = vmatmul.mubr.msk.bf16.gmra.mrb[36].mxu1 %vm5101_vm7, %v4787_v12 }
 0x49e   :  { %2147 = vmatprep.mubr.bf16.mxu1 %v6542_v50 }
 0x528   :  { %v5123_v20 = vpop.f32.mrb[16].mxu1 }
 0x529   :  { %v5125_v15 = vpop.f32.mrb[17].mxu1 }
 0x52a   :  { %v5127_v47 = vpop.f32.mrb[18].mxu1 }
 0x52b   :  { %v5129_v6 = vpop.f32.mrb[19].mxu1 }
 0x530   :  { %v5131_v35 = vpop.f32.mrb[20].mxu1 }
 0x531   :  { %v5133_v17 = vpop.f32.mrb[21].mxu1 }
 0x532   :  { %v5135_v33 = vpop.f32.mrb[22].mxu1 }
 0x533   :  { %v5137_v48 = vpop.f32.mrb[23].mxu1 }
 0x548   :  { %v3924_v19 = vpop.f32.mrb[24].mxu1 }
 0x549   :  { %v1139_v12 = vpop.f32.mrb[25].mxu1  ;;  %v5149_v51 = vsel %vm536_vm15, %v3924_v19, -1e+30  ;;  %v644_v19 = vpop.xlane.xlu0 %643 }
 0x54a   :  { %v5142_v16 = vsel %vm534_vm13, %v1139_v12, -1e+30  ;;  %v3925_v22 = vpop.f32.mrb[26].mxu1  ;;  %v1184_v27 = vsel %vm641_vm14, %v5149_v51, -inf  ;;  %v647_v12 = vpop.xlane.xlu1 %646 }
 0x54b   :  { %v1142_v41 = vpop.f32.mrb[27].mxu1  ;;  %v1178_v45 = vsel %vm641_vm14, %v5142_v16, -inf  ;;  %v5161_v54 = vsel %vm537_vm1, %v3925_v22, -1e+30 }
 0x54c   :  { %v5154_v55 = vsel %vm535_vm0, %v1142_v41, -1e+30  ;;  %1179 = vmax.xlane.f32.xlu0 %v1178_v45  ;;  %v1187_v0 = vsel %vm641_vm14, %v5161_v54, -inf  ;;  %v666_v45 = vsub.f32 %v5004_v36, %v644_v19 }
 0x54d   :  { %v1181_v52 = vsel %vm641_vm14, %v5154_v55, -inf  ;;  %v650_v22 = vpop.xlane.xlu0 %649 }
 0x54e   :  { %1182 = vmax.xlane.f32.xlu1 %v1181_v52  ;;  %v653_v41 = vpop.xlane.xlu1 %652  ;;  %v667_v52 = vsub.f32 %v5012_v46, %v647_v12 }
 0x550   :  { %v3928_v61 = vpop.f32.mrb[28].mxu1  ;;  %1185 = vmax.xlane.f32.xlu0 %v1184_v27  ;;  %v676_v46 = vmul.f32 1.442695, %v667_v52 }
 0x551   :  { %v1155_v28 = vpop.f32.mrb[29].mxu1  ;;  %v5177_v9 = vsel %vm540_vm3, %v3928_v61, -1e+30  ;;  %v656_v61 = vpop.xlane.xlu0 %655 }
 0x552   :  { %v5170_v26 = vsel %vm538_vm2, %v1155_v28, -1e+30  ;;  %v3929_v11 = vpop.f32.mrb[30].mxu1  ;;  %1188 = vmax.xlane.f32.xlu1 %v1187_v0  ;;  %v1196_v14 = vsel %vm641_vm14, %v5177_v9, -inf  ;;  %v674_v0 = vmul.f32 1.442695, %v666_v45 }
 0x553   :  { %v1158_v62 = vpop.f32.mrb[31].mxu1  ;;  %v1190_v56 = vsel %vm641_vm14, %v5170_v26, -inf  ;;  %v5189_v59 = vsel %vm541_vm5, %v3929_v11, -1e+30  ;;  %v668_v11 = vsub.f32 %v5020_v40, %v650_v22  ;;  %v670_v22 = vsub.f32 %v5036_v34, %v656_v61 }
 0x554   :  { %v5182_v21 = vsel %vm539_vm4, %v1158_v62, -1e+30  ;;  %1191 = vmax.xlane.f32.xlu0 %v1190_v56  ;;  %v1199_v13 = vsel %vm641_vm14, %v5189_v59, -inf  ;;  %4259 = vpow2.f32 %v674_v0 }
 0x555   :  { %v1193_v30 = vsel %vm641_vm14, %v5182_v21, -inf  ;;  %v678_v12 = vmul.f32 1.442695, %v668_v11  ;;  %v662_v45 = vpop.xlane.xlu0 %661  ;;  %4261 = vpow2.f32 %v676_v46  ;;  %v682_v38 = vmul.f32 1.442695, %v670_v22 }
 0x556   :  { %1194 = vmax.xlane.f32.xlu1 %v1193_v30  ;;  %v669_v30 = vsub.f32 %v5028_v49, %v653_v41  ;;  %v672_v61 = vsub.f32 %v5052_v29, %v662_v45 }
 0x557   :  { %4263 = vpow2.f32 %v678_v12 }
 0x558   :  { %1197 = vmax.xlane.f32.xlu0 %v1196_v14  ;;  %v659_v14 = vpop.xlane.xlu1 %658  ;;  %v680_v43 = vmul.f32 1.442695, %v669_v30  ;;  %v686_v46 = vmul.f32 1.442695, %v672_v61 }
 0x559   :  { %v671_v52 = vsub.f32 %v5044_v42, %v659_v14 }
 0x55a   :  { %1200 = vmax.xlane.f32.xlu1 %v1199_v13  ;;  %4265 = vpow2.f32 %v680_v43 }
 0x55b   :  { %v684_v14 = vmul.f32 1.442695, %v671_v52  ;;  %4267 = vpow2.f32 %v682_v38 }
 0x55d   :  { %4269 = vpow2.f32 %v684_v14 }
 0x55e   :  { %4271 = vpow2.f32 %v686_v46 }
 0x568   :  { %v3956_v27 = vpop.f32.mrb[32].mxu1 }
 0x569   :  { %v1415_v28 = vpop.f32.mrb[33].mxu1  ;;  %v5209_v19 = vsel %vm536_vm15, %v3956_v27, -1e+30 }
 0x56a   :  { %v5201_v62 = vsel %vm534_vm13, %v1415_v28, -1e+30  ;;  %v3957_v56 = vpop.f32.mrb[34].mxu1  ;;  %v1460_v32 = vsel %vm641_vm14, %v5209_v19, -inf  ;;  %v665_v28 = vpop.xlane.xlu1 %664 }
 0x56b   :  { %v1418_v13 = vpop.f32.mrb[35].mxu1  ;;  %v1454_v36 = vsel %vm641_vm14, %v5201_v62, -inf  ;;  %v5222_v41 = vsel %vm537_vm1, %v3957_v56, -1e+30 }
 0x56c   :  { %v5214_v40 = vsel %vm535_vm0, %v1418_v13, -1e+30  ;;  %1455 = vmax.xlane.f32.xlu0 %v1454_v36  ;;  %v1463_v34 = vsel %vm641_vm14, %v5222_v41, -inf  ;;  %v673_v13 = vsub.f32 %v5060_v18, %v665_v28 }
 0x56d   :  { %v1457_v49 = vsel %vm641_vm14, %v5214_v40, -inf }
 0x56e   :  { %1458 = vmax.xlane.f32.xlu1 %v1457_v49  ;;  %v5257_v49 = vpop.eup %4259  ;;  %v688_v58 = vmul.f32 1.442695, %v673_v13 }
 0x56f   :  { %v5261_v22 = vpop.eup %4261  ;;  %v690_v31 = vsel %vm641_vm14, %v5257_v49, 0.0 }
 0x570   :  { %v3960_v27 = vpop.f32.mrb[36].mxu1  ;;  %1461 = vmax.xlane.f32.xlu0 %v1460_v32  ;;  %v5265_v1 = vpop.eup %4263  ;;  %4273 = vpow2.f32 %v688_v58  ;;  %v693_v45 = vsel %vm641_vm14, %v5261_v22, 0.0 }
 0x571   :  { %v1431_v0 = vpop.f32.mrb[37].mxu1  ;;  %v5241_v36 = vsel %vm540_vm3, %v3960_v27, -1e+30  ;;  %v5267_v43 = vpop.eup %4265  ;;  %v696_v32 = vsel %vm641_vm14, %v5265_v1, 0.0 }
 0x572   :  { %v5233_v11 = vsel %vm538_vm2, %v1431_v0, -1e+30  ;;  %v3961_v56 = vpop.f32.mrb[38].mxu1  ;;  %1464 = vmax.xlane.f32.xlu1 %v1463_v34  ;;  %v1472_v57 = vsel %vm641_vm14, %v5241_v36, -inf  ;;  %v5273_v52 = vpop.eup %4267  ;;  %v699_v27 = vsel %vm641_vm14, %v5267_v43, 0.0 }
 0x573   :  { %v1434_v42 = vpop.f32.mrb[39].mxu1  ;;  %v1466_v30 = vsel %vm641_vm14, %v5233_v11, -inf  ;;  %v5253_v18 = vsel %vm541_vm5, %v3961_v56, -1e+30  ;;  %v5277_v28 = vpop.eup %4269  ;;  %v702_v0 = vsel %vm641_vm14, %v5273_v52, 0.0 }
 0x574   :  { %v5246_v53 = vsel %vm539_vm4, %v1434_v42, -1e+30  ;;  %1467 = vmax.xlane.f32.xlu0 %v1466_v30  ;;  %v1475_v12 = vsel %vm641_vm14, %v5253_v18, -inf  ;;  %v5281_v34 = vpop.eup %4271  ;;  %v705_v38 = vsel %vm641_vm14, %v5277_v28, 0.0 }
 0x575   :  { %v1469_v29 = vsel %vm641_vm14, %v5246_v53, -inf  ;;  %v708_v56 = vsel %vm641_vm14, %v5281_v34, 0.0 }
 0x576   :  { %1470 = vmax.xlane.f32.xlu1 %v1469_v29 }
 0x578   :  { %1473 = vmax.xlane.f32.xlu0 %v1472_v57 }
 0x57a   :  { %1476 = vmax.xlane.f32.xlu1 %v1475_v12  ;;  %v5285_v61 = vpop.eup %4273 }
 0x57b   :  { %v711_v42 = vsel %vm641_vm14, %v5285_v61, 0.0 }
 0x57c   :  { %691 = vadd.xlane.f32.xlu0 %v690_v31 }
 0x57e   :  { %694 = vadd.xlane.f32.xlu1 %v693_v45 }
 0x580   :  { %697 = vadd.xlane.f32.xlu0 %v696_v32 }
 0x582   :  { %700 = vadd.xlane.f32.xlu1 %v699_v27 }
 0x584   :  { %703 = vadd.xlane.f32.xlu0 %v702_v0 }
 0x586   :  { %706 = vadd.xlane.f32.xlu1 %v705_v38 }
 0x588   :  { %709 = vadd.xlane.f32.xlu0 %v708_v56 }
 0x58a   :  { %712 = vadd.xlane.f32.xlu1 %v711_v42 }
 0x5d9   :  { %v1180_v30 = vpop.xlane.xlu0 %1179 }
 0x5da   :  { %v1202_v14 = vsub.f32 %v5142_v16, %v1180_v30 }
 0x5db   :  { %v1183_v13 = vpop.xlane.xlu1 %1182 }
 0x5dc   :  { %v1210_v29 = vmul.f32 1.442695, %v1202_v14  ;;  %v1203_v46 = vsub.f32 %v5154_v55, %v1183_v13 }
 0x5dd   :  { %v1186_v57 = vpop.xlane.xlu0 %1185 }
 0x5de   :  { %4275 = vpow2.f32 %v1210_v29  ;;  %v1212_v58 = vmul.f32 1.442695, %v1203_v46  ;;  %v1204_v12 = vsub.f32 %v5149_v51, %v1186_v57 }
 0x5df   :  { %v1189_v31 = vpop.xlane.xlu1 %1188 }
 0x5e0   :  { %4277 = vpow2.f32 %v1212_v58  ;;  %v1214_v45 = vmul.f32 1.442695, %v1204_v12  ;;  %v1205_v32 = vsub.f32 %v5161_v54, %v1189_v31 }
 0x5e1   :  { %v1192_v27 = vpop.xlane.xlu0 %1191 }
 0x5e2   :  { %4279 = vpow2.f32 %v1214_v45  ;;  %v1216_v0 = vmul.f32 1.442695, %v1205_v32  ;;  %v1206_v38 = vsub.f32 %v5170_v26, %v1192_v27 }
 0x5e3   :  { %v1195_v16 = vpop.xlane.xlu1 %1194 }
 0x5e4   :  { %4281 = vpow2.f32 %v1216_v0  ;;  %v1218_v56 = vmul.f32 1.442695, %v1206_v38  ;;  %v1207_v55 = vsub.f32 %v5182_v21, %v1195_v16 }
 0x5e5   :  { %v1198_v42 = vpop.xlane.xlu0 %1197 }
 0x5e6   :  { %4283 = vpow2.f32 %v1218_v56  ;;  %v1220_v30 = vmul.f32 1.442695, %v1207_v55  ;;  %v1208_v51 = vsub.f32 %v5177_v9, %v1198_v42 }
 0x5e7   :  { %v1201_v14 = vpop.xlane.xlu1 %1200 }
 0x5e8   :  { %v5298_v13 = vpop.eup %4275  ;;  %4285 = vpow2.f32 %v1220_v30  ;;  %v1222_v54 = vmul.f32 1.442695, %v1208_v51  ;;  %v1209_v29 = vsub.f32 %v5189_v59, %v1201_v14 }
 0x5e9   :  { %v1226_v26 = vsel %vm641_vm14, %v5298_v13, 0.0 }
 0x5ea   :  { %v5303_v46 = vpop.eup %4277  ;;  %4287 = vpow2.f32 %v1222_v54  ;;  %v1224_v57 = vmul.f32 1.442695, %v1209_v29  ;;  %1227 = vadd.xlane.f32.xlu0 %v1226_v26 }
 0x5eb   :  { %v1229_v21 = vsel %vm641_vm14, %v5303_v46, 0.0 }
 0x5ec   :  { %v5307_v58 = vpop.eup %4279  ;;  %4289 = vpow2.f32 %v1224_v57  ;;  %1230 = vadd.xlane.f32.xlu1 %v1229_v21 }
 0x5ed   :  { %v1232_v9 = vsel %vm641_vm14, %v5307_v58, 0.0 }
 0x5ee   :  { %v5311_v12 = vpop.eup %4281  ;;  %1233 = vadd.xlane.f32.xlu0 %v1232_v9 }
 0x5ef   :  { %v1235_v59 = vsel %vm641_vm14, %v5311_v12, 0.0 }
 0x5f0   :  { %v5315_v31 = vpop.eup %4283  ;;  %1236 = vadd.xlane.f32.xlu1 %v1235_v59 }
 0x5f1   :  { %v1238_v45 = vsel %vm641_vm14, %v5315_v31, 0.0 }
 0x5f2   :  { %v5319_v32 = vpop.eup %4285  ;;  %1239 = vadd.xlane.f32.xlu0 %v1238_v45 }
 0x5f3   :  { %v1241_v27 = vsel %vm641_vm14, %v5319_v32, 0.0 }
 0x5f4   :  { %v5323_v0 = vpop.eup %4287  ;;  %1242 = vadd.xlane.f32.xlu1 %v1241_v27 }
 0x5f5   :  { %v1244_v38 = vsel %vm641_vm14, %v5323_v0, 0.0 }
 0x5f6   :  { %v5327_v16 = vpop.eup %4289  ;;  %1245 = vadd.xlane.f32.xlu0 %v1244_v38 }
 0x5f7   :  { %v1247_v56 = vsel %vm641_vm14, %v5327_v16, 0.0 }
 0x5f8   :  { %1248 = vadd.xlane.f32.xlu1 %v1247_v56 }
 0x5f9   :  { %v1456_v55 = vpop.xlane.xlu0 %1455 }
 0x5fa   :  { %v1478_v42 = vsub.f32 %v5201_v62, %v1456_v55 }
 0x5fb   :  { %v1459_v30 = vpop.xlane.xlu1 %1458 }
 0x5fc   :  { %v1486_v51 = vmul.f32 1.442695, %v1478_v42  ;;  %v1479_v14 = vsub.f32 %v5214_v40, %v1459_v30 }
 0x5fd   :  { %v1462_v54 = vpop.xlane.xlu0 %1461 }
 0x5fe   :  { %4291 = vpow2.f32 %v1486_v51  ;;  %v1488_v29 = vmul.f32 1.442695, %v1479_v14  ;;  %v1480_v26 = vsub.f32 %v5209_v19, %v1462_v54 }
 0x5ff   :  { %v1465_v57 = vpop.xlane.xlu1 %1464 }
 0x600   :  { %4293 = vpow2.f32 %v1488_v29  ;;  %v1490_v21 = vmul.f32 1.442695, %v1480_v26  ;;  %v1481_v9 = vsub.f32 %v5222_v41, %v1465_v57 }
 0x601   :  { %v1468_v59 = vpop.xlane.xlu0 %1467 }
 0x602   :  { %4295 = vpow2.f32 %v1490_v21  ;;  %v1492_v45 = vmul.f32 1.442695, %v1481_v9  ;;  %v1482_v27 = vsub.f32 %v5233_v11, %v1468_v59 }
 0x603   :  { %v1471_v62 = vpop.xlane.xlu1 %1470 }
 0x604   :  { %4297 = vpow2.f32 %v1492_v45  ;;  %v1494_v38 = vmul.f32 1.442695, %v1482_v27  ;;  %v1483_v40 = vsub.f32 %v5246_v53, %v1471_v62 }
 0x605   :  { %v1474_v56 = vpop.xlane.xlu0 %1473 }
 0x606   :  { %4299 = vpow2.f32 %v1494_v38  ;;  %v1496_v55 = vmul.f32 1.442695, %v1483_v40  ;;  %v1484_v19 = vsub.f32 %v5241_v36, %v1474_v56 }
 0x607   :  { %v1477_v42 = vpop.xlane.xlu1 %1476 }
 0x608   :  { %v5338_v30 = vpop.eup %4291  ;;  %4301 = vpow2.f32 %v1496_v55  ;;  %v1498_v41 = vmul.f32 1.442695, %v1484_v19  ;;  %v1485_v51 = vsub.f32 %v5253_v18, %v1477_v42 }
 0x609   :  { %v692_v14 = vpop.xlane.xlu0 %691  ;;  %v1502_v11 = vsel %vm641_vm14, %v5338_v30, 0.0 }
 0x60a   :  { %v5343_v54 = vpop.eup %4293  ;;  %4303 = vpow2.f32 %v1498_v41  ;;  %v1500_v53 = vmul.f32 1.442695, %v1485_v51  ;;  %1503 = vadd.xlane.f32.xlu0 %v1502_v11 }
 0x60b   :  { %4305 = vrcp.f32 %v692_v14  ;;  %v695_v29 = vpop.xlane.xlu1 %694  ;;  %v1505_v36 = vsel %vm641_vm14, %v5343_v54, 0.0 }
 0x60c   :  { %v5347_v26 = vpop.eup %4295  ;;  %4307 = vpow2.f32 %v1500_v53  ;;  %1506 = vadd.xlane.f32.xlu1 %v1505_v36 }
 0x60d   :  { %4309 = vrcp.f32 %v695_v29  ;;  %v698_v18 = vpop.xlane.xlu0 %697  ;;  %v1508_v57 = vsel %vm641_vm14, %v5347_v26, 0.0 }
 0x60e   :  { %v5351_v21 = vpop.eup %4297  ;;  %4311 = vrcp.f32 %v698_v18  ;;  %1509 = vadd.xlane.f32.xlu0 %v1508_v57 }
 0x60f   :  { %v701_v9 = vpop.xlane.xlu1 %700  ;;  %v1511_v59 = vsel %vm641_vm14, %v5351_v21, 0.0 }
 0x610   :  { %v5355_v45 = vpop.eup %4299  ;;  %4313 = vrcp.f32 %v701_v9  ;;  %1512 = vadd.xlane.f32.xlu1 %v1511_v59 }
 0x611   :  { %v704_v27 = vpop.xlane.xlu0 %703  ;;  %v1514_v62 = vsel %vm641_vm14, %v5355_v45, 0.0 }
 0x612   :  { %v5359_v38 = vpop.eup %4301  ;;  %4315 = vrcp.f32 %v704_v27  ;;  %1515 = vadd.xlane.f32.xlu0 %v1514_v62 }
 0x613   :  { %v707_v40 = vpop.xlane.xlu1 %706  ;;  %v1517_v56 = vsel %vm641_vm14, %v5359_v38, 0.0 }
 0x614   :  { %v5363_v55 = vpop.eup %4303  ;;  %4317 = vrcp.f32 %v707_v40  ;;  %1518 = vadd.xlane.f32.xlu1 %v1517_v56 }
 0x615   :  { %v4306_v19 = vpop.eup %4305  ;;  %v710_v42 = vpop.xlane.xlu0 %709  ;;  %v1520_v41 = vsel %vm641_vm14, %v5363_v55, 0.0 }
 0x616   :  { %v5367_v51 = vpop.eup %4307  ;;  %4319 = vrcp.f32 %v710_v42  ;;  %1521 = vadd.xlane.f32.xlu0 %v1520_v41  ;;  %v722_v36 = vmul.f32 %v4306_v19, %v5257_v49  ;;  %v1101_v42 = vsel %vm4878_vm12, %v4740_v63, 0  ;;  %v1102_v41 = vsel %vm4878_vm12, %v4726_v60, 0 }
 0x617   :  { %v4310_v14 = vpop.eup %4309  ;;  %v713_v11 = vpop.xlane.xlu1 %712  ;;  %v1523_v53 = vsel %vm641_vm14, %v5367_v51, 0.0 }
 0x618   :  { %v4312_v29 = vpop.eup %4311  ;;  %4321 = vrcp.f32 %v713_v11  ;;  %1524 = vadd.xlane.f32.xlu1 %v1523_v53  ;;  %v723_v18 = vmul.f32 %v4310_v14, %v5261_v22  ;;  %v1103_v53 = vsel %vm4878_vm12, %v4759_v37, 0 }
 0x619   :  { %v724_v59 = vmul.f32 %v4312_v29, %v5265_v1 }
 0x61a   :  { %v4314_v57 = vpop.eup %4313  ;;  %v730_v9 = vpack.c.bf16 %v723_v18, %v722_v36 }
 0x61b   :  { %v725_v27 = vmul.f32 %v4314_v57, %v5267_v43 }
 0x61c   :  { %v4316_v62 = vpop.eup %4315  ;;  %3906 = vmatprep.mubr.msk.bf16.mxu0 %vm641_vm14, %v730_v9 }
 0x61d   :  { %v731_v40 = vpack.c.bf16 %v725_v27, %v724_v59  ;;  %v726_v49 = vmul.f32 %v4316_v62, %v5273_v52 }
 0x61e   :  { %v4318_v56 = vpop.eup %4317 }
 0x61f   :  { %3907 = vmatmul.mubr.msk.bf16.vlgmr.msra.gmra.mrb[24].mxu0 %vm641_vm14, %v731_v40  ;;  %v727_v22 = vmul.f32 %v4318_v56, %v5277_v28  ;;  %v1371_v28 = vsel %vm5101_vm7, 65537, %v6542_v50 }
 0x620   :  { %v4320_v19 = vpop.eup %4319  ;;  %3931 = vmatpush3.bf16.msra.mxu0 %v1101_v42 }
 0x621   :  { %4035 = vmatprep.subr.msk.bf16.mxu0 %vm4878_vm12, %v4726_v60  ;;  %v732_v1 = vpack.c.bf16 %v727_v22, %v726_v49  ;;  %v728_v14 = vmul.f32 %v4320_v19, %v5281_v34  ;;  %v1375_v34 = vrot.slane %v1371_v28, %v4685_v44 }
 0x622   :  { %v4322_v43 = vpop.eup %4321 }
 0x623   :  { %3910 = vmatprep.mubr.msk.bf16.mxu0 %vm641_vm14, %v732_v1  ;;  %v729_v52 = vmul.f32 %v4322_v43, %v5285_v61  ;;  %vm5408_vm8 = vcmp.ne.s16.totalorder %v1375_v34, 0 }
 0x624   :  { %3933 = vmatpush3.bf16.msra.mxu0 %v1102_v41  ;;  %v1379_v34 = vsel %vm5408_vm8, %v4759_v37, 0 }
 0x625   :  { %4036 = vmatprep.subr.msk.bf16.mxu0 %vm4878_vm12, %v4759_v37  ;;  %v733_v11 = vpack.c.bf16 %v729_v52, %v728_v14 }
 0x627   :  { %3911 = vmatmul.mubr.msk.bf16.gmra.mrb[28].mxu0 %vm641_vm14, %v733_v11 }
 0x628   :  { %3935 = vmatpush3.bf16.msra.mxu0 %v1103_v53  ;;  %v1378_v53 = vsel %vm5408_vm8, %v4726_v60, 0 }
 0x629   :  { %4037 = vmatprep.subr.msk.bf16.mxu0 %vm4878_vm12, %v4755_v25 }
 0x62c   :  { %3937 = vmatpush3.bf16.msra.mxu0 %v1104_v39 }
 0x62d   :  { %4038 = vmatprep.subr.msk.bf16.mxu0 %vm5408_vm8, %v4740_v63 }
 0x677   :  { %v1228_v29 = vpop.xlane.xlu0 %1227 }
 0x678   :  { %4323 = vrcp.f32 %v1228_v29 }
 0x679   :  { %v1231_v36 = vpop.xlane.xlu1 %1230 }
 0x67a   :  { %4325 = vrcp.f32 %v1231_v36 }
 0x67b   :  { %v1234_v18 = vpop.xlane.xlu0 %1233 }
 0x67c   :  { %4327 = vrcp.f32 %v1234_v18 }
 0x67d   :  { %v1237_v57 = vpop.xlane.xlu1 %1236 }
 0x67e   :  { %4329 = vrcp.f32 %v1237_v57 }
 0x67f   :  { %v1240_v9 = vpop.xlane.xlu0 %1239 }
 0x680   :  { %4331 = vrcp.f32 %v1240_v9 }
 0x681   :  { %v1243_v23 = vpop.xlane.xlu1 %1242 }
 0x682   :  { %v4324_v59 = vpop.eup %4323  ;;  %4333 = vrcp.f32 %v1243_v23 }
 0x683   :  { %v1246_v27 = vpop.xlane.xlu0 %1245  ;;  %v1258_v56 = vmul.f32 %v4324_v59, %v5298_v13  ;;  %v1377_v13 = vsel %vm5408_vm8, %v4740_v63, 0 }
 0x684   :  { %v4326_v62 = vpop.eup %4325  ;;  %4335 = vrcp.f32 %v1246_v27 }
 0x685   :  { %v1249_v40 = vpop.xlane.xlu1 %1248  ;;  %v1259_v42 = vmul.f32 %v4326_v62, %v5303_v46 }
 0x686   :  { %v4328_v49 = vpop.eup %4327  ;;  %4337 = vrcp.f32 %v1249_v40 }
 0x687   :  { %v1266_v22 = vpack.c.bf16 %v1259_v42, %v1258_v56  ;;  %v1260_v1 = vmul.f32 %v4328_v49, %v5307_v58 }
 0x688   :  { %v4330_v19 = vpop.eup %4329 }
 0x689   :  { %v1261_v43 = vmul.f32 %v4330_v19, %v5311_v12  ;;  %3938 = vmatprep.mubr.msk.bf16.mxu0 %vm641_vm14, %v1266_v22  ;;  %v4076_v19 = vld [vmem:[%s6485_s5 + $0x8] sm:$0xff]  }
 0x68a   :  { %v4332_v41 = vpop.eup %4331 }
 0x68b   :  { %v1267_v14 = vpack.c.bf16 %v1261_v43, %v1260_v1  ;;  %v1262_v46 = vmul.f32 %v4332_v41, %v5315_v31 }
 0x68c   :  { %v4334_v52 = vpop.eup %4333 }
 0x68d   :  { %3939 = vmatmul.mubr.msk.bf16.vlgmr.msra.gmra.mrb[24].mxu0 %vm641_vm14, %v1267_v14  ;;  %v1263_v28 = vmul.f32 %v4334_v52, %v5319_v32 }
 0x68e   :  { %v4336_v11 = vpop.eup %4335  ;;  %3963 = vmatpush3.bf16.msra.mxu0 %v1377_v13 }
 0x68f   :  { %4039 = vmatprep.subr.msk.bf16.mxu0 %vm5408_vm8, %v4726_v60  ;;  %v1268_v58 = vpack.c.bf16 %v1263_v28, %v1262_v46  ;;  %v1264_v63 = vmul.f32 %v4336_v11, %v5323_v0  ;;  %v4075_v0 = vld [vmem:[%s6485_s5] sm:$0xff]   ;;  %v4082_v46 = vld [vmem:[%s6485_s5 + $0x38] sm:$0xff]  }
 0x690   :  { %v4338_v12 = vpop.eup %4337 }
 0x691   :  { %3942 = vmatprep.mubr.msk.bf16.mxu0 %vm641_vm14, %v1268_v58  ;;  %v1265_v31 = vmul.f32 %v4338_v12, %v5327_v16  ;;  %v1380_v16 = vsel %vm5408_vm8, %v4755_v25, 0 }
 0x692   :  { %3965 = vmatpush3.bf16.msra.mxu0 %v1378_v53 }
 0x693   :  { %4040 = vmatprep.subr.msk.bf16.mxu0 %vm5408_vm8, %v4759_v37  ;;  %v1269_v32 = vpack.c.bf16 %v1265_v31, %v1264_v63 }
 0x695   :  { %3943 = vmatmul.mubr.msk.bf16.gmra.mrb[28].mxu0 %vm641_vm14, %v1269_v32 }
 0x696   :  { %3967 = vmatpush3.bf16.msra.mxu0 %v1379_v34 }
 0x697   :  { %4041 = vmatprep.subr.msk.bf16.mxu0 %vm5408_vm8, %v4755_v25  ;;  %v1504_v60 = vpop.xlane.xlu0 %1503 }
 0x698   :  { %4339 = vrcp.f32 %v1504_v60 }
 0x699   :  { %v1507_v39 = vpop.xlane.xlu1 %1506 }
 0x69a   :  { %3969 = vmatpush3.bf16.msra.mxu0 %v1380_v16  ;;  %4341 = vrcp.f32 %v1507_v39 }
 0x69b   :  { %v1510_v29 = vpop.xlane.xlu0 %1509  ;;  %3978 = vmatprep.subr.bf16.mxu0 %v4075_v0 }
 0x69c   :  { %4343 = vrcp.f32 %v1510_v29 }
 0x69d   :  { %v1513_v37 = vpop.xlane.xlu1 %1512 }
 0x69e   :  { %4345 = vrcp.f32 %v1513_v37 }
 0x69f   :  { %v1516_v36 = vpop.xlane.xlu0 %1515 }
 0x6a0   :  { %4347 = vrcp.f32 %v1516_v36 }
 0x6a1   :  { %v1519_v18 = vpop.xlane.xlu1 %1518 }
 0x6a2   :  { %v4340_v57 = vpop.eup %4339  ;;  %4349 = vrcp.f32 %v1519_v18 }
 0x6a3   :  { %v1522_v9 = vpop.xlane.xlu0 %1521  ;;  %v1534_v61 = vmul.f32 %v4340_v57, %v5338_v30 }
 0x6a4   :  { %v4342_v23 = vpop.eup %4341  ;;  %4351 = vrcp.f32 %v1522_v9 }
 0x6a5   :  { %v1525_v59 = vpop.xlane.xlu1 %1524  ;;  %v1535_v25 = vmul.f32 %v4342_v23, %v5343_v54 }
 0x6a6   :  { %v4344_v27 = vpop.eup %4343  ;;  %4353 = vrcp.f32 %v1525_v59 }
 0x6a7   :  { %v1542_v62 = vpack.c.bf16 %v1535_v25, %v1534_v61  ;;  %v1536_v56 = vmul.f32 %v4344_v27, %v5347_v26 }
 0x6a8   :  { %v4346_v40 = vpop.eup %4345 }
 0x6a9   :  { %v1537_v42 = vmul.f32 %v4346_v40, %v5351_v21  ;;  %3970 = vmatprep.mubr.msk.bf16.mxu0 %vm641_vm14, %v1542_v62  ;;  %v4077_v21 = vld [vmem:[%s6485_s5 + $0x10] sm:$0xff]  }
 0x6aa   :  { %v4348_v49 = vpop.eup %4347 }
 0x6ab   :  { %v1543_v22 = vpack.c.bf16 %v1537_v42, %v1536_v56  ;;  %v1538_v30 = vmul.f32 %v4348_v49, %v5355_v45  ;;  %v4078_v45 = vld [vmem:[%s6485_s5 + $0x18] sm:$0xff]  }
 0x6ac   :  { %v4350_v1 = vpop.eup %4349 }
 0x6ad   :  { %3971 = vmatmul.mubr.msk.bf16.vlgmr.msra.gmra.mrb[24].mxu0 %vm641_vm14, %v1543_v22  ;;  %v1539_v54 = vmul.f32 %v4350_v1, %v5359_v38  ;;  %v4079_v38 = vld [vmem:[%s6485_s5 + $0x20] sm:$0xff]  }
 0x6ae   :  { %v4352_v43 = vpop.eup %4351  ;;  %3979 = vmatpush3.bf16.msra.mxu0 %v4075_v0 }
 0x6af   :  { %v1544_v26 = vpack.c.bf16 %v1539_v54, %v1538_v30  ;;  %3980 = vmatprep.subr.bf16.mxu0 %v4076_v19  ;;  %v1540_v14 = vmul.f32 %v4352_v43, %v5363_v55  ;;  %v4080_v55 = vld [vmem:[%s6485_s5 + $0x28] sm:$0xff]   ;;  %v6552_v30 = vld [vmem:[#allocation2_spill] sm:$0xff] }
 0x6b0   :  { %v4354_v41 = vpop.eup %4353  ;;  %v4088_v43 = vld [vmem:[%s6487_s9 + $0xc] ss:$16 sps:$4 sm:$0xff]  }
 0x6b1   :  { %3974 = vmatprep.mubr.msk.bf16.mxu0 %vm641_vm14, %v1544_v26  ;;  %v1541_v52 = vmul.f32 %v4354_v41, %v5367_v51  ;;  %v4081_v51 = vld [vmem:[%s6485_s5 + $0x30] sm:$0xff]   ;;  %v4092_v41 = vld [vmem:[%s6487_s9 + $0x28] ss:$16 sps:$4 sm:$0xff]  }
 0x6b2   :  { %3981 = vmatpush3.bf16.msra.mxu0 %v4076_v19  ;;  %v4091_v26 = vld [vmem:[%s6487_s9 + $0x24] ss:$16 sps:$4 sm:$0xff]  }
 0x6b3   :  { %v1545_v13 = vpack.c.bf16 %v1541_v52, %v1540_v14  ;;  %3982 = vmatprep.subr.bf16.mxu0 %v4077_v21  ;;  %v4094_v14 = vld [vmem:[%s6487_s9 + $0x2c] ss:$16 sps:$4 sm:$0xff]  }
 0x6b5   :  { %3975 = vmatmul.mubr.msk.bf16.gmra.mrb[28].mxu0 %vm641_vm14, %v1545_v13 }
 0x6b6   :  { %3983 = vmatpush3.bf16.msra.mxu0 %v4077_v21  ;;  %v4089_v21 = vld [vmem:[%s6487_s9 + $0x20] ss:$16 sps:$4 sm:$0xff]  }
 0x6b7   :  { %3984 = vmatprep.subr.bf16.mxu0 %v4078_v45 }
 0x6ba   :  { %3985 = vmatpush3.bf16.msra.mxu0 %v4078_v45 }
 0x6bb   :  { %3986 = vmatprep.subr.bf16.mxu0 %v4079_v38 }
 0x6be   :  { %3987 = vmatpush3.bf16.msra.mxu0 %v4079_v38 }
 0x6bf   :  { %3988 = vmatprep.subr.bf16.mxu0 %v4080_v55 }
 0x6c2   :  { %3989 = vmatpush3.bf16.msra.mxu0 %v4080_v55 }
 0x6c3   :  { %3990 = vmatprep.subr.bf16.mxu0 %v4081_v51 }
 0x6c6   :  { %3991 = vmatpush3.bf16.msra.mxu0 %v4081_v51 }
 0x6c7   :  { %3992 = vmatprep.subr.bf16.mxu0 %v4082_v46 }
 0x6ca   :  { %3993 = vmatpush3.bf16.msra.mxu0 %v4082_v46 }
 0x6cb   :  { %2188 = vmatprep.subr.bf16.mxu0 %v4088_v43  ;;  %v4121_v43 = vld [vmem:[%s6487_s9 + $0xc4] ss:$16 sps:$4 sm:$0xff]  }
 0x780   :  { %v3972_v28 = vpop.f32.mrb[24].mxu0 }
 0x781   :  { %v4002_v11 = vadd.f32 %v3972_v28, %v5123_v20  ;;  %v1592_v58 = vpop.f32.mrb[25].mxu0 }
 0x782   :  { %v4003_v12 = vadd.f32 %v1592_v58, %v5125_v15  ;;  %v3973_v53 = vpop.f32.mrb[26].mxu0 }
 0x783   :  { %v4004_v63 = vadd.f32 %v3973_v53, %v5127_v47  ;;  %v1595_v31 = vpop.f32.mrb[27].mxu0 }
 0x784   :  { %v4005_v32 = vadd.f32 %v1595_v31, %v5129_v6  ;;  %v3492_v6 = vld [vmem:[%s6486_s6] ss:$0 sm:$0xff] }
 0x785   :  { %v1632_v34 = vpack.c.bf16 %v4004_v63, %v4002_v11 }
 0x786   :  { %v1631_v60 = vpack.c.bf16 %v4005_v32, %v4003_v12 }
 0x788   :  { %v3976_v0 = vpop.f32.mrb[28].mxu0  ;;  %3994 = vmatprep.mubr.bf16.mxu0 %v1631_v60 }
 0x789   :  { %v4006_v16 = vadd.f32 %v3976_v0, %v5131_v35  ;;  %v1608_v39 = vpop.f32.mrb[29].mxu0  ;;  %3995 = vmatmul.mubr.bf16.vlgmr.msra.gmra.mrb[32].mxu0 %v1632_v34 }
 0x78a   :  { %v4007_v29 = vadd.f32 %v1608_v39, %v5133_v17  ;;  %v3977_v20 = vpop.f32.mrb[30].mxu0 }
 0x78b   :  { %v4008_v37 = vadd.f32 %v3977_v20, %v5135_v33  ;;  %v1611_v15 = vpop.f32.mrb[31].mxu0 }
 0x78c   :  { %v4009_v36 = vadd.f32 %v1611_v15, %v5137_v48 }
 0x78d   :  { %v1634_v47 = vpack.c.bf16 %v4008_v37, %v4006_v16 }
 0x78e   :  { %v1633_v18 = vpack.c.bf16 %v4009_v36, %v4007_v29 }
 0x790   :  { %3998 = vmatprep.mubr.bf16.mxu0 %v1633_v18 }
 0x791   :  { %3999 = vmatmul.mubr.bf16.gmra.mrb[36].mxu0 %v1634_v47 }
 0x792   :  { %2220 = vmatprep.mubr.bf16.mxu0 %v6542_v50 }
 0x85c   :  { %v3996_v35 = vpop.f32.mrb[32].mxu0 }
 0x85d   :  { %v1740_v57 = vpop.f32.mrb[33].mxu0  ;;  %v1749_v59 = vadd.f32 %v3996_v35, %v3492_v6 }
 0x85e   :  { %v1741_v9 = vadd.f32 %v3492_v6, %v1740_v57  ;;  %v3997_v17 = vpop.f32.mrb[34].mxu0 }
 0x85f   :  { %v1743_v23 = vpop.f32.mrb[35].mxu0  ;;  %v1752_v61 = vadd.f32 %v3997_v17, %v3492_v6  ;;  %v5504_v27 = vadd.f32 %v4524_v3, %v1749_v59  ;;  %v4100_v59 = vld [vmem:[%s6487_s9 + $0x4c] ss:$16 sps:$4 sm:$0xff]  }
 0x860   :  { %v5497_v33 = vadd.f32 %v4522_v2, %v1741_v9  ;;  %v1744_v48 = vadd.f32 %v3492_v6, %v1743_v23  ;;  %v4097_v23 = vld [vmem:[%s6487_s9 + $0x44] ss:$16 sps:$4 sm:$0xff]  }
 0x861   :  { %6547 = vst [vmem:[#allocation7_spill] sm:$0xff] %v5504_v27  ;;  %v5508_v56 = vadd.f32 %v4530_v5, %v1752_v61  ;;  %v4098_v61 = vld [vmem:[%s6487_s9 + $0x48] ss:$16 sps:$4 sm:$0xff]  }
 0x862   :  { %6545 = vst [vmem:[#allocation5_spill] sm:$0xff] %v5497_v33  ;;  %v5500_v25 = vadd.f32 %v4528_v4, %v1744_v48  ;;  %1781 = vadd.xlane.f32.xlu0 %v5497_v33  ;;  %v4095_v48 = vld [vmem:[%s6487_s9 + $0x40] ss:$16 sps:$4 sm:$0xff]  }
 0x863   :  { %6548 = vst [vmem:[#allocation8_spill] sm:$0xff] %v5508_v56 }
 0x864   :  { %6546 = vst [vmem:[#allocation6_spill] sm:$0xff] %v5500_v25  ;;  %1783 = vadd.xlane.f32.xlu1 %v5500_v25  ;;  %v4000_v62 = vpop.f32.mrb[36].mxu0 }
 0x865   :  { %v1756_v40 = vpop.f32.mrb[37].mxu0  ;;  %v1765_v22 = vadd.f32 %v4000_v62, %v3492_v6  ;;  %v4103_v62 = vld [vmem:[%s6487_s9 + $0x64] ss:$16 sps:$4 sm:$0xff]  }
 0x866   :  { %v1757_v42 = vadd.f32 %v3492_v6, %v1756_v40  ;;  %1785 = vadd.xlane.f32.xlu0 %v5504_v27  ;;  %v4001_v2 = vpop.f32.mrb[38].mxu0  ;;  %v4106_v40 = vld [vmem:[%s6487_s9 + $0x6c] ss:$16 sps:$4 sm:$0xff]  }
 0x867   :  { %v1759_v49 = vpop.f32.mrb[39].mxu0  ;;  %v1768_v3 = vadd.f32 %v4001_v2, %v3492_v6  ;;  %v5520_v5 = vadd.f32 %v4546_v10, %v1765_v22  ;;  %v4086_v10 = vld [vmem:[%s6487_s9 + $0x8] ss:$16 sps:$4 sm:$0xff]   ;;  %v4112_v22 = vld [vmem:[%s6487_s9 + $0x8c] ss:$16 sps:$4 sm:$0xff]  }
 0x868   :  { %v5512_v4 = vadd.f32 %v4537_v7, %v1757_v42  ;;  %v1760_v19 = vadd.f32 %v3492_v6, %v1759_v49  ;;  %1787 = vadd.xlane.f32.xlu1 %v5508_v56  ;;  %v4083_v7 = vld [vmem:[%s6487_s9] ss:$16 sps:$4 sm:$0xff]   ;;  %2189 = vmatpush1.bf16.msra.mxu0 %v4086_v10  ;;  %v4104_v2 = vld [vmem:[%s6487_s9 + $0x68] ss:$16 sps:$4 sm:$0xff]   ;;  %v4109_v49 = vld [vmem:[%s6487_s9 + $0x84] ss:$16 sps:$4 sm:$0xff]  }
 0x869   :  { %6551 = vst [vmem:[#allocation11_spill] sm:$0xff] %v5520_v5  ;;  %v5524_v54 = vadd.f32 %v6552_v30, %v1768_v3  ;;  %2190 = vmatprep.subr.bf16.mxu0 %v4094_v14  ;;  %v4101_v42 = vld [vmem:[%s6487_s9 + $0x60] ss:$16 sps:$4 sm:$0xff]   ;;  %v4110_v3 = vld [vmem:[%s6487_s9 + $0x88] ss:$16 sps:$4 sm:$0xff]  }
 0x86a   :  { %6549 = vst [vmem:[#allocation9_spill] sm:$0xff] %v5512_v4  ;;  %v5516_v1 = vadd.f32 %v4539_v8, %v1760_v19  ;;  %1789 = vadd.xlane.f32.xlu0 %v5512_v4  ;;  %v4085_v8 = vld [vmem:[%s6487_s9 + $0x4] ss:$16 sps:$4 sm:$0xff]   ;;  %v4107_v19 = vld [vmem:[%s6487_s9 + $0x80] ss:$16 sps:$4 sm:$0xff]  }
 0x86b   :  { %6553 = vst [vmem:[#allocation2_spill] sm:$0xff] %v5524_v54  ;;  %2115 = vmatprep.subr.bf16.mxu1 %v4085_v8  ;;  %v4115_v30 = vld [vmem:[%s6487_s9 + $0xa4] ss:$16 sps:$4 sm:$0xff]   ;;  %v4113_v8 = vld [vmem:[%s6487_s9 + $0xa0] ss:$16 sps:$4 sm:$0xff]  }
 0x86c   :  { %6550 = vst [vmem:[#allocation10_spill] sm:$0xff] %v5516_v1  ;;  %1791 = vadd.xlane.f32.xlu1 %v5516_v1  ;;  %2116 = vmatpush1.bf16.msra.mxu1 %v4083_v7  ;;  %v4118_v7 = vld [vmem:[%s6487_s9 + $0xac] ss:$16 sps:$4 sm:$0xff]   ;;  %v4116_v10 = vld [vmem:[%s6487_s9 + $0xa8] ss:$16 sps:$4 sm:$0xff]  }
 0x86d   :  { %2117 = vmatprep.subr.bf16.mxu1 %v4091_v26  ;;  %2191 = vmatpush1.bf16.msra.mxu0 %v4092_v41  ;;  %v4124_v26 = vld [vmem:[%s6487_s9 + $0xcc] ss:$16 sps:$4 sm:$0xff]   ;;  %v4122_v41 = vld [vmem:[%s6487_s9 + $0xc8] ss:$16 sps:$4 sm:$0xff]   ;;  %v4127_v14 = vld [vmem:[%s6487_s9 + $0xe4] ss:$16 sps:$4 sm:$0xff]  }
 0x86e   :  { %1793 = vadd.xlane.f32.xlu0 %v5520_v5  ;;  %2192 = vmatprep.subr.bf16.mxu0 %v4100_v59 }
 0x870   :  { %1795 = vadd.xlane.f32.xlu1 %v5524_v54  ;;  %2118 = vmatpush1.bf16.msra.mxu1 %v4089_v21  ;;  %v4119_v21 = vld [vmem:[%s6487_s9 + $0xc0] ss:$16 sps:$4 sm:$0xff]  }
 0x871   :  { %2119 = vmatprep.subr.bf16.mxu1 %v4097_v23  ;;  %2193 = vmatpush1.bf16.msra.mxu0 %v4098_v61 }
 0x872   :  { %2194 = vmatprep.subr.bf16.mxu0 %v4106_v40 }
 0x874   :  { %2120 = vmatpush1.bf16.msra.mxu1 %v4095_v48  ;;  %v5673_v48 = vld [vmem:[%s6489_s7] ss:$0 sm:$0xff] }
 0x875   :  { %2121 = vmatprep.subr.bf16.mxu1 %v4103_v62  ;;  %2195 = vmatpush1.bf16.msra.mxu0 %v4104_v2 }
 0x876   :  { %2196 = vmatprep.subr.bf16.mxu0 %v4112_v22 }
 0x878   :  { %2122 = vmatpush1.bf16.msra.mxu1 %v4101_v42 }
 0x879   :  { %2123 = vmatprep.subr.bf16.mxu1 %v4109_v49  ;;  %2197 = vmatpush1.bf16.msra.mxu0 %v4110_v3  ;;  %v5681_v3 = vld [vmem:[%s6490_s8] ss:$0 sm:$0xff] }
 0x87a   :  { %2198 = vmatprep.subr.bf16.mxu0 %v4118_v7 }
 0x87c   :  { %2124 = vmatpush1.bf16.msra.mxu1 %v4107_v19 }
 0x87d   :  { %2125 = vmatprep.subr.bf16.mxu1 %v4115_v30  ;;  %2199 = vmatpush1.bf16.msra.mxu0 %v4116_v10 }
 0x87e   :  { %2200 = vmatprep.subr.bf16.mxu0 %v4124_v26 }
 0x880   :  { %2126 = vmatpush1.bf16.msra.mxu1 %v4113_v8 }
 0x881   :  { %2127 = vmatprep.subr.bf16.mxu1 %v4121_v43  ;;  %2201 = vmatpush1.bf16.msra.mxu0 %v4122_v41 }
 0x884   :  { %2128 = vmatpush1.bf16.msra.mxu1 %v4119_v21  ;;  %v4134_v21 = vld [vmem:[%s6488_s11 + $0x8] ss:$16 sps:$4 sm:$0xff]  }
 0x885   :  { %2129 = vmatprep.subr.bf16.mxu1 %v4127_v14 }
 0x8ef   :  { %v1782_v52 = vpop.xlane.xlu0 %1781 }
 0x8f0   :  { %v1797_v13 = vmul.f32 0.0078125, %v1782_v52  ;;  %v4130_v52 = vld [vmem:[%s6487_s9 + $0xec] ss:$16 sps:$4 sm:$0xff]  }
 0x8f1   :  { %v1784_v45 = vpop.xlane.xlu1 %1783  ;;  %2202 = vmatprep.subr.bf16.mxu0 %v4130_v52 }
 0x8f2   :  { %v5553_v38 = vsub.f32 %v5497_v33, %v1797_v13  ;;  %v1798_v55 = vmul.f32 0.0078125, %v1784_v45  ;;  %v4125_v13 = vld [vmem:[%s6487_s9 + $0xe0] ss:$16 sps:$4 sm:$0xff]   ;;  %v4128_v45 = vld [vmem:[%s6487_s9 + $0xe8] ss:$16 sps:$4 sm:$0xff]  }
 0x8f3   :  { %v1786_v51 = vpop.xlane.xlu0 %1785  ;;  %2130 = vmatpush1.bf16.msra.mxu1 %v4125_v13  ;;  %2203 = vmatpush1.bf16.msra.mxu0 %v4128_v45 }
 0x8f4   :  { %v5556_v46 = vsub.f32 %v5500_v25, %v1798_v55  ;;  %v1799_v28 = vmul.f32 0.0078125, %v1786_v51  ;;  %v1813_v11 = vmul.f32 %v5553_v38, %v5553_v38  ;;  %v4133_v55 = vld [vmem:[%s6488_s11 + $0x4] ss:$16 sps:$4 sm:$0xff]   ;;  %v4136_v51 = vld [vmem:[%s6488_s11 + $0xc] ss:$16 sps:$4 sm:$0xff]  }
 0x8f5   :  { %v1788_v58 = vpop.xlane.xlu1 %1787  ;;  %2475 = vmatprep.subr.bf16.mxu1 %v4133_v55  ;;  %2548 = vmatprep.subr.bf16.mxu0 %v4136_v51  ;;  %v4137_v55 = vld [vmem:[%s6488_s11 + $0x20] ss:$16 sps:$4 sm:$0xff]   ;;  %v4140_v51 = vld [vmem:[%s6488_s11 + $0x28] ss:$16 sps:$4 sm:$0xff]  }
 0x8f6   :  { %v5561_v12 = vsub.f32 %v5504_v27, %v1799_v28  ;;  %v1800_v53 = vmul.f32 0.0078125, %v1788_v58  ;;  %1821 = vadd.xlane.f32.xlu0 %v1813_v11  ;;  %v1814_v63 = vmul.f32 %v5556_v46, %v5556_v46 }
 0x8f7   :  { %v1790_v31 = vpop.xlane.xlu0 %1789 }
 0x8f8   :  { %v5566_v32 = vsub.f32 %v5508_v56, %v1800_v53  ;;  %v1801_v34 = vmul.f32 0.0078125, %v1790_v31  ;;  %1823 = vadd.xlane.f32.xlu1 %v1814_v63  ;;  %v1815_v60 = vmul.f32 %v5561_v12, %v5561_v12 }
 0x8f9   :  { %v1792_v0 = vpop.xlane.xlu1 %1791 }
 0x8fa   :  { %v5571_v16 = vsub.f32 %v5512_v4, %v1801_v34  ;;  %v1802_v39 = vmul.f32 0.0078125, %v1792_v0  ;;  %1825 = vadd.xlane.f32.xlu0 %v1815_v60  ;;  %v1816_v29 = vmul.f32 %v5566_v32, %v5566_v32 }
 0x8fb   :  { %v1794_v20 = vpop.xlane.xlu0 %1793 }
 0x8fc   :  { %v5576_v37 = vsub.f32 %v5516_v1, %v1802_v39  ;;  %v1803_v15 = vmul.f32 0.0078125, %v1794_v20  ;;  %1827 = vadd.xlane.f32.xlu1 %v1816_v29  ;;  %v1817_v36 = vmul.f32 %v5571_v16, %v5571_v16 }
 0x8fd   :  { %v1796_v47 = vpop.xlane.xlu1 %1795 }
 0x8fe   :  { %v5581_v18 = vsub.f32 %v5520_v5, %v1803_v15  ;;  %v1804_v6 = vmul.f32 0.0078125, %v1796_v47  ;;  %1829 = vadd.xlane.f32.xlu0 %v1817_v36  ;;  %v1818_v35 = vmul.f32 %v5576_v37, %v5576_v37 }
 0x900   :  { %v5586_v57 = vsub.f32 %v5524_v54, %v1804_v6  ;;  %1831 = vadd.xlane.f32.xlu1 %v1818_v35  ;;  %v1819_v9 = vmul.f32 %v5581_v18, %v5581_v18 }
 0x902   :  { %1833 = vadd.xlane.f32.xlu0 %v1819_v9  ;;  %v1820_v17 = vmul.f32 %v5586_v57, %v5586_v57 }
 0x904   :  { %1835 = vadd.xlane.f32.xlu1 %v1820_v17 }
 0x983   :  { %v1822_v28 = vpop.xlane.xlu0 %1821 }
 0x984   :  { %v1837_v11 = vmul.f32 0.0078125, %v1822_v28 }
 0x985   :  { %v1824_v58 = vpop.xlane.xlu1 %1823 }
 0x986   :  { %v1845_v53 = vadd.f32 1e-05, %v1837_v11  ;;  %v1838_v63 = vmul.f32 0.0078125, %v1824_v58  ;;  %v4145_v11 = vld [vmem:[%s6488_s11 + $0x44] ss:$16 sps:$4 sm:$0xff]  }
 0x987   :  { %v1826_v31 = vpop.xlane.xlu0 %1825 }
 0x988   :  { %4355 = vrsqrt.f32 %v1845_v53  ;;  %v1846_v34 = vadd.f32 1e-05, %v1838_v63  ;;  %v1839_v60 = vmul.f32 0.0078125, %v1826_v31  ;;  %v4148_v53 = vld [vmem:[%s6488_s11 + $0x4c] ss:$16 sps:$4 sm:$0xff]  }
 0x989   :  { %v1828_v0 = vpop.xlane.xlu1 %1827  ;;  %v4143_v31 = vld [vmem:[%s6488_s11 + $0x40] ss:$16 sps:$4 sm:$0xff]  }
 0x98a   :  { %4357 = vrsqrt.f32 %v1846_v34  ;;  %v1847_v39 = vadd.f32 1e-05, %v1839_v60  ;;  %v1840_v29 = vmul.f32 0.0078125, %v1828_v0  ;;  %v4146_v34 = vld [vmem:[%s6488_s11 + $0x48] ss:$16 sps:$4 sm:$0xff]  }
 0x98b   :  { %v1830_v20 = vpop.xlane.xlu0 %1829  ;;  %v4154_v0 = vld [vmem:[%s6488_s11 + $0x6c] ss:$16 sps:$4 sm:$0xff]  }
 0x98c   :  { %4359 = vrsqrt.f32 %v1847_v39  ;;  %v1848_v15 = vadd.f32 1e-05, %v1840_v29  ;;  %v1841_v36 = vmul.f32 0.0078125, %v1830_v20 }
 0x98d   :  { %v1832_v47 = vpop.xlane.xlu1 %1831 }
 0x98e   :  { %4361 = vrsqrt.f32 %v1848_v15  ;;  %v1842_v6 = vmul.f32 0.0078125, %v1832_v47  ;;  %v1849_v35 = vadd.f32 1e-05, %v1841_v36  ;;  %v4149_v36 = vld [vmem:[%s6488_s11 + $0x60] ss:$16 sps:$4 sm:$0xff]  }
 0x98f   :  { %v1834_v17 = vpop.xlane.xlu0 %1833  ;;  %v4152_v47 = vld [vmem:[%s6488_s11 + $0x68] ss:$16 sps:$4 sm:$0xff]  }
 0x990   :  { %v1850_v9 = vadd.f32 1e-05, %v1842_v6  ;;  %v1843_v42 = vmul.f32 0.0078125, %v1834_v17  ;;  %v4160_v17 = vld [vmem:[%s6488_s11 + $0x8c] ss:$16 sps:$4 sm:$0xff]  }
 0x991   :  { %v1836_v23 = vpop.xlane.xlu1 %1835 }
 0x992   :  { %v4356_v59 = vpop.eup %4355  ;;  %4363 = vrsqrt.f32 %v1850_v9  ;;  %v1844_v61 = vmul.f32 0.0078125, %v1836_v23  ;;  %v1851_v8 = vadd.f32 1e-05, %v1843_v42 }
 0x993   :  { %v1861_v62 = vmul.f32 %v4356_v59, %v5553_v38  ;;  %4365 = vrsqrt.f32 %v1849_v35  ;;  %v4157_v35 = vld [vmem:[%s6488_s11 + $0x84] ss:$16 sps:$4 sm:$0xff]   ;;  %v4155_v59 = vld [vmem:[%s6488_s11 + $0x80] ss:$16 sps:$4 sm:$0xff]  }
 0x994   :  { %v4358_v40 = vpop.eup %4357  ;;  %v1852_v19 = vadd.f32 1e-05, %v1844_v61  ;;  %v4158_v61 = vld [vmem:[%s6488_s11 + $0x88] ss:$16 sps:$4 sm:$0xff]  }
 0x995   :  { %v1875_v2 = vmul.f32 %v5673_v48, %v1861_v62  ;;  %v1862_v49 = vmul.f32 %v4358_v40, %v5556_v46  ;;  %v4131_v46 = vld [vmem:[%s6488_s11] ss:$16 sps:$4 sm:$0xff]   ;;  %v4163_v40 = vld [vmem:[%s6488_s11 + $0xa4] ss:$16 sps:$4 sm:$0xff]  }
 0x996   :  { %v4360_v22 = vpop.eup %4359  ;;  %4367 = vrsqrt.f32 %v1852_v19  ;;  %v4169_v19 = vld [vmem:[%s6488_s11 + $0xc4] ss:$16 sps:$4 sm:$0xff]  }
 0x997   :  { %v1876_v30 = vmul.f32 %v5673_v48, %v1862_v49  ;;  %v1863_v38 = vmul.f32 %v4360_v22, %v5561_v12  ;;  %v1889_v43 = vadd.f32 %v5681_v3, %v1875_v2  ;;  %v4139_v12 = vld [vmem:[%s6488_s11 + $0x24] ss:$16 sps:$4 sm:$0xff]   ;;  %4369 = vrsqrt.f32 %v1851_v8  ;;  %v4161_v49 = vld [vmem:[%s6488_s11 + $0xa0] ss:$16 sps:$4 sm:$0xff]   ;;  %v4164_v22 = vld [vmem:[%s6488_s11 + $0xa8] ss:$16 sps:$4 sm:$0xff]  }
 0x998   :  { %v4362_v7 = vpop.eup %4361  ;;  %v4167_v8 = vld [vmem:[%s6488_s11 + $0xc0] ss:$16 sps:$4 sm:$0xff]  }
 0x999   :  { %v1864_v10 = vmul.f32 %v4362_v7, %v5566_v32  ;;  %v1890_v26 = vadd.f32 %v5681_v3, %v1876_v30  ;;  %v4142_v32 = vld [vmem:[%s6488_s11 + $0x2c] ss:$16 sps:$4 sm:$0xff]   ;;  %v1877_v13 = vmul.f32 %v5673_v48, %v1863_v38  ;;  %v4170_v38 = vld [vmem:[%s6488_s11 + $0xc8] ss:$16 sps:$4 sm:$0xff]  }
 0x99b   :  { %v5694_v41 = vpack.c.bf16 %v1890_v26, %v1889_v43  ;;  %v1878_v14 = vmul.f32 %v5673_v48, %v1864_v10  ;;  %v4175_v43 = vld [vmem:[%s6488_s11 + $0xe4] ss:$16 sps:$4 sm:$0xff]   ;;  %v4173_v26 = vld [vmem:[%s6488_s11 + $0xe0] ss:$16 sps:$4 sm:$0xff]  }
 0x99c   :  { %v4364_v52 = vpop.eup %4363 }
 0x99d   :  { %2148 = vmatmul.mubr.bf16.vlgmr.msra.gmra.mrb[40].mxu1 %v5694_v41  ;;  %2221 = vmatmul.mubr.bf16.vlgmr.msra.gmra.mrb[40].mxu0 %v5694_v41  ;;  %v4366_v45 = vpop.eup %4365  ;;  %v1866_v28 = vmul.f32 %v4364_v52, %v5576_v37  ;;  %v1892_v58 = vadd.f32 %v5681_v3, %v1878_v14  ;;  %v1891_v37 = vadd.f32 %v5681_v3, %v1877_v13  ;;  %v4185_v14 = vld [vmem:[%s6491_s13 + $0xc8] sm:$0xff]  }
 0x99e   :  { %2476 = vmatpush1.bf16.msra.mxu1 %v4131_v46  ;;  %2549 = vmatpush1.bf16.msra.mxu0 %v4134_v21  ;;  %v1865_v63 = vmul.f32 %v4366_v45, %v5571_v16  ;;  %v4151_v16 = vld [vmem:[%s6488_s11 + $0x64] ss:$16 sps:$4 sm:$0xff]   ;;  %v4176_v46 = vld [vmem:[%s6488_s11 + $0xe8] ss:$16 sps:$4 sm:$0xff]  }
 0x99f   :  { %2477 = vmatprep.subr.bf16.mxu1 %v4139_v12  ;;  %2550 = vmatprep.subr.bf16.mxu0 %v4142_v32  ;;  %v5730_v60 = vpack.c.bf16 %v1892_v58, %v1891_v37  ;;  %v1880_v39 = vmul.f32 %v5673_v48, %v1866_v28  ;;  %v4179_v21 = vld [vmem:[%s6491_s13 + $0x40] sm:$0xff]   ;;  %v4183_v32 = vld [vmem:[%s6491_s13 + $0x48] sm:$0xff]   ;;  %v4187_v45 = vld [vmem:[%s6491_s13 + $0x50] sm:$0xff]  }
 0x9a0   :  { %2157 = vmatprep.mubr.bf16.mxu1 %v6542_v50  ;;  %2230 = vmatprep.mubr.bf16.mxu0 %v6542_v50  ;;  %v4368_v29 = vpop.eup %4367  ;;  %v1879_v20 = vmul.f32 %v5673_v48, %v1865_v63  ;;  %v4181_v12 = vld [vmem:[%s6491_s13 + $0xc0] sm:$0xff]   ;;  %v4184_v52 = vld [vmem:[%s6491_s13 + $0x8] sm:$0xff]   ;;  %v4190_v28 = vld [vmem:[%s6491_s13 + $0x90] sm:$0xff]  }
 0x9a1   :  { %v4370_v15 = vpop.eup %4369  ;;  %v1868_v6 = vmul.f32 %v4368_v29, %v5586_v57  ;;  %v1894_v9 = vadd.f32 %v5681_v3, %v1880_v39  ;;  %v4186_v13 = vld [vmem:[%s6491_s13 + $0x88] sm:$0xff]   ;;  %v4193_v58 = vld [vmem:[%s6491_s13 + $0xd8] sm:$0xff]   ;;  %v4195_v37 = vld [vmem:[%s6491_s13 + $0x60] sm:$0xff]  }
 0x9a2   :  { %2478 = vmatpush1.bf16.msra.mxu1 %v4137_v55  ;;  %2551 = vmatpush1.bf16.msra.mxu0 %v4140_v51  ;;  %v1867_v23 = vmul.f32 %v4370_v15, %v5581_v18  ;;  %v1893_v57 = vadd.f32 %v5681_v3, %v1879_v20  ;;  %v4166_v18 = vld [vmem:[%s6488_s11 + $0xac] ss:$16 sps:$4 sm:$0xff]   ;;  %v4189_v55 = vld [vmem:[%s6491_s13 + $0xd0] sm:$0xff]  }
 0x9a3   :  { %2479 = vmatprep.subr.bf16.mxu1 %v4145_v11  ;;  %2552 = vmatprep.subr.bf16.mxu0 %v4148_v53  ;;  %v1882_v42 = vmul.f32 %v5673_v48, %v1868_v6  ;;  %v4188_v51 = vld [vmem:[%s6491_s13 + $0x10] sm:$0xff]   ;;  %v4191_v11 = vld [vmem:[%s6491_s13 + $0x58] sm:$0xff]   ;;  %v4200_v39 = vld [vmem:[%s6491_s13 + $0x28] sm:$0xff]  }
 0x9a4   :  { %v1899_v62 = vpack.c.bf16 %v1894_v9, %v1893_v57  ;;  %v1881_v2 = vmul.f32 %v5673_v48, %v1867_v23  ;;  %v4172_v48 = vld [vmem:[%s6488_s11 + $0xcc] ss:$16 sps:$4 sm:$0xff]   ;;  %v4203_v20 = vld [vmem:[%s6491_s13 + $0x70] sm:$0xff]  }
 0x9a5   :  { %2158 = vmatmul.mubr.bf16.gmra.mrb[44].mxu1 %v5730_v60  ;;  %2231 = vmatmul.mubr.bf16.gmra.mrb[44].mxu0 %v5730_v60  ;;  %v1896_v30 = vadd.f32 %v5681_v3, %v1882_v42  ;;  %v4192_v53 = vld [vmem:[%s6491_s13 + $0x18] sm:$0xff]   ;;  %v4202_v29 = vld [vmem:[%s6491_s13 + $0xa8] sm:$0xff]   ;;  %v4205_v15 = vld [vmem:[%s6491_s13 + $0xf0] sm:$0xff]  }
 0x9a6   :  { %2480 = vmatpush1.bf16.msra.mxu1 %v4143_v31  ;;  %2553 = vmatpush1.bf16.msra.mxu0 %v4146_v34  ;;  %v1895_v7 = vadd.f32 %v5681_v3, %v1881_v2  ;;  %v4178_v3 = vld [vmem:[%s6488_s11 + $0xec] ss:$16 sps:$4 sm:$0xff]   ;;  %v4197_v31 = vld [vmem:[%s6491_s13 + $0xe0] sm:$0xff]  }
 0x9a7   :  { %2481 = vmatprep.subr.bf16.mxu1 %v4151_v16  ;;  %2554 = vmatprep.subr.bf16.mxu0 %v4154_v0  ;;  %v4194_v63 = vld [vmem:[%s6491_s13 + $0x98] sm:$0xff]   ;;  %v4196_v34 = vld [vmem:[%s6491_s13 + $0x20] sm:$0xff]   ;;  %v4199_v16 = vld [vmem:[%s6491_s13 + $0x68] sm:$0xff]  }
 0x9a8   :  { %2167 = vmatprep.mubr.bf16.mxu1 %v6542_v50  ;;  %2240 = vmatprep.mubr.bf16.mxu0 %v6542_v50  ;;  %v1900_v10 = vpack.c.bf16 %v1896_v30, %v1895_v7  ;;  %v4201_v0 = vld [vmem:[%s6491_s13 + $0xe8] sm:$0xff]   ;;  %v4207_v6 = vld [vmem:[%s6491_s13 + $0x78] sm:$0xff]  }
 0x9a9   :  { %v4208_v9 = vld [vmem:[%s6491_s13 + $0x38] sm:$0xff]  }
 0x9aa   :  { %2482 = vmatpush1.bf16.msra.mxu1 %v4149_v36  ;;  %2555 = vmatpush1.bf16.msra.mxu0 %v4152_v47  ;;  %v4204_v36 = vld [vmem:[%s6491_s13 + $0x30] sm:$0xff]  }
 0x9ab   :  { %2483 = vmatprep.subr.bf16.mxu1 %v4157_v35  ;;  %2556 = vmatprep.subr.bf16.mxu0 %v4160_v17  ;;  %v4206_v47 = vld [vmem:[%s6491_s13 + $0xb0] sm:$0xff]   ;;  %v4209_v35 = vld [vmem:[%s6491_s13 + $0xf8] sm:$0xff]  }
 0x9ac   :  { %v4210_v17 = vld [vmem:[%s6491_s13 + $0xb8] sm:$0xff]  }
 0x9ad   :  { %2168 = vmatmul.mubr.bf16.gmra.mrb[48].mxu1 %v1899_v62  ;;  %2241 = vmatmul.mubr.bf16.gmra.mrb[48].mxu0 %v1899_v62 }
 0x9ae   :  { %2484 = vmatpush1.bf16.msra.mxu1 %v4155_v59  ;;  %2557 = vmatpush1.bf16.msra.mxu0 %v4158_v61 }
 0x9af   :  { %2485 = vmatprep.subr.bf16.mxu1 %v4163_v40  ;;  %2558 = vmatprep.subr.bf16.mxu0 %v4166_v18 }
 0x9b0   :  { %2177 = vmatprep.mubr.bf16.mxu1 %v6542_v50  ;;  %2250 = vmatprep.mubr.bf16.mxu0 %v6542_v50 }
 0x9b2   :  { %2486 = vmatpush1.bf16.msra.mxu1 %v4161_v49  ;;  %2559 = vmatpush1.bf16.msra.mxu0 %v4164_v22 }
 0x9b3   :  { %2487 = vmatprep.subr.bf16.mxu1 %v4169_v19  ;;  %2560 = vmatprep.subr.bf16.mxu0 %v4172_v48 }
 0x9b5   :  { %2178 = vmatmul.mubr.bf16.gmra.mrb[52].mxu1 %v1900_v10  ;;  %2251 = vmatmul.mubr.bf16.gmra.mrb[52].mxu0 %v1900_v10 }
 0x9b6   :  { %2488 = vmatpush1.bf16.msra.mxu1 %v4167_v8  ;;  %2561 = vmatpush1.bf16.msra.mxu0 %v4170_v38 }
 0x9b7   :  { %2489 = vmatprep.subr.bf16.mxu1 %v4175_v43  ;;  %2562 = vmatprep.subr.bf16.mxu0 %v4178_v3 }
 0x9b8   :  { %2507 = vmatprep.mubr.bf16.mxu1 %v6542_v50  ;;  %2580 = vmatprep.mubr.bf16.mxu0 %v6542_v50 }
 0x9ba   :  { %2490 = vmatpush1.bf16.msra.mxu1 %v4173_v26  ;;  %2563 = vmatpush1.bf16.msra.mxu0 %v4176_v46 }
 0x9bb   :  { %3746 = vmatprep.subr.bf16.mxu1 %v4179_v21  ;;  %3786 = vmatprep.subr.bf16.mxu0 %v4181_v12  ;;  %v1933_v21 = vld [vmem:[%s6492_s10] sm:$0xf] }
 0x9bd   :  { %2508 = vmatmul.mubr.bf16.vlgmr.msra.gmra.mrb[56].mxu1 %v5694_v41  ;;  %2581 = vmatmul.mubr.bf16.vlgmr.msra.gmra.mrb[56].mxu0 %v5694_v41  ;;  %v4180_v41 = vld [vmem:[%s6491_s13] sm:$0xff]  }
 0x9be   :  { %2517 = vmatprep.mubr.bf16.mxu1 %v6542_v50  ;;  %2590 = vmatprep.mubr.bf16.mxu0 %v6542_v50 }
 0x9bf   :  { %3747 = vmatpush3.bf16.msra.mxu1 %v4180_v41  ;;  %v1949_v41 = vsub.s32 3, %v4682_v24 }
 0x9c0   :  { %3748 = vmatprep.subr.bf16.mxu1 %v4183_v32  ;;  %v5921_v32 = vrot.slane %v1933_v21, %v4685_v44 }
 0x9c2   :  { %6554 = vst [vmem:[#allocation12_spill] sm:$0xff] %v5921_v32 }
 0x9c3   :  { %3749 = vmatpush3.bf16.msra.mxu1 %v4184_v52  ;;  %v6555_v52 = vld [vmem:[#allocation4_spill] sm:$0xff] }
 0x9c4   :  { %3750 = vmatprep.subr.bf16.mxu1 %v4187_v45  ;;  %v6557_v45 = vld [vmem:[#allocation3_spill] sm:$0xff] }
 0x9c5   :  { %2518 = vmatmul.mubr.bf16.gmra.mrb[60].mxu1 %v5730_v60  ;;  %2591 = vmatmul.mubr.bf16.gmra.mrb[60].mxu0 %v5730_v60  ;;  %v4198_v60 = vld [vmem:[%s6491_s13 + $0xa0] sm:$0xff]  }
 0x9c6   :  { %2527 = vmatprep.mubr.bf16.mxu1 %v6542_v50  ;;  %2600 = vmatprep.mubr.bf16.mxu0 %v6542_v50 }
 0x9c7   :  { %3751 = vmatpush3.bf16.msra.mxu1 %v4188_v51  ;;  %v1950_v51 = vrot.slane %v1933_v21, %v1949_v41 }
 0x9c8   :  { %3752 = vmatprep.subr.bf16.mxu1 %v4191_v11 }
 0x9cb   :  { %3753 = vmatpush3.bf16.msra.mxu1 %v4192_v53 }
 0x9cc   :  { %3754 = vmatprep.subr.bf16.mxu1 %v4195_v37 }
 0x9cd   :  { %2528 = vmatmul.mubr.bf16.gmra.mrb[64].mxu1 %v1899_v62  ;;  %2601 = vmatmul.mubr.bf16.gmra.mrb[64].mxu0 %v1899_v62 }
 0x9ce   :  { %2537 = vmatprep.mubr.bf16.mxu1 %v6542_v50  ;;  %2610 = vmatprep.mubr.bf16.mxu0 %v6542_v50  ;;  %v4182_v50 = vld [vmem:[%s6491_s13 + $0x80] sm:$0xff]  }
 0x9cf   :  { %3787 = vmatpush3.bf16.msra.mxu0 %v4182_v50  ;;  %3755 = vmatpush3.bf16.msra.mxu1 %v4196_v34 }
 0x9d0   :  { %3788 = vmatprep.subr.bf16.mxu0 %v4185_v14  ;;  %3756 = vmatprep.subr.bf16.mxu1 %v4199_v16  ;;  %v2293_v14 = vld [vmem:[%s6493_s12] sm:$0xf] }
 0x9d1   :  { %v5933_v53 = vrot.slane %v2293_v14, %v4685_v44  ;;  %v5943_v34 = vrot.slane %v2293_v14, %v6555_v52  ;;  %v5948_v16 = vrot.slane %v2293_v14, %v1949_v41 }
 0x9d3   :  { %3789 = vmatpush3.bf16.msra.mxu0 %v4186_v13  ;;  %3757 = vmatpush3.bf16.msra.mxu1 %v4200_v39  ;;  %v5927_v13 = vrot.slane %v1933_v21, %v6555_v52 }
 0x9d4   :  { %3790 = vmatprep.subr.bf16.mxu0 %v4189_v55  ;;  %3758 = vmatprep.subr.bf16.mxu1 %v4203_v20  ;;  %v1942_v55 = vrot.slane %v1933_v21, %v6557_v45 }
 0x9d5   :  { %2538 = vmatmul.mubr.bf16.gmra.mrb[68].mxu1 %v1900_v10  ;;  %2611 = vmatmul.mubr.bf16.gmra.mrb[68].mxu0 %v1900_v10  ;;  %6556 = vst [vmem:[#allocation4_spill] sm:$0xff] %v5927_v13 }
 0x9d7   :  { %3791 = vmatpush3.bf16.msra.mxu0 %v4190_v28  ;;  %3759 = vmatpush3.bf16.msra.mxu1 %v4204_v36 }
 0x9d8   :  { %3792 = vmatprep.subr.bf16.mxu0 %v4193_v58  ;;  %3760 = vmatprep.subr.bf16.mxu1 %v4207_v6 }
 0x9db   :  { %3793 = vmatpush3.bf16.msra.mxu0 %v4194_v63  ;;  %3761 = vmatpush3.bf16.msra.mxu1 %v4208_v9 }
 0x9dc   :  { %3794 = vmatprep.subr.bf16.mxu0 %v4197_v31 }
 0x9df   :  { %3795 = vmatpush3.bf16.msra.mxu0 %v4198_v60  ;;  %v5946_v60 = vrot.slane %v2293_v14, %v6557_v45 }
 0x9e0   :  { %3796 = vmatprep.subr.bf16.mxu0 %v4201_v0 }
 0x9e3   :  { %3797 = vmatpush3.bf16.msra.mxu0 %v4202_v29 }
 0x9e4   :  { %3798 = vmatprep.subr.bf16.mxu0 %v4205_v15 }
 0x9e7   :  { %3799 = vmatpush3.bf16.msra.mxu0 %v4206_v47 }
 0x9e8   :  { %3800 = vmatprep.subr.bf16.mxu0 %v4209_v35 }
 0x9eb   :  { %3801 = vmatpush3.bf16.msra.mxu0 %v4210_v17 }
 0xa70   :  { %v2149_v23 = vpop.f32.mrb[40].mxu1  ;;  %v2222_v57 = vpop.f32.mrb[40].mxu0 }
 0xa71   :  { %v2151_v59 = vpop.f32.mrb[41].mxu1  ;;  %v2224_v61 = vpop.f32.mrb[41].mxu0  ;;  %v5936_v63 = vadd.f32 %v2149_v23, %v5921_v32  ;;  %v5951_v0 = vadd.f32 %v2222_v57, %v5927_v13 }
 0xa72   :  { %v2153_v62 = vpop.f32.mrb[42].mxu1  ;;  %v2226_v40 = vpop.f32.mrb[42].mxu0  ;;  %v5953_v44 = vadd.f32 %v2151_v59, %v1942_v55  ;;  %v5955_v39 = vadd.f32 %v2224_v61, %v1950_v51 }
 0xa73   :  { %v2155_v18 = vpop.f32.mrb[43].mxu1  ;;  %v2228_v42 = vpop.f32.mrb[43].mxu0  ;;  %v5958_v29 = vadd.f32 %v2153_v62, %v5921_v32  ;;  %v5961_v36 = vadd.f32 %v2226_v40, %v5927_v13 }
 0xa74   :  { %v5963_v47 = vadd.f32 %v2155_v18, %v1942_v55  ;;  %v5965_v6 = vadd.f32 %v2228_v42, %v1950_v51 }
 0xa78   :  { %v2159_v2 = vpop.f32.mrb[44].mxu1  ;;  %v2232_v49 = vpop.f32.mrb[44].mxu0 }
 0xa79   :  { %v2161_v22 = vpop.f32.mrb[45].mxu1  ;;  %v2234_v19 = vpop.f32.mrb[45].mxu0  ;;  %v5968_v35 = vadd.f32 %v2159_v2, %v5921_v32  ;;  %v5971_v9 = vadd.f32 %v2232_v49, %v5927_v13 }
 0xa7a   :  { %v2163_v30 = vpop.f32.mrb[46].mxu1  ;;  %v2236_v48 = vpop.f32.mrb[46].mxu0  ;;  %v5973_v17 = vadd.f32 %v2161_v22, %v1942_v55  ;;  %v5975_v23 = vadd.f32 %v2234_v19, %v1950_v51 }
 0xa7b   :  { %v2165_v7 = vpop.f32.mrb[47].mxu1  ;;  %v2238_v8 = vpop.f32.mrb[47].mxu0  ;;  %6561 = vst [vmem:[#allocation15_spill] sm:$0xff] %v5968_v35  ;;  %6562 = vst [vmem:[#allocation16_spill] sm:$0xff] %v5971_v9  ;;  %v5978_v57 = vadd.f32 %v2163_v30, %v5921_v32  ;;  %v5981_v59 = vadd.f32 %v2236_v48, %v5927_v13 }
 0xa7c   :  { %6563 = vst [vmem:[#allocation17_spill] sm:$0xff] %v5975_v23  ;;  %v5983_v61 = vadd.f32 %v2165_v7, %v1942_v55  ;;  %v5985_v62 = vadd.f32 %v2238_v8, %v1950_v51 }
 0xa7d   :  { %6564 = vst [vmem:[#allocation18_spill] sm:$0xff] %v5978_v57  ;;  %6565 = vst [vmem:[#allocation19_spill] sm:$0xff] %v5981_v59 }
 0xa7e   :  { %6566 = vst [vmem:[#allocation20_spill] sm:$0xff] %v5985_v62 }
 0xa80   :  { %v2169_v38 = vpop.f32.mrb[48].mxu1  ;;  %v2242_v10 = vpop.f32.mrb[48].mxu0 }
 0xa81   :  { %v2171_v43 = vpop.f32.mrb[49].mxu1  ;;  %v2244_v3 = vpop.f32.mrb[49].mxu0  ;;  %v5988_v40 = vadd.f32 %v2169_v38, %v5921_v32  ;;  %v5991_v18 = vadd.f32 %v2242_v10, %v5927_v13 }
 0xa82   :  { %v2173_v26 = vpop.f32.mrb[50].mxu1  ;;  %v2246_v46 = vpop.f32.mrb[50].mxu0  ;;  %v5993_v42 = vadd.f32 %v2171_v43, %v1942_v55  ;;  %v5995_v2 = vadd.f32 %v2244_v3, %v1950_v51 }
 0xa83   :  { %v2175_v12 = vpop.f32.mrb[51].mxu1  ;;  %v2248_v50 = vpop.f32.mrb[51].mxu0  ;;  %6567 = vst [vmem:[#allocation21_spill] sm:$0xff] %v5988_v40  ;;  %6568 = vst [vmem:[#allocation22_spill] sm:$0xff] %v5991_v18  ;;  %v5998_v49 = vadd.f32 %v2173_v26, %v5921_v32  ;;  %v6001_v22 = vadd.f32 %v2246_v46, %v5927_v13 }
 0xa84   :  { %6569 = vst [vmem:[#allocation23_spill] sm:$0xff] %v5993_v42  ;;  %6570 = vst [vmem:[#allocation24_spill] sm:$0xff] %v5995_v2  ;;  %v6003_v19 = vadd.f32 %v2175_v12, %v1942_v55  ;;  %v6005_v30 = vadd.f32 %v2248_v50, %v1950_v51 }
 0xa85   :  { %6571 = vst [vmem:[#allocation25_spill] sm:$0xff] %v5998_v49  ;;  %6572 = vst [vmem:[#allocation26_spill] sm:$0xff] %v6001_v22 }
 0xa86   :  { %6573 = vst [vmem:[#allocation27_spill] sm:$0xff] %v6003_v19  ;;  %6574 = vst [vmem:[#allocation28_spill] sm:$0xff] %v6005_v30 }
 0xa88   :  { %v2179_v28 = vpop.f32.mrb[52].mxu1  ;;  %v5930_v11 = vpop.f32.mrb[52].mxu0 }
 0xa89   :  { %6558 = vst [vmem:[#allocation3_spill] sm:$0xff] %v5930_v11  ;;  %v2181_v58 = vpop.f32.mrb[53].mxu1  ;;  %v2254_v24 = vpop.f32.mrb[53].mxu0  ;;  %v6008_v48 = vadd.f32 %v2179_v28, %v5921_v32 }
 0xa8a   :  { %v5938_v37 = vpop.f32.mrb[54].mxu1  ;;  %v5940_v31 = vpop.f32.mrb[54].mxu0  ;;  %v6010_v38 = vadd.f32 %v2181_v58, %v1942_v55  ;;  %v6012_v10 = vadd.f32 %v2254_v24, %v1950_v51 }
 0xa8b   :  { %6559 = vst [vmem:[#allocation13_spill] sm:$0xff] %v5938_v37  ;;  %6560 = vst [vmem:[#allocation14_spill] sm:$0xff] %v5940_v31  ;;  %v2185_v20 = vpop.f32.mrb[55].mxu1  ;;  %v2258_v15 = vpop.f32.mrb[55].mxu0 }
 0xa8c   :  { %6575 = vst [vmem:[#allocation29_spill] sm:$0xff] %v6008_v48  ;;  %6576 = vst [vmem:[#allocation30_spill] sm:$0xff] %v6010_v38  ;;  %v6020_v21 = vadd.f32 %v2185_v20, %v1942_v55  ;;  %v6022_v41 = vadd.f32 %v2258_v15, %v1950_v51 }
 0xa8d   :  { %6577 = vst [vmem:[#allocation31_spill] sm:$0xff] %v6012_v10 }
 0xa8e   :  { %6578 = vst [vmem:[#allocation32_spill] sm:$0xff] %v6020_v21  ;;  %6579 = vst [vmem:[#allocation33_spill] sm:$0xff] %v6022_v41 }
 0xa90   :  { %v2509_v7 = vpop.f32.mrb[56].mxu1  ;;  %v2582_v8 = vpop.f32.mrb[56].mxu0 }
 0xa91   :  { %v6015_v43 = vadd.f32 %v2509_v7, %v5933_v53  ;;  %v6018_v3 = vadd.f32 %v2582_v8, %v5943_v34  ;;  %v2511_v26 = vpop.f32.mrb[57].mxu1  ;;  %v2584_v46 = vpop.f32.mrb[57].mxu0 }
 0xa92   :  { %v6025_v12 = vadd.f32 %v2511_v26, %v5946_v60  ;;  %v6028_v50 = vadd.f32 %v2584_v46, %v5948_v16  ;;  %v2513_v14 = vpop.f32.mrb[58].mxu1  ;;  %v2586_v52 = vpop.f32.mrb[58].mxu0 }
 0xa93   :  { %v2621_v45 = vmul.f32 %v6015_v43, %v6015_v43  ;;  %v2623_v28 = vmul.f32 %v6018_v3, %v6018_v3  ;;  %v6035_v58 = vadd.f32 %v2513_v14, %v5933_v53  ;;  %v6038_v55 = vadd.f32 %v2586_v52, %v5943_v34  ;;  %v2515_v51 = vpop.f32.mrb[59].mxu1  ;;  %v2588_v24 = vpop.f32.mrb[59].mxu0 }
 0xa94   :  { %v2622_v20 = vmul.f32 %v6025_v12, %v6025_v12  ;;  %v2624_v15 = vmul.f32 %v6028_v50, %v6028_v50  ;;  %v6045_v7 = vadd.f32 %v2515_v51, %v5946_v60  ;;  %v6048_v8 = vadd.f32 %v2588_v24, %v5948_v16 }
 0xa95   :  { %v2653_v26 = vmul.f32 %v2621_v45, %v6015_v43  ;;  %v2655_v46 = vmul.f32 %v2623_v28, %v6018_v3  ;;  %v2625_v14 = vmul.f32 %v6035_v58, %v6035_v58  ;;  %v2627_v52 = vmul.f32 %v6038_v55, %v6038_v55 }
 0xa96   :  { %v2654_v54 = vmul.f32 %v2622_v20, %v6025_v12  ;;  %v2656_v5 = vmul.f32 %v2624_v15, %v6028_v50  ;;  %v2626_v51 = vmul.f32 %v6045_v7, %v6045_v7  ;;  %v2628_v24 = vmul.f32 %v6048_v8, %v6048_v8 }
 0xa97   :  { %v2685_v1 = vmul.f32 0.044715, %v2653_v26  ;;  %v2687_v45 = vmul.f32 0.044715, %v2655_v46  ;;  %v2657_v28 = vmul.f32 %v2625_v14, %v6035_v58  ;;  %v2659_v4 = vmul.f32 %v2627_v52, %v6038_v55 }
 0xa98   :  { %v2686_v56 = vmul.f32 0.044715, %v2654_v54  ;;  %v2688_v27 = vmul.f32 0.044715, %v2656_v5  ;;  %v2658_v25 = vmul.f32 %v2626_v51, %v6045_v7  ;;  %v2660_v20 = vmul.f32 %v2628_v24, %v6048_v8  ;;  %v2519_v33 = vpop.f32.mrb[60].mxu1  ;;  %v2592_v15 = vpop.f32.mrb[60].mxu0 }
 0xa99   :  { %v2717_v31 = vadd.f32 %v2685_v1, %v6015_v43  ;;  %v2719_v48 = vadd.f32 %v2687_v45, %v6018_v3  ;;  %v2689_v11 = vmul.f32 0.044715, %v2657_v28  ;;  %v2691_v13 = vmul.f32 0.044715, %v2659_v4  ;;  %v2521_v26 = vpop.f32.mrb[61].mxu1  ;;  %v2594_v46 = vpop.f32.mrb[61].mxu0 }
 0xa9a   :  { %v2718_v14 = vadd.f32 %v2686_v56, %v6025_v12  ;;  %v2720_v52 = vadd.f32 %v2688_v27, %v6028_v50  ;;  %v2690_v54 = vmul.f32 0.044715, %v2658_v25  ;;  %v2692_v5 = vmul.f32 0.044715, %v2660_v20  ;;  %v2523_v41 = vpop.f32.mrb[62].mxu1  ;;  %v2596_v51 = vpop.f32.mrb[62].mxu0 }
 0xa9b   :  { %v2749_v10 = vmul.f32 0.7978846, %v2717_v31  ;;  %v2751_v24 = vmul.f32 0.7978846, %v2719_v48  ;;  %v2721_v37 = vadd.f32 %v2689_v11, %v6035_v58  ;;  %v2723_v1 = vadd.f32 %v2691_v13, %v6038_v55  ;;  %v2525_v32 = vpop.f32.mrb[63].mxu1  ;;  %v2598_v45 = vpop.f32.mrb[63].mxu0 }
 0xa9c   :  { %v2750_v28 = vmul.f32 0.7978846, %v2718_v14  ;;  %v2752_v4 = vmul.f32 0.7978846, %v2720_v52  ;;  %v2722_v21 = vadd.f32 %v2690_v54, %v6045_v7  ;;  %v2724_v56 = vadd.f32 %v2692_v5, %v6048_v8 }
 0xa9d   :  { %4371 = vtanh.f32 %v2749_v10  ;;  %v2753_v27 = vmul.f32 0.7978846, %v2721_v37  ;;  %v2755_v25 = vmul.f32 0.7978846, %v2723_v1  ;;  %v6075_v20 = vadd.f32 %v2519_v33, %v5933_v53 }
 0xa9e   :  { %4373 = vtanh.f32 %v2751_v24  ;;  %v2754_v31 = vmul.f32 0.7978846, %v2722_v21  ;;  %v2756_v48 = vmul.f32 0.7978846, %v2724_v56  ;;  %v6078_v11 = vadd.f32 %v2592_v15, %v5943_v34 }
 0xa9f   :  { %6580 = vst [vmem:[#allocation34_spill] sm:$0xff] %v6075_v20  ;;  %4375 = vtanh.f32 %v2750_v28  ;;  %v2629_v13 = vmul.f32 %v6075_v20, %v6075_v20  ;;  %v6083_v14 = vadd.f32 %v2521_v26, %v5946_v60  ;;  %v6086_v10 = vadd.f32 %v2594_v46, %v5948_v16 }
 0xaa0   :  { %6581 = vst [vmem:[#allocation35_spill] sm:$0xff] %v6078_v11  ;;  %4377 = vtanh.f32 %v2752_v4  ;;  %v2631_v33 = vmul.f32 %v6078_v11, %v6078_v11  ;;  %v6091_v37 = vadd.f32 %v2523_v41, %v5933_v53  ;;  %v6094_v21 = vadd.f32 %v2596_v51, %v5943_v34  ;;  %v6096_v15 = vpop.f32.mrb[64].mxu1  ;;  %v6098_v52 = vpop.f32.mrb[64].mxu0 }
 0xaa1   :  { %4379 = vtanh.f32 %v2753_v27  ;;  %v2661_v26 = vmul.f32 %v2629_v13, %v6075_v20  ;;  %v2630_v46 = vmul.f32 %v6083_v14, %v6083_v14  ;;  %v2632_v54 = vmul.f32 %v6086_v10, %v6086_v10  ;;  %v6105_v5 = vpop.f32.mrb[65].mxu1  ;;  %v6107_v41 = vpop.f32.mrb[65].mxu0 }
 0xaa2   :  { %6582 = vst [vmem:[#allocation36_spill] sm:$0xff] %v6091_v37  ;;  %6583 = vst [vmem:[#allocation37_spill] sm:$0xff] %v6094_v21  ;;  %4381 = vtanh.f32 %v2755_v25  ;;  %v2663_v51 = vmul.f32 %v2631_v33, %v6078_v11  ;;  %v2633_v24 = vmul.f32 %v6091_v37, %v6091_v37  ;;  %v2635_v1 = vmul.f32 %v6094_v21, %v6094_v21  ;;  %v6114_v28 = vpop.f32.mrb[66].mxu1  ;;  %v6116_v4 = vpop.f32.mrb[66].mxu0 }
 0xaa3   :  { %4383 = vtanh.f32 %v2754_v31  ;;  %v2693_v56 = vmul.f32 0.044715, %v2661_v26  ;;  %v2662_v27 = vmul.f32 %v2630_v46, %v6083_v14  ;;  %v2664_v13 = vmul.f32 %v2632_v54, %v6086_v10  ;;  %v6120_v38 = vpop.f32.mrb[67].mxu1  ;;  %v6122_v25 = vpop.f32.mrb[67].mxu0 }
 0xaa4   :  { %4385 = vtanh.f32 %v2756_v48  ;;  %v2695_v33 = vmul.f32 0.044715, %v2663_v51  ;;  %v2665_v22 = vmul.f32 %v2633_v24, %v6091_v37  ;;  %v2667_v18 = vmul.f32 %v2635_v1, %v6094_v21 }
 0xaa5   :  { %v2725_v49 = vadd.f32 %v2693_v56, %v6075_v20  ;;  %v2694_v40 = vmul.f32 0.044715, %v2662_v27  ;;  %v2696_v30 = vmul.f32 0.044715, %v2664_v13  ;;  %v6128_v31 = vadd.f32 %v2525_v32, %v5946_v60 }
 0xaa6   :  { %v2727_v26 = vadd.f32 %v2695_v33, %v6078_v11  ;;  %v2697_v46 = vmul.f32 0.044715, %v2665_v22  ;;  %v2699_v54 = vmul.f32 0.044715, %v2667_v18  ;;  %v6132_v2 = vadd.f32 %v2598_v45, %v5948_v16 }
 0xaa7   :  { %v4372_v48 = vpop.eup %4371  ;;  %v2757_v51 = vmul.f32 0.7978846, %v2725_v49  ;;  %v2726_v24 = vadd.f32 %v2694_v40, %v6083_v14  ;;  %v2728_v1 = vadd.f32 %v2696_v30, %v6086_v10  ;;  %v2634_v56 = vmul.f32 %v6128_v31, %v6128_v31 }
 0xaa8   :  { %v4374_v27 = vpop.eup %4373  ;;  %v2813_v13 = vadd.f32 1.0, %v4372_v48  ;;  %v2759_v32 = vmul.f32 0.7978846, %v2727_v26  ;;  %v2729_v19 = vadd.f32 %v2697_v46, %v6091_v37  ;;  %v2731_v22 = vadd.f32 %v2699_v54, %v6094_v21  ;;  %v6140_v18 = vpop.f32.mrb[68].mxu1 }
 0xaa9   :  { %v6142_v45 = vpop.f32.mrb[68].mxu0  ;;  %v6144_v33 = vpop.eup %4375  ;;  %v2815_v49 = vadd.f32 1.0, %v4374_v27  ;;  %4387 = vtanh.f32 %v2757_v51  ;;  %v2758_v40 = vmul.f32 0.7978846, %v2726_v24  ;;  %v2760_v30 = vmul.f32 0.7978846, %v2728_v1 }
 0xaaa   :  { %v6146_v42 = vpop.f32.mrb[69].mxu1  ;;  %v6148_v59 = vpop.eup %4377  ;;  %v2845_v48 = vmul.f32 0.5, %v2813_v13  ;;  %4389 = vtanh.f32 %v2759_v32  ;;  %v2761_v26 = vmul.f32 0.7978846, %v2729_v19  ;;  %v2763_v46 = vmul.f32 0.7978846, %v2731_v22 }
 0xaab   :  { %v6150_v9 = vpop.f32.mrb[69].mxu0  ;;  %v4380_v54 = vpop.eup %4379  ;;  %v2847_v21 = vmul.f32 0.5, %v2815_v49  ;;  %4391 = vtanh.f32 %v2758_v40  ;;  %v2666_v11 = vmul.f32 %v2634_v56, %v6128_v31  ;;  %v2636_v51 = vmul.f32 %v6132_v2, %v6132_v2 }
 0xaac   :  { %v6155_v24 = vpop.f32.mrb[70].mxu1  ;;  %v6157_v1 = vpop.f32.mrb[70].mxu0  ;;  %v2877_v13 = vmul.f32 %v2845_v48, %v6015_v43  ;;  %v2817_v32 = vadd.f32 1.0, %v4380_v54  ;;  %4393 = vtanh.f32 %v2760_v30  ;;  %v6162_v19 = vadd.f32 %v6096_v15, %v5933_v53 }
 0xaad   :  { %v4382_v27 = vpop.eup %4381  ;;  %v6164_v22 = vpop.f32.mrb[71].mxu1  ;;  %v2879_v40 = vmul.f32 %v2847_v21, %v6018_v3  ;;  %4395 = vtanh.f32 %v2761_v26  ;;  %v2698_v35 = vmul.f32 0.044715, %v2666_v11  ;;  %v2668_v15 = vmul.f32 %v2636_v51, %v6132_v2 }
 0xaae   :  { %6584 = vst [vmem:[#allocation38_spill] sm:$0xff] %v6162_v19  ;;  %v6166_v49 = vpop.f32.mrb[71].mxu0  ;;  %v6168_v56 = vpop.eup %4383  ;;  %v2819_v57 = vadd.f32 1.0, %v4382_v27  ;;  %v6174_v43 = vmul.f32 %v2877_v13, %v5936_v63  ;;  %v2849_v30 = vmul.f32 0.5, %v2817_v32  ;;  %4397 = vtanh.f32 %v2763_v46 }
 0xaaf   :  { %v6171_v62 = vpop.eup %4385  ;;  %v6178_v48 = vmul.f32 %v2879_v40, %v5951_v0  ;;  %v2730_v37 = vadd.f32 %v2698_v35, %v6128_v31  ;;  %v2637_v3 = vmul.f32 %v6162_v19, %v6162_v19  ;;  %v2700_v21 = vmul.f32 0.044715, %v2668_v15 }
 0xab0   :  { %v2851_v54 = vmul.f32 0.5, %v2819_v57  ;;  %v2881_v11 = vmul.f32 %v2849_v30, %v6035_v58  ;;  %v6186_v63 = vadd.f32 %v6098_v52, %v5943_v34  ;;  %v6190_v26 = vadd.f32 %v6105_v5, %v5946_v60 }
 0xab1   :  { %v2762_v46 = vmul.f32 0.7978846, %v2730_v37  ;;  %v2669_v57 = vmul.f32 %v2637_v3, %v6162_v19  ;;  %v6196_v35 = vadd.f32 %v6107_v41, %v5948_v16  ;;  %v2732_v51 = vadd.f32 %v2700_v21, %v6132_v2 }
 0xab2   :  { %6585 = vst [vmem:[#allocation39_spill] sm:$0xff] %v6186_v63  ;;  %v2883_v0 = vmul.f32 %v2851_v54, %v6038_v55  ;;  %v6199_v58 = vmul.f32 %v2881_v11, %v5958_v29  ;;  %v2639_v52 = vmul.f32 %v6186_v63, %v6186_v63  ;;  %v2638_v5 = vmul.f32 %v6190_v26, %v6190_v26 }
 0xab3   :  { %v6206_v27 = vpop.eup %4387  ;;  %4399 = vtanh.f32 %v2762_v46  ;;  %v2701_v37 = vmul.f32 0.044715, %v2669_v57  ;;  %v2640_v41 = vmul.f32 %v6196_v35, %v6196_v35  ;;  %v2764_v13 = vmul.f32 0.7978846, %v2732_v51 }
 0xab4   :  { %v6209_v55 = vmul.f32 %v2883_v0, %v5961_v36  ;;  %v6213_v29 = vpop.eup %4389  ;;  %v2671_v32 = vmul.f32 %v2639_v52, %v6186_v63  ;;  %v2670_v40 = vmul.f32 %v2638_v5, %v6190_v26  ;;  %v6219_v30 = vadd.f32 %v6114_v28, %v5933_v53 }
 0xab5   :  { %v6221_v15 = vpop.eup %4391  ;;  %v2733_v36 = vadd.f32 %v2701_v37, %v6162_v19  ;;  %v2672_v54 = vmul.f32 %v2640_v41, %v6196_v35  ;;  %v6227_v3 = vadd.f32 %v6116_v4, %v5943_v34  ;;  %v6231_v11 = vadd.f32 %v6120_v38, %v5946_v60 }
 0xab6   :  { %v6233_v21 = vpop.eup %4393  ;;  %4401 = vtanh.f32 %v2764_v13  ;;  %v2703_v0 = vmul.f32 0.044715, %v2671_v32  ;;  %v2702_v28 = vmul.f32 0.044715, %v2670_v40  ;;  %v2641_v46 = vmul.f32 %v6219_v30, %v6219_v30 }
 0xab7   :  { %v6237_v57 = vpop.eup %4395  ;;  %v2765_v51 = vmul.f32 0.7978846, %v2733_v36  ;;  %v2704_v52 = vmul.f32 0.044715, %v2672_v54  ;;  %v2643_v4 = vmul.f32 %v6227_v3, %v6227_v3  ;;  %v2642_v5 = vmul.f32 %v6231_v11, %v6231_v11 }
 0xab8   :  { %v6243_v38 = vpop.eup %4397  ;;  %v2735_v37 = vadd.f32 %v2703_v0, %v6186_v63  ;;  %v2734_v41 = vadd.f32 %v2702_v28, %v6190_v26  ;;  %v2673_v13 = vmul.f32 %v2641_v46, %v6219_v30  ;;  %v6250_v32 = vadd.f32 %v6122_v25, %v5948_v16 }
 0xab9   :  { %4403 = vtanh.f32 %v2765_v51  ;;  %v2736_v40 = vadd.f32 %v2704_v52, %v6196_v35  ;;  %v2675_v36 = vmul.f32 %v2643_v4, %v6227_v3  ;;  %v2674_v54 = vmul.f32 %v2642_v5, %v6231_v11 }
 0xaba   :  { %v2767_v19 = vmul.f32 0.7978846, %v2735_v37  ;;  %v2766_v20 = vmul.f32 0.7978846, %v2734_v41  ;;  %v2705_v23 = vmul.f32 0.044715, %v2673_v13  ;;  %v2644_v0 = vmul.f32 %v6250_v32, %v6250_v32 }
 0xabb   :  { %v2768_v28 = vmul.f32 0.7978846, %v2736_v40  ;;  %v2707_v63 = vmul.f32 0.044715, %v2675_v36  ;;  %v2706_v46 = vmul.f32 0.044715, %v2674_v54  ;;  %v6259_v25 = vadd.f32 %v6140_v18, %v5933_v53 }
 0xabc   :  { %4405 = vtanh.f32 %v2767_v19  ;;  %v2737_v51 = vadd.f32 %v2705_v23, %v6219_v30  ;;  %v2676_v52 = vmul.f32 %v2644_v0, %v6250_v32  ;;  %v6265_v4 = vadd.f32 %v6142_v45, %v5943_v34 }
 0xabd   :  { %6586 = vst [vmem:[#allocation40_spill] sm:$0xff] %v6259_v25  ;;  %v6267_v5 = vpop.eup %4399  ;;  %4407 = vtanh.f32 %v2766_v20  ;;  %v2739_v37 = vadd.f32 %v2707_v63, %v6227_v3  ;;  %v2738_v41 = vadd.f32 %v2706_v46, %v6231_v11  ;;  %v2645_v18 = vmul.f32 %v6259_v25, %v6259_v25 }
 0xabe   :  { %6587 = vst [vmem:[#allocation41_spill] sm:$0xff] %v6265_v4  ;;  %4409 = vtanh.f32 %v2768_v28  ;;  %v2769_v19 = vmul.f32 0.7978846, %v2737_v51  ;;  %v2708_v13 = vmul.f32 0.044715, %v2676_v52  ;;  %v2647_v23 = vmul.f32 %v6265_v4, %v6265_v4 }
 0xabf   :  { %v2771_v40 = vmul.f32 0.7978846, %v2739_v37  ;;  %v2770_v36 = vmul.f32 0.7978846, %v2738_v41  ;;  %v2677_v45 = vmul.f32 %v2645_v18, %v6259_v25  ;;  %v6278_v20 = vadd.f32 %v6146_v42, %v5946_v60 }
 0xac0   :  { %v6280_v63 = vpop.eup %4401  ;;  %4411 = vtanh.f32 %v2769_v19  ;;  %v2740_v54 = vadd.f32 %v2708_v13, %v6250_v32  ;;  %v2679_v0 = vmul.f32 %v2647_v23, %v6265_v4  ;;  %v6286_v28 = vadd.f32 %v6150_v9, %v5948_v16 }
 0xac1   :  { %4413 = vtanh.f32 %v2771_v40  ;;  %v2709_v46 = vmul.f32 0.044715, %v2677_v45  ;;  %v2646_v51 = vmul.f32 %v6278_v20, %v6278_v20  ;;  %v6292_v42 = vadd.f32 %v6155_v24, %v5933_v53 }
 0xac2   :  { %6588 = vst [vmem:[#allocation42_spill] sm:$0xff] %v6286_v28  ;;  %4415 = vtanh.f32 %v2770_v36  ;;  %v2772_v52 = vmul.f32 0.7978846, %v2740_v54  ;;  %v2711_v37 = vmul.f32 0.044715, %v2679_v0  ;;  %v2648_v41 = vmul.f32 %v6286_v28, %v6286_v28 }
 0xac3   :  { %v6296_v18 = vpop.eup %4403  ;;  %v2741_v9 = vadd.f32 %v2709_v46, %v6259_v25  ;;  %v2678_v19 = vmul.f32 %v2646_v51, %v6278_v20  ;;  %v2649_v13 = vmul.f32 %v6292_v42, %v6292_v42  ;;  %v6304_v23 = vadd.f32 %v6157_v1, %v5943_v34 }
 0xac4   :  { %4417 = vtanh.f32 %v2772_v52  ;;  %v2743_v53 = vadd.f32 %v2711_v37, %v6265_v4  ;;  %v2680_v24 = vmul.f32 %v2648_v41, %v6286_v28  ;;  %v6310_v40 = vadd.f32 %v6164_v22, %v5946_v60 }
 0xac5   :  { %v2773_v36 = vmul.f32 0.7978846, %v2741_v9  ;;  %v2710_v45 = vmul.f32 0.044715, %v2678_v19  ;;  %v2681_v54 = vmul.f32 %v2649_v13, %v6292_v42  ;;  %v2651_v0 = vmul.f32 %v6304_v23, %v6304_v23 }
 0xac6   :  { %v6315_v46 = vpop.eup %4405  ;;  %v2775_v34 = vmul.f32 0.7978846, %v2743_v53  ;;  %v2712_v1 = vmul.f32 0.044715, %v2680_v24  ;;  %v2650_v51 = vmul.f32 %v6310_v40, %v6310_v40  ;;  %v6321_v52 = vadd.f32 %v6166_v49, %v5948_v16 }
 0xac7   :  { %v6323_v60 = vpop.eup %4407  ;;  %4419 = vtanh.f32 %v2773_v36  ;;  %v2742_v22 = vadd.f32 %v2710_v45, %v6278_v20  ;;  %v2713_v37 = vmul.f32 0.044715, %v2681_v54  ;;  %v2683_v41 = vmul.f32 %v2651_v0, %v6304_v23 }
 0xac8   :  { %v6327_v9 = vpop.eup %4409  ;;  %4421 = vtanh.f32 %v2775_v34  ;;  %v2744_v19 = vadd.f32 %v2712_v1, %v6286_v28  ;;  %v2682_v13 = vmul.f32 %v2650_v51, %v6310_v40  ;;  %v2652_v53 = vmul.f32 %v6321_v52, %v6321_v52 }
 0xac9   :  { %v2774_v16 = vmul.f32 0.7978846, %v2742_v22  ;;  %v2745_v49 = vadd.f32 %v2713_v37, %v6292_v42  ;;  %v2715_v24 = vmul.f32 0.044715, %v2683_v41  ;;  %v2814_v36 = vadd.f32 1.0, %v6144_v33 }
 0xaca   :  { %v6335_v45 = vpop.eup %4411  ;;  %v2776_v54 = vmul.f32 0.7978846, %v2744_v19  ;;  %v2714_v0 = vmul.f32 0.044715, %v2682_v13  ;;  %v2684_v4 = vmul.f32 %v2652_v53, %v6321_v52  ;;  %v2818_v34 = vadd.f32 1.0, %v6168_v56 }
 0xacb   :  { %v6339_v1 = vpop.eup %4413  ;;  %4423 = vtanh.f32 %v2774_v16  ;;  %v2777_v51 = vmul.f32 0.7978846, %v2745_v49  ;;  %v2747_v25 = vadd.f32 %v2715_v24, %v6304_v23  ;;  %v2846_v22 = vmul.f32 0.5, %v2814_v36 }
 0xacc   :  { %v6342_v28 = vpop.eup %4415  ;;  %4425 = vtanh.f32 %v2776_v54  ;;  %v2746_v33 = vadd.f32 %v2714_v0, %v6310_v40  ;;  %v2716_v37 = vmul.f32 0.044715, %v2684_v4  ;;  %v2850_v41 = vmul.f32 0.5, %v2818_v34 }
 0xacd   :  { %4427 = vtanh.f32 %v2777_v51  ;;  %v2779_v19 = vmul.f32 0.7978846, %v2747_v25  ;;  %v2878_v13 = vmul.f32 %v2846_v22, %v6025_v12  ;;  %v2816_v56 = vadd.f32 1.0, %v6148_v59 }
 0xace   :  { %v6347_v53 = vpop.eup %4417  ;;  %v2778_v16 = vmul.f32 0.7978846, %v2746_v33  ;;  %v2748_v49 = vadd.f32 %v2716_v37, %v6321_v52  ;;  %v2882_v24 = vmul.f32 %v2850_v41, %v6045_v7  ;;  %v2820_v36 = vadd.f32 1.0, %v6171_v62 }
 0xacf   :  { %4429 = vtanh.f32 %v2779_v19  ;;  %v2910_v54 = vmul.f32 %v2878_v13, %v5953_v44  ;;  %v2848_v4 = vmul.f32 0.5, %v2816_v56  ;;  %v2941_v25 = vpack.c.bf16 %v6199_v58, %v6174_v43 }
 0xad0   :  { %4431 = vtanh.f32 %v2778_v16  ;;  %v2780_v12 = vmul.f32 0.7978846, %v2748_v49  ;;  %v2914_v59 = vmul.f32 %v2882_v24, %v5963_v47  ;;  %v2852_v0 = vmul.f32 0.5, %v2820_v36  ;;  %v6589_v36 = vld [vmem:[#allocation17_spill] sm:$0xff] }
 0xad1   :  { %v6356_v34 = vpop.eup %4419  ;;  %v2880_v51 = vmul.f32 %v2848_v4, %v6028_v50  ;;  %v2943_v7 = vpack.c.bf16 %v6209_v55, %v6178_v48  ;;  %v2822_v62 = vadd.f32 1.0, %v6221_v15  ;;  %v2826_v44 = vadd.f32 1.0, %v6267_v5 }
 0xad2   :  { %v6363_v22 = vpop.eup %4421  ;;  %4433 = vtanh.f32 %v2780_v12  ;;  %v2942_v43 = vpack.c.bf16 %v2914_v59, %v2910_v54  ;;  %v2884_v58 = vmul.f32 %v2852_v0, %v6048_v8  ;;  %v2824_v47 = vadd.f32 1.0, %v6233_v21  ;;  %v6590_v54 = vld [vmem:[#allocation34_spill] sm:$0xff] }
 0xad3   :  { %v2912_v33 = vmul.f32 %v2880_v51, %v5955_v39  ;;  %v2854_v37 = vmul.f32 0.5, %v2822_v62  ;;  %v2858_v41 = vmul.f32 0.5, %v2826_v44  ;;  %v2828_v50 = vadd.f32 1.0, %v6280_v63  ;;  %v6592_v51 = vld [vmem:[#allocation20_spill] sm:$0xff]  ;;  %v6593_v44 = vld [vmem:[#allocation15_spill] sm:$0xff] }
 0xad4   :  { %3252 = vmatprep.mubr.bf16.mxu1 %v2942_v43  ;;  %v2916_v48 = vmul.f32 %v2884_v58, %v5965_v6  ;;  %v2856_v55 = vmul.f32 0.5, %v2824_v47  ;;  %v2821_v15 = vadd.f32 1.0, %v6206_v27  ;;  %v2825_v5 = vadd.f32 1.0, %v6237_v57  ;;  %v6594_v43 = vld [vmem:[#allocation18_spill] sm:$0xff]  ;;  %v6595_v47 = vld [vmem:[#allocation35_spill] sm:$0xff] }
 0xad5   :  { %v6372_v19 = vpop.eup %4423  ;;  %3253 = vmatmul.mubr.bf16.vlgmr.msra.gmra.mrb[72].mxu1 %v2941_v25  ;;  %v2886_v8 = vmul.f32 %v2854_v37, %v6083_v14  ;;  %v2890_v21 = vmul.f32 %v2858_v41, %v6128_v31  ;;  %v2860_v39 = vmul.f32 0.5, %v2828_v50  ;;  %v2823_v13 = vadd.f32 1.0, %v6213_v29  ;;  %v6591_v25 = vld [vmem:[#allocation36_spill] sm:$0xff]  ;;  %v6596_v50 = vld [vmem:[#allocation37_spill] sm:$0xff] }
 0xad6   :  { %v6377_v56 = vpop.eup %4425  ;;  %v2944_v63 = vpack.c.bf16 %v2916_v48, %v2912_v33  ;;  %v2888_v6 = vmul.f32 %v2856_v55, %v6086_v10  ;;  %v2853_v16 = vmul.f32 0.5, %v2821_v15  ;;  %v2857_v49 = vmul.f32 0.5, %v2825_v5 }
 0xad7   :  { %v6380_v27 = vpop.eup %4427  ;;  %v2918_v57 = vmul.f32 %v2886_v8, %v5973_v17  ;;  %v2922_v24 = vmul.f32 %v2890_v21, %v5983_v61  ;;  %v2892_v14 = vmul.f32 %v2860_v39, %v6132_v2  ;;  %v2827_v31 = vadd.f32 1.0, %v6243_v38  ;;  %v6597_v8 = vld [vmem:[#allocation16_spill] sm:$0xff] }
 0xad8   :  { %3317 = vmatprep.mubr.bf16.mxu0 %v2944_v63  ;;  %v2920_v29 = vmul.f32 %v2888_v6, %v6589_v36  ;;  %v2885_v4 = vmul.f32 %v2853_v16, %v6590_v54  ;;  %v2889_v12 = vmul.f32 %v2857_v49, %v6591_v25  ;;  %v2855_v10 = vmul.f32 0.5, %v2823_v13  ;;  %v6598_v13 = vld [vmem:[#allocation19_spill] sm:$0xff] }
 0xad9   :  { %v6389_v59 = vpop.eup %4429  ;;  %3318 = vmatmul.mubr.bf16.vlgmr.msra.gmra.mrb[72].mxu0 %v2943_v7  ;;  %v2946_v0 = vpack.c.bf16 %v2922_v24, %v2918_v57  ;;  %v2924_v17 = vmul.f32 %v2892_v14, %v6592_v51  ;;  %v2859_v62 = vmul.f32 0.5, %v2827_v31  ;;  %v2830_v61 = vadd.f32 1.0, %v6323_v60  ;;  %v6599_v31 = vld [vmem:[#allocation23_spill] sm:$0xff] }
 0xada   :  { %v4432_v2 = vpop.eup %4431  ;;  %v2917_v38 = vmul.f32 %v2885_v4, %v6593_v44  ;;  %v2921_v58 = vmul.f32 %v2889_v12, %v6594_v43  ;;  %v2887_v33 = vmul.f32 %v2855_v10, %v6595_v47  ;;  %v2834_v37 = vadd.f32 1.0, %v6342_v28  ;;  %v6600_v54 = vld [vmem:[#allocation27_spill] sm:$0xff]  ;;  %v6602_v10 = vld [vmem:[#allocation38_spill] sm:$0xff]  ;;  %v6604_v44 = vld [vmem:[#allocation21_spill] sm:$0xff] }
 0xadb   :  { %3260 = vmatprep.mubr.bf16.mxu1 %v2946_v0  ;;  %v2948_v41 = vpack.c.bf16 %v2924_v17, %v2920_v29  ;;  %v2891_v48 = vmul.f32 %v2859_v62, %v6596_v50  ;;  %v2862_v7 = vmul.f32 0.5, %v2830_v61  ;;  %v2832_v55 = vadd.f32 1.0, %v6327_v9  ;;  %v6603_v17 = vld [vmem:[#allocation28_spill] sm:$0xff]  ;;  %v6607_v50 = vld [vmem:[#allocation22_spill] sm:$0xff] }
 0xadc   :  { %v4434_v15 = vpop.eup %4433  ;;  %v2945_v5 = vpack.c.bf16 %v2921_v58, %v2917_v38  ;;  %v2919_v60 = vmul.f32 %v2887_v33, %v6597_v8  ;;  %v2866_v21 = vmul.f32 0.5, %v2834_v37  ;;  %v2836_v39 = vadd.f32 1.0, %v6347_v53  ;;  %v6606_v33 = vld [vmem:[#allocation25_spill] sm:$0xff]  ;;  %v6608_v8 = vld [vmem:[#allocation26_spill] sm:$0xff] }
 0xadd   :  { %3325 = vmatprep.mubr.bf16.mxu0 %v2948_v41  ;;  %v2923_v63 = vmul.f32 %v2891_v48, %v6598_v13  ;;  %v2894_v6 = vmul.f32 %v2862_v7, %v6190_v26  ;;  %v2864_v28 = vmul.f32 0.5, %v2832_v55  ;;  %v2829_v16 = vadd.f32 1.0, %v6296_v18  ;;  %v6609_v13 = vld [vmem:[#allocation30_spill] sm:$0xff] }
 0xade   :  { %3261 = vmatmul.mubr.bf16.gmra.mrb[76].mxu1 %v2945_v5  ;;  %v2898_v49 = vmul.f32 %v2866_v21, %v6231_v11  ;;  %v2868_v57 = vmul.f32 0.5, %v2836_v39  ;;  %v2833_v9 = vadd.f32 1.0, %v6335_v45  ;;  %v2831_v24 = vadd.f32 1.0, %v6315_v46  ;;  %v6601_v11 = vld [vmem:[#allocation24_spill] sm:$0xff] }
 0xadf   :  { %v2947_v14 = vpack.c.bf16 %v2923_v63, %v2919_v60  ;;  %v2926_v36 = vmul.f32 %v2894_v6, %v6599_v31  ;;  %v2896_v53 = vmul.f32 %v2864_v28, %v6196_v35  ;;  %v2861_v29 = vmul.f32 0.5, %v2829_v16  ;;  %v6610_v28 = vld [vmem:[#allocation42_spill] sm:$0xff] }
 0xae0   :  { %v2930_v4 = vmul.f32 %v2898_v49, %v6600_v54  ;;  %v2900_v26 = vmul.f32 %v2868_v57, %v6250_v32  ;;  %v2865_v25 = vmul.f32 0.5, %v2833_v9  ;;  %v2835_v18 = vadd.f32 1.0, %v6339_v1  ;;  %v6605_v32 = vld [vmem:[#allocation39_spill] sm:$0xff]  ;;  %v6611_v49 = vld [vmem:[#allocation32_spill] sm:$0xff] }
 0xae1   :  { %3326 = vmatmul.mubr.bf16.gmra.mrb[76].mxu0 %v2947_v14  ;;  %v2928_v12 = vmul.f32 %v2896_v53, %v6601_v11  ;;  %v2893_v45 = vmul.f32 %v2861_v29, %v6602_v10  ;;  %v2863_v0 = vmul.f32 0.5, %v2831_v24  ;;  %v2838_v46 = vadd.f32 1.0, %v6372_v19  ;;  %v6613_v14 = vld [vmem:[#allocation13_spill] sm:$0xff]  ;;  %v6615_v53 = vld [vmem:[#allocation40_spill] sm:$0xff] }
 0xae2   :  { %v2950_v51 = vpack.c.bf16 %v2930_v4, %v2926_v36  ;;  %v2932_v62 = vmul.f32 %v2900_v26, %v6603_v17  ;;  %v2897_v35 = vmul.f32 %v2865_v25, %v6219_v30  ;;  %v2867_v61 = vmul.f32 0.5, %v2835_v18  ;;  %v6614_v36 = vld [vmem:[#allocation31_spill] sm:$0xff]  ;;  %v6616_v26 = vld [vmem:[#allocation33_spill] sm:$0xff]  ;;  %v6617_v11 = vld [vmem:[#allocation4_spill] sm:$0xff] }
 0xae3   :  { %v2925_v38 = vmul.f32 %v2893_v45, %v6604_v44  ;;  %v2895_v43 = vmul.f32 %v2863_v0, %v6605_v32  ;;  %v2842_v58 = vadd.f32 1.0, %v4432_v2  ;;  %v2870_v1 = vmul.f32 0.5, %v2838_v46  ;;  %v6619_v10 = vld [vmem:[#allocation29_spill] sm:$0xff]  ;;  %v6621_v46 = vld [vmem:[#allocation14_spill] sm:$0xff] }
 0xae4   :  { %3268 = vmatprep.mubr.bf16.mxu1 %v2950_v51  ;;  %v2952_v47 = vpack.c.bf16 %v2932_v62, %v2928_v12  ;;  %v2929_v37 = vmul.f32 %v2897_v35, %v6606_v33  ;;  %v2899_v41 = vmul.f32 %v2867_v61, %v6227_v3  ;;  %v2840_v19 = vadd.f32 1.0, %v6377_v56  ;;  %v6620_v45 = vld [vmem:[#allocation41_spill] sm:$0xff] }
 0xae5   :  { %v2927_v48 = vmul.f32 %v2895_v43, %v6607_v50  ;;  %v2874_v7 = vmul.f32 0.5, %v2842_v58  ;;  %v2902_v30 = vmul.f32 %v2870_v1, %v6278_v20  ;;  %v2844_v55 = vadd.f32 1.0, %v4434_v15  ;;  %v6450_v43 = vld [vmem:[%s6494_s14] ss:$0 sm:$0xff] }
 0xae6   :  { %3333 = vmatprep.mubr.bf16.mxu0 %v2952_v47  ;;  %v2949_v5 = vpack.c.bf16 %v2929_v37, %v2925_v38  ;;  %v2931_v60 = vmul.f32 %v2899_v41, %v6608_v8  ;;  %v2872_v2 = vmul.f32 0.5, %v2840_v19  ;;  %v2837_v21 = vadd.f32 1.0, %v6356_v34 }
 0xae7   :  { %v2906_v39 = vmul.f32 %v2874_v7, %v6310_v40  ;;  %v2934_v63 = vmul.f32 %v2902_v30, %v6609_v13  ;;  %v2876_v3 = vmul.f32 0.5, %v2844_v55  ;;  %v2841_v56 = vadd.f32 1.0, %v6380_v27  ;;  %v6612_v40 = vld [vmem:[#allocation12_spill] sm:$0xff]  ;;  %v6622_v13 = vld [vmem:[#allocation5_spill] sm:$0xff] }
 0xae8   :  { %3269 = vmatmul.mubr.bf16.gmra.mrb[80].mxu1 %v2949_v5  ;;  %v2951_v6 = vpack.c.bf16 %v2931_v60, %v2927_v48  ;;  %v2904_v16 = vmul.f32 %v2872_v2, %v6610_v28  ;;  %v2869_v20 = vmul.f32 0.5, %v2837_v21  ;;  %v2839_v15 = vadd.f32 1.0, %v6363_v22 }
 0xae9   :  { %v2938_v57 = vmul.f32 %v2906_v39, %v6611_v49  ;;  %v2908_v9 = vmul.f32 %v2876_v3, %v6321_v52  ;;  %v2873_v24 = vmul.f32 0.5, %v2841_v56  ;;  %v2843_v34 = vadd.f32 1.0, %v6389_v59  ;;  %v6618_v52 = vld [vmem:[#allocation3_spill] sm:$0xff]  ;;  %v6623_v3 = vld [vmem:[#allocation6_spill] sm:$0xff] }
 0xaea   :  { %v2184_v31 = vadd.f32 %v6613_v14, %v6612_v40  ;;  %3334 = vmatmul.mubr.bf16.gmra.mrb[80].mxu0 %v2951_v6  ;;  %v2936_v27 = vmul.f32 %v2904_v16, %v6614_v36  ;;  %v2901_v29 = vmul.f32 %v2869_v20, %v6615_v53  ;;  %v2871_v54 = vmul.f32 0.5, %v2839_v15 }
 0xaeb   :  { %v2954_v4 = vpack.c.bf16 %v2938_v57, %v2934_v63  ;;  %v2940_v25 = vmul.f32 %v2908_v9, %v6616_v26  ;;  %v2905_v22 = vmul.f32 %v2873_v24, %v6292_v42  ;;  %v2875_v18 = vmul.f32 0.5, %v2843_v34 }
 0xaec   :  { %v2253_v12 = vadd.f32 %v6618_v52, %v6617_v11  ;;  %v2933_v59 = vmul.f32 %v2901_v29, %v6619_v10  ;;  %v2903_v0 = vmul.f32 %v2871_v54, %v6620_v45  ;;  %v2257_v51 = vadd.f32 %v6621_v46, %v6617_v11  ;;  %v6625_v29 = vld [vmem:[#allocation8_spill] sm:$0xff] }
 0xaed   :  { %3276 = vmatprep.mubr.bf16.mxu1 %v2954_v4  ;;  %v2956_v17 = vpack.c.bf16 %v2940_v25, %v2936_v27  ;;  %v2937_v62 = vmul.f32 %v2905_v22, %v2184_v31  ;;  %v2907_v35 = vmul.f32 %v2875_v18, %v6304_v23  ;;  %v6624_v27 = vld [vmem:[#allocation7_spill] sm:$0xff] }
 0xaee   :  { %v2935_v61 = vmul.f32 %v2903_v0, %v2253_v12 }
 0xaef   :  { %3341 = vmatprep.mubr.bf16.mxu0 %v2956_v17  ;;  %v2953_v44 = vpack.c.bf16 %v2937_v62, %v2933_v59  ;;  %v2939_v42 = vmul.f32 %v2907_v35, %v2257_v51 }
 0xaf1   :  { %3277 = vmatmul.mubr.bf16.gmra.mrb[84].mxu1 %v2953_v44  ;;  %v2955_v38 = vpack.c.bf16 %v2939_v42, %v2935_v61  ;;  %v6626_v61 = vld [vmem:[#allocation9_spill] sm:$0xff]  ;;  %v6627_v42 = vld [vmem:[#allocation10_spill] sm:$0xff] }
 0xaf3   :  { %3342 = vmatmul.mubr.bf16.gmra.mrb[84].mxu0 %v2955_v38 }
 0xba8   :  { %v3762_v32 = vpop.f32.mrb[72].mxu1 }
 0xba9   :  { %v3763_v58 = vpop.f32.mrb[73].mxu1 }
 0xbaa   :  { %v3764_v1 = vadd.f32 %v3763_v58, %v3762_v32  ;;  %v3765_v47 = vpop.f32.mrb[74].mxu1 }
 0xbab   :  { %v3766_v33 = vpop.f32.mrb[75].mxu1 }
 0xbac   :  { %v3802_v37 = vpop.f32.mrb[72].mxu0  ;;  %v3255_v23 = vadd.f32 %v3764_v1, %v6450_v43  ;;  %v3767_v41 = vadd.f32 %v3766_v33, %v3765_v47 }
 0xbad   :  { %v3803_v19 = vpop.f32.mrb[73].mxu0 }
 0xbae   :  { %v3804_v50 = vadd.f32 %v3803_v19, %v3802_v37  ;;  %v3805_v48 = vpop.f32.mrb[74].mxu0  ;;  %v3258_v7 = vadd.f32 %v3767_v41, %v6450_v43 }
 0xbaf   :  { %v3806_v30 = vpop.f32.mrb[75].mxu0 }
 0xbb0   :  { %v3320_v55 = vadd.f32 %v3804_v50, %v3255_v23  ;;  %v3807_v5 = vadd.f32 %v3806_v30, %v3805_v48 }
 0xbb1   :  { %v3768_v8 = vpop.f32.mrb[76].mxu1 }
 0xbb2   :  { %v3323_v60 = vadd.f32 %v3807_v5, %v3258_v7  ;;  %v3769_v2 = vpop.f32.mrb[77].mxu1  ;;  %v3350_v63 = vadd.f32 %v3320_v55, %v6622_v13 }
 0xbb3   :  { %v3770_v21 = vadd.f32 %v3769_v2, %v3768_v8  ;;  %v3771_v39 = vpop.f32.mrb[78].mxu1 }
 0xbb4   :  { %v3351_v56 = vadd.f32 %v3323_v60, %v6623_v3  ;;  %v3808_v6 = vpop.f32.mrb[76].mxu0  ;;  %v3772_v28 = vpop.f32.mrb[79].mxu1  ;;  %v6628_v60 = vld [vmem:[#allocation11_spill] sm:$0xff] }
 0xbb5   :  { %v3263_v16 = vadd.f32 %v3770_v21, %v6450_v43  ;;  %v3809_v20 = vpop.f32.mrb[77].mxu0  ;;  %v3773_v15 = vadd.f32 %v3772_v28, %v3771_v39  ;;  %v6629_v21 = vld [vmem:[#allocation2_spill] sm:$0xff] }
 0xbb6   :  { %v3635_v49 = vpack.c.bf16 %v3351_v56, %v3350_v63  ;;  %v3810_v57 = vadd.f32 %v3809_v20, %v3808_v6  ;;  %v3811_v9 = vpop.f32.mrb[78].mxu0 }
 0xbb7   :  { %v3266_v24 = vadd.f32 %v3773_v15, %v6450_v43  ;;  %v3812_v34 = vpop.f32.mrb[79].mxu0 }
 0xbb8   :  { %3636 = vst [vmem:[%s6495_s15] sm:$0xff] %v3635_v49   ;;  %v3328_v40 = vadd.f32 %v3810_v57, %v3263_v16  ;;  %v3813_v14 = vadd.f32 %v3812_v34, %v3811_v9 }
 0xbba   :  { %v3331_v31 = vadd.f32 %v3813_v14, %v3266_v24  ;;  %v3352_v53 = vadd.f32 %v3328_v40, %v6624_v27 }
 0xbbb   :  { %v3774_v36 = vpop.f32.mrb[80].mxu1 }
 0xbbc   :  { %v3353_v54 = vadd.f32 %v3331_v31, %v6625_v29  ;;  %v3775_v4 = vpop.f32.mrb[81].mxu1 }
 0xbbd   :  { %v3814_v26 = vpop.f32.mrb[80].mxu0  ;;  %v3776_v25 = vadd.f32 %v3775_v4, %v3774_v36  ;;  %v3777_v22 = vpop.f32.mrb[82].mxu1 }
 0xbbe   :  { %v3640_v18 = vpack.c.bf16 %v3353_v54, %v3352_v53  ;;  %v3815_v11 = vpop.f32.mrb[81].mxu0  ;;  %v3778_v52 = vpop.f32.mrb[83].mxu1 }
 0xbbf   :  { %v3271_v12 = vadd.f32 %v3776_v25, %v6450_v43  ;;  %v3816_v10 = vadd.f32 %v3815_v11, %v3814_v26  ;;  %v3817_v59 = vpop.f32.mrb[82].mxu0  ;;  %v3779_v45 = vadd.f32 %v3778_v52, %v3777_v22 }
 0xbc0   :  { %3655 = vst [vmem:[%s6495_s15 + $0x8] sm:$0xff] %v3640_v18   ;;  %v3818_v0 = vpop.f32.mrb[83].mxu0 }
 0xbc1   :  { %v3336_v46 = vadd.f32 %v3816_v10, %v3271_v12  ;;  %v3274_v51 = vadd.f32 %v3779_v45, %v6450_v43  ;;  %v3819_v17 = vadd.f32 %v3818_v0, %v3817_v59 }
 0xbc3   :  { %v3339_v62 = vadd.f32 %v3819_v17, %v3274_v51  ;;  %v3354_v44 = vadd.f32 %v3336_v46, %v6626_v61 }
 0xbc4   :  { %v3780_v35 = vpop.f32.mrb[84].mxu1 }
 0xbc5   :  { %v3355_v38 = vadd.f32 %v3339_v62, %v6627_v42  ;;  %v3781_v32 = vpop.f32.mrb[85].mxu1 }
 0xbc6   :  { %v3820_v58 = vpop.f32.mrb[84].mxu0  ;;  %v3782_v1 = vadd.f32 %v3781_v32, %v3780_v35  ;;  %v3783_v47 = vpop.f32.mrb[86].mxu1 }
 0xbc7   :  { %v3645_v33 = vpack.c.bf16 %v3355_v38, %v3354_v44  ;;  %v3821_v37 = vpop.f32.mrb[85].mxu0  ;;  %v3784_v23 = vpop.f32.mrb[87].mxu1 }
 0xbc8   :  { %v3279_v41 = vadd.f32 %v3782_v1, %v6450_v43  ;;  %v3822_v19 = vadd.f32 %v3821_v37, %v3820_v58  ;;  %v3823_v50 = vpop.f32.mrb[86].mxu0  ;;  %v3785_v48 = vadd.f32 %v3784_v23, %v3783_v47 }
 0xbc9   :  { %3656 = vst [vmem:[%s6495_s15 + $0x10] sm:$0xff] %v3645_v33   ;;  %v3824_v7 = vpop.f32.mrb[87].mxu0 }
 0xbca   :  { %v3344_v30 = vadd.f32 %v3822_v19, %v3279_v41  ;;  %v3282_v55 = vadd.f32 %v3785_v48, %v6450_v43  ;;  %v3825_v5 = vadd.f32 %v3824_v7, %v3823_v50 }
 0xbcc   :  { %v3347_v8 = vadd.f32 %v3825_v5, %v3282_v55  ;;  %v3356_v2 = vadd.f32 %v3344_v30, %v6628_v60 }
 0xbce   :  { %v3357_v39 = vadd.f32 %v3347_v8, %v6629_v21 }
 0xbd0   :  { %v3650_v13 = vpack.c.bf16 %v3357_v39, %v3356_v2 }
 0xbd2   :  { %3657 = vst [vmem:[%s6495_s15 + $0x18] sm:$0xff] %v3650_v13  }

// kernel: treemeshgpt_forward.13
= control target key start
LH: loop header
LB: loop body
LE: loop exit
PB: predicated region body
PF: predicated region fallthrough
CT: control target
= control target key end

     0   :  { %v2629_v9 = vmov 0.0   ;;  %vm2630_vm0 = vmmov 0   ;;  %s3579_s0 = inlined_call_operand.vmem [shape: bf16[48,128], index: 0, kind: input, shape index: {}]   ;;  %s3580_s5 = inlined_call_operand.vmem [shape: bf16[128,128], index: 5, kind: input, shape index: {}]   ;;  %s3581_s7 = inlined_call_operand.vmem [shape: bf16[128,128], index: 7, kind: input, shape index: {}]   ;;  %s3582_s3 = inlined_call_operand.vmem [shape: f32[1,128], index: 3, kind: input, shape index: {}]   ;;  %s3583_s4 = inlined_call_operand.vmem [shape: f32[1,128], index: 4, kind: input, shape index: {}]   ;;  %s3584_s9 = inlined_call_operand.vmem [shape: bf16[128,256], index: 9, kind: input, shape index: {}]   ;;  %s3585_s6 = inlined_call_operand.vmem [shape: f32[1,128], index: 6, kind: input, shape index: {}]   ;;  %s3586_s12 = inlined_call_operand.vmem [shape: bf16[128,128], index: 12, kind: input, shape index: {}]   ;;  %s3587_s11 = inlined_call_operand.vmem [shape: bf16[128,128], index: 11, kind: input, shape index: {}]   ;;  %s3588_s1 = inlined_call_operand.vmem [shape: f32[48,128], index: 1, kind: input, shape index: {}]   ;;  %s3589_s8 = inlined_call_operand.vmem [shape: f32[1,128], index: 8, kind: input, shape index: {}]   ;;  %s3590_s14 = inlined_call_operand.vmem [shape: bf16[128,128], index: 14, kind: input, shape index: {}]   ;;  %s3591_s16 = inlined_call_operand.vmem [shape: bf16[128,256], index: 16, kind: input, shape index: {}]   ;;  %s3592_s19 = inlined_call_operand.vmem [shape: bf16[128,128], index: 19, kind: input, shape index: {}]   ;;  %s3593_s10 = inlined_call_operand.vmem [shape: f32[1,256], index: 10, kind: input, shape index: {}]   ;;  %s3594_s26 = inlined_call_operand.vmem [shape: f32[48,256], index: 26, kind: output, shape index: {0}]   ;;  %s3595_s13 = inlined_call_operand.vmem [shape: f32[1,128], index: 13, kind: input, shape index: {}]   ;;  %s3596_s20 = inlined_call_operand.vmem [shape: bf16[128,128], index: 20, kind: input, shape index: {}]   ;;  %s3597_s18 = inlined_call_operand.vmem [shape: bf16[128,128], index: 18, kind: input, shape index: {}]   ;;  %s3598_s2 = inlined_call_operand.vmem [shape: f32[48,128], index: 2, kind: input, shape index: {}]   ;;  %s3599_s15 = inlined_call_operand.vmem [shape: f32[1,128], index: 15, kind: input, shape index: {}]   ;;  %s3600_s22 = inlined_call_operand.vmem [shape: bf16[128,128], index: 22, kind: input, shape index: {}]   ;;  %s3601_s24 = inlined_call_operand.vmem [shape: bf16[128,256], index: 24, kind: input, shape index: {}]   ;;  %s3602_s17 = inlined_call_operand.vmem [shape: f32[1,256], index: 17, kind: input, shape index: {}]   ;;  %s3603_s27 = inlined_call_operand.vmem [shape: f32[48,256], index: 27, kind: output, shape index: {1}]   ;;  %s3604_s21 = inlined_call_operand.vmem [shape: f32[1,128], index: 21, kind: input, shape index: {}]   ;;  %s3605_s23 = inlined_call_operand.vmem [shape: f32[1,128], index: 23, kind: input, shape index: {}]   ;;  %s3606_s25 = inlined_call_operand.vmem [shape: f32[1,256], index: 25, kind: input, shape index: {}]   ;;  %s3607_s28 = inlined_call_operand.vmem [shape: f32[48,256], index: 28, kind: output, shape index: {2}]  }
   0x1   :  { %3617 = sst [smem:[#allocation2_spill]] %s3579_s0  ;;  %2218 = vmatprep.subr.bf16.mxu0 %v2629_v9  ;;  %2246 = vmatprep.subr.bf16.mxu1 %v2629_v9 }
   0x2   :  { %3618 = sst [smem:[#allocation3_spill]] %s3580_s5  ;;  %2234 = vmatprep.mubr.msk.bf16.mxu0 %vm2630_vm0, %v2629_v9  ;;  %2262 = vmatprep.mubr.msk.bf16.mxu1 %vm2630_vm0, %v2629_v9 }
   0x3   :  { %3619 = sst [smem:[#allocation4_spill]] %s3581_s7  ;;  %s3631_s29 = sld [smem:[#allocation3_spill]] }
   0x4   :  { %3620 = sst [smem:[#allocation5_spill]] %s3582_s3 }
   0x5   :  { %3621 = sst [smem:[#allocation6_spill]] %s3583_s4  ;;  %s3633_s4 = sld [smem:[#allocation5_spill]] }
   0x6   :  { %3622 = sst [smem:[#allocation7_spill]] %s3584_s9  ;;  %s3630_s9 = sld [smem:[#allocation2_spill]] }
   0x7   :  { %3623 = sst [smem:[#allocation8_spill]] %s3585_s6  ;;  %s3634_s7 = sld [smem:[#allocation6_spill]] }
   0x8   :  { %3624 = sst [smem:[#allocation9_spill]] %s3586_s12  ;;  %s3635_s6 = sld [smem:[#allocation7_spill]] }
   0x9   :  { %3625 = sst [smem:[#allocation10_spill]] %s3587_s11  ;;  %v2473_v10 = vld [vmem:[%s3631_s29] sm:$0xff]   ;;  %v2474_v35 = vld [vmem:[%s3631_s29 + $0x8] sm:$0xff]   ;;  %v2475_v36 = vld [vmem:[%s3631_s29 + $0x10] sm:$0xff]  }
   0xa   :  { %3626 = sst [smem:[#allocation11_spill]] %s3588_s1  ;;  %2219 = vmatpush3.bf16.msra.mxu0 %v2473_v10  ;;  %v2476_v37 = vld [vmem:[%s3631_s29 + $0x18] sm:$0xff]   ;;  %v2477_v38 = vld [vmem:[%s3631_s29 + $0x20] sm:$0xff]   ;;  %v2478_v39 = vld [vmem:[%s3631_s29 + $0x28] sm:$0xff]  }
   0xb   :  { %3627 = sst [smem:[#allocation12_spill]] %s3589_s8  ;;  %2220 = vmatprep.subr.bf16.mxu0 %v2629_v9  ;;  %v2479_v40 = vld [vmem:[%s3631_s29 + $0x30] sm:$0xff]   ;;  %v2480_v41 = vld [vmem:[%s3631_s29 + $0x38] sm:$0xff]   ;;  %s3636_s29 = sld [smem:[#allocation8_spill]] }
   0xc   :  { %3628 = sst [smem:[#allocation13_spill]] %s3590_s14  ;;  %v2106_v0 = vld [vmem:[%s3630_s9] sm:$0xff]   ;;  %v2117_v1 = vld [vmem:[%s3630_s9 + $0x8] sm:$0xff]   ;;  %v2118_v6 = vld [vmem:[%s3630_s9 + $0x10] sm:$0xff]   ;;  %s3639_s1 = sld [smem:[#allocation12_spill]] }
   0xd   :  { %3629 = sst [smem:[#allocation14_spill]] %s3591_s16  ;;  %v2107_v2 = vunpack.c.l.bf16 %v2106_v0  ;;  %v2111_v3 = vunpack.c.l.bf16 %v2117_v1  ;;  %v2108_v4 = vunpack.c.h.bf16 %v2106_v0  ;;  %v2112_v5 = vunpack.c.h.bf16 %v2117_v1  ;;  %s3632_s16 = sld [smem:[#allocation4_spill]]  ;;  %v1978_v10 = vld [vmem:[%s3634_s7] ss:$0 sm:$0xff] }
   0xe   :  { %v2115_v7 = vunpack.c.l.bf16 %v2118_v6  ;;  %v2116_v8 = vunpack.c.h.bf16 %v2118_v6  ;;  %2221 = vmatpush3.bf16.msra.mxu0 %v2474_v35  ;;  %v2491_v35 = vld [vmem:[%s3635_s6 + $0x4] ss:$8 sps:$4 sm:$0xff]   ;;  %s3637_s7 = sld [smem:[#allocation9_spill]]  ;;  %s3642_s8 = sld [smem:[#allocation14_spill]] }
   0xf   :  { %101 = vadd.xlane.f32.xlu0 %v2107_v2  ;;  %105 = vadd.xlane.f32.xlu1 %v2111_v3 }
  0x10   :  { %2222 = vmatprep.subr.bf16.mxu0 %v2629_v9 }
  0x12   :  { %2223 = vmatpush3.bf16.msra.mxu0 %v2475_v36  ;;  %v2494_v36 = vld [vmem:[%s3635_s6 + $0x14] ss:$8 sps:$4 sm:$0xff]  }
  0x13   :  { %103 = vadd.xlane.f32.xlu0 %v2108_v4  ;;  %107 = vadd.xlane.f32.xlu1 %v2112_v5  ;;  %v2481_v42 = vld [vmem:[%s3632_s16] sm:$0xff]   ;;  %v2482_v43 = vld [vmem:[%s3632_s16 + $0x8] sm:$0xff]   ;;  %v2483_v44 = vld [vmem:[%s3632_s16 + $0x10] sm:$0xff]  }
  0x14   :  { %2224 = vmatprep.subr.bf16.mxu0 %v2629_v9  ;;  %2247 = vmatpush3.bf16.msra.mxu1 %v2481_v42  ;;  %v2484_v45 = vld [vmem:[%s3632_s16 + $0x18] sm:$0xff]   ;;  %v2485_v46 = vld [vmem:[%s3632_s16 + $0x20] sm:$0xff]   ;;  %v2486_v47 = vld [vmem:[%s3632_s16 + $0x28] sm:$0xff]  }
  0x15   :  { %2248 = vmatprep.subr.bf16.mxu1 %v2629_v9  ;;  %v2503_v42 = vld [vmem:[%s3635_s6 + $0x44] ss:$8 sps:$4 sm:$0xff]  }
  0x16   :  { %2225 = vmatpush3.bf16.msra.mxu0 %v2476_v37  ;;  %v2492_v37 = vld [vmem:[%s3635_s6 + $0x10] ss:$8 sps:$4 sm:$0xff]  }
  0x17   :  { %109 = vadd.xlane.f32.xlu0 %v2115_v7  ;;  %111 = vadd.xlane.f32.xlu1 %v2116_v8 }
  0x18   :  { %2226 = vmatprep.subr.bf16.mxu0 %v2629_v9  ;;  %2249 = vmatpush3.bf16.msra.mxu1 %v2482_v43  ;;  %v2501_v43 = vld [vmem:[%s3635_s6 + $0x40] ss:$8 sps:$4 sm:$0xff]  }
  0x19   :  { %2250 = vmatprep.subr.bf16.mxu1 %v2629_v9 }
  0x1a   :  { %2227 = vmatpush3.bf16.msra.mxu0 %v2477_v38  ;;  %v2497_v38 = vld [vmem:[%s3635_s6 + $0x24] ss:$8 sps:$4 sm:$0xff]  }
  0x1b   :  { %2228 = vmatprep.subr.bf16.mxu0 %v2629_v9 }
  0x1c   :  { %2251 = vmatpush3.bf16.msra.mxu1 %v2483_v44  ;;  %v2506_v44 = vld [vmem:[%s3635_s6 + $0x54] ss:$8 sps:$4 sm:$0xff]  }
  0x1d   :  { %2252 = vmatprep.subr.bf16.mxu1 %v2629_v9 }
  0x1e   :  { %2229 = vmatpush3.bf16.msra.mxu0 %v2478_v39  ;;  %v2495_v39 = vld [vmem:[%s3635_s6 + $0x20] ss:$8 sps:$4 sm:$0xff]  }
  0x1f   :  { %2230 = vmatprep.subr.bf16.mxu0 %v2629_v9 }
  0x20   :  { %2253 = vmatpush3.bf16.msra.mxu1 %v2484_v45  ;;  %v2504_v45 = vld [vmem:[%s3635_s6 + $0x50] ss:$8 sps:$4 sm:$0xff]  }
  0x21   :  { %2254 = vmatprep.subr.bf16.mxu1 %v2629_v9 }
  0x22   :  { %2231 = vmatpush3.bf16.msra.mxu0 %v2479_v40  ;;  %v2500_v40 = vld [vmem:[%s3635_s6 + $0x34] ss:$8 sps:$4 sm:$0xff]  }
  0x23   :  { %2232 = vmatprep.subr.bf16.mxu0 %v2629_v9 }
  0x24   :  { %2255 = vmatpush3.bf16.msra.mxu1 %v2485_v46  ;;  %v1979_v46 = vld [vmem:[%s3636_s29] ss:$0 sm:$0xff]  ;;  %s3640_s29 = sld [smem:[#allocation10_spill]] }
  0x25   :  { %2256 = vmatprep.subr.bf16.mxu1 %v2629_v9 }
  0x26   :  { %2233 = vmatpush3.bf16.msra.mxu0 %v2480_v41  ;;  %v2498_v41 = vld [vmem:[%s3635_s6 + $0x30] ss:$8 sps:$4 sm:$0xff]  }
  0x27   :  { %595 = vmatprep.subr.bf16.mxu0 %v2491_v35 }
  0x28   :  { %2257 = vmatpush3.bf16.msra.mxu1 %v2486_v47 }
  0x29   :  { %2258 = vmatprep.subr.bf16.mxu1 %v2629_v9 }
  0x9c   :  { %v102_v11 = vpop.xlane.xlu0 %101  ;;  %v106_v12 = vpop.xlane.xlu1 %105 }
  0x9d   :  { %v114_v13 = vmul.f32 0.0078125, %v102_v11  ;;  %v116_v14 = vmul.f32 0.0078125, %v106_v12 }
  0x9f   :  { %v2792_v15 = vsub.f32 %v2107_v2, %v114_v13  ;;  %v2794_v16 = vsub.f32 %v2111_v3, %v116_v14 }
  0xa0   :  { %v104_v17 = vpop.xlane.xlu0 %103  ;;  %v108_v18 = vpop.xlane.xlu1 %107 }
  0xa1   :  { %v115_v19 = vmul.f32 0.0078125, %v104_v17  ;;  %v126_v20 = vmul.f32 %v2792_v15, %v2792_v15  ;;  %v117_v21 = vmul.f32 0.0078125, %v108_v18  ;;  %v128_v24 = vmul.f32 %v2794_v16, %v2794_v16 }
  0xa3   :  { %v2798_v22 = vsub.f32 %v2108_v4, %v115_v19  ;;  %132 = vadd.xlane.f32.xlu0 %v126_v20  ;;  %v2800_v23 = vsub.f32 %v2112_v5, %v117_v21  ;;  %v1977_v4 = vld [vmem:[%s3633_s4] ss:$0 sm:$0xff] }
  0xa4   :  { %v110_v25 = vpop.xlane.xlu0 %109  ;;  %v112_v26 = vpop.xlane.xlu1 %111 }
  0xa5   :  { %v118_v27 = vmul.f32 0.0078125, %v110_v25  ;;  %v127_v28 = vmul.f32 %v2798_v22, %v2798_v22  ;;  %v119_v29 = vmul.f32 0.0078125, %v112_v26  ;;  %v129_v32 = vmul.f32 %v2800_v23, %v2800_v23 }
  0xa7   :  { %v2806_v30 = vsub.f32 %v2115_v7, %v118_v27  ;;  %136 = vadd.xlane.f32.xlu0 %v128_v24  ;;  %134 = vadd.xlane.f32.xlu1 %v127_v28  ;;  %v2808_v31 = vsub.f32 %v2116_v8, %v119_v29 }
  0xa9   :  { %v130_v33 = vmul.f32 %v2806_v30, %v2806_v30  ;;  %v131_v34 = vmul.f32 %v2808_v31, %v2808_v31 }
  0xab   :  { %138 = vadd.xlane.f32.xlu1 %v129_v32  ;;  %140 = vadd.xlane.f32.xlu0 %v130_v33 }
  0xaf   :  { %142 = vadd.xlane.f32.xlu1 %v131_v34  ;;  %v2489_v34 = vld [vmem:[%s3635_s6] ss:$8 sps:$4 sm:$0xff]  }
 0x130   :  { %v133_v48 = vpop.xlane.xlu0 %132 }
 0x131   :  { %v144_v49 = vmul.f32 0.0078125, %v133_v48 }
 0x133   :  { %v150_v50 = vadd.f32 1e-05, %v144_v49 }
 0x134   :  { %v135_v51 = vpop.xlane.xlu1 %134  ;;  %v137_v52 = vpop.xlane.xlu0 %136 }
 0x135   :  { %2617 = vrsqrt.f32 %v150_v50  ;;  %v145_v53 = vmul.f32 0.0078125, %v135_v51  ;;  %v146_v54 = vmul.f32 0.0078125, %v137_v52 }
 0x137   :  { %v151_v55 = vadd.f32 1e-05, %v145_v53  ;;  %v152_v56 = vadd.f32 1e-05, %v146_v54 }
 0x138   :  { %v139_v57 = vpop.xlane.xlu1 %138  ;;  %v141_v58 = vpop.xlane.xlu0 %140 }
 0x139   :  { %2619 = vrsqrt.f32 %v151_v55  ;;  %v147_v59 = vmul.f32 0.0078125, %v139_v57  ;;  %v148_v61 = vmul.f32 0.0078125, %v141_v58 }
 0x13a   :  { %2621 = vrsqrt.f32 %v152_v56 }
 0x13b   :  { %v153_v60 = vadd.f32 1e-05, %v147_v59  ;;  %v154_v1 = vadd.f32 1e-05, %v148_v61 }
 0x13c   :  { %v143_v62 = vpop.xlane.xlu1 %142 }
 0x13d   :  { %2623 = vrsqrt.f32 %v153_v60  ;;  %v149_v63 = vmul.f32 0.0078125, %v143_v62 }
 0x13f   :  { %v2618_v0 = vpop.eup %2617  ;;  %v155_v2 = vadd.f32 1e-05, %v149_v63 }
 0x140   :  { %v162_v3 = vmul.f32 %v2618_v0, %v2792_v15 }
 0x141   :  { %2625 = vrsqrt.f32 %v155_v2 }
 0x142   :  { %2627 = vrsqrt.f32 %v154_v1  ;;  %v174_v7 = vmul.f32 %v1977_v4, %v162_v3 }
 0x143   :  { %v2620_v5 = vpop.eup %2619 }
 0x144   :  { %v163_v6 = vmul.f32 %v2620_v5, %v2798_v22  ;;  %v2622_v8 = vpop.eup %2621  ;;  %v186_v13 = vadd.f32 %v1978_v10, %v174_v7 }
 0x145   :  { %v164_v15 = vmul.f32 %v2622_v8, %v2794_v16 }
 0x146   :  { %v175_v11 = vmul.f32 %v1977_v4, %v163_v6 }
 0x147   :  { %v2624_v12 = vpop.eup %2623  ;;  %v176_v21 = vmul.f32 %v1977_v4, %v164_v15  ;;  %v2513_v15 = vld [vmem:[%s3637_s7] sm:$0xff]  }
 0x148   :  { %v187_v14 = vadd.f32 %v1978_v10, %v175_v11  ;;  %v165_v17 = vmul.f32 %v2624_v12, %v2800_v23  ;;  %v2509_v11 = vld [vmem:[%s3635_s6 + $0x64] ss:$8 sps:$4 sm:$0xff]   ;;  %v2507_v12 = vld [vmem:[%s3635_s6 + $0x60] ss:$8 sps:$4 sm:$0xff]  }
 0x149   :  { %v188_v26 = vadd.f32 %v1978_v10, %v176_v21  ;;  %v2519_v21 = vld [vmem:[%s3637_s7 + $0x18] sm:$0xff]  }
 0x14a   :  { %v2881_v18 = vpack.c.bf16 %v187_v14, %v186_v13  ;;  %v177_v19 = vmul.f32 %v1977_v4, %v165_v17  ;;  %v2512_v13 = vld [vmem:[%s3635_s6 + $0x74] ss:$8 sps:$4 sm:$0xff]   ;;  %v2510_v14 = vld [vmem:[%s3635_s6 + $0x70] ss:$8 sps:$4 sm:$0xff]   ;;  %v2631_v17 = vmov 0   ;;  %s3638_s6 = sld [smem:[#allocation11_spill]] }
 0x14b   :  { %v2626_v20 = vpop.eup %2625 }
 0x14c   :  { %2235 = vmatmul.mubr.bf16.vlgmr.msra.gmra.mrb[0].mxu0 %v2881_v18  ;;  %v2628_v22 = vpop.eup %2627  ;;  %v189_v24 = vadd.f32 %v1978_v10, %v177_v19  ;;  %v167_v25 = vmul.f32 %v2626_v20, %v2808_v31  ;;  %v2487_v31 = vld [vmem:[%s3632_s16 + $0x30] sm:$0xff]   ;;  %v2515_v19 = vld [vmem:[%s3637_s7 + $0x8] sm:$0xff]  }
 0x14d   :  { %2238 = vmatprep.mubr.msk.bf16.mxu0 %vm2630_vm0, %v2629_v9  ;;  %v166_v27 = vmul.f32 %v2628_v22, %v2806_v30  ;;  %2259 = vmatpush3.bf16.msra.mxu1 %v2487_v31  ;;  %v2488_v30 = vld [vmem:[%s3632_s16 + $0x38] sm:$0xff]   ;;  %v2517_v20 = vld [vmem:[%s3637_s7 + $0x10] sm:$0xff]   ;;  %v2521_v22 = vld [vmem:[%s3637_s7 + $0x20] sm:$0xff]  }
 0x14e   :  { %v2888_v16 = vpack.c.bf16 %v189_v24, %v188_v26  ;;  %v179_v23 = vmul.f32 %v1977_v4, %v167_v25  ;;  %2260 = vmatprep.subr.bf16.mxu1 %v2629_v9  ;;  %596 = vmatpush1.bf16.msra.mxu0 %v2489_v34  ;;  %v2523_v24 = vld [vmem:[%s3637_s7 + $0x28] sm:$0xff]   ;;  %v2525_v25 = vld [vmem:[%s3637_s7 + $0x30] sm:$0xff]   ;;  %v2527_v26 = vld [vmem:[%s3637_s7 + $0x38] sm:$0xff]  }
 0x14f   :  { %v178_v28 = vmul.f32 %v1977_v4, %v166_v27  ;;  %597 = vmatprep.subr.bf16.mxu0 %v2494_v36  ;;  %v1988_v36 = vld [vmem:[%s3639_s1] ss:$0 sm:$0xff] }
 0x150   :  { %v191_v29 = vadd.f32 %v1978_v10, %v179_v23  ;;  %v195_v27 = vld [vmem:[%s3638_s6] sm:$0xff]  ;;  %v196_v23 = vld [vmem:[%s3638_s6 + $0x8] sm:$0xff] }
 0x151   :  { %v190_v32 = vadd.f32 %v1978_v10, %v178_v28  ;;  %2261 = vmatpush3.bf16.msra.mxu1 %v2488_v30  ;;  %v3000_v28 = vpack.c.bf16 %v196_v23, %v195_v27  ;;  %v199_v30 = vld [vmem:[%s3638_s6 + $0x20] sm:$0xff]  ;;  %v200_v34 = vld [vmem:[%s3638_s6 + $0x28] sm:$0xff] }
 0x152   :  { %2274 = vmatprep.subr.bf16.mxu1 %v2629_v9  ;;  %598 = vmatpush1.bf16.msra.mxu0 %v2492_v37  ;;  %v3023_v35 = vpack.c.bf16 %v200_v34, %v199_v30 }
 0x153   :  { %v2893_v33 = vpack.c.bf16 %v191_v29, %v190_v32  ;;  %599 = vmatprep.subr.bf16.mxu0 %v2497_v38  ;;  %v197_v29 = vld [vmem:[%s3638_s6 + $0x10] sm:$0xff]  ;;  %v198_v32 = vld [vmem:[%s3638_s6 + $0x18] sm:$0xff] }
 0x154   :  { %2239 = vmatmul.mubr.bf16.gmra.mrb[4].mxu0 %v2888_v16  ;;  %v3012_v31 = vpack.c.bf16 %v198_v32, %v197_v29 }
 0x155   :  { %2242 = vmatprep.mubr.msk.bf16.mxu0 %vm2630_vm0, %v2629_v9 }
 0x156   :  { %600 = vmatpush1.bf16.msra.mxu0 %v2495_v39 }
 0x157   :  { %601 = vmatprep.subr.bf16.mxu0 %v2500_v40 }
 0x15a   :  { %602 = vmatpush1.bf16.msra.mxu0 %v2498_v41 }
 0x15b   :  { %603 = vmatprep.subr.bf16.mxu0 %v2503_v42 }
 0x15c   :  { %2243 = vmatmul.mubr.bf16.gmra.mrb[8].mxu0 %v2893_v33 }
 0x15d   :  { %627 = vmatprep.mubr.bf16.mxu0 %v2631_v17 }
 0x15e   :  { %604 = vmatpush1.bf16.msra.mxu0 %v2501_v43 }
 0x15f   :  { %605 = vmatprep.subr.bf16.mxu0 %v2506_v44 }
 0x162   :  { %606 = vmatpush1.bf16.msra.mxu0 %v2504_v45  ;;  %v2514_v45 = vld [vmem:[%s3640_s29] sm:$0xff]  }
 0x163   :  { %607 = vmatprep.subr.bf16.mxu0 %v2509_v11 }
 0x166   :  { %608 = vmatpush1.bf16.msra.mxu0 %v2507_v12 }
 0x167   :  { %609 = vmatprep.subr.bf16.mxu0 %v2512_v13 }
 0x16a   :  { %610 = vmatpush1.bf16.msra.mxu0 %v2510_v14 }
 0x16b   :  { %2302 = vmatprep.subr.bf16.mxu0 %v2629_v9 }
 0x21f   :  { %v318_v47 = vpop.f32.mrb[0].mxu0 }
 0x220   :  { %v319_v48 = vadd.f32 %v1979_v46, %v318_v47  ;;  %v2236_v49 = vpop.f32.mrb[1].mxu0 }
 0x221   :  { %v321_v50 = vpop.f32.mrb[2].mxu0 }
 0x222   :  { %v322_v51 = vadd.f32 %v1979_v46, %v321_v50  ;;  %v2237_v52 = vpop.f32.mrb[3].mxu0  ;;  %v375_v53 = vmax.f32 %v319_v48, 0.0 }
 0x224   :  { %v376_v54 = vmax.f32 %v322_v51, 0.0  ;;  %v2516_v51 = vld [vmem:[%s3640_s29 + $0x8] sm:$0xff]  }
 0x226   :  { %v381_v55 = vpack.c.bf16 %v376_v54, %v375_v53 }
 0x227   :  { %v326_v56 = vpop.f32.mrb[4].mxu0 }
 0x228   :  { %v327_v57 = vadd.f32 %v1979_v46, %v326_v56  ;;  %v2240_v58 = vpop.f32.mrb[5].mxu0  ;;  %2263 = vmatmul.mubr.bf16.vlgmr.msra.gmra.mrb[0].mxu1 %v381_v55  ;;  %v2518_v56 = vld [vmem:[%s3640_s29 + $0x10] sm:$0xff]  }
 0x229   :  { %v329_v59 = vpop.f32.mrb[6].mxu0  ;;  %2266 = vmatprep.mubr.msk.bf16.mxu1 %vm2630_vm0, %v2629_v9  ;;  %2275 = vmatpush3.bf16.msra.mxu1 %v2513_v15 }
 0x22a   :  { %v330_v60 = vadd.f32 %v1979_v46, %v329_v59  ;;  %v2241_v61 = vpop.f32.mrb[7].mxu0  ;;  %v377_v62 = vmax.f32 %v327_v57, 0.0  ;;  %2276 = vmatprep.subr.bf16.mxu1 %v2629_v9 }
 0x22c   :  { %v378_v63 = vmax.f32 %v330_v60, 0.0 }
 0x22d   :  { %2277 = vmatpush3.bf16.msra.mxu1 %v2515_v19 }
 0x22e   :  { %v382_v0 = vpack.c.bf16 %v378_v63, %v377_v62  ;;  %2278 = vmatprep.subr.bf16.mxu1 %v2629_v9  ;;  %v2520_v62 = vld [vmem:[%s3640_s29 + $0x18] sm:$0xff]  }
 0x22f   :  { %v334_v1 = vpop.f32.mrb[8].mxu0 }
 0x230   :  { %v335_v2 = vadd.f32 %v1979_v46, %v334_v1  ;;  %v2244_v3 = vpop.f32.mrb[9].mxu0  ;;  %2267 = vmatmul.mubr.bf16.gmra.mrb[4].mxu1 %v382_v0 }
 0x231   :  { %v337_v4 = vpop.f32.mrb[10].mxu0  ;;  %2270 = vmatprep.mubr.msk.bf16.mxu1 %vm2630_vm0, %v2629_v9  ;;  %2279 = vmatpush3.bf16.msra.mxu1 %v2517_v20  ;;  %v2522_v3 = vld [vmem:[%s3640_s29 + $0x20] sm:$0xff]  }
 0x232   :  { %v338_v5 = vadd.f32 %v1979_v46, %v337_v4  ;;  %v2245_v6 = vpop.f32.mrb[11].mxu0  ;;  %v379_v7 = vmax.f32 %v335_v2, 0.0  ;;  %2280 = vmatprep.subr.bf16.mxu1 %v2629_v9 }
 0x233   :  { %v2526_v6 = vld [vmem:[%s3640_s29 + $0x30] sm:$0xff]  }
 0x234   :  { %v380_v8 = vmax.f32 %v338_v5, 0.0  ;;  %v2524_v5 = vld [vmem:[%s3640_s29 + $0x28] sm:$0xff]  }
 0x235   :  { %2281 = vmatpush3.bf16.msra.mxu1 %v2519_v21 }
 0x236   :  { %v383_v10 = vpack.c.bf16 %v380_v8, %v379_v7  ;;  %2282 = vmatprep.subr.bf16.mxu1 %v2629_v9  ;;  %v2528_v7 = vld [vmem:[%s3640_s29 + $0x38] sm:$0xff]   ;;  %s3641_s29 = sld [smem:[#allocation13_spill]] }
 0x238   :  { %2271 = vmatmul.mubr.bf16.gmra.mrb[8].mxu1 %v383_v10 }
 0x239   :  { %2290 = vmatprep.mubr.msk.bf16.mxu1 %vm2630_vm0, %v2629_v9  ;;  %2283 = vmatpush3.bf16.msra.mxu1 %v2521_v22 }
 0x23a   :  { %2284 = vmatprep.subr.bf16.mxu1 %v2629_v9 }
 0x23c   :  { %v2529_v8 = vld [vmem:[%s3641_s29] sm:$0xff]   ;;  %v2530_v10 = vld [vmem:[%s3641_s29 + $0x8] sm:$0xff]   ;;  %v2531_v11 = vld [vmem:[%s3641_s29 + $0x10] sm:$0xff]  }
 0x23d   :  { %2285 = vmatpush3.bf16.msra.mxu1 %v2523_v24  ;;  %v2532_v12 = vld [vmem:[%s3641_s29 + $0x18] sm:$0xff]   ;;  %v2533_v13 = vld [vmem:[%s3641_s29 + $0x20] sm:$0xff]   ;;  %v2534_v19 = vld [vmem:[%s3641_s29 + $0x28] sm:$0xff]  }
 0x23e   :  { %2286 = vmatprep.subr.bf16.mxu1 %v2629_v9  ;;  %v2535_v22 = vld [vmem:[%s3641_s29 + $0x30] sm:$0xff]   ;;  %v2536_v24 = vld [vmem:[%s3641_s29 + $0x38] sm:$0xff]  }
 0x241   :  { %2287 = vmatpush3.bf16.msra.mxu1 %v2525_v25 }
 0x242   :  { %2288 = vmatprep.subr.bf16.mxu1 %v2629_v9 }
 0x245   :  { %2289 = vmatpush3.bf16.msra.mxu1 %v2527_v26 }
 0x246   :  { %2330 = vmatprep.subr.bf16.mxu1 %v2629_v9 }
 0x248   :  { %2291 = vmatmul.mubr.bf16.vlgmr.msra.gmra.mrb[12].mxu1 %v3000_v28 }
 0x249   :  { %2294 = vmatprep.mubr.msk.bf16.mxu1 %vm2630_vm0, %v2629_v9  ;;  %2331 = vmatpush3.bf16.msra.mxu1 %v2529_v8 }
 0x24a   :  { %2332 = vmatprep.subr.bf16.mxu1 %v2629_v9 }
 0x24d   :  { %2333 = vmatpush3.bf16.msra.mxu1 %v2530_v10 }
 0x24e   :  { %2334 = vmatprep.subr.bf16.mxu1 %v2629_v9 }
 0x250   :  { %2295 = vmatmul.mubr.bf16.gmra.mrb[16].mxu1 %v3012_v31 }
 0x251   :  { %2298 = vmatprep.mubr.msk.bf16.mxu1 %vm2630_vm0, %v2629_v9  ;;  %2335 = vmatpush3.bf16.msra.mxu1 %v2531_v11 }
 0x252   :  { %2336 = vmatprep.subr.bf16.mxu1 %v2629_v9 }
 0x255   :  { %2337 = vmatpush3.bf16.msra.mxu1 %v2532_v12 }
 0x256   :  { %2338 = vmatprep.subr.bf16.mxu1 %v2629_v9 }
 0x258   :  { %2299 = vmatmul.mubr.bf16.gmra.mrb[20].mxu1 %v3023_v35 }
 0x259   :  { %2346 = vmatprep.mubr.msk.bf16.mxu1 %vm2630_vm0, %v2629_v9  ;;  %2339 = vmatpush3.bf16.msra.mxu1 %v2533_v13 }
 0x25a   :  { %2340 = vmatprep.subr.bf16.mxu1 %v2629_v9 }
 0x25d   :  { %2341 = vmatpush3.bf16.msra.mxu1 %v2534_v19 }
 0x25e   :  { %2342 = vmatprep.subr.bf16.mxu1 %v2629_v9 }
 0x261   :  { %2343 = vmatpush3.bf16.msra.mxu1 %v2535_v22  ;;  %v2029_v22 = vld [vmem:[%s3595_s13] ss:$0 sm:$0xff] }
 0x262   :  { %2344 = vmatprep.subr.bf16.mxu1 %v2629_v9 }
 0x265   :  { %2345 = vmatpush3.bf16.msra.mxu1 %v2536_v24 }
 0x266   :  { %2358 = vmatprep.subr.bf16.mxu1 %v2629_v9 }
 0x2fb   :  { %v472_v37 = vpop.f32.mrb[0].mxu1 }
 0x2fc   :  { %v473_v38 = vadd.f32 %v1988_v36, %v472_v37  ;;  %v2264_v39 = vpop.f32.mrb[1].mxu1  ;;  %v2539_v37 = vld [vmem:[%s3642_s8 + $0x4] ss:$8 sps:$4 sm:$0xff]  }
 0x2fd   :  { %v475_v40 = vpop.f32.mrb[2].mxu1  ;;  %v2541_v39 = vld [vmem:[%s3642_s8 + $0x10] ss:$8 sps:$4 sm:$0xff]  }
 0x2fe   :  { %v476_v41 = vadd.f32 %v1988_v36, %v475_v40  ;;  %v2265_v42 = vpop.f32.mrb[3].mxu1  ;;  %v495_v43 = vmax.f32 %v473_v38, 0.0  ;;  %v2543_v38 = vld [vmem:[%s3642_s8 + $0x14] ss:$8 sps:$4 sm:$0xff]   ;;  %v2547_v40 = vld [vmem:[%s3642_s8 + $0x24] ss:$8 sps:$4 sm:$0xff]  }
 0x2ff   :  { %v2551_v42 = vld [vmem:[%s3642_s8 + $0x34] ss:$8 sps:$4 sm:$0xff]  }
 0x300   :  { %v496_v44 = vmax.f32 %v476_v41, 0.0  ;;  %v2545_v41 = vld [vmem:[%s3642_s8 + $0x20] ss:$8 sps:$4 sm:$0xff]  }
 0x302   :  { %v501_v46 = vpack.c.bf16 %v496_v44, %v495_v43  ;;  %v2549_v43 = vld [vmem:[%s3642_s8 + $0x30] ss:$8 sps:$4 sm:$0xff]   ;;  %v2555_v44 = vld [vmem:[%s3642_s8 + $0x44] ss:$8 sps:$4 sm:$0xff]  }
 0x303   :  { %v480_v47 = vpop.f32.mrb[4].mxu1 }
 0x304   :  { %v481_v48 = vadd.f32 %v1988_v36, %v480_v47  ;;  %v2268_v49 = vpop.f32.mrb[5].mxu1  ;;  %628 = vmatmul.mubr.bf16.vlgmr.msra.gmra.mrb[12].mxu0 %v501_v46  ;;  %v2559_v46 = vld [vmem:[%s3642_s8 + $0x54] ss:$8 sps:$4 sm:$0xff]   ;;  %v2557_v47 = vld [vmem:[%s3642_s8 + $0x50] ss:$8 sps:$4 sm:$0xff]  }
 0x305   :  { %2303 = vmatpush3.bf16.msra.mxu0 %v2514_v45  ;;  %v483_v50 = vpop.f32.mrb[6].mxu1  ;;  %637 = vmatprep.mubr.bf16.mxu0 %v2631_v17  ;;  %v2553_v45 = vld [vmem:[%s3642_s8 + $0x40] ss:$8 sps:$4 sm:$0xff]  }
 0x306   :  { %v484_v52 = vadd.f32 %v1988_v36, %v483_v50  ;;  %v2269_v53 = vpop.f32.mrb[7].mxu1  ;;  %2304 = vmatprep.subr.bf16.mxu0 %v2629_v9  ;;  %v497_v54 = vmax.f32 %v481_v48, 0.0  ;;  %v505_v48 = vlaneseq }
 0x308   :  { %v498_v55 = vmax.f32 %v484_v52, 0.0  ;;  %v506_v49 = vshrl.u32 %v505_v48, 7 }
 0x309   :  { %2305 = vmatpush3.bf16.msra.mxu0 %v2516_v51  ;;  %v374_v51 = vld [vmem:[%s3593_s10] sm:$0x3] }
 0x30a   :  { %v502_v57 = vpack.c.bf16 %v498_v55, %v497_v54  ;;  %2306 = vmatprep.subr.bf16.mxu0 %v2629_v9  ;;  %v3154_v50 = vsub.s32 0, %v506_v49  ;;  %v3159_v52 = vsub.s32 1, %v506_v49 }
 0x30b   :  { %v488_v58 = vpop.f32.mrb[8].mxu1 }
 0x30c   :  { %v489_v59 = vadd.f32 %v1988_v36, %v488_v58  ;;  %v2272_v60 = vpop.f32.mrb[9].mxu1  ;;  %638 = vmatmul.mubr.bf16.gmra.mrb[16].mxu0 %v502_v57  ;;  %v508_v53 = vrot.slane %v374_v51, %v3154_v50  ;;  %v512_v54 = vrot.slane %v374_v51, %v3159_v52 }
 0x30d   :  { %2307 = vmatpush3.bf16.msra.mxu0 %v2518_v56  ;;  %v491_v61 = vpop.f32.mrb[10].mxu1  ;;  %647 = vmatprep.mubr.bf16.mxu0 %v2631_v17 }
 0x30e   :  { %v492_v63 = vadd.f32 %v1988_v36, %v491_v61  ;;  %v2273_v0 = vpop.f32.mrb[11].mxu1  ;;  %2308 = vmatprep.subr.bf16.mxu0 %v2629_v9  ;;  %v499_v1 = vmax.f32 %v489_v59, 0.0  ;;  %v2537_v36 = vld [vmem:[%s3642_s8] ss:$8 sps:$4 sm:$0xff]  }
 0x310   :  { %v500_v2 = vmax.f32 %v492_v63, 0.0 }
 0x311   :  { %2309 = vmatpush3.bf16.msra.mxu0 %v2520_v62 }
 0x312   :  { %v503_v4 = vpack.c.bf16 %v500_v2, %v499_v1  ;;  %2310 = vmatprep.subr.bf16.mxu0 %v2629_v9 }
 0x314   :  { %648 = vmatmul.mubr.bf16.gmra.mrb[20].mxu0 %v503_v4 }
 0x315   :  { %2311 = vmatpush3.bf16.msra.mxu0 %v2522_v3  ;;  %2318 = vmatprep.mubr.msk.bf16.mxu0 %vm2630_vm0, %v2629_v9 }
 0x316   :  { %2312 = vmatprep.subr.bf16.mxu0 %v2629_v9 }
 0x319   :  { %2313 = vmatpush3.bf16.msra.mxu0 %v2524_v5 }
 0x31a   :  { %2314 = vmatprep.subr.bf16.mxu0 %v2629_v9 }
 0x31b   :  { %v3093_v14 = vpop.f32.mrb[12].mxu1 }
 0x31c   :  { %v2292_v15 = vpop.f32.mrb[13].mxu1 }
 0x31d   :  { %2315 = vmatpush3.bf16.msra.mxu0 %v2526_v6  ;;  %v3099_v20 = vpop.f32.mrb[14].mxu1 }
 0x31e   :  { %2316 = vmatprep.subr.bf16.mxu0 %v2629_v9  ;;  %v2293_v21 = vpop.f32.mrb[15].mxu1 }
 0x321   :  { %2317 = vmatpush3.bf16.msra.mxu0 %v2528_v7 }
 0x322   :  { %1179 = vmatprep.subr.bf16.mxu0 %v2539_v37 }
 0x323   :  { %v3109_v25 = vpop.f32.mrb[16].mxu1 }
 0x324   :  { %2319 = vmatmul.mubr.bf16.vlgmr.msra.gmra.mrb[24].mxu0 %v2881_v18  ;;  %v2296_v26 = vpop.f32.mrb[17].mxu1 }
 0x325   :  { %2322 = vmatprep.mubr.msk.bf16.mxu0 %vm2630_vm0, %v2629_v9  ;;  %v3112_v27 = vpop.f32.mrb[18].mxu1  ;;  %1180 = vmatpush1.bf16.msra.mxu0 %v2537_v36 }
 0x326   :  { %v2297_v23 = vpop.f32.mrb[19].mxu1  ;;  %1181 = vmatprep.subr.bf16.mxu0 %v2543_v38 }
 0x329   :  { %1182 = vmatpush1.bf16.msra.mxu0 %v2541_v39 }
 0x32a   :  { %1183 = vmatprep.subr.bf16.mxu0 %v2547_v40 }
 0x32b   :  { %v3114_v29 = vpop.f32.mrb[20].mxu1 }
 0x32c   :  { %2323 = vmatmul.mubr.bf16.gmra.mrb[28].mxu0 %v2888_v16  ;;  %v2300_v32 = vpop.f32.mrb[21].mxu1 }
 0x32d   :  { %2326 = vmatprep.mubr.msk.bf16.mxu0 %vm2630_vm0, %v2629_v9  ;;  %v3116_v30 = vpop.f32.mrb[22].mxu1  ;;  %1184 = vmatpush1.bf16.msra.mxu0 %v2545_v41  ;;  %v2540_v41 = vld [vmem:[%s3592_s19] sm:$0xff]  }
 0x32e   :  { %v2301_v34 = vpop.f32.mrb[23].mxu1  ;;  %1185 = vmatprep.subr.bf16.mxu0 %v2551_v42 }
 0x331   :  { %1186 = vmatpush1.bf16.msra.mxu0 %v2549_v43 }
 0x332   :  { %1187 = vmatprep.subr.bf16.mxu0 %v2555_v44 }
 0x334   :  { %2327 = vmatmul.mubr.bf16.gmra.mrb[32].mxu0 %v2893_v33 }
 0x335   :  { %1211 = vmatprep.mubr.bf16.mxu0 %v2631_v17  ;;  %1188 = vmatpush1.bf16.msra.mxu0 %v2553_v45 }
 0x336   :  { %1189 = vmatprep.subr.bf16.mxu0 %v2559_v46 }
 0x339   :  { %1190 = vmatpush1.bf16.msra.mxu0 %v2557_v47 }
 0x3d7   :  { %v629_v55 = vpop.f32.mrb[12].mxu0 }
 0x3d8   :  { %v630_v56 = vadd.f32 %v629_v55, %v508_v53  ;;  %v631_v57 = vpop.f32.mrb[13].mxu0 }
 0x3d9   :  { %v632_v58 = vadd.f32 %v631_v57, %v512_v54  ;;  %v633_v59 = vpop.f32.mrb[14].mxu0 }
 0x3da   :  { %658 = vst [vmem:[%s3594_s26] sm:$0xff] %v630_v56  ;;  %v634_v60 = vadd.f32 %v633_v59, %v508_v53  ;;  %v635_v61 = vpop.f32.mrb[15].mxu0 }
 0x3db   :  { %659 = vst [vmem:[%s3594_s26 + $0x8] sm:$0xff] %v632_v58  ;;  %v636_v62 = vadd.f32 %v635_v61, %v512_v54 }
 0x3dc   :  { %660 = vst [vmem:[%s3594_s26 + $0x10] sm:$0xff] %v634_v60  ;;  %v2552_v60 = vld [vmem:[%s3592_s19 + $0x18] sm:$0xff]  }
 0x3dd   :  { %661 = vst [vmem:[%s3594_s26 + $0x18] sm:$0xff] %v636_v62 }
 0x3df   :  { %v639_v63 = vpop.f32.mrb[16].mxu0 }
 0x3e0   :  { %v640_v0 = vadd.f32 %v639_v63, %v508_v53  ;;  %v641_v1 = vpop.f32.mrb[17].mxu0 }
 0x3e1   :  { %v642_v2 = vadd.f32 %v641_v1, %v512_v54  ;;  %v643_v3 = vpop.f32.mrb[18].mxu0  ;;  %v2563_v1 = vld [vmem:[%s3642_s8 + $0x64] ss:$8 sps:$4 sm:$0xff]  }
 0x3e2   :  { %662 = vst [vmem:[%s3594_s26 + $0x20] sm:$0xff] %v640_v0  ;;  %v644_v4 = vadd.f32 %v643_v3, %v508_v53  ;;  %v645_v5 = vpop.f32.mrb[19].mxu0  ;;  %v2560_v0 = vld [vmem:[%s3592_s19 + $0x28] sm:$0xff]   ;;  %1191 = vmatprep.subr.bf16.mxu0 %v2563_v1  ;;  %v2582_v1 = vld [vmem:[%s3597_s18 + $0x30] sm:$0xff]  }
 0x3e3   :  { %663 = vst [vmem:[%s3594_s26 + $0x28] sm:$0xff] %v642_v2  ;;  %v646_v6 = vadd.f32 %v645_v5, %v512_v54  ;;  %v2564_v2 = vld [vmem:[%s3592_s19 + $0x30] sm:$0xff]   ;;  %v2561_v3 = vld [vmem:[%s3642_s8 + $0x60] ss:$8 sps:$4 sm:$0xff]   ;;  %v2568_v5 = vld [vmem:[%s3592_s19 + $0x38] sm:$0xff]  }
 0x3e4   :  { %664 = vst [vmem:[%s3594_s26 + $0x30] sm:$0xff] %v644_v4  ;;  %1192 = vmatpush1.bf16.msra.mxu0 %v2561_v3  ;;  %v2567_v4 = vld [vmem:[%s3642_s8 + $0x74] ss:$8 sps:$4 sm:$0xff]  }
 0x3e5   :  { %665 = vst [vmem:[%s3594_s26 + $0x38] sm:$0xff] %v646_v6  ;;  %v2565_v6 = vld [vmem:[%s3642_s8 + $0x70] ss:$8 sps:$4 sm:$0xff]   ;;  %1193 = vmatprep.subr.bf16.mxu0 %v2567_v4 }
 0x3e7   :  { %v649_v7 = vpop.f32.mrb[20].mxu0 }
 0x3e8   :  { %v650_v8 = vadd.f32 %v649_v7, %v508_v53  ;;  %v651_v10 = vpop.f32.mrb[21].mxu0  ;;  %1194 = vmatpush1.bf16.msra.mxu0 %v2565_v6  ;;  %v2569_v7 = vld [vmem:[%s3596_s20] sm:$0xff]  }
 0x3e9   :  { %v652_v11 = vadd.f32 %v651_v10, %v512_v54  ;;  %v653_v12 = vpop.f32.mrb[22].mxu0  ;;  %2386 = vmatprep.subr.bf16.mxu0 %v2629_v9  ;;  %v2573_v10 = vld [vmem:[%s3596_s20 + $0x10] sm:$0xff]  }
 0x3ea   :  { %666 = vst [vmem:[%s3594_s26 + $0x40] sm:$0xff] %v650_v8  ;;  %v654_v13 = vadd.f32 %v653_v12, %v508_v53  ;;  %v655_v15 = vpop.f32.mrb[23].mxu0  ;;  %v2571_v8 = vld [vmem:[%s3596_s20 + $0x8] sm:$0xff]   ;;  %v2581_v12 = vld [vmem:[%s3596_s20 + $0x30] sm:$0xff]  }
 0x3eb   :  { %667 = vst [vmem:[%s3594_s26 + $0x48] sm:$0xff] %v652_v11  ;;  %v656_v19 = vadd.f32 %v655_v15, %v512_v54  ;;  %v2577_v11 = vld [vmem:[%s3596_s20 + $0x20] sm:$0xff]   ;;  %v205_v15 = vld [vmem:[%s3598_s2 + $0x8] sm:$0xff] }
 0x3ec   :  { %668 = vst [vmem:[%s3594_s26 + $0x50] sm:$0xff] %v654_v13  ;;  %v204_v13 = vld [vmem:[%s3598_s2] sm:$0xff] }
 0x3ed   :  { %669 = vst [vmem:[%s3594_s26 + $0x58] sm:$0xff] %v656_v19  ;;  %v210_v19 = vpack.c.bf16 %v205_v15, %v204_v13  ;;  %v2589_v15 = vld [vmem:[%s3600_s22 + $0x20] sm:$0xff]  }
 0x3f7   :  { %v889_v21 = vpop.f32.mrb[24].mxu0 }
 0x3f8   :  { %v890_v24 = vadd.f32 %v889_v21, %v3093_v14  ;;  %v2320_v26 = vpop.f32.mrb[25].mxu0  ;;  %v206_v21 = vld [vmem:[%s3598_s2 + $0x10] sm:$0xff] }
 0x3f9   :  { %v892_v23 = vpop.f32.mrb[26].mxu0  ;;  %v208_v26 = vld [vmem:[%s3598_s2 + $0x20] sm:$0xff] }
 0x3fa   :  { %v919_v32 = vadd.f32 %v2029_v22, %v890_v24  ;;  %v893_v34 = vadd.f32 %v892_v23, %v3099_v20  ;;  %v2321_v36 = vpop.f32.mrb[27].mxu0  ;;  %v2544_v20 = vld [vmem:[%s3592_s19 + $0x8] sm:$0xff]  }
 0x3fb   :  { %v209_v23 = vld [vmem:[%s3598_s2 + $0x28] sm:$0xff] }
 0x3fc   :  { %v920_v37 = vadd.f32 %v2029_v22, %v893_v34  ;;  %v959_v38 = vmax.f32 %v919_v32, 0.0  ;;  %v212_v32 = vpack.c.bf16 %v209_v23, %v208_v26  ;;  %v2030_v34 = vld [vmem:[%s3599_s15] ss:$0 sm:$0xff]  ;;  %v2591_v23 = vld [vmem:[%s3600_s22 + $0x30] sm:$0xff]  }
 0x3fe   :  { %v960_v39 = vmax.f32 %v920_v37, 0.0 }
 0x3ff   :  { %v897_v40 = vpop.f32.mrb[28].mxu0 }
 0x400   :  { %v965_v42 = vpack.c.bf16 %v960_v39, %v959_v38  ;;  %v898_v43 = vadd.f32 %v897_v40, %v3109_v25  ;;  %v2324_v44 = vpop.f32.mrb[29].mxu0 }
 0x401   :  { %v900_v45 = vpop.f32.mrb[30].mxu0  ;;  %v2570_v44 = vld [vmem:[%s3597_s18] sm:$0xff]  }
 0x402   :  { %v921_v14 = vadd.f32 %v2029_v22, %v898_v43  ;;  %v901_v46 = vadd.f32 %v900_v45, %v3112_v27  ;;  %v2325_v47 = vpop.f32.mrb[31].mxu0  ;;  %2347 = vmatmul.mubr.bf16.vlgmr.msra.gmra.mrb[24].mxu1 %v965_v42  ;;  %v2548_v27 = vld [vmem:[%s3592_s19 + $0x10] sm:$0xff]  }
 0x403   :  { %2350 = vmatprep.mubr.msk.bf16.mxu1 %vm2630_vm0, %v2629_v9  ;;  %2359 = vmatpush3.bf16.msra.mxu1 %v2540_v41 }
 0x404   :  { %v922_v48 = vadd.f32 %v2029_v22, %v901_v46  ;;  %2360 = vmatprep.subr.bf16.mxu1 %v2629_v9  ;;  %v961_v49 = vmax.f32 %v921_v14, 0.0 }
 0x406   :  { %v962_v25 = vmax.f32 %v922_v48, 0.0  ;;  %v2572_v48 = vld [vmem:[%s3597_s18 + $0x8] sm:$0xff]  }
 0x407   :  { %v905_v51 = vpop.f32.mrb[32].mxu0  ;;  %2361 = vmatpush3.bf16.msra.mxu1 %v2544_v20 }
 0x408   :  { %v906_v53 = vadd.f32 %v905_v51, %v3114_v29  ;;  %v2328_v54 = vpop.f32.mrb[33].mxu0  ;;  %v966_v55 = vpack.c.bf16 %v962_v25, %v961_v49  ;;  %2362 = vmatprep.subr.bf16.mxu1 %v2629_v9 }
 0x409   :  { %v908_v56 = vpop.f32.mrb[34].mxu0 }
 0x40a   :  { %v923_v57 = vadd.f32 %v2029_v22, %v906_v53  ;;  %v909_v58 = vadd.f32 %v908_v56, %v3116_v30  ;;  %v2329_v59 = vpop.f32.mrb[35].mxu0  ;;  %2351 = vmatmul.mubr.bf16.gmra.mrb[28].mxu1 %v966_v55  ;;  %v2556_v30 = vld [vmem:[%s3592_s19 + $0x20] sm:$0xff]   ;;  %v2574_v53 = vld [vmem:[%s3597_s18 + $0x10] sm:$0xff]  }
 0x40b   :  { %2354 = vmatprep.mubr.msk.bf16.mxu1 %vm2630_vm0, %v2629_v9  ;;  %2363 = vmatpush3.bf16.msra.mxu1 %v2548_v27  ;;  %v2576_v59 = vld [vmem:[%s3597_s18 + $0x18] sm:$0xff]  }
 0x40c   :  { %v924_v61 = vadd.f32 %v2029_v22, %v909_v58  ;;  %2364 = vmatprep.subr.bf16.mxu1 %v2629_v9  ;;  %v963_v29 = vmax.f32 %v923_v57, 0.0  ;;  %v207_v22 = vld [vmem:[%s3598_s2 + $0x18] sm:$0xff] }
 0x40d   :  { %v211_v24 = vpack.c.bf16 %v207_v22, %v206_v21  ;;  %v2590_v22 = vld [vmem:[%s3600_s22 + $0x28] sm:$0xff]  }
 0x40e   :  { %v964_v62 = vmax.f32 %v924_v61, 0.0 }
 0x40f   :  { %2365 = vmatpush3.bf16.msra.mxu1 %v2552_v60 }
 0x410   :  { %v967_v63 = vpack.c.bf16 %v964_v62, %v963_v29  ;;  %2366 = vmatprep.subr.bf16.mxu1 %v2629_v9 }
 0x412   :  { %2355 = vmatmul.mubr.bf16.gmra.mrb[32].mxu1 %v967_v63 }
 0x413   :  { %2367 = vmatpush3.bf16.msra.mxu1 %v2556_v30  ;;  %2374 = vmatprep.mubr.msk.bf16.mxu1 %vm2630_vm0, %v2629_v9  ;;  %v2578_v30 = vld [vmem:[%s3597_s18 + $0x20] sm:$0xff]  }
 0x414   :  { %2368 = vmatprep.subr.bf16.mxu1 %v2629_v9 }
 0x417   :  { %2369 = vmatpush3.bf16.msra.mxu1 %v2560_v0  ;;  %v2580_v0 = vld [vmem:[%s3597_s18 + $0x28] sm:$0xff]  }
 0x418   :  { %2370 = vmatprep.subr.bf16.mxu1 %v2629_v9 }
 0x41b   :  { %2371 = vmatpush3.bf16.msra.mxu1 %v2564_v2  ;;  %v2584_v2 = vld [vmem:[%s3597_s18 + $0x38] sm:$0xff]  }
 0x41c   :  { %2372 = vmatprep.subr.bf16.mxu1 %v2629_v9 }
 0x41f   :  { %2373 = vmatpush3.bf16.msra.mxu1 %v2568_v5 }
 0x420   :  { %2414 = vmatprep.subr.bf16.mxu1 %v2629_v9 }
 0x422   :  { %2375 = vmatmul.mubr.bf16.vlgmr.msra.gmra.mrb[36].mxu1 %v3000_v28  ;;  %v2575_v28 = vld [vmem:[%s3596_s20 + $0x18] sm:$0xff]  }
 0x423   :  { %2415 = vmatpush3.bf16.msra.mxu1 %v2569_v7  ;;  %2378 = vmatprep.mubr.msk.bf16.mxu1 %vm2630_vm0, %v2629_v9 }
 0x424   :  { %2416 = vmatprep.subr.bf16.mxu1 %v2629_v9 }
 0x427   :  { %2417 = vmatpush3.bf16.msra.mxu1 %v2571_v8 }
 0x428   :  { %2418 = vmatprep.subr.bf16.mxu1 %v2629_v9 }
 0x42a   :  { %2379 = vmatmul.mubr.bf16.gmra.mrb[40].mxu1 %v3012_v31  ;;  %v2579_v31 = vld [vmem:[%s3596_s20 + $0x28] sm:$0xff]  }
 0x42b   :  { %2382 = vmatprep.mubr.msk.bf16.mxu1 %vm2630_vm0, %v2629_v9  ;;  %2419 = vmatpush3.bf16.msra.mxu1 %v2573_v10 }
 0x42c   :  { %2420 = vmatprep.subr.bf16.mxu1 %v2629_v9 }
 0x42f   :  { %2421 = vmatpush3.bf16.msra.mxu1 %v2575_v28  ;;  %v2587_v28 = vld [vmem:[%s3600_s22 + $0x10] sm:$0xff]  }
 0x430   :  { %2422 = vmatprep.subr.bf16.mxu1 %v2629_v9 }
 0x432   :  { %2383 = vmatmul.mubr.bf16.gmra.mrb[44].mxu1 %v3023_v35  ;;  %v2583_v35 = vld [vmem:[%s3596_s20 + $0x38] sm:$0xff]  }
 0x433   :  { %2430 = vmatprep.mubr.msk.bf16.mxu1 %vm2630_vm0, %v2629_v9  ;;  %2423 = vmatpush3.bf16.msra.mxu1 %v2577_v11 }
 0x434   :  { %2424 = vmatprep.subr.bf16.mxu1 %v2629_v9 }
 0x437   :  { %2425 = vmatpush3.bf16.msra.mxu1 %v2579_v31  ;;  %v2588_v31 = vld [vmem:[%s3600_s22 + $0x18] sm:$0xff]  }
 0x438   :  { %2426 = vmatprep.subr.bf16.mxu1 %v2629_v9 }
 0x43b   :  { %2427 = vmatpush3.bf16.msra.mxu1 %v2581_v12 }
 0x43c   :  { %2428 = vmatprep.subr.bf16.mxu1 %v2629_v9 }
 0x43f   :  { %2429 = vmatpush3.bf16.msra.mxu1 %v2583_v35 }
 0x442   :  { %2431 = vmatmul.mubr.bf16.vlgmr.msra.gmra.mrb[48].mxu1 %v210_v19 }
 0x443   :  { %2434 = vmatprep.mubr.msk.bf16.mxu1 %vm2630_vm0, %v2629_v9 }
 0x44a   :  { %2435 = vmatmul.mubr.bf16.gmra.mrb[52].mxu1 %v211_v24 }
 0x44b   :  { %2438 = vmatprep.mubr.msk.bf16.mxu1 %vm2630_vm0, %v2629_v9 }
 0x452   :  { %2439 = vmatmul.mubr.bf16.gmra.mrb[56].mxu1 %v212_v32 }
 0x453   :  { %1922 = vmatprep.mubr.bf16.mxu1 %v2631_v17 }
 0x4d5   :  { %v1056_v36 = vpop.f32.mrb[24].mxu1 }
 0x4d6   :  { %v1057_v37 = vadd.f32 %v2030_v34, %v1056_v36  ;;  %v2348_v38 = vpop.f32.mrb[25].mxu1  ;;  %v2592_v36 = vld [vmem:[%s3600_s22 + $0x38] sm:$0xff]  }
 0x4d7   :  { %v1059_v39 = vpop.f32.mrb[26].mxu1 }
 0x4d8   :  { %v1060_v40 = vadd.f32 %v2030_v34, %v1059_v39  ;;  %v2349_v41 = vpop.f32.mrb[27].mxu1  ;;  %v1079_v42 = vmax.f32 %v1057_v37, 0.0 }
 0x4da   :  { %v1080_v43 = vmax.f32 %v1060_v40, 0.0 }
 0x4dc   :  { %v1085_v45 = vpack.c.bf16 %v1080_v43, %v1079_v42  ;;  %v2593_v43 = vld [vmem:[%s3601_s24] ss:$8 sps:$4 sm:$0xff]  }
 0x4dd   :  { %v1064_v14 = vpop.f32.mrb[28].mxu1 }
 0x4de   :  { %v1065_v46 = vadd.f32 %v2030_v34, %v1064_v14  ;;  %v2352_v47 = vpop.f32.mrb[29].mxu1  ;;  %1212 = vmatmul.mubr.bf16.vlgmr.msra.gmra.mrb[36].mxu0 %v1085_v45  ;;  %v2598_v45 = vld [vmem:[%s3601_s24 + $0x14] ss:$8 sps:$4 sm:$0xff]   ;;  %v2596_v14 = vld [vmem:[%s3601_s24 + $0x10] ss:$8 sps:$4 sm:$0xff]  }
 0x4df   :  { %2387 = vmatpush3.bf16.msra.mxu0 %v2570_v44  ;;  %v1067_v20 = vpop.f32.mrb[30].mxu1  ;;  %1221 = vmatprep.mubr.bf16.mxu0 %v2631_v17  ;;  %v2595_v44 = vld [vmem:[%s3601_s24 + $0x4] ss:$8 sps:$4 sm:$0xff]   ;;  %v2599_v47 = vld [vmem:[%s3601_s24 + $0x20] ss:$8 sps:$4 sm:$0xff]  }
 0x4e0   :  { %v1068_v49 = vadd.f32 %v2030_v34, %v1067_v20  ;;  %v2353_v25 = vpop.f32.mrb[31].mxu1  ;;  %2388 = vmatprep.subr.bf16.mxu0 %v2629_v9  ;;  %v1081_v51 = vmax.f32 %v1065_v46, 0.0  ;;  %1890 = vmatprep.subr.bf16.mxu1 %v2595_v44  ;;  %v2601_v46 = vld [vmem:[%s3601_s24 + $0x24] ss:$8 sps:$4 sm:$0xff]   ;;  %v2604_v20 = vld [vmem:[%s3601_s24 + $0x34] ss:$8 sps:$4 sm:$0xff]  }
 0x4e1   :  { %1891 = vmatpush1.bf16.msra.mxu1 %v2593_v43  ;;  %v2605_v25 = vld [vmem:[%s3601_s24 + $0x40] ss:$8 sps:$4 sm:$0xff]  }
 0x4e2   :  { %v1082_v27 = vmax.f32 %v1068_v49, 0.0  ;;  %1892 = vmatprep.subr.bf16.mxu1 %v2598_v45  ;;  %v2607_v49 = vld [vmem:[%s3601_s24 + $0x44] ss:$8 sps:$4 sm:$0xff]  }
 0x4e3   :  { %2389 = vmatpush3.bf16.msra.mxu0 %v2572_v48  ;;  %v2602_v48 = vld [vmem:[%s3601_s24 + $0x30] ss:$8 sps:$4 sm:$0xff]  }
 0x4e4   :  { %v1086_v54 = vpack.c.bf16 %v1082_v27, %v1081_v51  ;;  %2390 = vmatprep.subr.bf16.mxu0 %v2629_v9  ;;  %v2610_v51 = vld [vmem:[%s3601_s24 + $0x54] ss:$8 sps:$4 sm:$0xff]   ;;  %v2608_v27 = vld [vmem:[%s3601_s24 + $0x50] ss:$8 sps:$4 sm:$0xff]  }
 0x4e5   :  { %v1072_v55 = vpop.f32.mrb[32].mxu1  ;;  %1893 = vmatpush1.bf16.msra.mxu1 %v2596_v14 }
 0x4e6   :  { %v1073_v56 = vadd.f32 %v2030_v34, %v1072_v55  ;;  %v2356_v57 = vpop.f32.mrb[33].mxu1  ;;  %1222 = vmatmul.mubr.bf16.gmra.mrb[40].mxu0 %v1086_v54  ;;  %1894 = vmatprep.subr.bf16.mxu1 %v2601_v46 }
 0x4e7   :  { %2391 = vmatpush3.bf16.msra.mxu0 %v2574_v53  ;;  %v1075_v58 = vpop.f32.mrb[34].mxu1  ;;  %1231 = vmatprep.mubr.bf16.mxu0 %v2631_v17  ;;  %v958_v53 = vld [vmem:[%s3602_s17] sm:$0x3] }
 0x4e8   :  { %v1076_v60 = vadd.f32 %v2030_v34, %v1075_v58  ;;  %v2357_v61 = vpop.f32.mrb[35].mxu1  ;;  %2392 = vmatprep.subr.bf16.mxu0 %v2629_v9  ;;  %v1083_v29 = vmax.f32 %v1073_v56, 0.0  ;;  %v1092_v54 = vrot.slane %v958_v53, %v3154_v50  ;;  %v1096_v55 = vrot.slane %v958_v53, %v3159_v52 }
 0x4e9   :  { %1895 = vmatpush1.bf16.msra.mxu1 %v2599_v47 }
 0x4ea   :  { %v1084_v62 = vmax.f32 %v1076_v60, 0.0  ;;  %1896 = vmatprep.subr.bf16.mxu1 %v2604_v20 }
 0x4eb   :  { %2393 = vmatpush3.bf16.msra.mxu0 %v2576_v59 }
 0x4ec   :  { %v1087_v63 = vpack.c.bf16 %v1084_v62, %v1083_v29  ;;  %2394 = vmatprep.subr.bf16.mxu0 %v2629_v9 }
 0x4ed   :  { %1897 = vmatpush1.bf16.msra.mxu1 %v2602_v48 }
 0x4ee   :  { %1232 = vmatmul.mubr.bf16.gmra.mrb[44].mxu0 %v1087_v63  ;;  %1898 = vmatprep.subr.bf16.mxu1 %v2607_v49 }
 0x4ef   :  { %2395 = vmatpush3.bf16.msra.mxu0 %v2578_v30  ;;  %2402 = vmatprep.mubr.msk.bf16.mxu0 %vm2630_vm0, %v2629_v9 }
 0x4f0   :  { %2396 = vmatprep.subr.bf16.mxu0 %v2629_v9 }
 0x4f1   :  { %1899 = vmatpush1.bf16.msra.mxu1 %v2605_v25 }
 0x4f2   :  { %1900 = vmatprep.subr.bf16.mxu1 %v2610_v51 }
 0x4f3   :  { %2397 = vmatpush3.bf16.msra.mxu0 %v2580_v0 }
 0x4f4   :  { %2398 = vmatprep.subr.bf16.mxu0 %v2629_v9 }
 0x4f5   :  { %v3370_v3 = vpop.f32.mrb[36].mxu1  ;;  %1901 = vmatpush1.bf16.msra.mxu1 %v2608_v27 }
 0x4f6   :  { %v2376_v4 = vpop.f32.mrb[37].mxu1 }
 0x4f7   :  { %2399 = vmatpush3.bf16.msra.mxu0 %v2582_v1  ;;  %v3372_v5 = vpop.f32.mrb[38].mxu1 }
 0x4f8   :  { %2400 = vmatprep.subr.bf16.mxu0 %v2629_v9  ;;  %v2377_v6 = vpop.f32.mrb[39].mxu1 }
 0x4fb   :  { %2401 = vmatpush3.bf16.msra.mxu0 %v2584_v2 }
 0x4fc   :  { %2442 = vmatprep.subr.bf16.mxu0 %v2629_v9 }
 0x4fe   :  { %2403 = vmatmul.mubr.bf16.vlgmr.msra.gmra.mrb[48].mxu0 %v2881_v18  ;;  %v2585_v18 = vld [vmem:[%s3600_s22] sm:$0xff]  }
 0x4ff   :  { %2406 = vmatprep.mubr.msk.bf16.mxu0 %vm2630_vm0, %v2629_v9  ;;  %2443 = vmatpush3.bf16.msra.mxu0 %v2585_v18 }
 0x500   :  { %2444 = vmatprep.subr.bf16.mxu0 %v2629_v9 }
 0x506   :  { %2407 = vmatmul.mubr.bf16.gmra.mrb[52].mxu0 %v2888_v16  ;;  %v3377_v16 = vpop.f32.mrb[40].mxu1 }
 0x507   :  { %2410 = vmatprep.mubr.msk.bf16.mxu0 %vm2630_vm0, %v2629_v9  ;;  %v2380_v7 = vpop.f32.mrb[41].mxu1 }
 0x508   :  { %v3383_v8 = vpop.f32.mrb[42].mxu1 }
 0x509   :  { %v2381_v10 = vpop.f32.mrb[43].mxu1 }
 0x50a   :  { %v3389_v11 = vpop.f32.mrb[44].mxu1 }
 0x50b   :  { %v2384_v12 = vpop.f32.mrb[45].mxu1 }
 0x50c   :  { %v3395_v35 = vpop.f32.mrb[46].mxu1 }
 0x50d   :  { %v2385_v13 = vpop.f32.mrb[47].mxu1 }
 0x50e   :  { %2411 = vmatmul.mubr.bf16.gmra.mrb[56].mxu0 %v2893_v33  ;;  %v2586_v33 = vld [vmem:[%s3600_s22 + $0x8] sm:$0xff]  }
 0x50f   :  { %2458 = vmatprep.mubr.msk.bf16.mxu0 %vm2630_vm0, %v2629_v9  ;;  %2445 = vmatpush3.bf16.msra.mxu0 %v2586_v33 }
 0x510   :  { %2446 = vmatprep.subr.bf16.mxu0 %v2629_v9 }
 0x513   :  { %2447 = vmatpush3.bf16.msra.mxu0 %v2587_v28 }
 0x514   :  { %2448 = vmatprep.subr.bf16.mxu0 %v2629_v9 }
 0x515   :  { %v3401_v19 = vpop.f32.mrb[48].mxu1 }
 0x516   :  { %v2432_v21 = vpop.f32.mrb[49].mxu1 }
 0x517   :  { %2449 = vmatpush3.bf16.msra.mxu0 %v2588_v31  ;;  %v3407_v24 = vpop.f32.mrb[50].mxu1 }
 0x518   :  { %2450 = vmatprep.subr.bf16.mxu0 %v2629_v9  ;;  %v2433_v26 = vpop.f32.mrb[51].mxu1 }
 0x51b   :  { %2451 = vmatpush3.bf16.msra.mxu0 %v2589_v15 }
 0x51c   :  { %2452 = vmatprep.subr.bf16.mxu0 %v2629_v9 }
 0x51d   :  { %v3413_v32 = vpop.f32.mrb[52].mxu1 }
 0x51e   :  { %v2436_v34 = vpop.f32.mrb[53].mxu1 }
 0x51f   :  { %2453 = vmatpush3.bf16.msra.mxu0 %v2590_v22  ;;  %v3419_v37 = vpop.f32.mrb[54].mxu1 }
 0x520   :  { %2454 = vmatprep.subr.bf16.mxu0 %v2629_v9  ;;  %v2437_v38 = vpop.f32.mrb[55].mxu1 }
 0x523   :  { %2455 = vmatpush3.bf16.msra.mxu0 %v2591_v23  ;;  %v2079_v23 = vld [vmem:[%s3604_s21] ss:$0 sm:$0xff] }
 0x524   :  { %2456 = vmatprep.subr.bf16.mxu0 %v2629_v9 }
 0x525   :  { %v3421_v39 = vpop.f32.mrb[56].mxu1 }
 0x526   :  { %v2440_v40 = vpop.f32.mrb[57].mxu1 }
 0x527   :  { %2457 = vmatpush3.bf16.msra.mxu0 %v2592_v36  ;;  %v3423_v41 = vpop.f32.mrb[58].mxu1 }
 0x528   :  { %v2441_v42 = vpop.f32.mrb[59].mxu1 }
 0x5b1   :  { %v1213_v56 = vpop.f32.mrb[36].mxu0 }
 0x5b2   :  { %v1214_v57 = vadd.f32 %v1213_v56, %v1092_v54  ;;  %v1215_v58 = vpop.f32.mrb[37].mxu0 }
 0x5b3   :  { %v1216_v59 = vadd.f32 %v1215_v58, %v1096_v55  ;;  %v1217_v60 = vpop.f32.mrb[38].mxu0 }
 0x5b4   :  { %1242 = vst [vmem:[%s3603_s27] sm:$0xff] %v1214_v57  ;;  %v1218_v61 = vadd.f32 %v1217_v60, %v1092_v54  ;;  %v1219_v29 = vpop.f32.mrb[39].mxu0 }
 0x5b5   :  { %1243 = vst [vmem:[%s3603_s27 + $0x8] sm:$0xff] %v1216_v59  ;;  %v1220_v62 = vadd.f32 %v1219_v29, %v1096_v55 }
 0x5b6   :  { %1244 = vst [vmem:[%s3603_s27 + $0x10] sm:$0xff] %v1218_v61 }
 0x5b7   :  { %1245 = vst [vmem:[%s3603_s27 + $0x18] sm:$0xff] %v1220_v62 }
 0x5b9   :  { %v1223_v30 = vpop.f32.mrb[40].mxu0 }
 0x5ba   :  { %v1224_v63 = vadd.f32 %v1223_v30, %v1092_v54  ;;  %v1225_v0 = vpop.f32.mrb[41].mxu0 }
 0x5bb   :  { %v1226_v1 = vadd.f32 %v1225_v0, %v1096_v55  ;;  %v1227_v2 = vpop.f32.mrb[42].mxu0 }
 0x5bc   :  { %1246 = vst [vmem:[%s3603_s27 + $0x20] sm:$0xff] %v1224_v63  ;;  %v1228_v4 = vadd.f32 %v1227_v2, %v1092_v54  ;;  %v1229_v6 = vpop.f32.mrb[43].mxu0 }
 0x5bd   :  { %1247 = vst [vmem:[%s3603_s27 + $0x28] sm:$0xff] %v1226_v1  ;;  %v1230_v18 = vadd.f32 %v1229_v6, %v1096_v55 }
 0x5be   :  { %1248 = vst [vmem:[%s3603_s27 + $0x30] sm:$0xff] %v1228_v4 }
 0x5bf   :  { %1249 = vst [vmem:[%s3603_s27 + $0x38] sm:$0xff] %v1230_v18 }
 0x5c1   :  { %v1233_v7 = vpop.f32.mrb[44].mxu0 }
 0x5c2   :  { %v1234_v33 = vadd.f32 %v1233_v7, %v1092_v54  ;;  %v1235_v10 = vpop.f32.mrb[45].mxu0 }
 0x5c3   :  { %v1236_v28 = vadd.f32 %v1235_v10, %v1096_v55  ;;  %v1237_v31 = vpop.f32.mrb[46].mxu0 }
 0x5c4   :  { %1250 = vst [vmem:[%s3603_s27 + $0x40] sm:$0xff] %v1234_v33  ;;  %v1238_v12 = vadd.f32 %v1237_v31, %v1092_v54  ;;  %v1239_v13 = vpop.f32.mrb[47].mxu0 }
 0x5c5   :  { %1251 = vst [vmem:[%s3603_s27 + $0x48] sm:$0xff] %v1236_v28  ;;  %v1240_v15 = vadd.f32 %v1239_v13, %v1096_v55 }
 0x5c6   :  { %1252 = vst [vmem:[%s3603_s27 + $0x50] sm:$0xff] %v1238_v12 }
 0x5c7   :  { %1253 = vst [vmem:[%s3603_s27 + $0x58] sm:$0xff] %v1240_v15 }
 0x5d1   :  { %v1473_v21 = vpop.f32.mrb[48].mxu0 }
 0x5d2   :  { %v1474_v22 = vadd.f32 %v1473_v21, %v3370_v3  ;;  %v2404_v26 = vpop.f32.mrb[49].mxu0 }
 0x5d3   :  { %v1476_v34 = vpop.f32.mrb[50].mxu0 }
 0x5d4   :  { %v1617_v36 = vadd.f32 %v3401_v19, %v1474_v22  ;;  %v1477_v38 = vadd.f32 %v1476_v34, %v3372_v5  ;;  %v2405_v40 = vpop.f32.mrb[51].mxu0 }
 0x5d6   :  { %v1630_v42 = vadd.f32 %v2079_v23, %v1617_v36  ;;  %v1618_v43 = vadd.f32 %v3407_v24, %v1477_v38 }
 0x5d8   :  { %v1631_v44 = vadd.f32 %v2079_v23, %v1618_v43  ;;  %v1670_v14 = vmax.f32 %v1630_v42, 0.0 }
 0x5d9   :  { %v1481_v45 = vpop.f32.mrb[52].mxu0 }
 0x5da   :  { %v1671_v46 = vmax.f32 %v1631_v44, 0.0  ;;  %v1482_v3 = vadd.f32 %v1481_v45, %v3377_v16  ;;  %v2408_v47 = vpop.f32.mrb[53].mxu0  ;;  %v1669_v45 = vld [vmem:[%s3606_s25] sm:$0x3] }
 0x5db   :  { %v1484_v20 = vpop.f32.mrb[54].mxu0 }
 0x5dc   :  { %v1676_v48 = vpack.c.bf16 %v1671_v46, %v1670_v14  ;;  %v1619_v49 = vadd.f32 %v3413_v32, %v1482_v3  ;;  %v1485_v25 = vadd.f32 %v1484_v20, %v3383_v8  ;;  %v2409_v19 = vpop.f32.mrb[55].mxu0  ;;  %v1803_v14 = vrot.slane %v1669_v45, %v3154_v50 }
 0x5dd   :  { %v1807_v46 = vrot.slane %v1669_v45, %v3159_v52 }
 0x5de   :  { %v1632_v51 = vadd.f32 %v2079_v23, %v1619_v49  ;;  %v1620_v5 = vadd.f32 %v3419_v37, %v1485_v25  ;;  %2459 = vmatmul.mubr.bf16.vlgmr.msra.gmra.mrb[60].mxu0 %v1676_v48 }
 0x5df   :  { %2462 = vmatprep.mubr.msk.bf16.mxu0 %vm2630_vm0, %v2629_v9 }
 0x5e0   :  { %v1633_v24 = vadd.f32 %v2079_v23, %v1620_v5  ;;  %v1672_v53 = vmax.f32 %v1632_v51, 0.0 }
 0x5e1   :  { %v1489_v27 = vpop.f32.mrb[56].mxu0 }
 0x5e2   :  { %v1673_v54 = vmax.f32 %v1633_v24, 0.0  ;;  %v1490_v16 = vadd.f32 %v1489_v27, %v3389_v11  ;;  %v2412_v55 = vpop.f32.mrb[57].mxu0  ;;  %v2613_v11 = vld [vmem:[%s3601_s24 + $0x64] ss:$8 sps:$4 sm:$0xff]  }
 0x5e3   :  { %v1492_v56 = vpop.f32.mrb[58].mxu0  ;;  %1902 = vmatprep.subr.bf16.mxu1 %v2613_v11 }
 0x5e4   :  { %v1621_v32 = vadd.f32 %v3421_v39, %v1490_v16  ;;  %v1493_v8 = vadd.f32 %v1492_v56, %v3395_v35  ;;  %v2413_v57 = vpop.f32.mrb[59].mxu0  ;;  %v1677_v58 = vpack.c.bf16 %v1673_v54, %v1672_v53  ;;  %v2611_v35 = vld [vmem:[%s3601_s24 + $0x60] ss:$8 sps:$4 sm:$0xff]   ;;  %v2616_v39 = vld [vmem:[%s3601_s24 + $0x74] ss:$8 sps:$4 sm:$0xff]  }
 0x5e5   :  { %1903 = vmatpush1.bf16.msra.mxu1 %v2611_v35 }
 0x5e6   :  { %v1634_v59 = vadd.f32 %v2079_v23, %v1621_v32  ;;  %v1622_v37 = vadd.f32 %v3423_v41, %v1493_v8  ;;  %2463 = vmatmul.mubr.bf16.gmra.mrb[64].mxu0 %v1677_v58  ;;  %1904 = vmatprep.subr.bf16.mxu1 %v2616_v39  ;;  %v2080_v41 = vld [vmem:[%s3605_s23] ss:$0 sm:$0xff] }
 0x5e7   :  { %2466 = vmatprep.mubr.msk.bf16.mxu0 %vm2630_vm0, %v2629_v9  ;;  %v2614_v9 = vld [vmem:[%s3601_s24 + $0x70] ss:$8 sps:$4 sm:$0xff]  }
 0x5e8   :  { %v1635_v60 = vadd.f32 %v2079_v23, %v1622_v37  ;;  %v1674_v61 = vmax.f32 %v1634_v59, 0.0 }
 0x5e9   :  { %1905 = vmatpush1.bf16.msra.mxu1 %v2614_v9 }
 0x5ea   :  { %v1675_v29 = vmax.f32 %v1635_v60, 0.0 }
 0x5ec   :  { %v1678_v62 = vpack.c.bf16 %v1675_v29, %v1674_v61 }
 0x5ee   :  { %2467 = vmatmul.mubr.bf16.gmra.mrb[68].mxu0 %v1678_v62 }
 0x6b1   :  { %v1767_v30 = vpop.f32.mrb[60].mxu0 }
 0x6b2   :  { %v1768_v63 = vadd.f32 %v2080_v41, %v1767_v30  ;;  %v2460_v0 = vpop.f32.mrb[61].mxu0 }
 0x6b3   :  { %v1770_v1 = vpop.f32.mrb[62].mxu0 }
 0x6b4   :  { %v1771_v2 = vadd.f32 %v2080_v41, %v1770_v1  ;;  %v2461_v4 = vpop.f32.mrb[63].mxu0  ;;  %v1790_v6 = vmax.f32 %v1768_v63, 0.0 }
 0x6b6   :  { %v1791_v18 = vmax.f32 %v1771_v2, 0.0 }
 0x6b8   :  { %v1796_v7 = vpack.c.bf16 %v1791_v18, %v1790_v6 }
 0x6b9   :  { %v1775_v33 = vpop.f32.mrb[64].mxu0 }
 0x6ba   :  { %v1776_v10 = vadd.f32 %v2080_v41, %v1775_v33  ;;  %v2464_v28 = vpop.f32.mrb[65].mxu0  ;;  %1923 = vmatmul.mubr.bf16.vlgmr.msra.gmra.mrb[60].mxu1 %v1796_v7 }
 0x6bb   :  { %v1778_v31 = vpop.f32.mrb[66].mxu0  ;;  %1932 = vmatprep.mubr.bf16.mxu1 %v2631_v17 }
 0x6bc   :  { %v1779_v12 = vadd.f32 %v2080_v41, %v1778_v31  ;;  %v2465_v13 = vpop.f32.mrb[67].mxu0  ;;  %v1792_v15 = vmax.f32 %v1776_v10, 0.0 }
 0x6be   :  { %v1793_v21 = vmax.f32 %v1779_v12, 0.0 }
 0x6c0   :  { %v1797_v22 = vpack.c.bf16 %v1793_v21, %v1792_v15 }
 0x6c1   :  { %v1783_v26 = vpop.f32.mrb[68].mxu0 }
 0x6c2   :  { %v1784_v23 = vadd.f32 %v2080_v41, %v1783_v26  ;;  %v2468_v34 = vpop.f32.mrb[69].mxu0  ;;  %1933 = vmatmul.mubr.bf16.gmra.mrb[64].mxu1 %v1797_v22 }
 0x6c3   :  { %v1786_v36 = vpop.f32.mrb[70].mxu0  ;;  %1942 = vmatprep.mubr.bf16.mxu1 %v2631_v17 }
 0x6c4   :  { %v1787_v38 = vadd.f32 %v2080_v41, %v1786_v36  ;;  %v2469_v40 = vpop.f32.mrb[71].mxu0  ;;  %v1794_v42 = vmax.f32 %v1784_v23, 0.0 }
 0x6c6   :  { %v1795_v43 = vmax.f32 %v1787_v38, 0.0 }
 0x6c8   :  { %v1798_v44 = vpack.c.bf16 %v1795_v43, %v1794_v42 }
 0x6ca   :  { %1943 = vmatmul.mubr.bf16.gmra.mrb[68].mxu1 %v1798_v44 }
 0x78d   :  { %v1924_v3 = vpop.f32.mrb[60].mxu1 }
 0x78e   :  { %v1925_v47 = vadd.f32 %v1924_v3, %v1803_v14  ;;  %v1926_v20 = vpop.f32.mrb[61].mxu1 }
 0x78f   :  { %v1927_v48 = vadd.f32 %v1926_v20, %v1807_v46  ;;  %v1928_v49 = vpop.f32.mrb[62].mxu1 }
 0x790   :  { %1953 = vst [vmem:[%s3607_s28] sm:$0xff] %v1925_v47  ;;  %v1929_v17 = vadd.f32 %v1928_v49, %v1803_v14  ;;  %v1930_v25 = vpop.f32.mrb[63].mxu1 }
 0x791   :  { %1954 = vst [vmem:[%s3607_s28 + $0x8] sm:$0xff] %v1927_v48  ;;  %v1931_v19 = vadd.f32 %v1930_v25, %v1807_v46 }
 0x792   :  { %1955 = vst [vmem:[%s3607_s28 + $0x10] sm:$0xff] %v1929_v17 }
 0x793   :  { %1956 = vst [vmem:[%s3607_s28 + $0x18] sm:$0xff] %v1931_v19 }
 0x795   :  { %v1934_v50 = vpop.f32.mrb[64].mxu1 }
 0x796   :  { %v1935_v52 = vadd.f32 %v1934_v50, %v1803_v14  ;;  %v1936_v51 = vpop.f32.mrb[65].mxu1 }
 0x797   :  { %v1937_v5 = vadd.f32 %v1936_v51, %v1807_v46  ;;  %v1938_v24 = vpop.f32.mrb[66].mxu1 }
 0x798   :  { %1957 = vst [vmem:[%s3607_s28 + $0x20] sm:$0xff] %v1935_v52  ;;  %v1939_v27 = vadd.f32 %v1938_v24, %v1803_v14  ;;  %v1940_v53 = vpop.f32.mrb[67].mxu1 }
 0x799   :  { %1958 = vst [vmem:[%s3607_s28 + $0x28] sm:$0xff] %v1937_v5  ;;  %v1941_v54 = vadd.f32 %v1940_v53, %v1807_v46 }
 0x79a   :  { %1959 = vst [vmem:[%s3607_s28 + $0x30] sm:$0xff] %v1939_v27 }
 0x79b   :  { %1960 = vst [vmem:[%s3607_s28 + $0x38] sm:$0xff] %v1941_v54 }
 0x79d   :  { %v1944_v16 = vpop.f32.mrb[68].mxu1 }
 0x79e   :  { %v1945_v55 = vadd.f32 %v1944_v16, %v1803_v14  ;;  %v1946_v56 = vpop.f32.mrb[69].mxu1 }
 0x79f   :  { %v1947_v32 = vadd.f32 %v1946_v56, %v1807_v46  ;;  %v1948_v8 = vpop.f32.mrb[70].mxu1 }
 0x7a0   :  { %1961 = vst [vmem:[%s3607_s28 + $0x40] sm:$0xff] %v1945_v55  ;;  %v1949_v57 = vadd.f32 %v1948_v8, %v1803_v14  ;;  %v1950_v58 = vpop.f32.mrb[71].mxu1 }
 0x7a1   :  { %1962 = vst [vmem:[%s3607_s28 + $0x48] sm:$0xff] %v1947_v32  ;;  %v1951_v59 = vadd.f32 %v1950_v58, %v1807_v46 }
 0x7a2   :  { %1963 = vst [vmem:[%s3607_s28 + $0x50] sm:$0xff] %v1949_v57 }
 0x7a3   :  { %1964 = vst [vmem:[%s3607_s28 + $0x58] sm:$0xff] %v1951_v59 }

</bundles_post_ra>
